<compile_context>
chip_gen: v5e
topology: v5e:2x2
jax: 0.10.0
libtpu: 0.0.40
codegen_flags: <defaults>
</compile_context>

<pallas_src>
import functools

import jax
import jax.numpy as jnp
from jax.experimental import pallas as pl
from jax.experimental.pallas import tpu as pltpu

NEG_SLOPE = 5e-3  # LeakyReLU slope of the base AnomalyNet


# --------------------------------------------------------------------- Pallas kernels
def _conv3x3_lrelu_slidemax_kernel(x_ref, w_ref, b_ref, o_ref, *, W, Lact, L2):
    """Fused 3x3 valid conv + bias + LeakyReLU + 2x2 stride-1 sliding max.

    The batch group is flattened onto the lane axis (sample s at offset s*H*W).
      x_ref: (1, Cin, Lg)    flat (sample, row, col) on lanes
      w_ref: (9, Cout, Cin)  one (Cout, Cin) matrix per tap (index dy*3+dx)
      b_ref: (Cout, 1)
      o_ref: (1, Cout, L2)   flat sliding-max positions; positions whose taps
                             cross a row / sample boundary are garbage and are
                             cropped by the wrapper.
    """
    acc = None
    for dy in range(3):                                    # in-kernel im2col:
        for dx in range(3):                                # 9 shifted ref slices
            off = dy * W + dx
            xs = x_ref[0, :, off:off + Lact]               # (Cin, Lact)
            part = jnp.dot(w_ref[dy * 3 + dx], xs,
                           preferred_element_type=jnp.float32)   # (Cout, Lact)
            acc = part if acc is None else acc + part
    acc = acc + b_ref[...]                                 # bias (broadcast over lanes)
    act = jnp.maximum(acc, NEG_SLOPE * acc)                # LeakyReLU
    # fused 2x2 stride-1 sliding max over the conv grid, in flat coordinates
    o_ref[0] = jnp.maximum(
        jnp.maximum(act[:, 0:L2], act[:, 1:1 + L2]),
        jnp.maximum(act[:, W:W + L2], act[:, W + 1:W + 1 + L2]),
    )


def _conv4_conv5_decode_kernel(x_ref, w4_ref, b4_ref, w5_ref, b5_ref,
                               wd_ref, bd_ref, o_ref, *, Wsp, Lv):
    """Fused conv4(2x2) -> conv5(1x1) -> decode, each followed by LeakyReLU.

      x_ref : (1, Cin, Lg)  batch group flattened onto the lane axis
      w4_ref: (4, C4, Cin); w5_ref: (C5, C4); wd_ref: (Cd, C5); biases: (Cx, 1)
      o_ref : (1, Cd, Lv)
    """
    acc = None
    for dy in range(2):
        for dx in range(2):
            off = dy * Wsp + dx
            xs = x_ref[0, :, off:off + Lv]
            part = jnp.dot(w4_ref[dy * 2 + dx], xs,
                           preferred_element_type=jnp.float32)
            acc = part if acc is None else acc + part
    acc = acc + b4_ref[...]
    a4 = jnp.maximum(acc, NEG_SLOPE * acc)
    a5 = jnp.dot(w5_ref[...], a4, preferred_element_type=jnp.float32) + b5_ref[...]
    a5 = jnp.maximum(a5, NEG_SLOPE * a5)
    d = jnp.dot(wd_ref[...], a5, preferred_element_type=jnp.float32) + bd_ref[...]
    o_ref[0] = jnp.maximum(d, NEG_SLOPE * d)


# --------------------------------------------------------------------- layer wrappers
def _group_fold(x):
    """(B, C, H, W) -> (G, C, Bg*H*W): batch grouped (G=2 when possible, for
    megacore) and flattened onto the lane axis, preserving batch order."""
    B, C, H, W = x.shape
    G = 2 if B % 2 == 0 else 1
    Bg = B // G
    xg = x.reshape(G, Bg, C, H * W).transpose(0, 2, 1, 3).reshape(G, C, Bg * H * W)
    return xg, G, Bg


def conv3x3_lrelu_multipool(x, w, b):
    """leaky_relu(conv3x3(x)) followed by multiMaxPooling(2): NCHW in, NCHW out,
    the 4 pooling offsets concatenated along the batch axis (row-major i*2+j)."""
    B, Cin, H, W = x.shape
    Cout = w.shape[0]
    Ho, Wo = H - 2, W - 2

    xg, G, Bg = _group_fold(x)
    Lg = Bg * H * W
    Lact = Lg - 2 * W - 2            # conv positions computed (incl. garbage)
    L2 = Lg - 3 * W - 3              # sliding-max positions computed

    w_taps = jnp.transpose(w, (2, 3, 0, 1)).reshape(9, Cout, Cin)
    if Cin % 8:                      # align sublane / contraction dim (conv1: Cin=3)
        pad_c = 8 - Cin % 8
        xg = jnp.pad(xg, ((0, 0), (0, pad_c), (0, 0)))
        w_taps = jnp.pad(w_taps, ((0, 0), (0, 0), (0, pad_c)))
        Cin += pad_c

    kernel = functools.partial(_conv3x3_lrelu_slidemax_kernel, W=W, Lact=Lact, L2=L2)
    m_flat = pl.pallas_call(
        kernel,
        out_shape=jax.ShapeDtypeStruct((G, Cout, L2), jnp.float32),
        grid=(G,),
        in_specs=[
            pl.BlockSpec((1, Cin, Lg), lambda g: (g, 0, 0)),
            pl.BlockSpec((9, Cout, Cin), lambda g: (0, 0, 0)),    # grid-invariant
            pl.BlockSpec((Cout, 1), lambda g: (0, 0)),            # grid-invariant
        ],
        out_specs=pl.BlockSpec((1, Cout, L2), lambda g: (g, 0, 0)),
        compiler_params=pltpu.CompilerParams(dimension_semantics=("parallel",)),
    )(xg, w_taps, b.reshape(Cout, 1))

    # unfold flat lanes -> (B, Cout, Ho-1, Wo-1) sliding-max grid (valid positions)
    sliding = jnp.pad(m_flat, ((0, 0), (0, 0), (0, Lg - L2)))
    sliding = sliding.reshape(G, Cout, Bg, H, W)[:, :, :, :Ho - 1, :Wo - 1]
    sliding = sliding.transpose(0, 2, 1, 3, 4).reshape(B, Cout, Ho - 1, Wo - 1)

    # multiMaxPooling: 4 phase offsets -> crop to common size -> concat on batch.
    # The max itself was computed in the kernel epilogue; this is pure data
    # movement (phase subsample) on tiny tensors.
    mh = min((Ho - i - 2) // 2 + 1 for i in range(2))
    mw = min((Wo - j - 2) // 2 + 1 for j in range(2))
    parts = [sliding[:, :, i::2, j::2][:, :, :mh, :mw]
             for i in range(2) for j in range(2)]
    return jnp.concatenate(parts, axis=0)


def conv45_decode_lrelu(x, w4, b4, w5, b5, wd, bd):
    """Fused leaky(conv4 2x2) -> leaky(conv5 1x1) -> leaky(decode) per position.
    x: (B, C, H, W) NCHW; returns (B, decode_out, H-1, W-1) NCHW."""
    B, C, H, W = x.shape
    C4, C5, Cd = w4.shape[0], w5.shape[0], wd.shape[0]

    xg, G, Bg = _group_fold(x)
    HW = H * W
    Lg = Bg * HW
    Lv = Lg - (W + 1)                 # drop the largest 2x2 tap offset

    w4t = jnp.transpose(w4, (2, 3, 0, 1)).reshape(4, C4, C)
    w5m = w5.reshape(C5, C4)

    kernel = functools.partial(_conv4_conv5_decode_kernel, Wsp=W, Lv=Lv)
    out = pl.pallas_call(
        kernel,
        out_shape=jax.ShapeDtypeStruct((G, Cd, Lv), jnp.float32),
        grid=(G,),
        in_specs=[
            pl.BlockSpec((1, C, Lg), lambda g: (g, 0, 0)),
            pl.BlockSpec((4, C4, C), lambda g: (0, 0, 0)),
            pl.BlockSpec((C4, 1), lambda g: (0, 0)),
            pl.BlockSpec((C5, C4), lambda g: (0, 0)),
            pl.BlockSpec((C5, 1), lambda g: (0, 0)),
            pl.BlockSpec((Cd, C5), lambda g: (0, 0)),
            pl.BlockSpec((Cd, 1), lambda g: (0, 0)),
        ],
        out_specs=pl.BlockSpec((1, Cd, Lv), lambda g: (g, 0, 0)),
        compiler_params=pltpu.CompilerParams(dimension_semantics=("parallel",)),
    )(xg, w4t, b4.reshape(C4, 1), w5m, b5.reshape(C5, 1), wd, bd.reshape(Cd, 1))

    # un-flatten and keep only valid conv4 positions (h < H-1, w < W-1)
    out = jnp.pad(out, ((0, 0), (0, 0), (0, Lg - Lv)))
    out = out.reshape(G, Cd, Bg, H, W)[:, :, :, :H - 1, :W - 1]
    return out.transpose(0, 2, 1, 3, 4).reshape(B, Cd, H - 1, W - 1)


# ------------------------------------------------------------------------- FDFE glue
def unwrap_prepare(x):
    # unwrapPrepare: drop last row/col, flatten per sample (row-major NCHW),
    # transpose -> (C*(H-1)*(W-1), B).  Pure data movement, kept in JAX.
    x_ = x[:, :, :-1, :-1]
    return x_.reshape(x_.shape[0], -1).T


def unwrap_pool(x, out_chans, cur_w, cur_h, d_w, d_h):
    # unwrapPool: view (outChans, curW, curH, dH, dW, -1) then swap axes 2,3.
    y = x.reshape(int(out_chans), int(cur_w), int(cur_h), int(d_h), int(d_w), -1)
    return jnp.swapaxes(y, 2, 3)


def fdfe_anomaly_net(params, x, *, pH, pW, imH, imW, sL1, sL2, sL3):
    assert sL1 == sL2 == sL3 == 2, "kernels are specialised to stride-2 pooling"
    # multiPoolPrepare: zero-pad so every patch position is represented
    pady, padx = pH - 1, pW - 1
    x = jnp.pad(x, ((0, 0), (0, 0),
                    (-(-pady // 2), pady // 2), (-(-padx // 2), padx // 2)))

    x = conv3x3_lrelu_multipool(x, params["conv1_w"], params["conv1_b"])
    x = conv3x3_lrelu_multipool(x, params["conv2_w"], params["conv2_b"])
    x = conv3x3_lrelu_multipool(x, params["conv3_w"], params["conv3_b"])
    # conv4 + conv5 + decode fused: decode is a per-position channel linear, and
    # the unwrap reshuffles permute positions identically for every channel, so
    # applying it here is exactly equivalent to applying it after the unwraps.
    x = conv45_decode_lrelu(x, params["conv4_w"], params["conv4_b"],
                            params["conv5_w"], params["conv5_b"],
                            params["decode_w"], params["decode_b"])

    dec_chans = params["decode_w"].shape[0]
    x = unwrap_prepare(x)
    x = unwrap_pool(x, dec_chans, imH // (sL1 * sL2 * sL3), imW // (sL1 * sL2 * sL3), sL3, sL3)
    x = unwrap_pool(x, dec_chans, imH // (sL1 * sL2), imW // (sL1 * sL2), sL2, sL2)
    x = unwrap_pool(x, dec_chans, imH // sL1, imW // sL1, sL1, sL1)

    y = x.reshape(dec_chans, imH, imW, -1)
    return jnp.transpose(y, (3, 1, 2, 0))          # (N, imH, imW, decodeChans)


def init_params(key):
    keys = jax.random.split(key, 12)
    w = lambda k, shape: 0.1 * jax.random.normal(k, shape, dtype=jnp.float32)
    return {
        "conv1_w": w(keys[0], (8, 3, 3, 3)),   "conv1_b": w(keys[1], (8,)),
        "conv2_w": w(keys[2], (8, 8, 3, 3)),   "conv2_b": w(keys[3], (8,)),
        "conv3_w": w(keys[4], (16, 8, 3, 3)),  "conv3_b": w(keys[5], (16,)),
        "conv4_w": w(keys[6], (16, 16, 2, 2)), "conv4_b": w(keys[7], (16,)),
        "conv5_w": w(keys[8], (8, 16, 1, 1)),  "conv5_b": w(keys[9], (8,)),
        "decode_w": w(keys[10], (16, 8)),      "decode_b": w(keys[11], (16,)),
    }


if __name__ == "__main__":
    # Small config consistent with the module: 41x41 patch base net (k=3,3,3,2,1
    # with three stride-2 pools) densely applied to a 16x16 image; decode 8 -> 16.
    config = dict(pH=41, pW=41, imH=16, imW=16, sL1=2, sL2=2, sL3=2)

    key = jax.random.PRNGKey(0)
    k_param, k_x = jax.random.split(key)
    params = init_params(k_param)
    x = jax.random.normal(k_x, (2, 3, 16, 16), dtype=jnp.float32)  # NCHW

    fwd = jax.jit(functools.partial(fdfe_anomaly_net, **config))
    y = fwd(params, x)
    jax.block_until_ready(y)
    assert y.shape == (2, 16, 16, 16), y.shape
    assert bool(jnp.isfinite(y).all())
    print("KERNEL_OK")
</pallas_src>

<mosaic_0001>
module attributes {stable_mosaic.version = 11 : i64} {
  func.func @_conv3x3_lrelu_slidemax_kernel(%arg0: i32, %arg1: memref<1x8x3136xf32, #tpu.memory_space<vmem>>, %arg2: memref<9x8x8xf32, #tpu.memory_space<vmem>>, %arg3: memref<8x1xf32, #tpu.memory_space<vmem>>, %arg4: memref<1x8x2965xf32, #tpu.memory_space<vmem>>) attributes {dimension_semantics = [#tpu.dimension_semantics<parallel>], iteration_bounds = array<i64: 2>, scalar_prefetch = 0 : i64, scratch_operands = 0 : i64, tpu.core_type = #tpu.core_type<tc>, window_params = [{transform_indices = @transform_0, window_bounds = array<i64: 1, 8, 3136>}, {pipeline_mode = #tpu.pipeline_mode<synchronous>, transform_indices = @transform_1, window_bounds = array<i64: 9, 8, 8>}, {pipeline_mode = #tpu.pipeline_mode<synchronous>, transform_indices = @transform_2, window_bounds = array<i64: 8, 1>}, {transform_indices = @transform_3, window_bounds = array<i64: 1, 8, 2965>}]} {
    %c0 = arith.constant 0 : index
    %c0_0 = arith.constant 0 : index
    %c0_1 = arith.constant 0 : index
    %0 = vector.load %arg1[%c0, %c0_0, %c0_1] : memref<1x8x3136xf32, #tpu.memory_space<vmem>>, vector<1x8x3022xf32>
    %1 = vector.shape_cast %0 : vector<1x8x3022xf32> to vector<8x3022xf32>
    %c0_2 = arith.constant 0 : index
    %c0_3 = arith.constant 0 : index
    %c0_4 = arith.constant 0 : index
    %2 = vector.load %arg2[%c0_2, %c0_3, %c0_4] : memref<9x8x8xf32, #tpu.memory_space<vmem>>, vector<1x8x8xf32>
    %3 = vector.shape_cast %2 : vector<1x8x8xf32> to vector<8x8xf32>
    %cst = arith.constant dense<0.000000e+00> : vector<8x3022xf32>
    %4 = tpu.matmul %3, %1, %cst {dimension_numbers = #tpu.dot_dimension_numbers<[1], [0], [0], [1], [0, 0, 1, 1], [], []>} : vector<8x8xf32>, vector<8x3022xf32>, vector<8x3022xf32> -> vector<8x3022xf32>
    %c0_5 = arith.constant 0 : index
    %c0_6 = arith.constant 0 : index
    %c1 = arith.constant 1 : index
    %5 = vector.load %arg1[%c0_5, %c0_6, %c1] : memref<1x8x3136xf32, #tpu.memory_space<vmem>>, vector<1x8x3022xf32>
    %6 = vector.shape_cast %5 : vector<1x8x3022xf32> to vector<8x3022xf32>
    %c1_7 = arith.constant 1 : index
    %c0_8 = arith.constant 0 : index
    %c0_9 = arith.constant 0 : index
    %7 = vector.load %arg2[%c1_7, %c0_8, %c0_9] : memref<9x8x8xf32, #tpu.memory_space<vmem>>, vector<1x8x8xf32>
    %8 = vector.shape_cast %7 : vector<1x8x8xf32> to vector<8x8xf32>
    %cst_10 = arith.constant dense<0.000000e+00> : vector<8x3022xf32>
    %9 = tpu.matmul %8, %6, %cst_10 {dimension_numbers = #tpu.dot_dimension_numbers<[1], [0], [0], [1], [0, 0, 1, 1], [], []>} : vector<8x8xf32>, vector<8x3022xf32>, vector<8x3022xf32> -> vector<8x3022xf32>
    %10 = arith.addf %4, %9 : vector<8x3022xf32>
    %c0_11 = arith.constant 0 : index
    %c0_12 = arith.constant 0 : index
    %c2 = arith.constant 2 : index
    %11 = vector.load %arg1[%c0_11, %c0_12, %c2] : memref<1x8x3136xf32, #tpu.memory_space<vmem>>, vector<1x8x3022xf32>
    %12 = vector.shape_cast %11 : vector<1x8x3022xf32> to vector<8x3022xf32>
    %c2_13 = arith.constant 2 : index
    %c0_14 = arith.constant 0 : index
    %c0_15 = arith.constant 0 : index
    %13 = vector.load %arg2[%c2_13, %c0_14, %c0_15] : memref<9x8x8xf32, #tpu.memory_space<vmem>>, vector<1x8x8xf32>
    %14 = vector.shape_cast %13 : vector<1x8x8xf32> to vector<8x8xf32>
    %cst_16 = arith.constant dense<0.000000e+00> : vector<8x3022xf32>
    %15 = tpu.matmul %14, %12, %cst_16 {dimension_numbers = #tpu.dot_dimension_numbers<[1], [0], [0], [1], [0, 0, 1, 1], [], []>} : vector<8x8xf32>, vector<8x3022xf32>, vector<8x3022xf32> -> vector<8x3022xf32>
    %16 = arith.addf %10, %15 : vector<8x3022xf32>
    %c0_17 = arith.constant 0 : index
    %c0_18 = arith.constant 0 : index
    %c56 = arith.constant 56 : index
    %17 = vector.load %arg1[%c0_17, %c0_18, %c56] : memref<1x8x3136xf32, #tpu.memory_space<vmem>>, vector<1x8x3022xf32>
    %18 = vector.shape_cast %17 : vector<1x8x3022xf32> to vector<8x3022xf32>
    %c3 = arith.constant 3 : index
    %c0_19 = arith.constant 0 : index
    %c0_20 = arith.constant 0 : index
    %19 = vector.load %arg2[%c3, %c0_19, %c0_20] : memref<9x8x8xf32, #tpu.memory_space<vmem>>, vector<1x8x8xf32>
    %20 = vector.shape_cast %19 : vector<1x8x8xf32> to vector<8x8xf32>
    %cst_21 = arith.constant dense<0.000000e+00> : vector<8x3022xf32>
    %21 = tpu.matmul %20, %18, %cst_21 {dimension_numbers = #tpu.dot_dimension_numbers<[1], [0], [0], [1], [0, 0, 1, 1], [], []>} : vector<8x8xf32>, vector<8x3022xf32>, vector<8x3022xf32> -> vector<8x3022xf32>
    %22 = arith.addf %16, %21 : vector<8x3022xf32>
    %c0_22 = arith.constant 0 : index
    %c0_23 = arith.constant 0 : index
    %c57 = arith.constant 57 : index
    %23 = vector.load %arg1[%c0_22, %c0_23, %c57] : memref<1x8x3136xf32, #tpu.memory_space<vmem>>, vector<1x8x3022xf32>
    %24 = vector.shape_cast %23 : vector<1x8x3022xf32> to vector<8x3022xf32>
    %c4 = arith.constant 4 : index
    %c0_24 = arith.constant 0 : index
    %c0_25 = arith.constant 0 : index
    %25 = vector.load %arg2[%c4, %c0_24, %c0_25] : memref<9x8x8xf32, #tpu.memory_space<vmem>>, vector<1x8x8xf32>
    %26 = vector.shape_cast %25 : vector<1x8x8xf32> to vector<8x8xf32>
    %cst_26 = arith.constant dense<0.000000e+00> : vector<8x3022xf32>
    %27 = tpu.matmul %26, %24, %cst_26 {dimension_numbers = #tpu.dot_dimension_numbers<[1], [0], [0], [1], [0, 0, 1, 1], [], []>} : vector<8x8xf32>, vector<8x3022xf32>, vector<8x3022xf32> -> vector<8x3022xf32>
    %28 = arith.addf %22, %27 : vector<8x3022xf32>
    %c0_27 = arith.constant 0 : index
    %c0_28 = arith.constant 0 : index
    %c58 = arith.constant 58 : index
    %29 = vector.load %arg1[%c0_27, %c0_28, %c58] : memref<1x8x3136xf32, #tpu.memory_space<vmem>>, vector<1x8x3022xf32>
    %30 = vector.shape_cast %29 : vector<1x8x3022xf32> to vector<8x3022xf32>
    %c5 = arith.constant 5 : index
    %c0_29 = arith.constant 0 : index
    %c0_30 = arith.constant 0 : index
    %31 = vector.load %arg2[%c5, %c0_29, %c0_30] : memref<9x8x8xf32, #tpu.memory_space<vmem>>, vector<1x8x8xf32>
    %32 = vector.shape_cast %31 : vector<1x8x8xf32> to vector<8x8xf32>
    %cst_31 = arith.constant dense<0.000000e+00> : vector<8x3022xf32>
    %33 = tpu.matmul %32, %30, %cst_31 {dimension_numbers = #tpu.dot_dimension_numbers<[1], [0], [0], [1], [0, 0, 1, 1], [], []>} : vector<8x8xf32>, vector<8x3022xf32>, vector<8x3022xf32> -> vector<8x3022xf32>
    %34 = arith.addf %28, %33 : vector<8x3022xf32>
    %c0_32 = arith.constant 0 : index
    %c0_33 = arith.constant 0 : index
    %c112 = arith.constant 112 : index
    %35 = vector.load %arg1[%c0_32, %c0_33, %c112] : memref<1x8x3136xf32, #tpu.memory_space<vmem>>, vector<1x8x3022xf32>
    %36 = vector.shape_cast %35 : vector<1x8x3022xf32> to vector<8x3022xf32>
    %c6 = arith.constant 6 : index
    %c0_34 = arith.constant 0 : index
    %c0_35 = arith.constant 0 : index
    %37 = vector.load %arg2[%c6, %c0_34, %c0_35] : memref<9x8x8xf32, #tpu.memory_space<vmem>>, vector<1x8x8xf32>
    %38 = vector.shape_cast %37 : vector<1x8x8xf32> to vector<8x8xf32>
    %cst_36 = arith.constant dense<0.000000e+00> : vector<8x3022xf32>
    %39 = tpu.matmul %38, %36, %cst_36 {dimension_numbers = #tpu.dot_dimension_numbers<[1], [0], [0], [1], [0, 0, 1, 1], [], []>} : vector<8x8xf32>, vector<8x3022xf32>, vector<8x3022xf32> -> vector<8x3022xf32>
    %40 = arith.addf %34, %39 : vector<8x3022xf32>
    %c0_37 = arith.constant 0 : index
    %c0_38 = arith.constant 0 : index
    %c113 = arith.constant 113 : index
    %41 = vector.load %arg1[%c0_37, %c0_38, %c113] : memref<1x8x3136xf32, #tpu.memory_space<vmem>>, vector<1x8x3022xf32>
    %42 = vector.shape_cast %41 : vector<1x8x3022xf32> to vector<8x3022xf32>
    %c7 = arith.constant 7 : index
    %c0_39 = arith.constant 0 : index
    %c0_40 = arith.constant 0 : index
    %43 = vector.load %arg2[%c7, %c0_39, %c0_40] : memref<9x8x8xf32, #tpu.memory_space<vmem>>, vector<1x8x8xf32>
    %44 = vector.shape_cast %43 : vector<1x8x8xf32> to vector<8x8xf32>
    %cst_41 = arith.constant dense<0.000000e+00> : vector<8x3022xf32>
    %45 = tpu.matmul %44, %42, %cst_41 {dimension_numbers = #tpu.dot_dimension_numbers<[1], [0], [0], [1], [0, 0, 1, 1], [], []>} : vector<8x8xf32>, vector<8x3022xf32>, vector<8x3022xf32> -> vector<8x3022xf32>
    %46 = arith.addf %40, %45 : vector<8x3022xf32>
    %c0_42 = arith.constant 0 : index
    %c0_43 = arith.constant 0 : index
    %c114 = arith.constant 114 : index
    %47 = vector.load %arg1[%c0_42, %c0_43, %c114] : memref<1x8x3136xf32, #tpu.memory_space<vmem>>, vector<1x8x3022xf32>
    %48 = vector.shape_cast %47 : vector<1x8x3022xf32> to vector<8x3022xf32>
    %c8 = arith.constant 8 : index
    %c0_44 = arith.constant 0 : index
    %c0_45 = arith.constant 0 : index
    %49 = vector.load %arg2[%c8, %c0_44, %c0_45] : memref<9x8x8xf32, #tpu.memory_space<vmem>>, vector<1x8x8xf32>
    %50 = vector.shape_cast %49 : vector<1x8x8xf32> to vector<8x8xf32>
    %cst_46 = arith.constant dense<0.000000e+00> : vector<8x3022xf32>
    %51 = tpu.matmul %50, %48, %cst_46 {dimension_numbers = #tpu.dot_dimension_numbers<[1], [0], [0], [1], [0, 0, 1, 1], [], []>} : vector<8x8xf32>, vector<8x3022xf32>, vector<8x3022xf32> -> vector<8x3022xf32>
    %52 = arith.addf %46, %51 : vector<8x3022xf32>
    %c0_47 = arith.constant 0 : index
    %c0_48 = arith.constant 0 : index
    %53 = vector.load %arg3[%c0_47, %c0_48] : memref<8x1xf32, #tpu.memory_space<vmem>>, vector<8x1xf32>
    %54 = vector.broadcast %53 : vector<8x1xf32> to vector<8x3022xf32>
    %55 = arith.addf %52, %54 : vector<8x3022xf32>
    %cst_49 = arith.constant 5.000000e-03 : f32
    %56 = vector.broadcast %cst_49 : f32 to vector<8x3022xf32>
    %57 = arith.mulf %56, %55 : vector<8x3022xf32>
    %58 = arith.maximumf %55, %57 : vector<8x3022xf32>
    %59 = vector.extract_strided_slice %58 {offsets = [0, 0], sizes = [8, 2965], strides = [1, 1]} : vector<8x3022xf32> to vector<8x2965xf32>
    %60 = vector.extract_strided_slice %58 {offsets = [0, 1], sizes = [8, 2965], strides = [1, 1]} : vector<8x3022xf32> to vector<8x2965xf32>
    %61 = arith.maximumf %59, %60 : vector<8x2965xf32>
    %62 = vector.extract_strided_slice %58 {offsets = [0, 56], sizes = [8, 2965], strides = [1, 1]} : vector<8x3022xf32> to vector<8x2965xf32>
    %63 = vector.extract_strided_slice %58 {offsets = [0, 57], sizes = [8, 2965], strides = [1, 1]} : vector<8x3022xf32> to vector<8x2965xf32>
    %64 = arith.maximumf %62, %63 : vector<8x2965xf32>
    %65 = arith.maximumf %61, %64 : vector<8x2965xf32>
    %c0_50 = arith.constant 0 : index
    %c0_51 = arith.constant 0 : index
    %c0_52 = arith.constant 0 : index
    %66 = vector.load %arg4[%c0_50, %c0_51, %c0_52] : memref<1x8x2965xf32, #tpu.memory_space<vmem>>, vector<1x8x2965xf32>
    %67 = vector.shape_cast %66 : vector<1x8x2965xf32> to vector<8x2965xf32>
    %68 = vector.shape_cast %65 : vector<8x2965xf32> to vector<1x8x2965xf32>
    tpu.vector_store %arg4[%c0_50, %c0_51, %c0_52], %68 {strides = array<i32>} : memref<1x8x2965xf32, #tpu.memory_space<vmem>>, vector<1x8x2965xf32>,
    return
  }
  func.func @transform_0(%arg0: i32) -> (i32, i32, i32) {
    %c0_i32 = arith.constant 0 : i32
    %c0_i32_0 = arith.constant 0 : i32
    %c0_i32_1 = arith.constant 0 : i32
    return %arg0, %c0_i32, %c0_i32_0 : i32, i32, i32
  }
  func.func @transform_1(%arg0: i32) -> (i32, i32, i32) {
    %c0_i32 = arith.constant 0 : i32
    %c0_i32_0 = arith.constant 0 : i32
    %c0_i32_1 = arith.constant 0 : i32
    %c0_i32_2 = arith.constant 0 : i32
    return %c0_i32, %c0_i32_0, %c0_i32_1 : i32, i32, i32
  }
  func.func @transform_2(%arg0: i32) -> (i32, i32) {
    %c0_i32 = arith.constant 0 : i32
    %c0_i32_0 = arith.constant 0 : i32
    %c0_i32_1 = arith.constant 0 : i32
    return %c0_i32, %c0_i32_0 : i32, i32
  }
  func.func @transform_3(%arg0: i32) -> (i32, i32, i32) {
    %c0_i32 = arith.constant 0 : i32
    %c0_i32_0 = arith.constant 0 : i32
    %c0_i32_1 = arith.constant 0 : i32
    return %arg0, %c0_i32, %c0_i32_0 : i32, i32, i32
  }
}

module attributes {stable_mosaic.version = 11 : i64} {
  func.func @_conv3x3_lrelu_slidemax_kernel(%arg0: i32, %arg1: memref<1x8x2704xf32, #tpu.memory_space<vmem>>, %arg2: memref<9x8x8xf32, #tpu.memory_space<vmem>>, %arg3: memref<8x1xf32, #tpu.memory_space<vmem>>, %arg4: memref<1x8x2623xf32, #tpu.memory_space<vmem>>) attributes {dimension_semantics = [#tpu.dimension_semantics<parallel>], iteration_bounds = array<i64: 2>, scalar_prefetch = 0 : i64, scratch_operands = 0 : i64, tpu.core_type = #tpu.core_type<tc>, window_params = [{transform_indices = @transform_0, window_bounds = array<i64: 1, 8, 2704>}, {pipeline_mode = #tpu.pipeline_mode<synchronous>, transform_indices = @transform_1, window_bounds = array<i64: 9, 8, 8>}, {pipeline_mode = #tpu.pipeline_mode<synchronous>, transform_indices = @transform_2, window_bounds = array<i64: 8, 1>}, {transform_indices = @transform_3, window_bounds = array<i64: 1, 8, 2623>}]} {
    %c0 = arith.constant 0 : index
    %c0_0 = arith.constant 0 : index
    %c0_1 = arith.constant 0 : index
    %0 = vector.load %arg1[%c0, %c0_0, %c0_1] : memref<1x8x2704xf32, #tpu.memory_space<vmem>>, vector<1x8x2650xf32>
    %1 = vector.shape_cast %0 : vector<1x8x2650xf32> to vector<8x2650xf32>
    %c0_2 = arith.constant 0 : index
    %c0_3 = arith.constant 0 : index
    %c0_4 = arith.constant 0 : index
    %2 = vector.load %arg2[%c0_2, %c0_3, %c0_4] : memref<9x8x8xf32, #tpu.memory_space<vmem>>, vector<1x8x8xf32>
    %3 = vector.shape_cast %2 : vector<1x8x8xf32> to vector<8x8xf32>
    %cst = arith.constant dense<0.000000e+00> : vector<8x2650xf32>
    %4 = tpu.matmul %3, %1, %cst {dimension_numbers = #tpu.dot_dimension_numbers<[1], [0], [0], [1], [0, 0, 1, 1], [], []>} : vector<8x8xf32>, vector<8x2650xf32>, vector<8x2650xf32> -> vector<8x2650xf32>
    %c0_5 = arith.constant 0 : index
    %c0_6 = arith.constant 0 : index
    %c1 = arith.constant 1 : index
    %5 = vector.load %arg1[%c0_5, %c0_6, %c1] : memref<1x8x2704xf32, #tpu.memory_space<vmem>>, vector<1x8x2650xf32>
    %6 = vector.shape_cast %5 : vector<1x8x2650xf32> to vector<8x2650xf32>
    %c1_7 = arith.constant 1 : index
    %c0_8 = arith.constant 0 : index
    %c0_9 = arith.constant 0 : index
    %7 = vector.load %arg2[%c1_7, %c0_8, %c0_9] : memref<9x8x8xf32, #tpu.memory_space<vmem>>, vector<1x8x8xf32>
    %8 = vector.shape_cast %7 : vector<1x8x8xf32> to vector<8x8xf32>
    %cst_10 = arith.constant dense<0.000000e+00> : vector<8x2650xf32>
    %9 = tpu.matmul %8, %6, %cst_10 {dimension_numbers = #tpu.dot_dimension_numbers<[1], [0], [0], [1], [0, 0, 1, 1], [], []>} : vector<8x8xf32>, vector<8x2650xf32>, vector<8x2650xf32> -> vector<8x2650xf32>
    %10 = arith.addf %4, %9 : vector<8x2650xf32>
    %c0_11 = arith.constant 0 : index
    %c0_12 = arith.constant 0 : index
    %c2 = arith.constant 2 : index
    %11 = vector.load %arg1[%c0_11, %c0_12, %c2] : memref<1x8x2704xf32, #tpu.memory_space<vmem>>, vector<1x8x2650xf32>
    %12 = vector.shape_cast %11 : vector<1x8x2650xf32> to vector<8x2650xf32>
    %c2_13 = arith.constant 2 : index
    %c0_14 = arith.constant 0 : index
    %c0_15 = arith.constant 0 : index
    %13 = vector.load %arg2[%c2_13, %c0_14, %c0_15] : memref<9x8x8xf32, #tpu.memory_space<vmem>>, vector<1x8x8xf32>
    %14 = vector.shape_cast %13 : vector<1x8x8xf32> to vector<8x8xf32>
    %cst_16 = arith.constant dense<0.000000e+00> : vector<8x2650xf32>
    %15 = tpu.matmul %14, %12, %cst_16 {dimension_numbers = #tpu.dot_dimension_numbers<[1], [0], [0], [1], [0, 0, 1, 1], [], []>} : vector<8x8xf32>, vector<8x2650xf32>, vector<8x2650xf32> -> vector<8x2650xf32>
    %16 = arith.addf %10, %15 : vector<8x2650xf32>
    %c0_17 = arith.constant 0 : index
    %c0_18 = arith.constant 0 : index
    %c26 = arith.constant 26 : index
    %17 = vector.load %arg1[%c0_17, %c0_18, %c26] : memref<1x8x2704xf32, #tpu.memory_space<vmem>>, vector<1x8x2650xf32>
    %18 = vector.shape_cast %17 : vector<1x8x2650xf32> to vector<8x2650xf32>
    %c3 = arith.constant 3 : index
    %c0_19 = arith.constant 0 : index
    %c0_20 = arith.constant 0 : index
    %19 = vector.load %arg2[%c3, %c0_19, %c0_20] : memref<9x8x8xf32, #tpu.memory_space<vmem>>, vector<1x8x8xf32>
    %20 = vector.shape_cast %19 : vector<1x8x8xf32> to vector<8x8xf32>
    %cst_21 = arith.constant dense<0.000000e+00> : vector<8x2650xf32>
    %21 = tpu.matmul %20, %18, %cst_21 {dimension_numbers = #tpu.dot_dimension_numbers<[1], [0], [0], [1], [0, 0, 1, 1], [], []>} : vector<8x8xf32>, vector<8x2650xf32>, vector<8x2650xf32> -> vector<8x2650xf32>
    %22 = arith.addf %16, %21 : vector<8x2650xf32>
    %c0_22 = arith.constant 0 : index
    %c0_23 = arith.constant 0 : index
    %c27 = arith.constant 27 : index
    %23 = vector.load %arg1[%c0_22, %c0_23, %c27] : memref<1x8x2704xf32, #tpu.memory_space<vmem>>, vector<1x8x2650xf32>
    %24 = vector.shape_cast %23 : vector<1x8x2650xf32> to vector<8x2650xf32>
    %c4 = arith.constant 4 : index
    %c0_24 = arith.constant 0 : index
    %c0_25 = arith.constant 0 : index
    %25 = vector.load %arg2[%c4, %c0_24, %c0_25] : memref<9x8x8xf32, #tpu.memory_space<vmem>>, vector<1x8x8xf32>
    %26 = vector.shape_cast %25 : vector<1x8x8xf32> to vector<8x8xf32>
    %cst_26 = arith.constant dense<0.000000e+00> : vector<8x2650xf32>
    %27 = tpu.matmul %26, %24, %cst_26 {dimension_numbers = #tpu.dot_dimension_numbers<[1], [0], [0], [1], [0, 0, 1, 1], [], []>} : vector<8x8xf32>, vector<8x2650xf32>, vector<8x2650xf32> -> vector<8x2650xf32>
    %28 = arith.addf %22, %27 : vector<8x2650xf32>
    %c0_27 = arith.constant 0 : index
    %c0_28 = arith.constant 0 : index
    %c28 = arith.constant 28 : index
    %29 = vector.load %arg1[%c0_27, %c0_28, %c28] : memref<1x8x2704xf32, #tpu.memory_space<vmem>>, vector<1x8x2650xf32>
    %30 = vector.shape_cast %29 : vector<1x8x2650xf32> to vector<8x2650xf32>
    %c5 = arith.constant 5 : index
    %c0_29 = arith.constant 0 : index
    %c0_30 = arith.constant 0 : index
    %31 = vector.load %arg2[%c5, %c0_29, %c0_30] : memref<9x8x8xf32, #tpu.memory_space<vmem>>, vector<1x8x8xf32>
    %32 = vector.shape_cast %31 : vector<1x8x8xf32> to vector<8x8xf32>
    %cst_31 = arith.constant dense<0.000000e+00> : vector<8x2650xf32>
    %33 = tpu.matmul %32, %30, %cst_31 {dimension_numbers = #tpu.dot_dimension_numbers<[1], [0], [0], [1], [0, 0, 1, 1], [], []>} : vector<8x8xf32>, vector<8x2650xf32>, vector<8x2650xf32> -> vector<8x2650xf32>
    %34 = arith.addf %28, %33 : vector<8x2650xf32>
    %c0_32 = arith.constant 0 : index
    %c0_33 = arith.constant 0 : index
    %c52 = arith.constant 52 : index
    %35 = vector.load %arg1[%c0_32, %c0_33, %c52] : memref<1x8x2704xf32, #tpu.memory_space<vmem>>, vector<1x8x2650xf32>
    %36 = vector.shape_cast %35 : vector<1x8x2650xf32> to vector<8x2650xf32>
    %c6 = arith.constant 6 : index
    %c0_34 = arith.constant 0 : index
    %c0_35 = arith.constant 0 : index
    %37 = vector.load %arg2[%c6, %c0_34, %c0_35] : memref<9x8x8xf32, #tpu.memory_space<vmem>>, vector<1x8x8xf32>
    %38 = vector.shape_cast %37 : vector<1x8x8xf32> to vector<8x8xf32>
    %cst_36 = arith.constant dense<0.000000e+00> : vector<8x2650xf32>
    %39 = tpu.matmul %38, %36, %cst_36 {dimension_numbers = #tpu.dot_dimension_numbers<[1], [0], [0], [1], [0, 0, 1, 1], [], []>} : vector<8x8xf32>, vector<8x2650xf32>, vector<8x2650xf32> -> vector<8x2650xf32>
    %40 = arith.addf %34, %39 : vector<8x2650xf32>
    %c0_37 = arith.constant 0 : index
    %c0_38 = arith.constant 0 : index
    %c53 = arith.constant 53 : index
    %41 = vector.load %arg1[%c0_37, %c0_38, %c53] : memref<1x8x2704xf32, #tpu.memory_space<vmem>>, vector<1x8x2650xf32>
    %42 = vector.shape_cast %41 : vector<1x8x2650xf32> to vector<8x2650xf32>
    %c7 = arith.constant 7 : index
    %c0_39 = arith.constant 0 : index
    %c0_40 = arith.constant 0 : index
    %43 = vector.load %arg2[%c7, %c0_39, %c0_40] : memref<9x8x8xf32, #tpu.memory_space<vmem>>, vector<1x8x8xf32>
    %44 = vector.shape_cast %43 : vector<1x8x8xf32> to vector<8x8xf32>
    %cst_41 = arith.constant dense<0.000000e+00> : vector<8x2650xf32>
    %45 = tpu.matmul %44, %42, %cst_41 {dimension_numbers = #tpu.dot_dimension_numbers<[1], [0], [0], [1], [0, 0, 1, 1], [], []>} : vector<8x8xf32>, vector<8x2650xf32>, vector<8x2650xf32> -> vector<8x2650xf32>
    %46 = arith.addf %40, %45 : vector<8x2650xf32>
    %c0_42 = arith.constant 0 : index
    %c0_43 = arith.constant 0 : index
    %c54 = arith.constant 54 : index
    %47 = vector.load %arg1[%c0_42, %c0_43, %c54] : memref<1x8x2704xf32, #tpu.memory_space<vmem>>, vector<1x8x2650xf32>
    %48 = vector.shape_cast %47 : vector<1x8x2650xf32> to vector<8x2650xf32>
    %c8 = arith.constant 8 : index
    %c0_44 = arith.constant 0 : index
    %c0_45 = arith.constant 0 : index
    %49 = vector.load %arg2[%c8, %c0_44, %c0_45] : memref<9x8x8xf32, #tpu.memory_space<vmem>>, vector<1x8x8xf32>
    %50 = vector.shape_cast %49 : vector<1x8x8xf32> to vector<8x8xf32>
    %cst_46 = arith.constant dense<0.000000e+00> : vector<8x2650xf32>
    %51 = tpu.matmul %50, %48, %cst_46 {dimension_numbers = #tpu.dot_dimension_numbers<[1], [0], [0], [1], [0, 0, 1, 1], [], []>} : vector<8x8xf32>, vector<8x2650xf32>, vector<8x2650xf32> -> vector<8x2650xf32>
    %52 = arith.addf %46, %51 : vector<8x2650xf32>
    %c0_47 = arith.constant 0 : index
    %c0_48 = arith.constant 0 : index
    %53 = vector.load %arg3[%c0_47, %c0_48] : memref<8x1xf32, #tpu.memory_space<vmem>>, vector<8x1xf32>
    %54 = vector.broadcast %53 : vector<8x1xf32> to vector<8x2650xf32>
    %55 = arith.addf %52, %54 : vector<8x2650xf32>
    %cst_49 = arith.constant 5.000000e-03 : f32
    %56 = vector.broadcast %cst_49 : f32 to vector<8x2650xf32>
    %57 = arith.mulf %56, %55 : vector<8x2650xf32>
    %58 = arith.maximumf %55, %57 : vector<8x2650xf32>
    %59 = vector.extract_strided_slice %58 {offsets = [0, 0], sizes = [8, 2623], strides = [1, 1]} : vector<8x2650xf32> to vector<8x2623xf32>
    %60 = vector.extract_strided_slice %58 {offsets = [0, 1], sizes = [8, 2623], strides = [1, 1]} : vector<8x2650xf32> to vector<8x2623xf32>
    %61 = arith.maximumf %59, %60 : vector<8x2623xf32>
    %62 = vector.extract_strided_slice %58 {offsets = [0, 26], sizes = [8, 2623], strides = [1, 1]} : vector<8x2650xf32> to vector<8x2623xf32>
    %63 = vector.extract_strided_slice %58 {offsets = [0, 27], sizes = [8, 2623], strides = [1, 1]} : vector<8x2650xf32> to vector<8x2623xf32>
    %64 = arith.maximumf %62, %63 : vector<8x2623xf32>
    %65 = arith.maximumf %61, %64 : vector<8x2623xf32>
    %c0_50 = arith.constant 0 : index
    %c0_51 = arith.constant 0 : index
    %c0_52 = arith.constant 0 : index
    %66 = vector.load %arg4[%c0_50, %c0_51, %c0_52] : memref<1x8x2623xf32, #tpu.memory_space<vmem>>, vector<1x8x2623xf32>
    %67 = vector.shape_cast %66 : vector<1x8x2623xf32> to vector<8x2623xf32>
    %68 = vector.shape_cast %65 : vector<8x2623xf32> to vector<1x8x2623xf32>
    tpu.vector_store %arg4[%c0_50, %c0_51, %c0_52], %68 {strides = array<i32>} : memref<1x8x2623xf32, #tpu.memory_space<vmem>>, vector<1x8x2623xf32>,
    return
  }
  func.func @transform_0(%arg0: i32) -> (i32, i32, i32) {
    %c0_i32 = arith.constant 0 : i32
    %c0_i32_0 = arith.constant 0 : i32
    %c0_i32_1 = arith.constant 0 : i32
    return %arg0, %c0_i32, %c0_i32_0 : i32, i32, i32
  }
  func.func @transform_1(%arg0: i32) -> (i32, i32, i32) {
    %c0_i32 = arith.constant 0 : i32
    %c0_i32_0 = arith.constant 0 : i32
    %c0_i32_1 = arith.constant 0 : i32
    %c0_i32_2 = arith.constant 0 : i32
    return %c0_i32, %c0_i32_0, %c0_i32_1 : i32, i32, i32
  }
  func.func @transform_2(%arg0: i32) -> (i32, i32) {
    %c0_i32 = arith.constant 0 : i32
    %c0_i32_0 = arith.constant 0 : i32
    %c0_i32_1 = arith.constant 0 : i32
    return %c0_i32, %c0_i32_0 : i32, i32
  }
  func.func @transform_3(%arg0: i32) -> (i32, i32, i32) {
    %c0_i32 = arith.constant 0 : i32
    %c0_i32_0 = arith.constant 0 : i32
    %c0_i32_1 = arith.constant 0 : i32
    return %arg0, %c0_i32, %c0_i32_0 : i32, i32, i32
  }
}

module attributes {stable_mosaic.version = 11 : i64} {
  func.func @_conv3x3_lrelu_slidemax_kernel(%arg0: i32, %arg1: memref<1x8x1936xf32, #tpu.memory_space<vmem>>, %arg2: memref<9x16x8xf32, #tpu.memory_space<vmem>>, %arg3: memref<16x1xf32, #tpu.memory_space<vmem>>, %arg4: memref<1x16x1900xf32, #tpu.memory_space<vmem>>) attributes {dimension_semantics = [#tpu.dimension_semantics<parallel>], iteration_bounds = array<i64: 2>, scalar_prefetch = 0 : i64, scratch_operands = 0 : i64, tpu.core_type = #tpu.core_type<tc>, window_params = [{transform_indices = @transform_0, window_bounds = array<i64: 1, 8, 1936>}, {pipeline_mode = #tpu.pipeline_mode<synchronous>, transform_indices = @transform_1, window_bounds = array<i64: 9, 16, 8>}, {pipeline_mode = #tpu.pipeline_mode<synchronous>, transform_indices = @transform_2, window_bounds = array<i64: 16, 1>}, {transform_indices = @transform_3, window_bounds = array<i64: 1, 16, 1900>}]} {
    %c0 = arith.constant 0 : index
    %c0_0 = arith.constant 0 : index
    %c0_1 = arith.constant 0 : index
    %0 = vector.load %arg1[%c0, %c0_0, %c0_1] : memref<1x8x1936xf32, #tpu.memory_space<vmem>>, vector<1x8x1912xf32>
    %1 = vector.shape_cast %0 : vector<1x8x1912xf32> to vector<8x1912xf32>
    %c0_2 = arith.constant 0 : index
    %c0_3 = arith.constant 0 : index
    %c0_4 = arith.constant 0 : index
    %2 = vector.load %arg2[%c0_2, %c0_3, %c0_4] : memref<9x16x8xf32, #tpu.memory_space<vmem>>, vector<1x16x8xf32>
    %3 = vector.shape_cast %2 : vector<1x16x8xf32> to vector<16x8xf32>
    %cst = arith.constant dense<0.000000e+00> : vector<16x1912xf32>
    %4 = tpu.matmul %3, %1, %cst {dimension_numbers = #tpu.dot_dimension_numbers<[1], [0], [0], [1], [0, 0, 1, 1], [], []>} : vector<16x8xf32>, vector<8x1912xf32>, vector<16x1912xf32> -> vector<16x1912xf32>
    %c0_5 = arith.constant 0 : index
    %c0_6 = arith.constant 0 : index
    %c1 = arith.constant 1 : index
    %5 = vector.load %arg1[%c0_5, %c0_6, %c1] : memref<1x8x1936xf32, #tpu.memory_space<vmem>>, vector<1x8x1912xf32>
    %6 = vector.shape_cast %5 : vector<1x8x1912xf32> to vector<8x1912xf32>
    %c1_7 = arith.constant 1 : index
    %c0_8 = arith.constant 0 : index
    %c0_9 = arith.constant 0 : index
    %7 = vector.load %arg2[%c1_7, %c0_8, %c0_9] : memref<9x16x8xf32, #tpu.memory_space<vmem>>, vector<1x16x8xf32>
    %8 = vector.shape_cast %7 : vector<1x16x8xf32> to vector<16x8xf32>
    %cst_10 = arith.constant dense<0.000000e+00> : vector<16x1912xf32>
    %9 = tpu.matmul %8, %6, %cst_10 {dimension_numbers = #tpu.dot_dimension_numbers<[1], [0], [0], [1], [0, 0, 1, 1], [], []>} : vector<16x8xf32>, vector<8x1912xf32>, vector<16x1912xf32> -> vector<16x1912xf32>
    %10 = arith.addf %4, %9 : vector<16x1912xf32>
    %c0_11 = arith.constant 0 : index
    %c0_12 = arith.constant 0 : index
    %c2 = arith.constant 2 : index
    %11 = vector.load %arg1[%c0_11, %c0_12, %c2] : memref<1x8x1936xf32, #tpu.memory_space<vmem>>, vector<1x8x1912xf32>
    %12 = vector.shape_cast %11 : vector<1x8x1912xf32> to vector<8x1912xf32>
    %c2_13 = arith.constant 2 : index
    %c0_14 = arith.constant 0 : index
    %c0_15 = arith.constant 0 : index
    %13 = vector.load %arg2[%c2_13, %c0_14, %c0_15] : memref<9x16x8xf32, #tpu.memory_space<vmem>>, vector<1x16x8xf32>
    %14 = vector.shape_cast %13 : vector<1x16x8xf32> to vector<16x8xf32>
    %cst_16 = arith.constant dense<0.000000e+00> : vector<16x1912xf32>
    %15 = tpu.matmul %14, %12, %cst_16 {dimension_numbers = #tpu.dot_dimension_numbers<[1], [0], [0], [1], [0, 0, 1, 1], [], []>} : vector<16x8xf32>, vector<8x1912xf32>, vector<16x1912xf32> -> vector<16x1912xf32>
    %16 = arith.addf %10, %15 : vector<16x1912xf32>
    %c0_17 = arith.constant 0 : index
    %c0_18 = arith.constant 0 : index
    %c11 = arith.constant 11 : index
    %17 = vector.load %arg1[%c0_17, %c0_18, %c11] : memref<1x8x1936xf32, #tpu.memory_space<vmem>>, vector<1x8x1912xf32>
    %18 = vector.shape_cast %17 : vector<1x8x1912xf32> to vector<8x1912xf32>
    %c3 = arith.constant 3 : index
    %c0_19 = arith.constant 0 : index
    %c0_20 = arith.constant 0 : index
    %19 = vector.load %arg2[%c3, %c0_19, %c0_20] : memref<9x16x8xf32, #tpu.memory_space<vmem>>, vector<1x16x8xf32>
    %20 = vector.shape_cast %19 : vector<1x16x8xf32> to vector<16x8xf32>
    %cst_21 = arith.constant dense<0.000000e+00> : vector<16x1912xf32>
    %21 = tpu.matmul %20, %18, %cst_21 {dimension_numbers = #tpu.dot_dimension_numbers<[1], [0], [0], [1], [0, 0, 1, 1], [], []>} : vector<16x8xf32>, vector<8x1912xf32>, vector<16x1912xf32> -> vector<16x1912xf32>
    %22 = arith.addf %16, %21 : vector<16x1912xf32>
    %c0_22 = arith.constant 0 : index
    %c0_23 = arith.constant 0 : index
    %c12 = arith.constant 12 : index
    %23 = vector.load %arg1[%c0_22, %c0_23, %c12] : memref<1x8x1936xf32, #tpu.memory_space<vmem>>, vector<1x8x1912xf32>
    %24 = vector.shape_cast %23 : vector<1x8x1912xf32> to vector<8x1912xf32>
    %c4 = arith.constant 4 : index
    %c0_24 = arith.constant 0 : index
    %c0_25 = arith.constant 0 : index
    %25 = vector.load %arg2[%c4, %c0_24, %c0_25] : memref<9x16x8xf32, #tpu.memory_space<vmem>>, vector<1x16x8xf32>
    %26 = vector.shape_cast %25 : vector<1x16x8xf32> to vector<16x8xf32>
    %cst_26 = arith.constant dense<0.000000e+00> : vector<16x1912xf32>
    %27 = tpu.matmul %26, %24, %cst_26 {dimension_numbers = #tpu.dot_dimension_numbers<[1], [0], [0], [1], [0, 0, 1, 1], [], []>} : vector<16x8xf32>, vector<8x1912xf32>, vector<16x1912xf32> -> vector<16x1912xf32>
    %28 = arith.addf %22, %27 : vector<16x1912xf32>
    %c0_27 = arith.constant 0 : index
    %c0_28 = arith.constant 0 : index
    %c13 = arith.constant 13 : index
    %29 = vector.load %arg1[%c0_27, %c0_28, %c13] : memref<1x8x1936xf32, #tpu.memory_space<vmem>>, vector<1x8x1912xf32>
    %30 = vector.shape_cast %29 : vector<1x8x1912xf32> to vector<8x1912xf32>
    %c5 = arith.constant 5 : index
    %c0_29 = arith.constant 0 : index
    %c0_30 = arith.constant 0 : index
    %31 = vector.load %arg2[%c5, %c0_29, %c0_30] : memref<9x16x8xf32, #tpu.memory_space<vmem>>, vector<1x16x8xf32>
    %32 = vector.shape_cast %31 : vector<1x16x8xf32> to vector<16x8xf32>
    %cst_31 = arith.constant dense<0.000000e+00> : vector<16x1912xf32>
    %33 = tpu.matmul %32, %30, %cst_31 {dimension_numbers = #tpu.dot_dimension_numbers<[1], [0], [0], [1], [0, 0, 1, 1], [], []>} : vector<16x8xf32>, vector<8x1912xf32>, vector<16x1912xf32> -> vector<16x1912xf32>
    %34 = arith.addf %28, %33 : vector<16x1912xf32>
    %c0_32 = arith.constant 0 : index
    %c0_33 = arith.constant 0 : index
    %c22 = arith.constant 22 : index
    %35 = vector.load %arg1[%c0_32, %c0_33, %c22] : memref<1x8x1936xf32, #tpu.memory_space<vmem>>, vector<1x8x1912xf32>
    %36 = vector.shape_cast %35 : vector<1x8x1912xf32> to vector<8x1912xf32>
    %c6 = arith.constant 6 : index
    %c0_34 = arith.constant 0 : index
    %c0_35 = arith.constant 0 : index
    %37 = vector.load %arg2[%c6, %c0_34, %c0_35] : memref<9x16x8xf32, #tpu.memory_space<vmem>>, vector<1x16x8xf32>
    %38 = vector.shape_cast %37 : vector<1x16x8xf32> to vector<16x8xf32>
    %cst_36 = arith.constant dense<0.000000e+00> : vector<16x1912xf32>
    %39 = tpu.matmul %38, %36, %cst_36 {dimension_numbers = #tpu.dot_dimension_numbers<[1], [0], [0], [1], [0, 0, 1, 1], [], []>} : vector<16x8xf32>, vector<8x1912xf32>, vector<16x1912xf32> -> vector<16x1912xf32>
    %40 = arith.addf %34, %39 : vector<16x1912xf32>
    %c0_37 = arith.constant 0 : index
    %c0_38 = arith.constant 0 : index
    %c23 = arith.constant 23 : index
    %41 = vector.load %arg1[%c0_37, %c0_38, %c23] : memref<1x8x1936xf32, #tpu.memory_space<vmem>>, vector<1x8x1912xf32>
    %42 = vector.shape_cast %41 : vector<1x8x1912xf32> to vector<8x1912xf32>
    %c7 = arith.constant 7 : index
    %c0_39 = arith.constant 0 : index
    %c0_40 = arith.constant 0 : index
    %43 = vector.load %arg2[%c7, %c0_39, %c0_40] : memref<9x16x8xf32, #tpu.memory_space<vmem>>, vector<1x16x8xf32>
    %44 = vector.shape_cast %43 : vector<1x16x8xf32> to vector<16x8xf32>
    %cst_41 = arith.constant dense<0.000000e+00> : vector<16x1912xf32>
    %45 = tpu.matmul %44, %42, %cst_41 {dimension_numbers = #tpu.dot_dimension_numbers<[1], [0], [0], [1], [0, 0, 1, 1], [], []>} : vector<16x8xf32>, vector<8x1912xf32>, vector<16x1912xf32> -> vector<16x1912xf32>
    %46 = arith.addf %40, %45 : vector<16x1912xf32>
    %c0_42 = arith.constant 0 : index
    %c0_43 = arith.constant 0 : index
    %c24 = arith.constant 24 : index
    %47 = vector.load %arg1[%c0_42, %c0_43, %c24] : memref<1x8x1936xf32, #tpu.memory_space<vmem>>, vector<1x8x1912xf32>
    %48 = vector.shape_cast %47 : vector<1x8x1912xf32> to vector<8x1912xf32>
    %c8 = arith.constant 8 : index
    %c0_44 = arith.constant 0 : index
    %c0_45 = arith.constant 0 : index
    %49 = vector.load %arg2[%c8, %c0_44, %c0_45] : memref<9x16x8xf32, #tpu.memory_space<vmem>>, vector<1x16x8xf32>
    %50 = vector.shape_cast %49 : vector<1x16x8xf32> to vector<16x8xf32>
    %cst_46 = arith.constant dense<0.000000e+00> : vector<16x1912xf32>
    %51 = tpu.matmul %50, %48, %cst_46 {dimension_numbers = #tpu.dot_dimension_numbers<[1], [0], [0], [1], [0, 0, 1, 1], [], []>} : vector<16x8xf32>, vector<8x1912xf32>, vector<16x1912xf32> -> vector<16x1912xf32>
    %52 = arith.addf %46, %51 : vector<16x1912xf32>
    %c0_47 = arith.constant 0 : index
    %c0_48 = arith.constant 0 : index
    %53 = vector.load %arg3[%c0_47, %c0_48] : memref<16x1xf32, #tpu.memory_space<vmem>>, vector<16x1xf32>
    %54 = vector.broadcast %53 : vector<16x1xf32> to vector<16x1912xf32>
    %55 = arith.addf %52, %54 : vector<16x1912xf32>
    %cst_49 = arith.constant 5.000000e-03 : f32
    %56 = vector.broadcast %cst_49 : f32 to vector<16x1912xf32>
    %57 = arith.mulf %56, %55 : vector<16x1912xf32>
    %58 = arith.maximumf %55, %57 : vector<16x1912xf32>
    %59 = vector.extract_strided_slice %58 {offsets = [0, 0], sizes = [16, 1900], strides = [1, 1]} : vector<16x1912xf32> to vector<16x1900xf32>
    %60 = vector.extract_strided_slice %58 {offsets = [0, 1], sizes = [16, 1900], strides = [1, 1]} : vector<16x1912xf32> to vector<16x1900xf32>
    %61 = arith.maximumf %59, %60 : vector<16x1900xf32>
    %62 = vector.extract_strided_slice %58 {offsets = [0, 11], sizes = [16, 1900], strides = [1, 1]} : vector<16x1912xf32> to vector<16x1900xf32>
    %63 = vector.extract_strided_slice %58 {offsets = [0, 12], sizes = [16, 1900], strides = [1, 1]} : vector<16x1912xf32> to vector<16x1900xf32>
    %64 = arith.maximumf %62, %63 : vector<16x1900xf32>
    %65 = arith.maximumf %61, %64 : vector<16x1900xf32>
    %c0_50 = arith.constant 0 : index
    %c0_51 = arith.constant 0 : index
    %c0_52 = arith.constant 0 : index
    %66 = vector.load %arg4[%c0_50, %c0_51, %c0_52] : memref<1x16x1900xf32, #tpu.memory_space<vmem>>, vector<1x16x1900xf32>
    %67 = vector.shape_cast %66 : vector<1x16x1900xf32> to vector<16x1900xf32>
    %68 = vector.shape_cast %65 : vector<16x1900xf32> to vector<1x16x1900xf32>
    tpu.vector_store %arg4[%c0_50, %c0_51, %c0_52], %68 {strides = array<i32>} : memref<1x16x1900xf32, #tpu.memory_space<vmem>>, vector<1x16x1900xf32>,
    return
  }
  func.func @transform_0(%arg0: i32) -> (i32, i32, i32) {
    %c0_i32 = arith.constant 0 : i32
    %c0_i32_0 = arith.constant 0 : i32
    %c0_i32_1 = arith.constant 0 : i32
    return %arg0, %c0_i32, %c0_i32_0 : i32, i32, i32
  }
  func.func @transform_1(%arg0: i32) -> (i32, i32, i32) {
    %c0_i32 = arith.constant 0 : i32
    %c0_i32_0 = arith.constant 0 : i32
    %c0_i32_1 = arith.constant 0 : i32
    %c0_i32_2 = arith.constant 0 : i32
    return %c0_i32, %c0_i32_0, %c0_i32_1 : i32, i32, i32
  }
  func.func @transform_2(%arg0: i32) -> (i32, i32) {
    %c0_i32 = arith.constant 0 : i32
    %c0_i32_0 = arith.constant 0 : i32
    %c0_i32_1 = arith.constant 0 : i32
    return %c0_i32, %c0_i32_0 : i32, i32
  }
  func.func @transform_3(%arg0: i32) -> (i32, i32, i32) {
    %c0_i32 = arith.constant 0 : i32
    %c0_i32_0 = arith.constant 0 : i32
    %c0_i32_1 = arith.constant 0 : i32
    return %arg0, %c0_i32, %c0_i32_0 : i32, i32, i32
  }
}

module attributes {stable_mosaic.version = 11 : i64} {
  func.func @_conv4_conv5_decode_kernel(%arg0: i32, %arg1: memref<1x16x1024xf32, #tpu.memory_space<vmem>>, %arg2: memref<4x16x16xf32, #tpu.memory_space<vmem>>, %arg3: memref<16x1xf32, #tpu.memory_space<vmem>>, %arg4: memref<8x16xf32, #tpu.memory_space<vmem>>, %arg5: memref<8x1xf32, #tpu.memory_space<vmem>>, %arg6: memref<16x8xf32, #tpu.memory_space<vmem>>, %arg7: memref<16x1xf32, #tpu.memory_space<vmem>>, %arg8: memref<1x16x1019xf32, #tpu.memory_space<vmem>>) attributes {dimension_semantics = [#tpu.dimension_semantics<parallel>], iteration_bounds = array<i64: 2>, scalar_prefetch = 0 : i64, scratch_operands = 0 : i64, tpu.core_type = #tpu.core_type<tc>, window_params = [{transform_indices = @transform_0, window_bounds = array<i64: 1, 16, 1024>}, {pipeline_mode = #tpu.pipeline_mode<synchronous>, transform_indices = @transform_1, window_bounds = array<i64: 4, 16, 16>}, {pipeline_mode = #tpu.pipeline_mode<synchronous>, transform_indices = @transform_2, window_bounds = array<i64: 16, 1>}, {pipeline_mode = #tpu.pipeline_mode<synchronous>, transform_indices = @transform_3, window_bounds = array<i64: 8, 16>}, {pipeline_mode = #tpu.pipeline_mode<synchronous>, transform_indices = @transform_4, window_bounds = array<i64: 8, 1>}, {pipeline_mode = #tpu.pipeline_mode<synchronous>, transform_indices = @transform_5, window_bounds = array<i64: 16, 8>}, {pipeline_mode = #tpu.pipeline_mode<synchronous>, transform_indices = @transform_6, window_bounds = array<i64: 16, 1>}, {transform_indices = @transform_7, window_bounds = array<i64: 1, 16, 1019>}]} {
    %c0 = arith.constant 0 : index
    %c0_0 = arith.constant 0 : index
    %c0_1 = arith.constant 0 : index
    %0 = vector.load %arg1[%c0, %c0_0, %c0_1] : memref<1x16x1024xf32, #tpu.memory_space<vmem>>, vector<1x16x1019xf32>
    %1 = vector.shape_cast %0 : vector<1x16x1019xf32> to vector<16x1019xf32>
    %c0_2 = arith.constant 0 : index
    %c0_3 = arith.constant 0 : index
    %c0_4 = arith.constant 0 : index
    %2 = vector.load %arg2[%c0_2, %c0_3, %c0_4] : memref<4x16x16xf32, #tpu.memory_space<vmem>>, vector<1x16x16xf32>
    %3 = vector.shape_cast %2 : vector<1x16x16xf32> to vector<16x16xf32>
    %cst = arith.constant dense<0.000000e+00> : vector<16x1019xf32>
    %4 = tpu.matmul %3, %1, %cst {dimension_numbers = #tpu.dot_dimension_numbers<[1], [0], [0], [1], [0, 0, 1, 1], [], []>} : vector<16x16xf32>, vector<16x1019xf32>, vector<16x1019xf32> -> vector<16x1019xf32>
    %c0_5 = arith.constant 0 : index
    %c0_6 = arith.constant 0 : index
    %c1 = arith.constant 1 : index
    %5 = vector.load %arg1[%c0_5, %c0_6, %c1] : memref<1x16x1024xf32, #tpu.memory_space<vmem>>, vector<1x16x1019xf32>
    %6 = vector.shape_cast %5 : vector<1x16x1019xf32> to vector<16x1019xf32>
    %c1_7 = arith.constant 1 : index
    %c0_8 = arith.constant 0 : index
    %c0_9 = arith.constant 0 : index
    %7 = vector.load %arg2[%c1_7, %c0_8, %c0_9] : memref<4x16x16xf32, #tpu.memory_space<vmem>>, vector<1x16x16xf32>
    %8 = vector.shape_cast %7 : vector<1x16x16xf32> to vector<16x16xf32>
    %cst_10 = arith.constant dense<0.000000e+00> : vector<16x1019xf32>
    %9 = tpu.matmul %8, %6, %cst_10 {dimension_numbers = #tpu.dot_dimension_numbers<[1], [0], [0], [1], [0, 0, 1, 1], [], []>} : vector<16x16xf32>, vector<16x1019xf32>, vector<16x1019xf32> -> vector<16x1019xf32>
    %10 = arith.addf %4, %9 : vector<16x1019xf32>
    %c0_11 = arith.constant 0 : index
    %c0_12 = arith.constant 0 : index
    %c4 = arith.constant 4 : index
    %11 = vector.load %arg1[%c0_11, %c0_12, %c4] : memref<1x16x1024xf32, #tpu.memory_space<vmem>>, vector<1x16x1019xf32>
    %12 = vector.shape_cast %11 : vector<1x16x1019xf32> to vector<16x1019xf32>
    %c2 = arith.constant 2 : index
    %c0_13 = arith.constant 0 : index
    %c0_14 = arith.constant 0 : index
    %13 = vector.load %arg2[%c2, %c0_13, %c0_14] : memref<4x16x16xf32, #tpu.memory_space<vmem>>, vector<1x16x16xf32>
    %14 = vector.shape_cast %13 : vector<1x16x16xf32> to vector<16x16xf32>
    %cst_15 = arith.constant dense<0.000000e+00> : vector<16x1019xf32>
    %15 = tpu.matmul %14, %12, %cst_15 {dimension_numbers = #tpu.dot_dimension_numbers<[1], [0], [0], [1], [0, 0, 1, 1], [], []>} : vector<16x16xf32>, vector<16x1019xf32>, vector<16x1019xf32> -> vector<16x1019xf32>
    %16 = arith.addf %10, %15 : vector<16x1019xf32>
    %c0_16 = arith.constant 0 : index
    %c0_17 = arith.constant 0 : index
    %c5 = arith.constant 5 : index
    %17 = vector.load %arg1[%c0_16, %c0_17, %c5] : memref<1x16x1024xf32, #tpu.memory_space<vmem>>, vector<1x16x1019xf32>
    %18 = vector.shape_cast %17 : vector<1x16x1019xf32> to vector<16x1019xf32>
    %c3 = arith.constant 3 : index
    %c0_18 = arith.constant 0 : index
    %c0_19 = arith.constant 0 : index
    %19 = vector.load %arg2[%c3, %c0_18, %c0_19] : memref<4x16x16xf32, #tpu.memory_space<vmem>>, vector<1x16x16xf32>
    %20 = vector.shape_cast %19 : vector<1x16x16xf32> to vector<16x16xf32>
    %cst_20 = arith.constant dense<0.000000e+00> : vector<16x1019xf32>
    %21 = tpu.matmul %20, %18, %cst_20 {dimension_numbers = #tpu.dot_dimension_numbers<[1], [0], [0], [1], [0, 0, 1, 1], [], []>} : vector<16x16xf32>, vector<16x1019xf32>, vector<16x1019xf32> -> vector<16x1019xf32>
    %22 = arith.addf %16, %21 : vector<16x1019xf32>
    %c0_21 = arith.constant 0 : index
    %c0_22 = arith.constant 0 : index
    %23 = vector.load %arg3[%c0_21, %c0_22] : memref<16x1xf32, #tpu.memory_space<vmem>>, vector<16x1xf32>
    %24 = vector.broadcast %23 : vector<16x1xf32> to vector<16x1019xf32>
    %25 = arith.addf %22, %24 : vector<16x1019xf32>
    %cst_23 = arith.constant 5.000000e-03 : f32
    %26 = vector.broadcast %cst_23 : f32 to vector<16x1019xf32>
    %27 = arith.mulf %26, %25 : vector<16x1019xf32>
    %28 = arith.maximumf %25, %27 : vector<16x1019xf32>
    %c0_24 = arith.constant 0 : index
    %c0_25 = arith.constant 0 : index
    %29 = vector.load %arg4[%c0_24, %c0_25] : memref<8x16xf32, #tpu.memory_space<vmem>>, vector<8x16xf32>
    %cst_26 = arith.constant dense<0.000000e+00> : vector<8x1019xf32>
    %30 = tpu.matmul %29, %28, %cst_26 {dimension_numbers = #tpu.dot_dimension_numbers<[1], [0], [0], [1], [0, 0, 1, 1], [], []>} : vector<8x16xf32>, vector<16x1019xf32>, vector<8x1019xf32> -> vector<8x1019xf32>
    %c0_27 = arith.constant 0 : index
    %c0_28 = arith.constant 0 : index
    %31 = vector.load %arg5[%c0_27, %c0_28] : memref<8x1xf32, #tpu.memory_space<vmem>>, vector<8x1xf32>
    %32 = vector.broadcast %31 : vector<8x1xf32> to vector<8x1019xf32>
    %33 = arith.addf %30, %32 : vector<8x1019xf32>
    %cst_29 = arith.constant 5.000000e-03 : f32
    %34 = vector.broadcast %cst_29 : f32 to vector<8x1019xf32>
    %35 = arith.mulf %34, %33 : vector<8x1019xf32>
    %36 = arith.maximumf %33, %35 : vector<8x1019xf32>
    %c0_30 = arith.constant 0 : index
    %c0_31 = arith.constant 0 : index
    %37 = vector.load %arg6[%c0_30, %c0_31] : memref<16x8xf32, #tpu.memory_space<vmem>>, vector<16x8xf32>
    %cst_32 = arith.constant dense<0.000000e+00> : vector<16x1019xf32>
    %38 = tpu.matmul %37, %36, %cst_32 {dimension_numbers = #tpu.dot_dimension_numbers<[1], [0], [0], [1], [0, 0, 1, 1], [], []>} : vector<16x8xf32>, vector<8x1019xf32>, vector<16x1019xf32> -> vector<16x1019xf32>
    %c0_33 = arith.constant 0 : index
    %c0_34 = arith.constant 0 : index
    %39 = vector.load %arg7[%c0_33, %c0_34] : memref<16x1xf32, #tpu.memory_space<vmem>>, vector<16x1xf32>
    %40 = vector.broadcast %39 : vector<16x1xf32> to vector<16x1019xf32>
    %41 = arith.addf %38, %40 : vector<16x1019xf32>
    %cst_35 = arith.constant 5.000000e-03 : f32
    %42 = vector.broadcast %cst_35 : f32 to vector<16x1019xf32>
    %43 = arith.mulf %42, %41 : vector<16x1019xf32>
    %44 = arith.maximumf %41, %43 : vector<16x1019xf32>
    %c0_36 = arith.constant 0 : index
    %c0_37 = arith.constant 0 : index
    %c0_38 = arith.constant 0 : index
    %45 = vector.load %arg8[%c0_36, %c0_37, %c0_38] : memref<1x16x1019xf32, #tpu.memory_space<vmem>>, vector<1x16x1019xf32>
    %46 = vector.shape_cast %45 : vector<1x16x1019xf32> to vector<16x1019xf32>
    %47 = vector.shape_cast %44 : vector<16x1019xf32> to vector<1x16x1019xf32>
    tpu.vector_store %arg8[%c0_36, %c0_37, %c0_38], %47 {strides = array<i32>} : memref<1x16x1019xf32, #tpu.memory_space<vmem>>, vector<1x16x1019xf32>,
    return
  }
  func.func @transform_0(%arg0: i32) -> (i32, i32, i32) {
    %c0_i32 = arith.constant 0 : i32
    %c0_i32_0 = arith.constant 0 : i32
    %c0_i32_1 = arith.constant 0 : i32
    return %arg0, %c0_i32, %c0_i32_0 : i32, i32, i32
  }
  func.func @transform_1(%arg0: i32) -> (i32, i32, i32) {
    %c0_i32 = arith.constant 0 : i32
    %c0_i32_0 = arith.constant 0 : i32
    %c0_i32_1 = arith.constant 0 : i32
    %c0_i32_2 = arith.constant 0 : i32
    return %c0_i32, %c0_i32_0, %c0_i32_1 : i32, i32, i32
  }
  func.func @transform_2(%arg0: i32) -> (i32, i32) {
    %c0_i32 = arith.constant 0 : i32
    %c0_i32_0 = arith.constant 0 : i32
    %c0_i32_1 = arith.constant 0 : i32
    return %c0_i32, %c0_i32_0 : i32, i32
  }
  func.func @transform_3(%arg0: i32) -> (i32, i32) {
    %c0_i32 = arith.constant 0 : i32
    %c0_i32_0 = arith.constant 0 : i32
    %c0_i32_1 = arith.constant 0 : i32
    return %c0_i32, %c0_i32_0 : i32, i32
  }
  func.func @transform_4(%arg0: i32) -> (i32, i32) {
    %c0_i32 = arith.constant 0 : i32
    %c0_i32_0 = arith.constant 0 : i32
    %c0_i32_1 = arith.constant 0 : i32
    return %c0_i32, %c0_i32_0 : i32, i32
  }
  func.func @transform_5(%arg0: i32) -> (i32, i32) {
    %c0_i32 = arith.constant 0 : i32
    %c0_i32_0 = arith.constant 0 : i32
    %c0_i32_1 = arith.constant 0 : i32
    return %c0_i32, %c0_i32_0 : i32, i32
  }
  func.func @transform_6(%arg0: i32) -> (i32, i32) {
    %c0_i32 = arith.constant 0 : i32
    %c0_i32_0 = arith.constant 0 : i32
    %c0_i32_1 = arith.constant 0 : i32
    return %c0_i32, %c0_i32_0 : i32, i32
  }
  func.func @transform_7(%arg0: i32) -> (i32, i32, i32) {
    %c0_i32 = arith.constant 0 : i32
    %c0_i32_0 = arith.constant 0 : i32
    %c0_i32_1 = arith.constant 0 : i32
    return %arg0, %c0_i32, %c0_i32_0 : i32, i32, i32
  }
}

</mosaic_0001>

<bundles_post_ra>
// kernel: fdfe_anomaly_net.4
= control target key start
LH: loop header
LB: loop body
LE: loop exit
PB: predicated region body
PF: predicated region fallthrough
CT: control target
= control target key end

     0   :  { %s6825_s12 = smov 0   ;;  %s8906_s0 = inlined_call_operand.vmem [shape: f32[2,8,3136], index: 0, kind: input, shape index: {}]   ;;  %s8907_s1 = inlined_call_operand.vmem [shape: f32[9,8,8], index: 1, kind: input, shape index: {}]   ;;  %s8908_s2 = inlined_call_operand.vmem [shape: f32[8,1], index: 2, kind: input, shape index: {}]   ;;  %s8909_s3 = inlined_call_operand.vmem [shape: f32[2,8,2965], index: 3, kind: output, shape index: {}]  }
   0x1 LB: > { %s6032_s13 = sadd.s32 4294967295, %s6794_s12   ;;  %p6036_p0 = scmp.ge.s32.totalorder %s6794_s12, 1  ;;  %s6794_s12 = sphi %s6825_s12, %s13_s12  }
   0x2   : > { %p137_p1 = scmp.lt.s32.totalorder %s6794_s12, 3 }
   0x4   : > { %p138_p2 = pnand %p6036_p0, %p137_p1 }
   0x6   : > { %141 = sbr.rel (%p138_p2) target bundleno = 968 (0x3c8), region = 32 }
   0xb   : > { %p161_p3 = scmp.lt.s32.totalorder %s6032_s13, 1  ;;  %s6796_s18 = smov 127   ;;  %vm270_vm0 = vcmask 1039360   ;;  %v7013_v45 = vld [vmem:[%s8907_s1 + $0x8] sm:$0xff]  ;;  %vm318_vm1 = vcmask 64512   ;;  %vm1335_vm2 = vcmask 1031168  }
   0xc   : > { %s6797_s19 = smov 126   ;;  %s6798_s20 = smov 72   ;;  %vm1992_vm3 = vcmask 588800   ;;  %vm2600_vm4 = vcmask 580608   ;;  %vm3208_vm5 = vcmask 572416   ;;  %vm3816_vm6 = vcmask 130048  }
   0xd   : > { %s8961_s13 = smov (!%p161_p3, %s6032_s13), 1  ;;  %s6799_s21 = smov 71   ;;  %vm4424_vm7 = vcmask 121856   ;;  %vm5032_vm8 = vcmask 113664   ;;  %vm5975_vm9 = vcmask 171008  }
   0xe   : > { %s6265_s14 = smul.u32 200, %s8961_s13  ;;  %s6800_s26 = smov 70  }
   0xf   : > { %s6801_s29 = smov 16   ;;  %s6802_s5 = smov 15  }
  0x10   : > { %s6839_s17 = scalar_lea.vmem %s8906_s0, %s6265_s14  ;;  %s6803_s8 = smov 14  }
  0x11   : > { %v6842_v0 = vld [vmem:[%s6839_s17 + $0x20] sm:$0xff]  ;;  %v6845_v1 = vld [vmem:[%s6839_s17 + $0x28] sm:$0xff]  ;;  %v6864_v6 = vld [vmem:[%s6839_s17 + $0x30] sm:$0xff] }
  0x12   : > { %v6848_v2 = vld [vmem:[%s6839_s17] sm:$0xff]  ;;  %v6852_v3 = vpack.i.bf16 %v6845_v1, %v6842_v0  ;;  %v6855_v4 = vld [vmem:[%s6839_s17 + $0x8] sm:$0xff]  ;;  %v6869_v7 = vld [vmem:[%s6839_s17 + $0x38] sm:$0xff] }
  0x13   : > { %v6859_v5 = vpack.i.bf16 %v6855_v4, %v6848_v2  ;;  %v6872_v8 = vld [vmem:[%s6839_s17 + $0x40] sm:$0xff]  ;;  %v6875_v9 = vld [vmem:[%s6839_s17 + $0x48] sm:$0xff]  ;;  %v6878_v10 = vld [vmem:[%s6839_s17 + $0x10] sm:$0xff]  ;;  %v6299_v13 = vpack.i.bf16 %v6869_v7, %v6864_v6 }
  0x14   : > { %6295 = vrot.lane.b32.xlu1 %v6852_v3, %s6796_s18  ;;  %v6881_v11 = vld [vmem:[%s6839_s17 + $0x18] sm:$0xff]  ;;  %v6885_v12 = vpack.i.bf16 %v6875_v9, %v6872_v8  ;;  %v6896_v15 = vld [vmem:[%s6839_s17 + $0x50] sm:$0xff]  ;;  %v6915_v20 = vld [vmem:[%s6839_s17 + $0x60] sm:$0xff] }
  0x15   : > { %6285 = vrot.lane.b32.xlu0 %v6859_v5, %s6796_s18  ;;  %v6893_v14 = vpack.i.bf16 %v6881_v11, %v6878_v10  ;;  %v6899_v16 = vld [vmem:[%s6839_s17 + $0x58] sm:$0xff]  ;;  %v6909_v18 = vld [vmem:[%s6839_s17 + $0x70] sm:$0xff]  ;;  %v6918_v21 = vld [vmem:[%s6839_s17 + $0x68] sm:$0xff] }
  0x16   : > { %6305 = vrot.lane.b32.xlu2 %v6885_v12, %s6796_s18  ;;  %v6904_v17 = vpack.i.bf16 %v6899_v16, %v6896_v15  ;;  %v6912_v19 = vld [vmem:[%s6839_s17 + $0x78] sm:$0xff]  ;;  %v6314_v23 = vpack.i.bf16 %v6918_v21, %v6915_v20  ;;  %v6927_v24 = vld [vmem:[%s6839_s17 + $0x80] sm:$0xff]  ;;  %v6930_v25 = vld [vmem:[%s6839_s17 + $0x88] sm:$0xff] }
  0x17   : > { %v6319_v22 = vpack.i.bf16 %v6912_v19, %v6909_v18  ;;  %v6935_v26 = vpack.i.bf16 %v6930_v25, %v6927_v24  ;;  %v6939_v27 = vld [vmem:[%s6839_s17 + $0xa0] sm:$0xff]  ;;  %v6942_v28 = vld [vmem:[%s6839_s17 + $0xa8] sm:$0xff]  ;;  %v6945_v29 = vld [vmem:[%s6839_s17 + $0x90] sm:$0xff] }
  0x18   : > { %v6948_v30 = vld [vmem:[%s6839_s17 + $0x98] sm:$0xff]  ;;  %v6952_v31 = vpack.i.bf16 %v6942_v28, %v6939_v27  ;;  %v6959_v33 = vld [vmem:[%s6839_s17 + $0xb0] sm:$0xff] }
  0x19   : > { %v6329_v32 = vpack.i.bf16 %v6948_v30, %v6945_v29  ;;  %v6962_v34 = vld [vmem:[%s6839_s17 + $0xb8] sm:$0xff] }
  0x1a   : > { %v6968_v35 = vpack.i.bf16 %v6962_v34, %v6959_v33 }
  0x1c   : > { %6300 = vrot.lane.b32.xlu1 %v6299_v13, %s6796_s18 }
  0x1d   : > { %6290 = vrot.lane.b32.xlu0 %v6893_v14, %s6796_s18 }
  0x1e   : > { %6310 = vrot.lane.b32.xlu2 %v6904_v17, %s6796_s18 }
  0x24   : > { %6320 = vrot.lane.b32.xlu1 %v6319_v22, %s6796_s18 }
  0x25   : > { %6315 = vrot.lane.b32.xlu0 %v6314_v23, %s6796_s18 }
  0x26   : > { %6325 = vrot.lane.b32.xlu2 %v6935_v26, %s6796_s18 }
  0x2c   : > { %6335 = vrot.lane.b32.xlu1 %v6952_v31, %s6796_s18 }
  0x2d   : > { %6330 = vrot.lane.b32.xlu0 %v6329_v32, %s6796_s18 }
  0x2e   : > { %6340 = vrot.lane.b32.xlu2 %v6968_v35, %s6796_s18 }
  0x34   : > { %6350 = vrot.lane.b32.xlu1 %v6893_v14, %s6797_s19 }
  0x35   : > { %6345 = vrot.lane.b32.xlu0 %v6859_v5, %s6797_s19 }
  0x36   : > { %6355 = vrot.lane.b32.xlu2 %v6852_v3, %s6797_s19 }
  0x3c   : > { %6365 = vrot.lane.b32.xlu1 %v6885_v12, %s6797_s19 }
  0x3d   : > { %6360 = vrot.lane.b32.xlu0 %v6299_v13, %s6797_s19 }
  0x3e   : > { %6370 = vrot.lane.b32.xlu2 %v6904_v17, %s6797_s19 }
  0x44   : > { %6380 = vrot.lane.b32.xlu1 %v6319_v22, %s6797_s19 }
  0x45   : > { %6375 = vrot.lane.b32.xlu0 %v6314_v23, %s6797_s19 }
  0x46   : > { %6385 = vrot.lane.b32.xlu2 %v6935_v26, %s6797_s19 }
  0x4c   : > { %6395 = vrot.lane.b32.xlu1 %v6952_v31, %s6797_s19 }
  0x4d   : > { %6390 = vrot.lane.b32.xlu0 %v6329_v32, %s6797_s19 }
  0x4e   : > { %6400 = vrot.lane.b32.xlu2 %v6968_v35, %s6797_s19 }
  0x54   : > { %6410 = vrot.lane.b32.xlu1 %v6893_v14, %s6798_s20 }
  0x55   : > { %6405 = vrot.lane.b32.xlu0 %v6859_v5, %s6798_s20 }
  0x56   : > { %6415 = vrot.lane.b32.xlu2 %v6852_v3, %s6798_s20 }
  0x5c   : > { %6425 = vrot.lane.b32.xlu1 %v6885_v12, %s6798_s20 }
  0x5d   : > { %6420 = vrot.lane.b32.xlu0 %v6299_v13, %s6798_s20 }
  0x5e   : > { %6430 = vrot.lane.b32.xlu2 %v6904_v17, %s6798_s20 }
  0x64   : > { %6440 = vrot.lane.b32.xlu1 %v6319_v22, %s6798_s20 }
  0x65   : > { %6435 = vrot.lane.b32.xlu0 %v6314_v23, %s6798_s20 }
  0x66   : > { %6445 = vrot.lane.b32.xlu2 %v6935_v26, %s6798_s20 }
  0x6c   : > { %6455 = vrot.lane.b32.xlu1 %v6952_v31, %s6798_s20 }
  0x6d   : > { %6450 = vrot.lane.b32.xlu0 %v6329_v32, %s6798_s20 }
  0x6e   : > { %6460 = vrot.lane.b32.xlu2 %v6968_v35, %s6798_s20 }
  0x70   : > { %v6306_v36 = vpop.permute.xlu2 %6305 }
  0x71   : > { %v6308_v41 = vunpack.i.h.bf16 %v6306_v36  ;;  %v6307_v42 = vunpack.i.l.bf16 %v6306_v36 }
  0x73   : > { %v279_v48 = vsel %vm270_vm0, %v6307_v42, %v6308_v41 }
  0x74   : > { %6465 = vrot.lane.b32.xlu1 %v6859_v5, %s6799_s21 }
  0x76   : > { %6470 = vrot.lane.b32.xlu2 %v6893_v14, %s6799_s21 }
  0x78   : > { %v6311_v49 = vpop.permute.xlu2 %6310 }
  0x79   : > { %v6313_v56 = vunpack.i.h.bf16 %v6311_v49  ;;  %v6312_v57 = vunpack.i.l.bf16 %v6311_v49 }
  0x7b   : > { %v280_v5 = vsel %vm270_vm0, %v6308_v41, %v6312_v57 }
  0x7c   : > { %6480 = vrot.lane.b32.xlu1 %v6299_v13, %s6799_s21 }
  0x7e   : > { %6485 = vrot.lane.b32.xlu2 %v6885_v12, %s6799_s21  ;;  %v281_v12 = vsel %vm270_vm0, %v6312_v57, %v6313_v56 }
  0x80   : > { %v6326_v13 = vpop.permute.xlu2 %6325 }
  0x84   : > { %6495 = vrot.lane.b32.xlu1 %v6314_v23, %s6799_s21 }
  0x86   : > { %v6296_v37 = vpop.permute.xlu1 %6295  ;;  %6500 = vrot.lane.b32.xlu2 %v6319_v22, %s6799_s21 }
  0x87   : > { %v6298_v38 = vunpack.i.h.bf16 %v6296_v37  ;;  %v6297_v39 = vunpack.i.l.bf16 %v6296_v37  ;;  %v6286_v40 = vpop.permute.xlu0 %6285 }
  0x88   : > { %v6288_v43 = vunpack.i.h.bf16 %v6286_v40  ;;  %v6287_v44 = vunpack.i.l.bf16 %v6286_v40 }
  0x89   : > { %v275_v47 = vsel %vm270_vm0, %v6297_v39, %v6298_v38 }
  0x8a   : > { %v271_v46 = vsel %vm270_vm0, %v6287_v44, %v6288_v43 }
  0x8b   : > { %337 = vmatpush.msra.mxu0 %v271_v46 }
  0x8c   : > { %6040 = vmatmul.msk.f32.vlgmr.msra.gmra.mxu0 %vm318_vm1, %v7013_v45  ;;  %6510 = vrot.lane.b32.xlu1 %v6329_v32, %s6799_s21 }
  0x8d   : > { %417 = vmatpush.msrb.mxu0 %v275_v47 }
  0x8e   : > { %v6301_v50 = vpop.permute.xlu1 %6300  ;;  %6515 = vrot.lane.b32.xlu2 %v6952_v31, %s6799_s21 }
  0x8f   : > { %497 = vmatpush.msra.mxu0 %v279_v48  ;;  %v6302_v51 = vunpack.i.l.bf16 %v6301_v50  ;;  %v6291_v52 = vpop.permute.xlu0 %6290  ;;  %v6303_v53 = vunpack.i.h.bf16 %v6301_v50 }
  0x90   : > { %v6293_v54 = vunpack.i.h.bf16 %v6291_v52  ;;  %v6292_v55 = vunpack.i.l.bf16 %v6291_v52 }
  0x91   : > { %v276_v61 = vsel %vm270_vm0, %v6298_v38, %v6302_v51  ;;  %v277_v62 = vsel %vm270_vm0, %v6302_v51, %v6303_v53  ;;  %v278_v63 = vsel %vm270_vm0, %v6303_v53, %v6307_v42  ;;  %v6327_v38 = vunpack.i.l.bf16 %v6326_v13 }
  0x92   : > { %v272_v58 = vsel %vm270_vm0, %v6288_v43, %v6292_v55  ;;  %v273_v59 = vsel %vm270_vm0, %v6292_v55, %v6293_v54  ;;  %v274_v60 = vsel %vm270_vm0, %v6293_v54, %v6297_v39  ;;  %v6328_v39 = vunpack.i.h.bf16 %v6326_v13 }
  0x93   : > { %357 = vmatpush.msra.mxu1 %v272_v58  ;;  %377 = vmatpush.msra.mxu2 %v273_v59 }
  0x94   : > { %397 = vmatpush.msra.mxu3 %v274_v60  ;;  %6041 = vmatmul.msk.f32.vlgmr.msra.gmra.mxu1 %vm318_vm1, %v7013_v45  ;;  %v287_v46 = vsel %vm270_vm0, %v6327_v38, %v6328_v39 }
  0x95   : > { %6042 = vmatmul.msk.f32.vlgmr.msra.gmra.mxu2 %vm318_vm1, %v7013_v45  ;;  %6043 = vmatmul.msk.f32.vlgmr.msra.gmra.mxu3 %vm318_vm1, %v7013_v45 }
  0x96   : > { %6044 = vmatmul.msk.f32.vlgmr.msrb.gmra.mxu0 %vm318_vm1, %v7013_v45  ;;  %437 = vmatpush.msrb.mxu1 %v276_v61  ;;  %v6321_v22 = vpop.permute.xlu1 %6320 }
  0x97   : > { %457 = vmatpush.msrb.mxu2 %v277_v62  ;;  %477 = vmatpush.msrb.mxu3 %v278_v63  ;;  %v6316_v23 = vpop.permute.xlu0 %6315  ;;  %v6322_v31 = vunpack.i.l.bf16 %v6321_v22  ;;  %v6323_v37 = vunpack.i.h.bf16 %v6321_v22  ;;  %v7076_v62 = vld [vmem:[%s6839_s17 + $0xc0] sm:$0xff] }
  0x98   : > { %517 = vmatpush.msra.mxu1 %v280_v5  ;;  %v6318_v32 = vunpack.i.h.bf16 %v6316_v23  ;;  %v6317_v36 = vunpack.i.l.bf16 %v6316_v23  ;;  %1990 = vrot.lane.b32.xlu0 %v7076_v62, %s6798_s20  ;;  %v7100_v63 = vld [vmem:[%s8907_s1] sm:$0xff]  ;;  %v7173_v23 = vpack.i.bf16 %v6864_v6, %v6855_v4 }
  0x99   : > { %537 = vmatpush.msra.mxu2 %v281_v12  ;;  %v285_v43 = vsel %vm270_vm0, %v6322_v31, %v6323_v37  ;;  %v286_v44 = vsel %vm270_vm0, %v6323_v37, %v6327_v38  ;;  %2598 = vrot.lane.b32.xlu1 %v7076_v62, %s6799_s21 }
  0x9a   : > { %v282_v40 = vsel %vm270_vm0, %v6313_v56, %v6317_v36  ;;  %v283_v41 = vsel %vm270_vm0, %v6317_v36, %v6318_v32  ;;  %v284_v42 = vsel %vm270_vm0, %v6318_v32, %v6322_v31  ;;  %v6341_v56 = vpop.permute.xlu2 %6340  ;;  %v7177_v31 = vpack.i.bf16 %v6896_v15, %v6845_v1 }
  0x9b   : > { %557 = vmatpush.msra.mxu3 %v282_v40  ;;  %577 = vmatpush.msrb.mxu0 %v283_v41  ;;  %v6342_v58 = vunpack.i.l.bf16 %v6341_v56  ;;  %v6343_v59 = vunpack.i.h.bf16 %v6341_v56 }
  0x9c   : > { %6045 = vmatmul.msk.f32.vlgmr.msrb.gmra.mxu1 %vm318_vm1, %v7013_v45 }
  0x9d   : > { %6046 = vmatmul.msk.f32.vlgmr.msrb.gmra.mxu2 %vm318_vm1, %v7013_v45  ;;  %6047 = vmatmul.msk.f32.vlgmr.msrb.gmra.mxu3 %vm318_vm1, %v7013_v45  ;;  %v293_v61 = vsel %vm270_vm0, %v6342_v58, %v6343_v59 }
  0x9e   : > { %6048 = vmatmul.msk.f32.vlgmr.msra.gmra.mxu0 %vm318_vm1, %v7013_v45  ;;  %597 = vmatpush.msrb.mxu1 %v284_v42  ;;  %v6336_v47 = vpop.permute.xlu1 %6335  ;;  %v7197_v42 = vpack.i.bf16 %v6915_v20, %v6899_v16 }
  0x9f   : > { %617 = vmatpush.msrb.mxu2 %v285_v43  ;;  %637 = vmatpush.msrb.mxu3 %v286_v44  ;;  %v6331_v48 = vpop.permute.xlu0 %6330  ;;  %v6337_v51 = vunpack.i.l.bf16 %v6336_v47  ;;  %v6338_v52 = vunpack.i.h.bf16 %v6336_v47  ;;  %v7202_v43 = vld [vmem:[%s8907_s1 + $0x10] sm:$0xff] }
  0xa0   : > { %v6333_v49 = vunpack.i.h.bf16 %v6331_v48  ;;  %v6332_v50 = vunpack.i.l.bf16 %v6331_v48  ;;  %657 = vmatpush.msra.mxu0 %v287_v46  ;;  %6475 = vrot.lane.b32.xlu0 %v6852_v3, %s6799_s21 }
  0xa1   : > { %v291_v57 = vsel %vm270_vm0, %v6337_v51, %v6338_v52  ;;  %v292_v60 = vsel %vm270_vm0, %v6338_v52, %v6342_v58  ;;  %6535 = vrot.lane.b32.xlu1 %v7173_v23, %s6800_s26 }
  0xa2   : > { %v288_v53 = vsel %vm270_vm0, %v6328_v39, %v6332_v50  ;;  %v289_v54 = vsel %vm270_vm0, %v6332_v50, %v6333_v49  ;;  %v290_v55 = vsel %vm270_vm0, %v6333_v49, %v6337_v51  ;;  %v6356_v12 = vpop.permute.xlu2 %6355 }
  0xa3   : > { %v6357_v22 = vunpack.i.l.bf16 %v6356_v12  ;;  %v6358_v32 = vunpack.i.h.bf16 %v6356_v12 }
  0xa4   : > { %6049 = vmatmul.msk.f32.vlgmr.msra.gmra.mxu1 %vm318_vm1, %v7013_v45 }
  0xa5   : > { %6050 = vmatmul.msk.f32.vlgmr.msra.gmra.mxu2 %vm318_vm1, %v7013_v45  ;;  %6051 = vmatmul.msk.f32.vlgmr.msra.gmra.mxu3 %vm318_vm1, %v7013_v45 }
  0xa6   : > { %6052 = vmatmul.msk.f32.vlgmr.msrb.gmra.mxu0 %vm318_vm1, %v7013_v45  ;;  %677 = vmatpush.msra.mxu1 %v288_v53 }
  0xa7   : > { %697 = vmatpush.msra.mxu2 %v289_v54  ;;  %717 = vmatpush.msra.mxu3 %v290_v55  ;;  %v6346_v3 = vpop.permute.xlu0 %6345 }
  0xa8   : > { %737 = vmatpush.msrb.mxu0 %v291_v57  ;;  %6490 = vrot.lane.b32.xlu0 %v6904_v17, %s6799_s21  ;;  %v6348_v17 = vunpack.i.h.bf16 %v6346_v3  ;;  %v6524_v57 = vpack.i.bf16 %v6878_v10, %v6848_v2 }
  0xa9   : > { %6550 = vrot.lane.b32.xlu1 %v7197_v42, %s6800_s26 }
  0xaa   : > { %v6371_v48 = vpop.permute.xlu2 %6370  ;;  %6525 = vrot.lane.b32.xlu2 %v6524_v57, %s6800_s26 }
  0xab   : > { %v6372_v49 = vunpack.i.l.bf16 %v6371_v48  ;;  %v6373_v50 = vunpack.i.h.bf16 %v6371_v48 }
  0xac   : > { %6053 = vmatmul.msk.f32.vlgmr.msrb.gmra.mxu1 %vm318_vm1, %v7013_v45 }
  0xad   : > { %6054 = vmatmul.msk.f32.vlgmr.msrb.gmra.mxu2 %vm318_vm1, %v7013_v45  ;;  %6055 = vmatmul.msk.f32.vlgmr.msrb.gmra.mxu3 %vm318_vm1, %v7013_v45  ;;  %v1346_v54 = vsel %vm1335_vm2, %v6372_v49, %v6373_v50 }
  0xae   : > { %6056 = vmatmul.msk.f32.vlgmr.msra.gmra.mxu0 %vm318_vm1, %v7013_v45  ;;  %757 = vmatpush.msrb.mxu1 %v292_v60  ;;  %v7232_v60 = vpack.i.bf16 %v6945_v29, %v6918_v21 }
  0xaf   : > { %797 = vmatpush.msrb.mxu3 %v6343_v59  ;;  %777 = vmatpush.msrb.mxu2 %v293_v61  ;;  %v7236_v61 = vpack.i.bf16 %v6927_v24, %v6912_v19 }
  0xb0   : > { %820 = vmatpush.msra.mxu0 %v6848_v2  ;;  %6505 = vrot.lane.b32.xlu0 %v6935_v26, %s6799_s21  ;;  %v6347_v26 = vunpack.i.l.bf16 %v6346_v3 }
  0xb1   : > { %6565 = vrot.lane.b32.xlu1 %v7232_v60, %s6800_s26 }
  0xb2   : > { %v1336_v5 = vsel %vm1335_vm2, %v6347_v26, %v6348_v17  ;;  %v6386_v58 = vpop.permute.xlu2 %6385  ;;  %v7252_v26 = vpack.i.bf16 %v6872_v8, %v6869_v7 }
  0xb3   : > { %v6387_v3 = vunpack.i.l.bf16 %v6386_v58 }
  0xb4   : > { %6057 = vmatmul.msk.f32.vlgmr.msra.gmra.mxu1 %vm318_vm1, %v7013_v45  ;;  %6540 = vrot.lane.b32.xlu2 %v7252_v26, %s6800_s26 }
  0xb5   : > { %6058 = vmatmul.msk.f32.vlgmr.msra.gmra.mxu2 %vm318_vm1, %v7013_v45  ;;  %6059 = vmatmul.msk.f32.vlgmr.msra.gmra.mxu3 %vm318_vm1, %v7013_v45 }
  0xb6   : > { %6060 = vmatmul.msk.f32.vlgmr.msrb.gmra.mxu0 %vm318_vm1, %v7013_v45  ;;  %860 = vmatpush.msra.mxu2 %v6878_v10 }
  0xb7   : > { %840 = vmatpush.msra.mxu1 %v6855_v4  ;;  %900 = vmatpush.msrb.mxu0 %v6842_v0 }
  0xb8   : > { %880 = vmatpush.msra.mxu3 %v6881_v11  ;;  %6520 = vrot.lane.b32.xlu0 %v6968_v35, %s6799_s21  ;;  %v6529_v35 = vpack.i.bf16 %v6842_v0, %v6881_v11 }
  0xbc   : > { %6061 = vmatmul.msk.f32.vlgmr.msrb.gmra.mxu1 %vm318_vm1, %v7013_v45 }
  0xbd   : > { %6062 = vmatmul.msk.f32.vlgmr.msrb.gmra.mxu2 %vm318_vm1, %v7013_v45  ;;  %6063 = vmatmul.msk.f32.vlgmr.msrb.gmra.mxu3 %vm318_vm1, %v7013_v45  ;;  %v6351_v45 = vpop.permute.xlu1 %6350 }
  0xbe   : > { %6064 = vmatmul.msk.f32.vlgmr.msra.gmra.mxu0 %vm318_vm1, %v7100_v63  ;;  %940 = vmatpush.msrb.mxu2 %v6864_v6  ;;  %v6352_v11 = vunpack.i.l.bf16 %v6351_v45  ;;  %v6353_v13 = vunpack.i.h.bf16 %v6351_v45  ;;  %v6361_v6 = vpop.permute.xlu0 %6360 }
  0xbf   : > { %920 = vmatpush.msrb.mxu1 %v6845_v1  ;;  %980 = vmatpush.msra.mxu0 %v6872_v8  ;;  %v6362_v38 = vunpack.i.l.bf16 %v6361_v6  ;;  %v6363_v39 = vunpack.i.h.bf16 %v6361_v6 }
  0xc0   : > { %960 = vmatpush.msrb.mxu3 %v6869_v7  ;;  %6530 = vrot.lane.b32.xlu0 %v6529_v35, %s6800_s26  ;;  %v1337_v36 = vsel %vm1335_vm2, %v6348_v17, %v6352_v11  ;;  %v1338_v37 = vsel %vm1335_vm2, %v6352_v11, %v6353_v13  ;;  %v1339_v4 = vsel %vm1335_vm2, %v6353_v13, %v6357_v22  ;;  %v6388_v17 = vunpack.i.h.bf16 %v6386_v58 }
  0xc1   : > { %v1341_v44 = vsel %vm1335_vm2, %v6358_v32, %v6362_v38  ;;  %v1342_v46 = vsel %vm1335_vm2, %v6362_v38, %v6363_v39 }
  0xc2   : > { %v1352_v45 = vsel %vm1335_vm2, %v6387_v3, %v6388_v17 }
  0xc4   : > { %6065 = vmatmul.msk.f32.vlgmr.msra.gmra.mxu1 %vm318_vm1, %v7100_v63 }
  0xc5   : > { %6066 = vmatmul.msk.f32.vlgmr.msra.gmra.mxu2 %vm318_vm1, %v7100_v63  ;;  %6067 = vmatmul.msk.f32.vlgmr.msra.gmra.mxu3 %vm318_vm1, %v7100_v63  ;;  %v6366_v1 = vpop.permute.xlu1 %6365 }
  0xc6   : > { %6068 = vmatmul.msk.f32.vlgmr.msrb.gmra.mxu0 %vm318_vm1, %v7100_v63  ;;  %1020 = vmatpush.msra.mxu2 %v6896_v15  ;;  %v1340_v15 = vsel %vm1335_vm2, %v6357_v22, %v6358_v32  ;;  %v6367_v40 = vunpack.i.l.bf16 %v6366_v1  ;;  %v6368_v41 = vunpack.i.h.bf16 %v6366_v1  ;;  %v6401_v22 = vpop.permute.xlu2 %6400  ;;  %v7276_v32 = vpack.i.bf16 %v6909_v18, %v6875_v9 }
  0xc7   : > { %1000 = vmatpush.msra.mxu1 %v6875_v9  ;;  %1060 = vmatpush.msrb.mxu0 %v6915_v20  ;;  %v6402_v9 = vunpack.i.l.bf16 %v6401_v22 }
  0xc8   : > { %1040 = vmatpush.msra.mxu3 %v6899_v16  ;;  %6545 = vrot.lane.b32.xlu0 %v7177_v31, %s6800_s26  ;;  %v1343_v47 = vsel %vm1335_vm2, %v6363_v39, %v6367_v40  ;;  %v6376_v16 = vpop.permute.xlu0 %6375  ;;  %v1344_v20 = vsel %vm1335_vm2, %v6367_v40, %v6368_v41  ;;  %v1345_v53 = vsel %vm1335_vm2, %v6368_v41, %v6372_v49 }
  0xc9   : > { %v6377_v51 = vunpack.i.l.bf16 %v6376_v16  ;;  %v6378_v52 = vunpack.i.h.bf16 %v6376_v16  ;;  %6555 = vrot.lane.b32.xlu2 %v7276_v32, %s6800_s26 }
  0xcb   : > { %v1347_v55 = vsel %vm1335_vm2, %v6373_v50, %v6377_v51  ;;  %v1348_v59 = vsel %vm1335_vm2, %v6377_v51, %v6378_v52  ;;  %v7327_v50 = vpack.i.bf16 %v6939_v27, %v6948_v30 }
  0xcc   : > { %6069 = vmatmul.msk.f32.vlgmr.msrb.gmra.mxu1 %vm318_vm1, %v7100_v63 }
  0xcd   : > { %6070 = vmatmul.msk.f32.vlgmr.msrb.gmra.mxu2 %vm318_vm1, %v7100_v63  ;;  %6071 = vmatmul.msk.f32.vlgmr.msrb.gmra.mxu3 %vm318_vm1, %v7100_v63  ;;  %v6381_v56 = vpop.permute.xlu1 %6380 }
  0xce   : > { %6072 = vmatmul.msk.f32.vlgmr.msra.gmra.mxu0 %vm318_vm1, %v7100_v63  ;;  %1100 = vmatpush.msrb.mxu2 %v6909_v18  ;;  %v6382_v10 = vunpack.i.l.bf16 %v6381_v56  ;;  %v6403_v18 = vunpack.i.h.bf16 %v6401_v22  ;;  %v6416_v39 = vpop.permute.xlu2 %6415 }
  0xcf   : > { %1080 = vmatpush.msrb.mxu1 %v6918_v21  ;;  %1140 = vmatpush.msra.mxu0 %v6927_v24  ;;  %v6418_v48 = vunpack.i.h.bf16 %v6416_v39 }
  0xd0   : > { %1120 = vmatpush.msrb.mxu3 %v6912_v19  ;;  %6560 = vrot.lane.b32.xlu0 %v7236_v61, %s6800_s26  ;;  %v1349_v19 = vsel %vm1335_vm2, %v6378_v52, %v6382_v10 }
  0xd1   : > { %6570 = vrot.lane.b32.xlu2 %v7327_v50, %s6800_s26 }
  0xd4   : > { %6073 = vmatmul.msk.f32.vlgmr.msra.gmra.mxu1 %vm318_vm1, %v7100_v63 }
  0xd5   : > { %6074 = vmatmul.msk.f32.vlgmr.msra.gmra.mxu2 %vm318_vm1, %v7100_v63  ;;  %6075 = vmatmul.msk.f32.vlgmr.msra.gmra.mxu3 %vm318_vm1, %v7100_v63  ;;  %v6396_v35 = vpop.permute.xlu1 %6395 }
  0xd6   : > { %6076 = vmatmul.msk.f32.vlgmr.msrb.gmra.mxu0 %vm318_vm1, %v7100_v63  ;;  %1180 = vmatpush.msra.mxu2 %v6945_v29  ;;  %v6391_v29 = vpop.permute.xlu0 %6390  ;;  %v6397_v12 = vunpack.i.l.bf16 %v6396_v35  ;;  %v6398_v11 = vunpack.i.h.bf16 %v6396_v35 }
  0xd7   : > { %1160 = vmatpush.msra.mxu1 %v6930_v25  ;;  %1220 = vmatpush.msrb.mxu0 %v6939_v27  ;;  %v6392_v7 = vunpack.i.l.bf16 %v6391_v29  ;;  %v6393_v8 = vunpack.i.h.bf16 %v6391_v29 }
  0xd8   : > { %1200 = vmatpush.msra.mxu3 %v6948_v30 }
  0xd9   : > { %v1355_v13 = vsel %vm1335_vm2, %v6393_v8, %v6397_v12  ;;  %3200 = vrot.lane.b32.xlu2 %v6942_v28, %s6800_s26 }
  0xdc   : > { %6077 = vmatmul.msk.f32.vlgmr.msrb.gmra.mxu1 %vm318_vm1, %v7100_v63 }
  0xdd   : > { %6078 = vmatmul.msk.f32.vlgmr.msrb.gmra.mxu2 %vm318_vm1, %v7100_v63  ;;  %6079 = vmatmul.msk.f32.vlgmr.msrb.gmra.mxu3 %vm318_vm1, %v7100_v63  ;;  %v6411_v38 = vpop.permute.xlu1 %6410 }
  0xde   : > { %6080 = vmatmul.msk.f32.vlgmr.msra.gmra.mxu0 %vm318_vm1, %v7100_v63  ;;  %1260 = vmatpush.msrb.mxu2 %v6959_v33  ;;  %v6412_v41 = vunpack.i.l.bf16 %v6411_v38 }
  0xdf   : > { %1240 = vmatpush.msrb.mxu1 %v6942_v28  ;;  %1401 = vmatpush.msra.mxu0 %v1336_v5  ;;  %v7261_v5 = vpack.i.bf16 %v6959_v33, %v6930_v25  ;;  %v1353_v25 = vsel %vm1335_vm2, %v6388_v17, %v6392_v7  ;;  %v1354_v33 = vsel %vm1335_vm2, %v6392_v7, %v6393_v8  ;;  %v6431_v17 = vpop.permute.xlu2 %6430 }
  0xe0   : > { %1280 = vmatpush.msrb.mxu3 %v6962_v34 }
  0xe1   : > { %6575 = vrot.lane.b32.xlu0 %v7261_v5, %s6800_s26  ;;  %6595 = vrot.lane.b32.xlu2 %v7173_v23, %s6801_s29 }
  0xe4   : > { %6081 = vmatmul.msk.f32.vlgmr.msra.gmra.mxu1 %vm318_vm1, %v7100_v63 }
  0xe5   : > { %6082 = vmatmul.msk.f32.vlgmr.msra.gmra.mxu2 %vm318_vm1, %v7100_v63  ;;  %6083 = vmatmul.msk.f32.vlgmr.msra.gmra.mxu3 %vm318_vm1, %v7100_v63  ;;  %v6426_v51 = vpop.permute.xlu1 %6425 }
  0xe6   : > { %6084 = vmatmul.msk.f32.vlgmr.msrb.gmra.mxu0 %vm318_vm1, %v7100_v63  ;;  %1421 = vmatpush.msra.mxu1 %v1337_v36  ;;  %v1356_v36 = vsel %vm1335_vm2, %v6397_v12, %v6398_v11  ;;  %v6428_v57 = vunpack.i.h.bf16 %v6426_v51 }
  0xe7   : > { %1441 = vmatpush.msra.mxu2 %v1338_v37  ;;  %1461 = vmatpush.msra.mxu3 %v1339_v4  ;;  %v7285_v37 = vpack.i.bf16 %v7076_v62, %v6962_v34  ;;  %v6406_v4 = vpop.permute.xlu0 %6405  ;;  %v1357_v34 = vsel %vm1335_vm2, %v6398_v11, %v6402_v9  ;;  %v1358_v62 = vsel %vm1335_vm2, %v6402_v9, %v6403_v18  ;;  %v6446_v22 = vpop.permute.xlu2 %6445 }
  0xe8   : > { %1481 = vmatpush.msrb.mxu0 %v1340_v15  ;;  %v6408_v1 = vunpack.i.h.bf16 %v6406_v4  ;;  %v6407_v15 = vunpack.i.l.bf16 %v6406_v4 }
  0xe9   : > { %6580 = vrot.lane.b32.xlu1 %v7285_v37, %s6800_s26  ;;  %6585 = vrot.lane.b32.xlu0 %v6893_v14, %s6801_s29  ;;  %v7308_v14 = vpack.i.bf16 %v6848_v2, %v6842_v0 }
  0xea   : > { %v1993_v40 = vsel %vm1992_vm3, %v6407_v15, %v6408_v1  ;;  %v1994_v2 = vsel %vm1992_vm3, %v6408_v1, %v6412_v41  ;;  %v6447_v15 = vunpack.i.l.bf16 %v6446_v22  ;;  %6610 = vrot.lane.b32.xlu2 %v7197_v42, %s6801_s29 }
  0xec   : > { %6085 = vmatmul.msk.f32.vlgmr.msrb.gmra.mxu1 %vm318_vm1, %v7100_v63 }
  0xed   : > { %6086 = vmatmul.msk.f32.vlgmr.msrb.gmra.mxu2 %vm318_vm1, %v7100_v63  ;;  %6087 = vmatmul.msk.f32.vlgmr.msrb.gmra.mxu3 %vm318_vm1, %v7100_v63  ;;  %v6383_v63 = vunpack.i.h.bf16 %v6381_v56 }
  0xee   : > { %6089 = vmatmul.msk.f32.vlgmr.msra.gmra.mxu0 %vm318_vm1, %v7202_v43  ;;  %1501 = vmatpush.msrb.mxu1 %v1341_v44  ;;  %v6413_v44 = vunpack.i.h.bf16 %v6411_v38 }
  0xef   : > { %1521 = vmatpush.msrb.mxu2 %v1342_v46  ;;  %1541 = vmatpush.msrb.mxu3 %v1343_v47  ;;  %v1350_v21 = vsel %vm1335_vm2, %v6382_v10, %v6383_v63  ;;  %v1351_v24 = vsel %vm1335_vm2, %v6383_v63, %v6387_v3  ;;  %v6417_v46 = vunpack.i.l.bf16 %v6416_v39  ;;  %v6421_v49 = vpop.permute.xlu0 %6420 }
  0xf0   : > { %1561 = vmatpush.msra.mxu0 %v1344_v20  ;;  %v1995_v16 = vsel %vm1992_vm3, %v6412_v41, %v6413_v44  ;;  %v6423_v30 = vunpack.i.h.bf16 %v6421_v49 }
  0xf1   : > { %6590 = vrot.lane.b32.xlu1 %v7308_v14, %s6801_s29  ;;  %6600 = vrot.lane.b32.xlu0 %v7252_v26, %s6801_s29  ;;  %v1996_v20 = vsel %vm1992_vm3, %v6413_v44, %v6417_v46  ;;  %v1997_v52 = vsel %vm1992_vm3, %v6417_v46, %v6418_v48 }
  0xf2   : > { %6625 = vrot.lane.b32.xlu2 %v7232_v60, %s6801_s29 }
  0xf4   : > { %6090 = vmatmul.msk.f32.vlgmr.msra.gmra.mxu1 %vm318_vm1, %v7202_v43 }
  0xf5   : > { %6091 = vmatmul.msk.f32.vlgmr.msra.gmra.mxu2 %vm318_vm1, %v7202_v43  ;;  %6092 = vmatmul.msk.f32.vlgmr.msra.gmra.mxu3 %vm318_vm1, %v7202_v43 }
  0xf6   : > { %6093 = vmatmul.msk.f32.vlgmr.msrb.gmra.mxu0 %vm318_vm1, %v7202_v43  ;;  %1581 = vmatpush.msra.mxu1 %v1345_v53  ;;  %v6422_v53 = vunpack.i.l.bf16 %v6421_v49 }
  0xf7   : > { %1601 = vmatpush.msra.mxu2 %v1346_v54  ;;  %1621 = vmatpush.msra.mxu3 %v1347_v55  ;;  %v6427_v55 = vunpack.i.l.bf16 %v6426_v51 }
  0xf8   : > { %1641 = vmatpush.msrb.mxu0 %v1348_v59  ;;  %v7353_v59 = vld [vmem:[%s8907_s1 + $0x18] sm:$0xff]  ;;  %v1998_v10 = vsel %vm1992_vm3, %v6418_v48, %v6422_v53  ;;  %v1999_v63 = vsel %vm1992_vm3, %v6422_v53, %v6423_v30  ;;  %v6461_v53 = vpop.permute.xlu2 %6460 }
  0xf9   : > { %6605 = vrot.lane.b32.xlu1 %v7177_v31, %s6801_s29  ;;  %6615 = vrot.lane.b32.xlu0 %v7276_v32, %s6801_s29  ;;  %v2000_v3 = vsel %vm1992_vm3, %v6423_v30, %v6427_v55 }
  0xfa   : > { %6640 = vrot.lane.b32.xlu2 %v7285_v37, %s6801_s29 }
  0xfc   : > { %6094 = vmatmul.msk.f32.vlgmr.msrb.gmra.mxu1 %vm318_vm1, %v7202_v43 }
  0xfd   : > { %6095 = vmatmul.msk.f32.vlgmr.msrb.gmra.mxu2 %vm318_vm1, %v7202_v43  ;;  %6096 = vmatmul.msk.f32.vlgmr.msrb.gmra.mxu3 %vm318_vm1, %v7202_v43 }
  0xfe   : > { %6097 = vmatmul.msk.f32.vlgmr.msra.gmra.mxu0 %vm318_vm1, %v7202_v43  ;;  %1661 = vmatpush.msrb.mxu1 %v1349_v19  ;;  %v6436_v19 = vpop.permute.xlu0 %6435 }
  0xff   : > { %1681 = vmatpush.msrb.mxu2 %v1350_v21  ;;  %1701 = vmatpush.msrb.mxu3 %v1351_v24  ;;  %v2001_v21 = vsel %vm1992_vm3, %v6427_v55, %v6428_v57  ;;  %v6432_v24 = vunpack.i.l.bf16 %v6431_v17  ;;  %v6437_v7 = vunpack.i.l.bf16 %v6436_v19  ;;  %v6438_v8 = vunpack.i.h.bf16 %v6436_v19 }
 0x100   : > { %1721 = vmatpush.msra.mxu0 %v1352_v45  ;;  %v6433_v45 = vunpack.i.h.bf16 %v6431_v17  ;;  %v6462_v17 = vunpack.i.l.bf16 %v6461_v53 }
 0x101   : > { %6620 = vrot.lane.b32.xlu1 %v7236_v61, %s6801_s29  ;;  %6630 = vrot.lane.b32.xlu0 %v7327_v50, %s6801_s29  ;;  %v2002_v11 = vsel %vm1992_vm3, %v6428_v57, %v6432_v24 }
 0x102   : > { %6650 = vrot.lane.b32.xlu2 %v7308_v14, %s6802_s5 }
 0x104   : > { %6098 = vmatmul.msk.f32.vlgmr.msra.gmra.mxu1 %vm318_vm1, %v7202_v43 }
 0x105   : > { %6099 = vmatmul.msk.f32.vlgmr.msra.gmra.mxu2 %vm318_vm1, %v7202_v43  ;;  %6100 = vmatmul.msk.f32.vlgmr.msra.gmra.mxu3 %vm318_vm1, %v7202_v43 }
 0x106   : > { %6101 = vmatmul.msk.f32.vlgmr.msrb.gmra.mxu0 %vm318_vm1, %v7202_v43  ;;  %1741 = vmatpush.msra.mxu1 %v1353_v25  ;;  %v2003_v25 = vsel %vm1992_vm3, %v6432_v24, %v6433_v45  ;;  %v6463_v24 = vunpack.i.h.bf16 %v6461_v53 }
 0x107   : > { %1761 = vmatpush.msra.mxu2 %v1354_v33  ;;  %1781 = vmatpush.msra.mxu3 %v1355_v13  ;;  %v2004_v33 = vsel %vm1992_vm3, %v6433_v45, %v6437_v7  ;;  %v6441_v13 = vpop.permute.xlu1 %6440 }
 0x108   : > { %1801 = vmatpush.msrb.mxu0 %v1356_v36  ;;  %v2005_v36 = vsel %vm1992_vm3, %v6437_v7, %v6438_v8  ;;  %v6442_v4 = vunpack.i.l.bf16 %v6441_v13  ;;  %v6443_v1 = vunpack.i.h.bf16 %v6441_v13  ;;  %v2015_v13 = vsel %vm1992_vm3, %v6462_v17, %v6463_v24 }
 0x109   : > { %v7291_v6 = vpop.f32.mrf.mxu0  ;;  %6635 = vrot.lane.b32.xlu1 %v7261_v5, %s6801_s29  ;;  %3808 = vrot.lane.b32.xlu0 %v6942_v28, %s6801_s29 }
 0x10a   : > { %v2006_v39 = vsel %vm1992_vm3, %v6438_v8, %v6442_v4  ;;  %v2007_v41 = vsel %vm1992_vm3, %v6442_v4, %v6443_v1  ;;  %v2008_v44 = vsel %vm1992_vm3, %v6443_v1, %v6447_v15  ;;  %v6766_v4 = vld [vmem:[%s6839_s17 + $0x18] sm:$0xff]  ;;  %6665 = vrot.lane.b32.xlu2 %v7177_v31, %s6802_s5 }
 0x10c   : > { %6102 = vmatmul.msk.f32.vlgmr.msrb.gmra.mxu1 %vm318_vm1, %v7202_v43 }
 0x10d   : > { %6103 = vmatmul.msk.f32.vlgmr.msrb.gmra.mxu2 %vm318_vm1, %v7202_v43  ;;  %6104 = vmatmul.msk.f32.vlgmr.msrb.gmra.mxu3 %vm318_vm1, %v7202_v43 }
 0x10e   : > { %6105 = vmatmul.msk.f32.vlgmr.msra.gmra.mxu0 %vm318_vm1, %v7202_v43  ;;  %1821 = vmatpush.msrb.mxu1 %v1357_v34 }
 0x10f   : > { %1861 = vmatpush.msrb.mxu3 %v6403_v18  ;;  %1841 = vmatpush.msrb.mxu2 %v1358_v62  ;;  %v6448_v62 = vunpack.i.h.bf16 %v6446_v22  ;;  %v6456_v46 = vpop.permute.xlu1 %6455  ;;  %v6471_v22 = vpop.permute.xlu2 %6470 }
 0x110   : > { %2059 = vmatpush.msra.mxu0 %v1993_v40  ;;  %v6451_v40 = vpop.permute.xlu0 %6450  ;;  %v6457_v49 = vunpack.i.l.bf16 %v6456_v46 }
 0x111   : > { %v7312_v47 = vpop.f32.mrf.mxu1  ;;  %v2009_v28 = vsel %vm1992_vm3, %v6447_v15, %v6448_v62  ;;  %v6452_v48 = vunpack.i.l.bf16 %v6451_v40  ;;  %6655 = vrot.lane.b32.xlu0 %v7173_v23, %s6802_s5 }
 0x112   : > { %6680 = vrot.lane.b32.xlu2 %v7236_v61, %s6802_s5 }
 0x113   : > { %v7318_v0 = vpop.f32.mrf.mxu0  ;;  %v2010_v55 = vsel %vm1992_vm3, %v6448_v62, %v6452_v48  ;;  %v6472_v62 = vunpack.i.l.bf16 %v6471_v22 }
 0x114   : > { %6106 = vmatmul.msk.f32.vlgmr.msra.gmra.mxu1 %vm318_vm1, %v7202_v43 }
 0x115   : > { %6107 = vmatmul.msk.f32.vlgmr.msra.gmra.mxu2 %vm318_vm1, %v7202_v43  ;;  %6108 = vmatmul.msk.f32.vlgmr.msra.gmra.mxu3 %vm318_vm1, %v7202_v43 }
 0x116   : > { %6109 = vmatmul.msk.f32.vlgmr.msrb.gmra.mxu0 %vm318_vm1, %v7202_v43  ;;  %2079 = vmatpush.msra.mxu1 %v1994_v2 }
 0x117   : > { %2099 = vmatpush.msra.mxu2 %v1995_v16  ;;  %2119 = vmatpush.msra.mxu3 %v1996_v20  ;;  %v6453_v20 = vunpack.i.h.bf16 %v6451_v40 }
 0x118   : > { %v7336_v54 = vpop.f32.mrf.mxu2  ;;  %v7338_v27 = vpop.f32.mrf.mxu3  ;;  %2139 = vmatpush.msrb.mxu0 %v1997_v52  ;;  %v6458_v52 = vunpack.i.h.bf16 %v6456_v46 }
 0x119   : > { %v7342_v56 = vpop.f32.mrf.mxu1  ;;  %v1991_v57 = vpop.permute.xlu0 %1990  ;;  %6670 = vrot.lane.b32.xlu0 %v7197_v42, %s6802_s5 }
 0x11a   : > { %v2013_v23 = vsel %vm1992_vm3, %v6457_v49, %v6458_v52  ;;  %6695 = vrot.lane.b32.xlu2 %v7261_v5, %s6802_s5 }
 0x11b   : > { %v7348_v58 = vpop.f32.mrf.mxu0 }
 0x11c   : > { %6110 = vmatmul.msk.f32.vlgmr.msrb.gmra.mxu1 %vm318_vm1, %v7202_v43 }
 0x11d   : > { %6111 = vmatmul.msk.f32.vlgmr.msrb.gmra.mxu2 %vm318_vm1, %v7202_v43  ;;  %6112 = vmatmul.msk.f32.vlgmr.msrb.gmra.mxu3 %vm318_vm1, %v7202_v43 }
 0x11e   : > { %6114 = vmatmul.msk.f32.vlgmr.msra.gmra.mxu0 %vm318_vm1, %v7353_v59  ;;  %2159 = vmatpush.msrb.mxu1 %v1998_v10  ;;  %v2011_v10 = vsel %vm1992_vm3, %v6452_v48, %v6453_v20 }
 0x11f   : > { %2179 = vmatpush.msrb.mxu2 %v1999_v63  ;;  %2199 = vmatpush.msrb.mxu3 %v2000_v3  ;;  %v2012_v63 = vsel %vm1992_vm3, %v6453_v20, %v6457_v49  ;;  %v6466_v3 = vpop.permute.xlu1 %6465 }
 0x120   : > { %v7367_v29 = vpop.f32.mrf.mxu2  ;;  %v7369_v35 = vpop.f32.mrf.mxu3  ;;  %2219 = vmatpush.msra.mxu0 %v2001_v21  ;;  %v6468_v7 = vunpack.i.h.bf16 %v6466_v3  ;;  %v6467_v8 = vunpack.i.l.bf16 %v6466_v3 }
 0x121   : > { %v7373_v43 = vpop.f32.mrf.mxu1  ;;  %v6476_v42 = vpop.permute.xlu0 %6475  ;;  %6685 = vrot.lane.b32.xlu0 %v7232_v60, %s6802_s5 }
 0x122   : > { %v2601_v15 = vsel %vm2600_vm4, %v6467_v8, %v6468_v7  ;;  %v6477_v46 = vunpack.i.l.bf16 %v6476_v42  ;;  %v6478_v48 = vunpack.i.h.bf16 %v6476_v42  ;;  %v2602_v49 = vsel %vm2600_vm4, %v6468_v7, %v6472_v62 }
 0x123   : > { %v7379_v12 = vpop.f32.mrf.mxu0 }
 0x124   : > { %6115 = vmatmul.msk.f32.vlgmr.msra.gmra.mxu1 %vm318_vm1, %v7353_v59  ;;  %v2605_v60 = vsel %vm2600_vm4, %v6477_v46, %v6478_v48 }
 0x125   : > { %6116 = vmatmul.msk.f32.vlgmr.msra.gmra.mxu2 %vm318_vm1, %v7353_v59  ;;  %6117 = vmatmul.msk.f32.vlgmr.msra.gmra.mxu3 %vm318_vm1, %v7353_v59 }
 0x126   : > { %6118 = vmatmul.msk.f32.vlgmr.msrb.gmra.mxu0 %vm318_vm1, %v7353_v59  ;;  %2239 = vmatpush.msra.mxu1 %v2002_v11 }
 0x127   : > { %2259 = vmatpush.msra.mxu2 %v2003_v25  ;;  %2279 = vmatpush.msra.mxu3 %v2004_v33  ;;  %v2014_v25 = vsel %vm1992_vm3, %v6458_v52, %v6462_v17  ;;  %v2016_v33 = vsel %vm1992_vm3, %v6463_v24, %v1991_v57 }
 0x128   : > { %v7393_v9 = vpop.f32.mrf.mxu2  ;;  %v7395_v18 = vpop.f32.mrf.mxu3  ;;  %2299 = vmatpush.msrb.mxu0 %v2005_v36  ;;  %v6765_v36 = vld [vmem:[%s6839_s17 + $0x10] sm:$0xff] }
 0x129   : > { %v7399_v34 = vpop.f32.mrf.mxu1  ;;  %v7462_v1 = vpack.i.bf16 %v6766_v4, %v6765_v36  ;;  %v6491_v57 = vpop.permute.xlu0 %6490  ;;  %6700 = vrot.lane.b32.xlu0 %v7285_v37, %s6802_s5 }
 0x12a   : > { %8910 = vst [vmem:[#allocation2_spill] sm:$0xff] %v7399_v34  ;;  %v6492_v4 = vunpack.i.l.bf16 %v6491_v57 }
 0x12b   : > { %v7405_v38 = vpop.f32.mrf.mxu0  ;;  %6645 = vrot.lane.b32.xlu1 %v7462_v1, %s6802_s5  ;;  %6705 = vrot.lane.b32.xlu2 %v7462_v1, %s6803_s8 }
 0x12c   : > { %8911 = vst [vmem:[#allocation3_spill] sm:$0xff] %v7405_v38  ;;  %6119 = vmatmul.msk.f32.vlgmr.msrb.gmra.mxu1 %vm318_vm1, %v7353_v59 }
 0x12d   : > { %6120 = vmatmul.msk.f32.vlgmr.msrb.gmra.mxu2 %vm318_vm1, %v7353_v59  ;;  %6121 = vmatmul.msk.f32.vlgmr.msrb.gmra.mxu3 %vm318_vm1, %v7353_v59 }
 0x12e   : > { %6122 = vmatmul.msk.f32.vlgmr.msra.gmra.mxu0 %vm318_vm1, %v7353_v59  ;;  %2319 = vmatpush.msrb.mxu1 %v2006_v39  ;;  %v6481_v39 = vpop.permute.xlu1 %6480 }
 0x12f   : > { %2339 = vmatpush.msrb.mxu2 %v2007_v41  ;;  %2359 = vmatpush.msrb.mxu3 %v2008_v44  ;;  %v6473_v44 = vunpack.i.h.bf16 %v6471_v22  ;;  %v6483_v17 = vunpack.i.h.bf16 %v6481_v39 }
 0x130   : > { %v7419_v2 = vpop.f32.mrf.mxu2  ;;  %v7421_v16 = vpop.f32.mrf.mxu3  ;;  %2379 = vmatpush.msra.mxu0 %v2009_v28 }
 0x131   : > { %v7425_v51 = vpop.f32.mrf.mxu1  ;;  %v2603_v52 = vsel %vm2600_vm4, %v6472_v62, %v6473_v44  ;;  %v2604_v53 = vsel %vm2600_vm4, %v6473_v44, %v6477_v46  ;;  %v7532_v42 = vpop.permute.xlu0 %6505  ;;  %6710 = vrot.lane.b32.xlu0 %v7308_v14, %s6803_s8 }
 0x132   : > { %8912 = vst [vmem:[#allocation4_spill] sm:$0xff] %v7425_v51 }
 0x133   : > { %v7429_v30 = vpop.f32.mrf.mxu0  ;;  %6660 = vrot.lane.b32.xlu1 %v7252_v26, %s6802_s5  ;;  %v7518_v26 = vld [vmem:[%s8907_s1 + $0x20] sm:$0xff] }
 0x134   : > { %8913 = vst [vmem:[#allocation5_spill] sm:$0xff] %v7429_v30  ;;  %6123 = vmatmul.msk.f32.vlgmr.msra.gmra.mxu1 %vm318_vm1, %v7353_v59 }
 0x135   : > { %6124 = vmatmul.msk.f32.vlgmr.msra.gmra.mxu2 %vm318_vm1, %v7353_v59  ;;  %6125 = vmatmul.msk.f32.vlgmr.msra.gmra.mxu3 %vm318_vm1, %v7353_v59 }
 0x136   : > { %6126 = vmatmul.msk.f32.vlgmr.msrb.gmra.mxu0 %vm318_vm1, %v7353_v59  ;;  %2399 = vmatpush.msra.mxu1 %v2010_v55  ;;  %v6486_v55 = vpop.permute.xlu2 %6485 }
 0x137   : > { %2419 = vmatpush.msra.mxu2 %v2011_v10  ;;  %2439 = vmatpush.msra.mxu3 %v2012_v63  ;;  %v6482_v10 = vunpack.i.l.bf16 %v6481_v39  ;;  %v7497_v63 = vpop.permute.xlu1 %6495  ;;  %v6487_v24 = vunpack.i.l.bf16 %v6486_v55  ;;  %v6493_v39 = vunpack.i.h.bf16 %v6491_v57 }
 0x138   : > { %v7443_v19 = vpop.f32.mrf.mxu2  ;;  %v7445_v21 = vpop.f32.mrf.mxu3  ;;  %2459 = vmatpush.msrb.mxu0 %v2013_v23  ;;  %v6497_v44 = vunpack.i.l.bf16 %v7497_v63 }
 0x139   : > { %v7449_v45 = vpop.f32.mrf.mxu1  ;;  %v2608_v22 = vsel %vm2600_vm4, %v6483_v17, %v6487_v24 }
 0x13a   : > { %8914 = vst [vmem:[#allocation6_spill] sm:$0xff] %v7449_v45  ;;  %v6778_v45 = vld [vmem:[%s6839_s17 + $0x78] sm:$0xff] }
 0x13b   : > { %v7453_v11 = vpop.f32.mrf.mxu0  ;;  %6675 = vrot.lane.b32.xlu1 %v7276_v32, %s6802_s5 }
 0x13c   : > { %6127 = vmatmul.msk.f32.vlgmr.msrb.gmra.mxu1 %vm318_vm1, %v7353_v59 }
 0x13d   : > { %6128 = vmatmul.msk.f32.vlgmr.msrb.gmra.mxu2 %vm318_vm1, %v7353_v59  ;;  %6129 = vmatmul.msk.f32.vlgmr.msrb.gmra.mxu3 %vm318_vm1, %v7353_v59 }
 0x13e   : > { %6130 = vmatmul.msk.f32.vlgmr.msra.gmra.mxu0 %vm318_vm1, %v7353_v59  ;;  %2479 = vmatpush.msrb.mxu1 %v2014_v25  ;;  %v6501_v36 = vpop.permute.xlu2 %6500 }
 0x13f   : > { %2499 = vmatpush.msrb.mxu2 %v2015_v13  ;;  %2519 = vmatpush.msrb.mxu3 %v2016_v33  ;;  %v6488_v33 = vunpack.i.h.bf16 %v6486_v55  ;;  %v6502_v14 = vunpack.i.l.bf16 %v6501_v36 }
 0x140   : > { %v7471_v40 = vpop.f32.mrf.mxu2  ;;  %v7473_v41 = vpop.f32.mrf.mxu3  ;;  %2667 = vmatpush.msra.mxu0 %v2601_v15 }
 0x141   : > { %v7477_v28 = vpop.f32.mrf.mxu1  ;;  %v2609_v37 = vsel %vm2600_vm4, %v6487_v24, %v6488_v33  ;;  %v2610_v32 = vsel %vm2600_vm4, %v6488_v33, %v6492_v4  ;;  %v6508_v24 = vunpack.i.h.bf16 %v7532_v42  ;;  %v6521_v33 = vpop.permute.xlu0 %6520 }
 0x143   : > { %v7483_v20 = vpop.f32.mrf.mxu0  ;;  %6690 = vrot.lane.b32.xlu1 %v7327_v50, %s6802_s5 }
 0x144   : > { %6131 = vmatmul.msk.f32.vlgmr.msra.gmra.mxu1 %vm318_vm1, %v7353_v59 }
 0x145   : > { %6132 = vmatmul.msk.f32.vlgmr.msra.gmra.mxu2 %vm318_vm1, %v7353_v59  ;;  %6133 = vmatmul.msk.f32.vlgmr.msra.gmra.mxu3 %vm318_vm1, %v7353_v59 }
 0x146   : > { %6134 = vmatmul.msk.f32.vlgmr.msrb.gmra.mxu0 %vm318_vm1, %v7353_v59  ;;  %2687 = vmatpush.msra.mxu1 %v2602_v49  ;;  %v6498_v49 = vunpack.i.h.bf16 %v7497_v63  ;;  %v7564_v55 = vpop.permute.xlu2 %6515  ;;  %v6507_v63 = vunpack.i.l.bf16 %v7532_v42 }
 0x147   : > { %2707 = vmatpush.msra.mxu2 %v2603_v52  ;;  %2727 = vmatpush.msra.mxu3 %v2604_v53  ;;  %v6511_v52 = vpop.permute.xlu1 %6510  ;;  %v6517_v42 = vunpack.i.l.bf16 %v7564_v55 }
 0x148   : > { %v862_v23 = vpop.f32.mrf.mxu2  ;;  %v882_v3 = vpop.f32.mrf.mxu3  ;;  %2747 = vmatpush.msrb.mxu0 %v2605_v60  ;;  %v2613_v31 = vsel %vm2600_vm4, %v6497_v44, %v6498_v49  ;;  %v2617_v61 = vsel %vm2600_vm4, %v6507_v63, %v6508_v24 }
 0x149   : > { %v7502_v7 = vadd.f32 %v862_v23, %v7336_v54  ;;  %v7505_v8 = vadd.f32 %v882_v3, %v7338_v27  ;;  %v7507_v25 = vpop.f32.mrf.mxu1  ;;  %v2606_v54 = vsel %vm2600_vm4, %v6478_v48, %v6482_v10  ;;  %v2607_v27 = vsel %vm2600_vm4, %v6482_v10, %v6483_v17 }
 0x14a   : > { %v6503_v10 = vunpack.i.h.bf16 %v6501_v36 }
 0x14b   : > { %v7513_v13 = vpop.f32.mrf.mxu0 }
 0x14c   : > { %6135 = vmatmul.msk.f32.vlgmr.msrb.gmra.mxu1 %vm318_vm1, %v7353_v59  ;;  %v2615_v50 = vsel %vm2600_vm4, %v6502_v14, %v6503_v10 }
 0x14d   : > { %6136 = vmatmul.msk.f32.vlgmr.msrb.gmra.mxu2 %vm318_vm1, %v7353_v59  ;;  %6137 = vmatmul.msk.f32.vlgmr.msrb.gmra.mxu3 %vm318_vm1, %v7353_v59 }
 0x14e   : > { %6139 = vmatmul.msk.f32.vlgmr.msra.gmra.mxu0 %vm318_vm1, %v7518_v26  ;;  %2767 = vmatpush.msrb.mxu1 %v2606_v54 }
 0x14f   : > { %2787 = vmatpush.msrb.mxu2 %v2607_v27  ;;  %2807 = vmatpush.msrb.mxu3 %v2608_v22  ;;  %v2614_v27 = vsel %vm2600_vm4, %v6498_v49, %v6502_v14  ;;  %v6512_v22 = vunpack.i.l.bf16 %v6511_v52  ;;  %v6518_v49 = vunpack.i.h.bf16 %v7564_v55  ;;  %v6523_v14 = vunpack.i.h.bf16 %v6521_v33 }
 0x150   : > { %v942_v15 = vpop.f32.mrf.mxu2  ;;  %v962_v62 = vpop.f32.mrf.mxu3  ;;  %2827 = vmatpush.msra.mxu0 %v2609_v37  ;;  %v6522_v55 = vunpack.i.l.bf16 %v6521_v33 }
 0x151   : > { %v7538_v59 = vadd.f32 %v942_v15, %v7367_v29  ;;  %v7541_v46 = vadd.f32 %v962_v62, %v7369_v35  ;;  %v7543_v48 = vpop.f32.mrf.mxu1  ;;  %v2611_v29 = vsel %vm2600_vm4, %v6492_v4, %v6493_v39  ;;  %v2612_v35 = vsel %vm2600_vm4, %v6493_v39, %v6497_v44  ;;  %v7596_v15 = vld [vmem:[%s6839_s17 + $0xa8] sm:$0xff] }
 0x152   : > { %v6513_v4 = vunpack.i.h.bf16 %v6511_v52  ;;  %4416 = vrot.lane.b32.xlu1 %v7596_v15, %s6802_s5  ;;  %v6526_v52 = vpop.permute.xlu2 %6525  ;;  %v2621_v5 = vsel %vm2600_vm4, %v6517_v42, %v6518_v49 }
 0x153   : > { %v7550_v53 = vpop.f32.mrf.mxu0 }
 0x154   : > { %6140 = vmatmul.msk.f32.vlgmr.msra.gmra.mxu1 %vm318_vm1, %v7518_v26 }
 0x155   : > { %6141 = vmatmul.msk.f32.vlgmr.msra.gmra.mxu2 %vm318_vm1, %v7518_v26  ;;  %6142 = vmatmul.msk.f32.vlgmr.msra.gmra.mxu3 %vm318_vm1, %v7518_v26 }
 0x156   : > { %6143 = vmatmul.msk.f32.vlgmr.msrb.gmra.mxu0 %vm318_vm1, %v7518_v26  ;;  %2847 = vmatpush.msra.mxu1 %v2610_v32 }
 0x157   : > { %2867 = vmatpush.msra.mxu2 %v2611_v29  ;;  %2887 = vmatpush.msra.mxu3 %v2612_v35  ;;  %v2618_v29 = vsel %vm2600_vm4, %v6508_v24, %v6512_v22  ;;  %v6531_v35 = vpop.permute.xlu0 %6530 }
 0x158   : > { %v1022_v60 = vpop.f32.mrf.mxu2  ;;  %v1042_v57 = vpop.f32.mrf.mxu3  ;;  %2907 = vmatpush.msrb.mxu0 %v2613_v31 }
 0x159   : > { %v7570_v23 = vadd.f32 %v1022_v60, %v7393_v9  ;;  %v7573_v3 = vadd.f32 %v1042_v57, %v7395_v18  ;;  %v7575_v17 = vpop.f32.mrf.mxu1  ;;  %v2616_v9 = vsel %vm2600_vm4, %v6503_v10, %v6507_v63  ;;  %v2599_v18 = vpop.permute.xlu1 %2598 }
 0x15a   : > { %8915 = vst [vmem:[#allocation7_spill] sm:$0xff] %v7575_v17  ;;  %v2624_v33 = vsel %vm2600_vm4, %v6523_v14, %v2599_v18 }
 0x15b   : > { %v7580_v54 = vpop.f32.mrf.mxu0 }
 0x15c   : > { %8916 = vst [vmem:[#allocation8_spill] sm:$0xff] %v7580_v54  ;;  %6144 = vmatmul.msk.f32.vlgmr.msrb.gmra.mxu1 %vm318_vm1, %v7518_v26 }
 0x15d   : > { %6145 = vmatmul.msk.f32.vlgmr.msrb.gmra.mxu2 %vm318_vm1, %v7518_v26  ;;  %6146 = vmatmul.msk.f32.vlgmr.msrb.gmra.mxu3 %vm318_vm1, %v7518_v26 }
 0x15e   : > { %6147 = vmatmul.msk.f32.vlgmr.msra.gmra.mxu0 %vm318_vm1, %v7518_v26  ;;  %2927 = vmatpush.msrb.mxu1 %v2614_v27  ;;  %v6527_v27 = vunpack.i.l.bf16 %v6526_v52 }
 0x15f   : > { %2947 = vmatpush.msrb.mxu2 %v2615_v50  ;;  %2967 = vmatpush.msrb.mxu3 %v2616_v9  ;;  %v7652_v18 = vpop.permute.xlu0 %6545 }
 0x160   : > { %v1102_v37 = vpop.f32.mrf.mxu2  ;;  %v1122_v36 = vpop.f32.mrf.mxu3  ;;  %2987 = vmatpush.msra.mxu0 %v2617_v61 }
 0x161   : > { %v7601_v62 = vadd.f32 %v1102_v37, %v7419_v2  ;;  %v7604_v39 = vadd.f32 %v1122_v36, %v7421_v16  ;;  %v7606_v44 = vpop.f32.mrf.mxu1  ;;  %v2619_v2 = vsel %vm2600_vm4, %v6512_v22, %v6513_v4  ;;  %v2620_v16 = vsel %vm2600_vm4, %v6513_v4, %v6517_v42  ;;  %v7625_v31 = vpop.permute.xlu1 %6535 }
 0x162   : > { %8917 = vst [vmem:[#allocation9_spill] sm:$0xff] %v7606_v44  ;;  %v6537_v50 = vunpack.i.l.bf16 %v7625_v31  ;;  %v6541_v61 = vpop.permute.xlu2 %6540  ;;  %v6528_v22 = vunpack.i.h.bf16 %v6526_v52  ;;  %v6533_v37 = vunpack.i.h.bf16 %v6531_v35  ;;  %v6532_v36 = vunpack.i.l.bf16 %v6531_v35 }
 0x163   : > { %v7611_v32 = vpop.f32.mrf.mxu0  ;;  %v6547_v52 = vunpack.i.l.bf16 %v7652_v18 }
 0x164   : > { %8918 = vst [vmem:[#allocation10_spill] sm:$0xff] %v7611_v32  ;;  %6148 = vmatmul.msk.f32.vlgmr.msra.gmra.mxu1 %vm318_vm1, %v7518_v26  ;;  %v3209_v1 = vsel %vm3208_vm5, %v6527_v27, %v6537_v50  ;;  %v3211_v35 = vsel %vm3208_vm5, %v6528_v22, %v6532_v36  ;;  %v6770_v27 = vld [vmem:[%s6839_s17 + $0x28] sm:$0xff]  ;;  %v6779_v32 = vld [vmem:[%s6839_s17 + $0x80] sm:$0xff] }
 0x165   : > { %6149 = vmatmul.msk.f32.vlgmr.msra.gmra.mxu2 %vm318_vm1, %v7518_v26  ;;  %6150 = vmatmul.msk.f32.vlgmr.msra.gmra.mxu3 %vm318_vm1, %v7518_v26  ;;  %v6739_v30 = vpack.i.bf16 %v6779_v32, %v6778_v45 }
 0x166   : > { %6151 = vmatmul.msk.f32.vlgmr.msrb.gmra.mxu0 %vm318_vm1, %v7518_v26  ;;  %3007 = vmatpush.msra.mxu1 %v2618_v29 }
 0x167   : > { %3027 = vmatpush.msra.mxu2 %v2619_v2  ;;  %3047 = vmatpush.msra.mxu3 %v2620_v16 }
 0x168   : > { %v1182_v60 = vpop.f32.mrf.mxu2  ;;  %v1202_v57 = vpop.f32.mrf.mxu3  ;;  %3067 = vmatpush.msrb.mxu0 %v2621_v5  ;;  %v3210_v5 = vsel %vm3208_vm5, %v6537_v50, %v6528_v22  ;;  %v6771_v50 = vld [vmem:[%s6839_s17 + $0x50] sm:$0xff]  ;;  %v6542_v22 = vunpack.i.l.bf16 %v6541_v61 }
 0x169   : > { %v7628_v10 = vadd.f32 %v1182_v60, %v7443_v19  ;;  %v7631_v63 = vadd.f32 %v1202_v57, %v7445_v21  ;;  %v7633_v24 = vpop.f32.mrf.mxu1  ;;  %v2622_v19 = vsel %vm2600_vm4, %v6518_v49, %v6522_v55  ;;  %v2623_v21 = vsel %vm2600_vm4, %v6522_v55, %v6523_v14  ;;  %v6551_v14 = vpop.permute.xlu1 %6550  ;;  %v6768_v55 = vld [vmem:[%s6839_s17 + $0x8] sm:$0xff] }
 0x16a   : > { %8919 = vst [vmem:[#allocation11_spill] sm:$0xff] %v7633_v24  ;;  %v3213_v57 = vsel %vm3208_vm5, %v6533_v37, %v6547_v52 }
 0x16b   : > { %v7638_v9 = vpop.f32.mrf.mxu0 }
 0x16c   : > { %6152 = vmatmul.msk.f32.vlgmr.msrb.gmra.mxu1 %vm318_vm1, %v7518_v26 }
 0x16d   : > { %6153 = vmatmul.msk.f32.vlgmr.msrb.gmra.mxu2 %vm318_vm1, %v7518_v26  ;;  %6154 = vmatmul.msk.f32.vlgmr.msrb.gmra.mxu3 %vm318_vm1, %v7518_v26 }
 0x16e   : > { %6155 = vmatmul.msk.f32.vlgmr.msra.gmra.mxu0 %vm318_vm1, %v7518_v26  ;;  %3127 = vmatpush.msrb.mxu3 %v2624_v33  ;;  %v6724_v33 = vpack.i.bf16 %v6771_v50, %v6770_v27  ;;  %v6552_v27 = vunpack.i.l.bf16 %v6551_v14 }
 0x16f   : > { %3087 = vmatpush.msrb.mxu1 %v2622_v19  ;;  %3107 = vmatpush.msrb.mxu2 %v2623_v21  ;;  %v7681_v19 = vpop.permute.xlu2 %6555  ;;  %v6538_v21 = vunpack.i.h.bf16 %v7625_v31 }
 0x170   : > { %v1262_v4 = vpop.f32.mrf.mxu2  ;;  %v1282_v42 = vpop.f32.mrf.mxu3  ;;  %3275 = vmatpush.msra.mxu0 %v3209_v1  ;;  %v6543_v1 = vunpack.i.h.bf16 %v6541_v61  ;;  %6725 = vrot.lane.b32.xlu0 %v6724_v33, %s6803_s8  ;;  %v7700_v61 = vld [vmem:[%s8907_s1 + $0x28] sm:$0xff] }
 0x171   : > { %v7655_v49 = vadd.f32 %v1262_v4, %v7471_v40  ;;  %v7658_v29 = vadd.f32 %v1282_v42, %v7473_v41  ;;  %v7660_v2 = vpop.f32.mrf.mxu1  ;;  %v3212_v40 = vsel %vm3208_vm5, %v6532_v36, %v6533_v37  ;;  %v6769_v41 = vld [vmem:[%s6839_s17 + $0x30] sm:$0xff] }
 0x172   : > { %v6714_v60 = vpack.i.bf16 %v6769_v41, %v6768_v55  ;;  %v6557_v55 = vunpack.i.l.bf16 %v7681_v19 }
 0x173   : > { %v7663_v16 = vpop.f32.mrf.mxu0 }
 0x174   : > { %6156 = vmatmul.msk.f32.vlgmr.msra.gmra.mxu1 %vm318_vm1, %v7518_v26  ;;  %6715 = vrot.lane.b32.xlu1 %v6714_v60, %s6803_s8  ;;  %v3217_v41 = vsel %vm3208_vm5, %v6543_v1, %v6557_v55  ;;  %v6548_v60 = vunpack.i.h.bf16 %v7652_v18 }
 0x175   : > { %6157 = vmatmul.msk.f32.vlgmr.msra.gmra.mxu2 %vm318_vm1, %v7518_v26  ;;  %6158 = vmatmul.msk.f32.vlgmr.msra.gmra.mxu3 %vm318_vm1, %v7518_v26 }
 0x176   : > { %6159 = vmatmul.msk.f32.vlgmr.msrb.gmra.mxu0 %vm318_vm1, %v7518_v26  ;;  %3295 = vmatpush.msra.mxu1 %v3210_v5 }
 0x177   : > { %3315 = vmatpush.msra.mxu2 %v3211_v35  ;;  %3335 = vmatpush.msra.mxu3 %v3212_v40  ;;  %v3214_v35 = vsel %vm3208_vm5, %v6547_v52, %v6538_v21  ;;  %v6561_v40 = vpop.permute.xlu0 %6560  ;;  %v7714_v52 = vpop.permute.xlu1 %6565 }
 0x178   : > { %v1443_v36 = vpop.f32.mrf.mxu2  ;;  %v1463_v4 = vpop.f32.mrf.mxu3  ;;  %3355 = vmatpush.msrb.mxu0 %v3213_v57  ;;  %v6553_v57 = vunpack.i.h.bf16 %v6551_v14  ;;  %v3219_v14 = vsel %vm3208_vm5, %v6548_v60, %v6552_v27  ;;  %v6568_v24 = vunpack.i.h.bf16 %v7714_v52  ;;  %6740 = vrot.lane.b32.xlu0 %v6739_v30, %s6803_s8 }
 0x179   : > { %v7686_v37 = vadd.f32 %v1443_v36, %v7502_v7  ;;  %v7689_v42 = vadd.f32 %v1463_v4, %v7505_v8  ;;  %v7691_v5 = vpop.f32.mrf.mxu1  ;;  %v3215_v7 = vsel %vm3208_vm5, %v6538_v21, %v6542_v22  ;;  %v3216_v8 = vsel %vm3208_vm5, %v6542_v22, %v6543_v1 }
 0x17a   : > { %v6567_v22 = vunpack.i.l.bf16 %v7714_v52  ;;  %v3218_v36 = vsel %vm3208_vm5, %v6557_v55, %v6548_v60  ;;  %v3220_v4 = vsel %vm3208_vm5, %v6552_v27, %v6553_v57  ;;  %v6563_v60 = vunpack.i.h.bf16 %v6561_v40 }
 0x17b   : > { %v7695_v31 = vpop.f32.mrf.mxu0  ;;  %v6562_v27 = vunpack.i.l.bf16 %v6561_v40 }
 0x17c   : > { %6160 = vmatmul.msk.f32.vlgmr.msrb.gmra.mxu1 %vm318_vm1, %v7518_v26 }
 0x17d   : > { %6161 = vmatmul.msk.f32.vlgmr.msrb.gmra.mxu2 %vm318_vm1, %v7518_v26  ;;  %6162 = vmatmul.msk.f32.vlgmr.msrb.gmra.mxu3 %vm318_vm1, %v7518_v26 }
 0x17e   : > { %6164 = vmatmul.msk.f32.vlgmr.msra.gmra.mxu0 %vm318_vm1, %v7700_v61  ;;  %3375 = vmatpush.msrb.mxu1 %v3214_v35  ;;  %v6772_v35 = vld [vmem:[%s6839_s17 + $0x58] sm:$0xff] }
 0x17f   : > { %3395 = vmatpush.msrb.mxu2 %v3215_v7  ;;  %3415 = vmatpush.msrb.mxu3 %v3216_v8  ;;  %v6773_v7 = vld [vmem:[%s6839_s17 + $0x60] sm:$0xff]  ;;  %v7744_v8 = vpop.permute.xlu0 %6575 }
 0x180   : > { %v1523_v50 = vpop.f32.mrf.mxu2  ;;  %v1543_v33 = vpop.f32.mrf.mxu3  ;;  %3435 = vmatpush.msra.mxu0 %v3217_v41  ;;  %v6729_v55 = vpack.i.bf16 %v6773_v7, %v6772_v35  ;;  %v6558_v41 = vunpack.i.h.bf16 %v7681_v19  ;;  %v6577_v19 = vunpack.i.l.bf16 %v7744_v8 }
 0x181   : > { %v7718_v26 = vadd.f32 %v1523_v50, %v7538_v59  ;;  %v7721_v21 = vadd.f32 %v1543_v33, %v7541_v46  ;;  %v7723_v1 = vpop.f32.mrf.mxu1  ;;  %v7733_v59 = vpop.permute.xlu2 %6570  ;;  %v3221_v46 = vsel %vm3208_vm5, %v6553_v57, %v6567_v22 }
 0x182   : > { %6730 = vrot.lane.b32.xlu1 %v6729_v55, %s6803_s8  ;;  %v3225_v7 = vsel %vm3208_vm5, %v6563_v60, %v6577_v19  ;;  %v6775_v55 = vld [vmem:[%s6839_s17 + $0x40] sm:$0xff]  ;;  %v6573_v44 = vunpack.i.h.bf16 %v7733_v59 }
 0x183   : > { %v7726_v18 = vpop.f32.mrf.mxu0 }
 0x184   : > { %6165 = vmatmul.msk.f32.vlgmr.msra.gmra.mxu1 %vm318_vm1, %v7700_v61 }
 0x185   : > { %6166 = vmatmul.msk.f32.vlgmr.msra.gmra.mxu2 %vm318_vm1, %v7700_v61  ;;  %6167 = vmatmul.msk.f32.vlgmr.msra.gmra.mxu3 %vm318_vm1, %v7700_v61 }
 0x186   : > { %6168 = vmatmul.msk.f32.vlgmr.msrb.gmra.mxu0 %vm318_vm1, %v7700_v61  ;;  %3455 = vmatpush.msra.mxu1 %v3218_v36 }
 0x187   : > { %3475 = vmatpush.msra.mxu2 %v3219_v14  ;;  %3495 = vmatpush.msra.mxu3 %v3220_v4  ;;  %v7757_v14 = vpop.permute.xlu1 %6580  ;;  %v3222_v4 = vsel %vm3208_vm5, %v6567_v22, %v6558_v41  ;;  %v6774_v22 = vld [vmem:[%s6839_s17 + $0x38] sm:$0xff]  ;;  %v7793_v45 = vpop.permute.xlu0 %6585 }
 0x188   : > { %v1603_v50 = vpop.f32.mrf.mxu2  ;;  %v1623_v33 = vpop.f32.mrf.mxu3  ;;  %3515 = vmatpush.msrb.mxu0 %v3221_v46 }
 0x189   : > { %v7749_v57 = vadd.f32 %v1603_v50, %v7570_v23  ;;  %v7752_v35 = vadd.f32 %v1623_v33, %v7573_v3  ;;  %v7754_v36 = vpop.f32.mrf.mxu1  ;;  %v3223_v23 = vsel %vm3208_vm5, %v6558_v41, %v6562_v27  ;;  %v3224_v3 = vsel %vm3208_vm5, %v6562_v27, %v6563_v60  ;;  %v3201_v46 = vpop.permute.xlu2 %3200  ;;  %v6776_v50 = vld [vmem:[%s6839_s17 + $0x68] sm:$0xff]  ;;  %v6777_v27 = vld [vmem:[%s6839_s17 + $0x90] sm:$0xff] }
 0x18a   : > { %8920 = vst [vmem:[#allocation12_spill] sm:$0xff] %v7754_v36  ;;  %v6719_v41 = vpack.i.bf16 %v6775_v55, %v6774_v22  ;;  %v6744_v33 = vpack.i.bf16 %v6777_v27, %v6776_v50  ;;  %v6572_v60 = vunpack.i.l.bf16 %v7733_v59  ;;  %v3226_v59 = vsel %vm3208_vm5, %v6577_v19, %v6568_v24 }
 0x18b   : > { %v7759_v40 = vpop.f32.mrf.mxu0  ;;  %v3229_v30 = vsel %vm3208_vm5, %v6573_v44, %v3201_v46  ;;  %v6583_v22 = vunpack.i.h.bf16 %v7757_v14  ;;  %v6582_v55 = vunpack.i.l.bf16 %v7757_v14 }
 0x18c   : > { %8921 = vst [vmem:[#allocation13_spill] sm:$0xff] %v7759_v40  ;;  %6169 = vmatmul.msk.f32.vlgmr.msrb.gmra.mxu1 %vm318_vm1, %v7700_v61  ;;  %6720 = vrot.lane.b32.xlu2 %v6719_v41, %s6803_s8 }
 0x18d   : > { %6170 = vmatmul.msk.f32.vlgmr.msrb.gmra.mxu2 %vm318_vm1, %v7700_v61  ;;  %6171 = vmatmul.msk.f32.vlgmr.msrb.gmra.mxu3 %vm318_vm1, %v7700_v61 }
 0x18e   : > { %6172 = vmatmul.msk.f32.vlgmr.msra.gmra.mxu0 %vm318_vm1, %v7700_v61  ;;  %3535 = vmatpush.msrb.mxu1 %v3222_v4 }
 0x18f   : > { %3555 = vmatpush.msrb.mxu2 %v3223_v23  ;;  %3575 = vmatpush.msrb.mxu3 %v3224_v3  ;;  %v6781_v3 = vld [vmem:[%s6839_s17 + $0xb0] sm:$0xff] }
 0x190   : > { %v1683_v51 = vpop.f32.mrf.mxu2  ;;  %v1703_v40 = vpop.f32.mrf.mxu3  ;;  %3595 = vmatpush.msra.mxu0 %v3225_v7  ;;  %6745 = vrot.lane.b32.xlu1 %v6744_v33, %s6803_s8  ;;  %v6578_v7 = vunpack.i.h.bf16 %v7744_v8 }
 0x191   : > { %v7784_v4 = vadd.f32 %v1683_v51, %v7601_v62  ;;  %v7787_v52 = vadd.f32 %v1703_v40, %v7604_v39  ;;  %v7789_v23 = vpop.f32.mrf.mxu1  ;;  %v3227_v51 = vsel %vm3208_vm5, %v6568_v24, %v6572_v60  ;;  %v3228_v62 = vsel %vm3208_vm5, %v6572_v60, %v6573_v44  ;;  %v7802_v39 = vpop.permute.xlu1 %6590  ;;  %v6780_v40 = vld [vmem:[%s6839_s17 + $0x88] sm:$0xff] }
 0x192   : > { %8922 = vst [vmem:[#allocation14_spill] sm:$0xff] %v7789_v23  ;;  %v6754_v19 = vpack.i.bf16 %v6781_v3, %v6780_v40  ;;  %v7813_v24 = vpop.permute.xlu2 %6595  ;;  %v6593_v8 = vunpack.i.h.bf16 %v7802_v39  ;;  %v3230_v14 = vsel %vm3208_vm5, %v3201_v46, %v6578_v7 }
 0x193   : > { %v7795_v32 = vpop.f32.mrf.mxu0  ;;  %v6597_v60 = vunpack.i.l.bf16 %v7813_v24 }
 0x194   : > { %8923 = vst [vmem:[#allocation15_spill] sm:$0xff] %v7795_v32  ;;  %6173 = vmatmul.msk.f32.vlgmr.msra.gmra.mxu1 %vm318_vm1, %v7700_v61  ;;  %6755 = vrot.lane.b32.xlu0 %v6754_v19, %s6803_s8  ;;  %v6587_v19 = vunpack.i.l.bf16 %v7793_v45 }
 0x195   : > { %6174 = vmatmul.msk.f32.vlgmr.msra.gmra.mxu2 %vm318_vm1, %v7700_v61  ;;  %6175 = vmatmul.msk.f32.vlgmr.msra.gmra.mxu3 %vm318_vm1, %v7700_v61  ;;  %v3817_v46 = vsel %vm3816_vm6, %v6593_v8, %v6597_v60 }
 0x196   : > { %6176 = vmatmul.msk.f32.vlgmr.msrb.gmra.mxu0 %vm318_vm1, %v7700_v61  ;;  %3615 = vmatpush.msra.mxu1 %v3226_v59 }
 0x197   : > { %3635 = vmatpush.msra.mxu2 %v3227_v51  ;;  %3655 = vmatpush.msra.mxu3 %v3228_v62  ;;  %v6601_v51 = vpop.permute.xlu0 %6600  ;;  %v6782_v62 = vld [vmem:[%s6839_s17 + $0x48] sm:$0xff] }
 0x198   : > { %v1763_v41 = vpop.f32.mrf.mxu2  ;;  %v1783_v44 = vpop.f32.mrf.mxu3  ;;  %3675 = vmatpush.msrb.mxu0 %v3229_v30  ;;  %v6783_v30 = vld [vmem:[%s6839_s17 + $0x70] sm:$0xff] }
 0x199   : > { %v7819_v50 = vadd.f32 %v1763_v41, %v7628_v10  ;;  %v7822_v27 = vadd.f32 %v1783_v44, %v7631_v63  ;;  %v7824_v33 = vpop.f32.mrf.mxu1  ;;  %v3231_v10 = vsel %vm3208_vm5, %v6578_v7, %v6582_v55  ;;  %v3232_v63 = vsel %vm3208_vm5, %v6582_v55, %v6583_v22  ;;  %v7845_v3 = vpop.permute.xlu1 %6605 }
 0x19a   : > { %8924 = vst [vmem:[#allocation16_spill] sm:$0xff] %v7824_v33  ;;  %v6734_v40 = vpack.i.bf16 %v6783_v30, %v6782_v62  ;;  %v6592_v7 = vunpack.i.l.bf16 %v7802_v39  ;;  %v6588_v22 = vunpack.i.h.bf16 %v7793_v45  ;;  %v3818_v45 = vsel %vm3816_vm6, %v6597_v60, %v6587_v19  ;;  %v6784_v30 = vld [vmem:[%s6839_s17 + $0xb8] sm:$0xff] }
 0x19b   : > { %v7830_v59 = vpop.f32.mrf.mxu0 }
 0x19c   : > { %6177 = vmatmul.msk.f32.vlgmr.msrb.gmra.mxu1 %vm318_vm1, %v7700_v61  ;;  %6735 = vrot.lane.b32.xlu2 %v6734_v40, %s6803_s8  ;;  %v3820_v62 = vsel %vm3816_vm6, %v6588_v22, %v6592_v7  ;;  %v6785_v40 = vld [vmem:[%s6839_s17 + $0xc0] sm:$0xff] }
 0x19d   : > { %6178 = vmatmul.msk.f32.vlgmr.msrb.gmra.mxu2 %vm318_vm1, %v7700_v61  ;;  %6179 = vmatmul.msk.f32.vlgmr.msrb.gmra.mxu3 %vm318_vm1, %v7700_v61 }
 0x19e   : > { %6180 = vmatmul.msk.f32.vlgmr.msra.gmra.mxu0 %vm318_vm1, %v7700_v61  ;;  %3695 = vmatpush.msrb.mxu1 %v3230_v14 }
 0x19f   : > { %3715 = vmatpush.msrb.mxu2 %v3231_v10  ;;  %3735 = vmatpush.msrb.mxu3 %v3232_v63  ;;  %v6607_v10 = vunpack.i.l.bf16 %v7845_v3  ;;  %v3819_v63 = vsel %vm3816_vm6, %v6587_v19, %v6588_v22  ;;  %v7876_v60 = vpop.permute.xlu0 %6615  ;;  %v6598_v19 = vunpack.i.h.bf16 %v7813_v24  ;;  %v6603_v22 = vunpack.i.h.bf16 %v6601_v51 }
 0x1a0   : > { %v1843_v55 = vpop.f32.mrf.mxu2  ;;  %v1863_v41 = vpop.f32.mrf.mxu3  ;;  %3883 = vmatpush.msra.mxu0 %v3817_v46  ;;  %v6617_v33 = vunpack.i.l.bf16 %v7876_v60 }
 0x1a1   : > { %v7852_v44 = vadd.f32 %v1843_v55, %v7655_v49  ;;  %v7855_v8 = vadd.f32 %v1863_v41, %v7658_v29  ;;  %v7857_v14 = vpop.f32.mrf.mxu1  ;;  %v6611_v49 = vpop.permute.xlu2 %6610  ;;  %v6759_v29 = vpack.i.bf16 %v6785_v40, %v6784_v30  ;;  %v3821_v46 = vsel %vm3816_vm6, %v6592_v7, %v6607_v10 }
 0x1a2   : > { %v6602_v55 = vunpack.i.l.bf16 %v6601_v51  ;;  %v7894_v51 = vld [vmem:[%s8907_s1 + $0x30] sm:$0xff]  ;;  %v6612_v32 = vunpack.i.l.bf16 %v6611_v49 }
 0x1a3   : > { %v7860_v39 = vpop.f32.mrf.mxu0  ;;  %6760 = vrot.lane.b32.xlu1 %v6759_v29, %s6803_s8  ;;  %v3825_v29 = vsel %vm3816_vm6, %v6603_v22, %v6617_v33 }
 0x1a4   : > { %6181 = vmatmul.msk.f32.vlgmr.msra.gmra.mxu1 %vm318_vm1, %v7700_v61 }
 0x1a5   : > { %6182 = vmatmul.msk.f32.vlgmr.msra.gmra.mxu2 %vm318_vm1, %v7700_v61  ;;  %6183 = vmatmul.msk.f32.vlgmr.msra.gmra.mxu3 %vm318_vm1, %v7700_v61 }
 0x1a6   : > { %6184 = vmatmul.msk.f32.vlgmr.msrb.gmra.mxu0 %vm318_vm1, %v7700_v61  ;;  %3903 = vmatpush.msra.mxu1 %v3818_v45 }
 0x1a7   : > { %3923 = vmatpush.msra.mxu2 %v3819_v63  ;;  %3943 = vmatpush.msra.mxu3 %v3820_v62  ;;  %v3822_v63 = vsel %vm3816_vm6, %v6607_v10, %v6598_v19  ;;  %v6621_v62 = vpop.permute.xlu1 %6620 }
 0x1a8   : > { %v2101_v41 = vpop.f32.mrf.mxu2  ;;  %v2121_v30 = vpop.f32.mrf.mxu3  ;;  %3963 = vmatpush.msrb.mxu0 %v3821_v46  ;;  %v6608_v46 = vunpack.i.h.bf16 %v7845_v3 }
 0x1a9   : > { %v7881_v40 = vadd.f32 %v2101_v41, %v7686_v37  ;;  %v7884_v7 = vadd.f32 %v2121_v30, %v7689_v42  ;;  %v7886_v45 = vpop.f32.mrf.mxu1  ;;  %v3823_v37 = vsel %vm3816_vm6, %v6598_v19, %v6602_v55  ;;  %v3824_v42 = vsel %vm3816_vm6, %v6602_v55, %v6603_v22  ;;  %v7908_v10 = vpop.permute.xlu2 %6625  ;;  %v6786_v19 = vld [vmem:[%s6839_s17 + $0xa0] sm:$0xff]  ;;  %v6787_v55 = vld [vmem:[%s6839_s17 + $0x98] sm:$0xff] }
 0x1aa   : > { %v6749_v41 = vpack.i.bf16 %v6786_v19, %v6787_v55  ;;  %v6613_v30 = vunpack.i.h.bf16 %v6611_v49  ;;  %v6627_v3 = vunpack.i.l.bf16 %v7908_v10  ;;  %v3827_v49 = vsel %vm3816_vm6, %v6608_v46, %v6612_v32 }
 0x1ab   : > { %v7889_v24 = vpop.f32.mrf.mxu0 }
 0x1ac   : > { %6185 = vmatmul.msk.f32.vlgmr.msrb.gmra.mxu1 %vm318_vm1, %v7700_v61  ;;  %6750 = vrot.lane.b32.xlu2 %v6749_v41, %s6803_s8 }
 0x1ad   : > { %6186 = vmatmul.msk.f32.vlgmr.msrb.gmra.mxu2 %vm318_vm1, %v7700_v61  ;;  %6187 = vmatmul.msk.f32.vlgmr.msrb.gmra.mxu3 %vm318_vm1, %v7700_v61 }
 0x1ae   : > { %6189 = vmatmul.msk.f32.vlgmr.msra.gmra.mxu0 %vm318_vm1, %v7894_v51  ;;  %3983 = vmatpush.msrb.mxu1 %v3822_v63 }
 0x1af   : > { %4003 = vmatpush.msrb.mxu2 %v3823_v37  ;;  %4023 = vmatpush.msrb.mxu3 %v3824_v42  ;;  %v3826_v42 = vsel %vm3816_vm6, %v6617_v33, %v6608_v46  ;;  %v6618_v33 = vunpack.i.h.bf16 %v7876_v60 }
 0x1b0   : > { %v2181_v23 = vpop.f32.mrf.mxu2  ;;  %v2201_v36 = vpop.f32.mrf.mxu3  ;;  %4043 = vmatpush.msra.mxu0 %v3825_v29  ;;  %v6622_v29 = vunpack.i.l.bf16 %v6621_v62 }
 0x1b1   : > { %v7914_v61 = vadd.f32 %v2181_v23, %v7718_v26  ;;  %v7917_v22 = vadd.f32 %v2201_v36, %v7721_v21  ;;  %v7919_v63 = vpop.f32.mrf.mxu1  ;;  %v3828_v26 = vsel %vm3816_vm6, %v6612_v32, %v6613_v30  ;;  %v6631_v23 = vpop.permute.xlu0 %6630  ;;  %v3829_v21 = vsel %vm3816_vm6, %v6613_v30, %v6627_v3 }
 0x1b2   : > { %v7937_v36 = vpop.permute.xlu1 %6635  ;;  %v6623_v32 = vunpack.i.h.bf16 %v6621_v62  ;;  %v6641_v60 = vpop.permute.xlu2 %6640  ;;  %v3830_v62 = vsel %vm3816_vm6, %v6627_v3, %v6618_v33  ;;  %v6628_v3 = vunpack.i.h.bf16 %v7908_v10 }
 0x1b3   : > { %v7923_v37 = vpop.f32.mrf.mxu0 }
 0x1b4   : > { %8925 = vst [vmem:[#allocation17_spill] sm:$0xff] %v7923_v37  ;;  %6190 = vmatmul.msk.f32.vlgmr.msra.gmra.mxu1 %vm318_vm1, %v7894_v51  ;;  %5024 = vrot.lane.b32.xlu2 %v7596_v15, %s6803_s8 }
 0x1b5   : > { %6191 = vmatmul.msk.f32.vlgmr.msra.gmra.mxu2 %vm318_vm1, %v7894_v51  ;;  %6192 = vmatmul.msk.f32.vlgmr.msra.gmra.mxu3 %vm318_vm1, %v7894_v51 }
 0x1b6   : > { %6193 = vmatmul.msk.f32.vlgmr.msrb.gmra.mxu0 %vm318_vm1, %v7894_v51  ;;  %4063 = vmatpush.msra.mxu1 %v3826_v42  ;;  %v6637_v42 = vunpack.i.l.bf16 %v7937_v36 }
 0x1b7   : > { %4083 = vmatpush.msra.mxu2 %v3827_v49  ;;  %4103 = vmatpush.msra.mxu3 %v3828_v26 }
 0x1b8   : > { %v2261_v46 = vpop.f32.mrf.mxu2  ;;  %v2281_v19 = vpop.f32.mrf.mxu3  ;;  %4123 = vmatpush.msrb.mxu0 %v3829_v21  ;;  %v3833_v15 = vsel %vm3816_vm6, %v6623_v32, %v6637_v42  ;;  %v6633_v21 = vunpack.i.h.bf16 %v6631_v23  ;;  %v3834_v10 = vsel %vm3816_vm6, %v6637_v42, %v6628_v3  ;;  %v6638_v42 = vunpack.i.h.bf16 %v7937_v36 }
 0x1b9   : > { %v7941_v55 = vadd.f32 %v2261_v46, %v7749_v57  ;;  %v7944_v41 = vadd.f32 %v2281_v19, %v7752_v35  ;;  %v7946_v30 = vpop.f32.mrf.mxu1  ;;  %v3831_v57 = vsel %vm3816_vm6, %v6618_v33, %v6622_v29  ;;  %v3832_v35 = vsel %vm3816_vm6, %v6622_v29, %v6623_v32  ;;  %v3809_v26 = vpop.permute.xlu0 %3808 }
 0x1ba   : > { %8926 = vst [vmem:[#allocation18_spill] sm:$0xff] %v7946_v30  ;;  %v6632_v33 = vunpack.i.l.bf16 %v6631_v23  ;;  %v6646_v30 = vpop.permute.xlu1 %6645  ;;  %v3838_v36 = vsel %vm3816_vm6, %v3809_v26, %v6638_v42 }
 0x1bb   : > { %v7951_v49 = vpop.f32.mrf.mxu0 }
 0x1bc   : > { %8927 = vst [vmem:[#allocation19_spill] sm:$0xff] %v7951_v49  ;;  %6194 = vmatmul.msk.f32.vlgmr.msrb.gmra.mxu1 %vm318_vm1, %v7894_v51  ;;  %v3835_v23 = vsel %vm3816_vm6, %v6628_v3, %v6632_v33 }
 0x1bd   : > { %6195 = vmatmul.msk.f32.vlgmr.msrb.gmra.mxu2 %vm318_vm1, %v7894_v51  ;;  %6196 = vmatmul.msk.f32.vlgmr.msrb.gmra.mxu3 %vm318_vm1, %v7894_v51 }
 0x1be   : > { %6197 = vmatmul.msk.f32.vlgmr.msra.gmra.mxu0 %vm318_vm1, %v7894_v51  ;;  %4143 = vmatpush.msrb.mxu1 %v3830_v62  ;;  %v3836_v62 = vsel %vm3816_vm6, %v6632_v33, %v6633_v21 }
 0x1bf   : > { %4163 = vmatpush.msrb.mxu2 %v3831_v57  ;;  %4183 = vmatpush.msrb.mxu3 %v3832_v35  ;;  %v6651_v57 = vpop.permute.xlu2 %6650  ;;  %v6643_v35 = vunpack.i.h.bf16 %v6641_v60 }
 0x1c0   : > { %v2341_v29 = vpop.f32.mrf.mxu2  ;;  %v2361_v46 = vpop.f32.mrf.mxu3  ;;  %4203 = vmatpush.msra.mxu0 %v3833_v15  ;;  %v6642_v15 = vunpack.i.l.bf16 %v6641_v60 }
 0x1c1   : > { %v7967_v19 = vadd.f32 %v2341_v29, %v7784_v4  ;;  %v7970_v49 = vadd.f32 %v2361_v46, %v7787_v52  ;;  %v7972_v32 = vpop.f32.mrf.mxu1  ;;  %v3837_v4 = vsel %vm3816_vm6, %v6633_v21, %v3809_v26  ;;  %v7988_v52 = vpop.permute.xlu0 %6655 }
 0x1c2   : > { %8928 = vst [vmem:[#allocation20_spill] sm:$0xff] %v7972_v32  ;;  %v3839_v60 = vsel %vm3816_vm6, %v6638_v42, %v6642_v15  ;;  %v6652_v42 = vunpack.i.l.bf16 %v6651_v57 }
 0x1c3   : > { %v7974_v54 = vpop.f32.mrf.mxu0 }
 0x1c4   : > { %8929 = vst [vmem:[#allocation21_spill] sm:$0xff] %v7974_v54  ;;  %6198 = vmatmul.msk.f32.vlgmr.msra.gmra.mxu1 %vm318_vm1, %v7894_v51  ;;  %v6657_v54 = vunpack.i.l.bf16 %v7988_v52 }
 0x1c5   : > { %6199 = vmatmul.msk.f32.vlgmr.msra.gmra.mxu2 %vm318_vm1, %v7894_v51  ;;  %6200 = vmatmul.msk.f32.vlgmr.msra.gmra.mxu3 %vm318_vm1, %v7894_v51 }
 0x1c6   : > { %6201 = vmatmul.msk.f32.vlgmr.msrb.gmra.mxu0 %vm318_vm1, %v7894_v51  ;;  %4223 = vmatpush.msra.mxu1 %v3834_v10  ;;  %v6653_v10 = vunpack.i.h.bf16 %v6651_v57 }
 0x1c7   : > { %4243 = vmatpush.msra.mxu2 %v3835_v23  ;;  %4263 = vmatpush.msra.mxu3 %v3836_v62  ;;  %v6661_v62 = vpop.permute.xlu1 %6660  ;;  %v8014_v26 = vpop.permute.xlu2 %6665 }
 0x1c8   : > { %v2421_v3 = vpop.f32.mrf.mxu2  ;;  %v2441_v33 = vpop.f32.mrf.mxu3  ;;  %4283 = vmatpush.msrb.mxu0 %v3837_v4  ;;  %v6647_v4 = vunpack.i.l.bf16 %v6646_v30 }
 0x1c9   : > { %v7992_v29 = vadd.f32 %v2421_v3, %v7819_v50  ;;  %v7995_v21 = vadd.f32 %v2441_v33, %v7822_v27  ;;  %v7997_v46 = vpop.f32.mrf.mxu1  ;;  %v3840_v50 = vsel %vm3816_vm6, %v6642_v15, %v6643_v35  ;;  %v4425_v27 = vsel %vm4424_vm7, %v6653_v10, %v6657_v54 }
 0x1ca   : > { %8930 = vst [vmem:[#allocation22_spill] sm:$0xff] %v7997_v46  ;;  %v6648_v35 = vunpack.i.h.bf16 %v6646_v30 }
 0x1cb   : > { %v8001_v23 = vpop.f32.mrf.mxu0 }
 0x1cc   : > { %6202 = vmatmul.msk.f32.vlgmr.msrb.gmra.mxu1 %vm318_vm1, %v7894_v51  ;;  %v4427_v30 = vsel %vm4424_vm7, %v6647_v4, %v6648_v35  ;;  %v4428_v57 = vsel %vm4424_vm7, %v6648_v35, %v6652_v42 }
 0x1cd   : > { %6203 = vmatmul.msk.f32.vlgmr.msrb.gmra.mxu2 %vm318_vm1, %v7894_v51  ;;  %6204 = vmatmul.msk.f32.vlgmr.msrb.gmra.mxu3 %vm318_vm1, %v7894_v51 }
 0x1ce   : > { %6205 = vmatmul.msk.f32.vlgmr.msra.gmra.mxu0 %vm318_vm1, %v7894_v51  ;;  %4303 = vmatpush.msrb.mxu1 %v3838_v36  ;;  %v6667_v36 = vunpack.i.l.bf16 %v8014_v26 }
 0x1cf   : > { %4323 = vmatpush.msrb.mxu2 %v3839_v60  ;;  %4343 = vmatpush.msrb.mxu3 %v3840_v50  ;;  %v4426_v60 = vsel %vm4424_vm7, %v6657_v54, %v6647_v4  ;;  %v8039_v54 = vpop.permute.xlu1 %6675  ;;  %v6658_v50 = vunpack.i.h.bf16 %v7988_v52  ;;  %v6662_v4 = vunpack.i.l.bf16 %v6661_v62  ;;  %v8056_v52 = vld [vmem:[%s8907_s1 + $0x38] sm:$0xff] }
 0x1d0   : > { %v2501_v15 = vpop.f32.mrf.mxu2  ;;  %v2521_v3 = vpop.f32.mrf.mxu3  ;;  %4491 = vmatpush.msra.mxu0 %v4425_v27  ;;  %v6663_v27 = vunpack.i.h.bf16 %v6661_v62 }
 0x1d1   : > { %v8017_v33 = vadd.f32 %v2501_v15, %v7852_v44  ;;  %v8020_v46 = vadd.f32 %v2521_v3, %v7855_v8  ;;  %v8022_v10 = vpop.f32.mrf.mxu1  ;;  %v6671_v44 = vpop.permute.xlu0 %6670  ;;  %v4429_v8 = vsel %vm4424_vm7, %v6652_v42, %v6667_v36  ;;  %v4430_v62 = vsel %vm4424_vm7, %v6667_v36, %v6658_v50 }
 0x1d3   : > { %v8025_v32 = vpop.f32.mrf.mxu0 }
 0x1d4   : > { %6206 = vmatmul.msk.f32.vlgmr.msra.gmra.mxu1 %vm318_vm1, %v7894_v51 }
 0x1d5   : > { %6207 = vmatmul.msk.f32.vlgmr.msra.gmra.mxu2 %vm318_vm1, %v7894_v51  ;;  %6208 = vmatmul.msk.f32.vlgmr.msra.gmra.mxu3 %vm318_vm1, %v7894_v51 }
 0x1d6   : > { %6209 = vmatmul.msk.f32.vlgmr.msrb.gmra.mxu0 %vm318_vm1, %v7894_v51  ;;  %4511 = vmatpush.msra.mxu1 %v4426_v60  ;;  %v6677_v60 = vunpack.i.l.bf16 %v8039_v54 }
 0x1d7   : > { %4531 = vmatpush.msra.mxu2 %v4427_v30  ;;  %4551 = vmatpush.msra.mxu3 %v4428_v57  ;;  %v6681_v30 = vpop.permute.xlu2 %6680 }
 0x1d8   : > { %v2709_v35 = vpop.f32.mrf.mxu2  ;;  %v2729_v15 = vpop.f32.mrf.mxu3  ;;  %4571 = vmatpush.msrb.mxu0 %v4429_v8  ;;  %v4433_v57 = vsel %vm4424_vm7, %v6663_v27, %v6677_v60  ;;  %v6668_v8 = vunpack.i.h.bf16 %v8014_v26 }
 0x1d9   : > { %v8043_v3 = vadd.f32 %v2709_v35, %v7881_v40  ;;  %v8046_v42 = vadd.f32 %v2729_v15, %v7884_v7  ;;  %v8048_v38 = vpop.f32.mrf.mxu1  ;;  %v4431_v40 = vsel %vm4424_vm7, %v6658_v50, %v6662_v4  ;;  %v4432_v7 = vsel %vm4424_vm7, %v6662_v4, %v6663_v27  ;;  %v8070_v36 = vpop.permute.xlu0 %6685 }
 0x1da   : > { %v6673_v50 = vunpack.i.h.bf16 %v6671_v44  ;;  %v6672_v4 = vunpack.i.l.bf16 %v6671_v44  ;;  %v4434_v26 = vsel %vm4424_vm7, %v6677_v60, %v6668_v8 }
 0x1db   : > { %v8051_v17 = vpop.f32.mrf.mxu0 }
 0x1dc   : > { %6210 = vmatmul.msk.f32.vlgmr.msrb.gmra.mxu1 %vm318_vm1, %v7894_v51  ;;  %v4435_v44 = vsel %vm4424_vm7, %v6668_v8, %v6672_v4  ;;  %v6682_v8 = vunpack.i.l.bf16 %v6681_v30 }
 0x1dd   : > { %6211 = vmatmul.msk.f32.vlgmr.msrb.gmra.mxu2 %vm318_vm1, %v7894_v51  ;;  %6212 = vmatmul.msk.f32.vlgmr.msrb.gmra.mxu3 %vm318_vm1, %v7894_v51 }
 0x1de   : > { %6214 = vmatmul.msk.f32.vlgmr.msra.gmra.mxu0 %vm318_vm1, %v8056_v52  ;;  %4591 = vmatpush.msrb.mxu1 %v4430_v62  ;;  %v6687_v62 = vunpack.i.l.bf16 %v8070_v36 }
 0x1df   : > { %4611 = vmatpush.msrb.mxu2 %v4431_v40  ;;  %4631 = vmatpush.msrb.mxu3 %v4432_v7  ;;  %v4436_v40 = vsel %vm4424_vm7, %v6672_v4, %v6673_v50  ;;  %v8096_v60 = vpop.permute.xlu2 %6695  ;;  %v6678_v7 = vunpack.i.h.bf16 %v8039_v54 }
 0x1e0   : > { %v2789_v35 = vpop.f32.mrf.mxu2  ;;  %v2809_v15 = vpop.f32.mrf.mxu3  ;;  %4651 = vmatpush.msra.mxu0 %v4433_v57  ;;  %v6683_v57 = vunpack.i.h.bf16 %v6681_v30 }
 0x1e1   : > { %v8074_v34 = vadd.f32 %v2789_v35, %v7914_v61  ;;  %v8077_v51 = vadd.f32 %v2809_v15, %v7917_v22  ;;  %v8079_v27 = vpop.f32.mrf.mxu1  ;;  %v6691_v61 = vpop.permute.xlu1 %6690  ;;  %v4437_v22 = vsel %vm4424_vm7, %v6673_v50, %v6687_v62  ;;  %v4439_v30 = vsel %vm4424_vm7, %v6678_v7, %v6682_v8 }
 0x1e3   : > { %8931 = vst [vmem:[#allocation23_spill] sm:$0xff] %v8077_v51  ;;  %v8082_v37 = vpop.f32.mrf.mxu0  ;;  %v8108_v51 = vpop.permute.xlu0 %6700 }
 0x1e4   : > { %8932 = vst [vmem:[#allocation24_spill] sm:$0xff] %v8082_v37  ;;  %6215 = vmatmul.msk.f32.vlgmr.msra.gmra.mxu1 %vm318_vm1, %v8056_v52 }
 0x1e5   : > { %6216 = vmatmul.msk.f32.vlgmr.msra.gmra.mxu2 %vm318_vm1, %v8056_v52  ;;  %6217 = vmatmul.msk.f32.vlgmr.msra.gmra.mxu3 %vm318_vm1, %v8056_v52 }
 0x1e6   : > { %6218 = vmatmul.msk.f32.vlgmr.msrb.gmra.mxu0 %vm318_vm1, %v8056_v52  ;;  %4671 = vmatpush.msra.mxu1 %v4434_v26  ;;  %v6697_v26 = vunpack.i.l.bf16 %v8096_v60 }
 0x1e7   : > { %4691 = vmatpush.msra.mxu2 %v4435_v44  ;;  %4711 = vmatpush.msra.mxu3 %v4436_v40  ;;  %v4438_v44 = vsel %vm4424_vm7, %v6687_v62, %v6678_v7  ;;  %v6688_v62 = vunpack.i.h.bf16 %v8070_v36  ;;  %v6692_v7 = vunpack.i.l.bf16 %v6691_v61 }
 0x1e8   : > { %v2869_v4 = vpop.f32.mrf.mxu2  ;;  %v2889_v35 = vpop.f32.mrf.mxu3  ;;  %4731 = vmatpush.msrb.mxu0 %v4437_v22  ;;  %v6693_v22 = vunpack.i.h.bf16 %v6691_v61  ;;  %v823_v61 = vadd.f32 %v7453_v11, %v7291_v6  ;;  %v6698_v11 = vunpack.i.h.bf16 %v8096_v60 }
 0x1e9   : > { %v8100_v15 = vadd.f32 %v2869_v4, %v7941_v55  ;;  %v8103_v50 = vadd.f32 %v2889_v35, %v7944_v41  ;;  %v8105_v37 = vpop.f32.mrf.mxu1  ;;  %v4440_v55 = vsel %vm4424_vm7, %v6682_v8, %v6683_v57  ;;  %v4417_v40 = vpop.permute.xlu1 %4416  ;;  %v4441_v41 = vsel %vm4424_vm7, %v6683_v57, %v6697_v26 }
 0x1eb   : > { %8933 = vst [vmem:[#allocation25_spill] sm:$0xff] %v8103_v50  ;;  %v8110_v54 = vpop.f32.mrf.mxu0  ;;  %v8136_v36 = vpop.permute.xlu0 %6710 }
 0x1ec   : > { %8934 = vst [vmem:[#allocation26_spill] sm:$0xff] %v8110_v54  ;;  %6219 = vmatmul.msk.f32.vlgmr.msrb.gmra.mxu1 %vm318_vm1, %v8056_v52 }
 0x1ed   : > { %6220 = vmatmul.msk.f32.vlgmr.msrb.gmra.mxu2 %vm318_vm1, %v8056_v52  ;;  %6221 = vmatmul.msk.f32.vlgmr.msrb.gmra.mxu3 %vm318_vm1, %v8056_v52 }
 0x1ee   : > { %6222 = vmatmul.msk.f32.vlgmr.msra.gmra.mxu0 %vm318_vm1, %v8056_v52  ;;  %4751 = vmatpush.msrb.mxu1 %v4438_v44  ;;  %v4442_v44 = vsel %vm4424_vm7, %v6697_v26, %v6688_v62  ;;  %v4445_v26 = vsel %vm4424_vm7, %v6693_v22, %v4417_v40 }
 0x1ef   : > { %4771 = vmatpush.msrb.mxu2 %v4439_v30  ;;  %4791 = vmatpush.msrb.mxu3 %v4440_v55  ;;  %v4444_v30 = vsel %vm4424_vm7, %v6692_v7, %v6693_v22  ;;  %v1866_v55 = vadd.f32 %v7638_v9, %v823_v61  ;;  %v6713_v9 = vunpack.i.h.bf16 %v8136_v36 }
 0x1f0   : > { %v2949_v8 = vpop.f32.mrf.mxu2  ;;  %v2969_v4 = vpop.f32.mrf.mxu3  ;;  %4811 = vmatpush.msra.mxu0 %v4441_v41 }
 0x1f1   : > { %v8126_v35 = vadd.f32 %v2949_v8, %v7967_v19  ;;  %v8129_v54 = vadd.f32 %v2969_v4, %v7970_v49  ;;  %v8131_v57 = vpop.f32.mrf.mxu1  ;;  %v4443_v19 = vsel %vm4424_vm7, %v6688_v62, %v6692_v7  ;;  %v8144_v49 = vpop.permute.xlu2 %6705  ;;  %v2524_v41 = vadd.f32 %v7830_v59, %v1866_v55  ;;  %v5588_v59 = vld [vmem:[%s8908_s2] sm:$0xff] }
 0x1f2   : > { %v8154_v6 = vpop.permute.xlu1 %6715  ;;  %v6703_v62 = vunpack.i.h.bf16 %v8108_v51  ;;  %v6702_v7 = vunpack.i.l.bf16 %v8108_v51  ;;  %v843_v51 = vadd.f32 %v7477_v28, %v7312_v47 }
 0x1f3   : > { %v8133_v50 = vpop.f32.mrf.mxu0  ;;  %v6717_v61 = vunpack.i.l.bf16 %v8154_v6 }
 0x1f4   : > { %6223 = vmatmul.msk.f32.vlgmr.msra.gmra.mxu1 %vm318_vm1, %v8056_v52  ;;  %v1867_v55 = vadd.f32 %v7660_v2, %v843_v51  ;;  %v4447_v47 = vsel %vm4424_vm7, %v6698_v11, %v6702_v7  ;;  %v4448_v28 = vsel %vm4424_vm7, %v6702_v7, %v6703_v62  ;;  %v6708_v62 = vunpack.i.h.bf16 %v8144_v49 }
 0x1f5   : > { %6224 = vmatmul.msk.f32.vlgmr.msra.gmra.mxu2 %vm318_vm1, %v8056_v52  ;;  %6225 = vmatmul.msk.f32.vlgmr.msra.gmra.mxu3 %vm318_vm1, %v8056_v52  ;;  %v6712_v7 = vunpack.i.l.bf16 %v8136_v36  ;;  %v983_v36 = vadd.f32 %v7513_v13, %v7348_v58 }
 0x1f6   : > { %6226 = vmatmul.msk.f32.vlgmr.msrb.gmra.mxu0 %vm318_vm1, %v8056_v52  ;;  %4831 = vmatpush.msra.mxu1 %v4442_v44  ;;  %v2525_v2 = vadd.f32 %v7857_v14, %v1867_v55 }
 0x1f7   : > { %4851 = vmatpush.msra.mxu2 %v4443_v19  ;;  %4871 = vmatpush.msra.mxu3 %v4444_v30  ;;  %v3132_v19 = vadd.f32 %v8001_v23, %v2524_v41  ;;  %v6804_v30 = vmov 0   ;;  %v1874_v13 = vadd.f32 %v7695_v31, %v983_v36  ;;  %v8936_v36 = vld [vmem:[#allocation23_spill] sm:$0xff] }
 0x1f8   : > { %v3029_v8 = vpop.f32.mrf.mxu2  ;;  %v3049_v22 = vpop.f32.mrf.mxu3  ;;  %4891 = vmatpush.msrb.mxu0 %v4445_v26  ;;  %6764 = vset.pattern.permute.xlu0 %v6804_v30  ;;  %v3133_v41 = vadd.f32 %v8022_v10, %v2525_v2 }
 0x1f9   : > { %v8162_v4 = vadd.f32 %v3029_v8, %v7992_v29  ;;  %v8165_v44 = vadd.f32 %v3049_v22, %v7995_v21  ;;  %v8167_v60 = vpop.f32.mrf.mxu1  ;;  %v903_v29 = vadd.f32 %v7483_v20, %v7318_v0  ;;  %v4446_v21 = vsel %vm4424_vm7, %v4417_v40, %v6698_v11  ;;  %5591 = vperm.xlu0 %6764, %v5588_v59   ;;  %v8191_v0 = vpop.permute.xlu0 %6725 }
 0x1fa   : > { %v5033_v20 = vsel %vm5032_vm8, %v6713_v9, %v6717_v61  ;;  %v8197_v40 = vpop.permute.xlu2 %6720  ;;  %v6707_v11 = vunpack.i.l.bf16 %v8144_v49  ;;  %v6727_v9 = vunpack.i.l.bf16 %v8191_v0 }
 0x1fb   : > { %v3277_v26 = vpop.f32.mrf.mxu0  ;;  %v1870_v23 = vadd.f32 %v7663_v16, %v903_v29  ;;  %v6722_v31 = vunpack.i.l.bf16 %v8197_v40 }
 0x1fc   : > { %v8180_v8 = vadd.f32 %v3277_v26, %v3132_v19  ;;  %6227 = vmatmul.msk.f32.vlgmr.msrb.gmra.mxu1 %vm318_vm1, %v8056_v52  ;;  %v923_v19 = vadd.f32 %v7507_v25, %v7342_v56  ;;  %v5034_v29 = vsel %vm5032_vm8, %v6717_v61, %v6707_v11  ;;  %v5037_v56 = vsel %vm5032_vm8, %v6712_v7, %v6727_v9  ;;  %v8226_v25 = vpop.permute.xlu1 %6730 }
 0x1fd   : > { %6228 = vmatmul.msk.f32.vlgmr.msrb.gmra.mxu2 %vm318_vm1, %v8056_v52  ;;  %6229 = vmatmul.msk.f32.vlgmr.msrb.gmra.mxu3 %vm318_vm1, %v8056_v52  ;;  %v2528_v16 = vadd.f32 %v7860_v39, %v1870_v23  ;;  %v5035_v58 = vsel %vm5032_vm8, %v6707_v11, %v6708_v62  ;;  %v6718_v61 = vunpack.i.h.bf16 %v8154_v6  ;;  %v2532_v26 = vadd.f32 %v7889_v24, %v1874_v13 }
 0x1fe   : > { %6230 = vmatmul.msk.f32.vlgmr.msra.gmra.mxu0 %vm318_vm1, %v8056_v52  ;;  %4911 = vmatpush.msrb.mxu1 %v4446_v21  ;;  %v1003_v24 = vadd.f32 %v7543_v48, %v7373_v43 }
 0x1ff   : > { %4931 = vmatpush.msrb.mxu2 %v4447_v47  ;;  %4951 = vmatpush.msrb.mxu3 %v4448_v28  ;;  %v3136_v10 = vadd.f32 %v8025_v32, %v2528_v16  ;;  %v6723_v47 = vunpack.i.h.bf16 %v8197_v40  ;;  %v1063_v40 = vadd.f32 %v7550_v53, %v7379_v12  ;;  %v5039_v43 = vsel %vm5032_vm8, %v6718_v61, %v6722_v31 }
 0x200   : > { %v3109_v22 = vpop.f32.mrf.mxu2  ;;  %v3129_v14 = vpop.f32.mrf.mxu3  ;;  %5099 = vmatpush.msra.mxu0 %v5033_v20 }
 0x201   : > { %v8206_v59 = vadd.f32 %v3109_v22, %v8017_v33  ;;  %v8209_v39 = vadd.f32 %v3129_v14, %v8020_v46  ;;  %v3297_v51 = vpop.f32.mrf.mxu1  ;;  %v1871_v33 = vadd.f32 %v7691_v5, %v923_v19  ;;  %v5036_v46 = vsel %vm5032_vm8, %v6708_v62, %v6712_v7  ;;  %v8271_v12 = vpop.permute.xlu0 %6740  ;;  %v8935_v14 = vld [vmem:[#allocation17_spill] sm:$0xff] }
 0x202   : > { %v8214_v49 = vadd.f32 %v3297_v51, %v3133_v41  ;;  %v8237_v32 = vpop.permute.xlu2 %6735  ;;  %v1875_v41 = vadd.f32 %v7723_v1, %v1003_v24  ;;  %v5040_v48 = vsel %vm5032_vm8, %v6722_v31, %v6723_v47  ;;  %v6728_v22 = vunpack.i.h.bf16 %v8191_v0 }
 0x203   : > { %v3357_v30 = vpop.f32.mrf.mxu0  ;;  %v2529_v5 = vadd.f32 %v7886_v45, %v1871_v33  ;;  %v6737_v2 = vunpack.i.l.bf16 %v8237_v32  ;;  %v8937_v33 = vld [vmem:[#allocation2_spill] sm:$0xff] }
 0x204   : > { %v8220_v21 = vadd.f32 %v3357_v30, %v3136_v10  ;;  %6231 = vmatmul.msk.f32.vlgmr.msra.gmra.mxu1 %vm318_vm1, %v8056_v52  ;;  %v2533_v1 = vadd.f32 %v7919_v63, %v1875_v41  ;;  %v8282_v7 = vpop.permute.xlu1 %6745  ;;  %v6732_v63 = vunpack.i.l.bf16 %v8226_v25 }
 0x205   : > { %6232 = vmatmul.msk.f32.vlgmr.msra.gmra.mxu2 %vm318_vm1, %v8056_v52  ;;  %6233 = vmatmul.msk.f32.vlgmr.msra.gmra.mxu3 %vm318_vm1, %v8056_v52  ;;  %v3137_v55 = vadd.f32 %v8048_v38, %v2529_v5  ;;  %v3140_v38 = vadd.f32 %v8051_v17, %v2532_v26  ;;  %v5041_v53 = vsel %vm5032_vm8, %v6723_v47, %v6737_v2  ;;  %v8940_v5 = vld [vmem:[#allocation3_spill] sm:$0xff] }
 0x206   : > { %6234 = vmatmul.msk.f32.vlgmr.msrb.gmra.mxu0 %vm318_vm1, %v8056_v52  ;;  %5119 = vmatpush.msra.mxu1 %v5034_v29  ;;  %v1878_v17 = vadd.f32 %v7726_v18, %v1063_v40  ;;  %v6733_v18 = vunpack.i.h.bf16 %v8226_v25  ;;  %v6747_v29 = vunpack.i.l.bf16 %v8282_v7 }
 0x207   : > { %5159 = vmatpush.msra.mxu3 %v5036_v46  ;;  %5179 = vmatpush.msrb.mxu0 %v5037_v56  ;;  %v8938_v46 = vld [vmem:[#allocation7_spill] sm:$0xff] }
 0x208   : > { %v3317_v28 = vpop.f32.mrf.mxu2  ;;  %v3337_v45 = vpop.f32.mrf.mxu3  ;;  %5139 = vmatpush.msra.mxu2 %v5035_v58  ;;  %v1083_v56 = vadd.f32 %v8938_v46, %v8937_v33  ;;  %v8950_v46 = vld [vmem:[#allocation5_spill] sm:$0xff] }
 0x209   : > { %v8245_v23 = vadd.f32 %v3317_v28, %v8043_v3  ;;  %v8248_v20 = vadd.f32 %v3337_v45, %v8046_v42  ;;  %v3377_v6 = vpop.f32.mrf.mxu1  ;;  %v8261_v3 = vld [vmem:[%s8907_s1 + $0x40] sm:$0xff]  ;;  %v5038_v42 = vsel %vm5032_vm8, %v6727_v9, %v6718_v61  ;;  %v2536_v9 = vadd.f32 %v8935_v14, %v1878_v17  ;;  %v8941_v61 = vld [vmem:[#allocation8_spill] sm:$0xff] }
 0x20a   : > { %v8254_v16 = vadd.f32 %v3377_v6, %v3137_v55  ;;  %v1143_v25 = vadd.f32 %v8941_v61, %v8940_v5  ;;  %v8942_v55 = vld [vmem:[#allocation12_spill] sm:$0xff]  ;;  %v5043_v28 = vsel %vm5032_vm8, %v6728_v22, %v6732_v63  ;;  %v5044_v45 = vsel %vm5032_vm8, %v6732_v63, %v6733_v18  ;;  %v6751_v41 = vpop.permute.xlu2 %6750  ;;  %v8948_v63 = vld [vmem:[#allocation9_spill] sm:$0xff] }
 0x20b   : > { %v3437_v11 = vpop.f32.mrf.mxu0  ;;  %v1879_v47 = vadd.f32 %v8942_v55, %v1083_v56  ;;  %v5045_v6 = vsel %vm5032_vm8, %v6733_v18, %v6747_v29  ;;  %v6742_v14 = vunpack.i.l.bf16 %v8271_v12  ;;  %v8947_v18 = vld [vmem:[#allocation4_spill] sm:$0xff]  ;;  %v8951_v56 = vld [vmem:[#allocation10_spill] sm:$0xff] }
 0x20c   : > { %v8265_v62 = vadd.f32 %v3437_v11, %v3140_v38  ;;  %6235 = vmatmul.msk.f32.vlgmr.msrb.gmra.mxu1 %vm318_vm1, %v8056_v52  ;;  %v8944_v38 = vld [vmem:[#allocation18_spill] sm:$0xff]  ;;  %v8320_v11 = vpop.permute.xlu0 %6755 }
 0x20d   : > { %6236 = vmatmul.msk.f32.vlgmr.msrb.gmra.mxu2 %vm318_vm1, %v8056_v52  ;;  %6237 = vmatmul.msk.f32.vlgmr.msrb.gmra.mxu3 %vm318_vm1, %v8056_v52  ;;  %v3141_v52 = vadd.f32 %v8079_v27, %v2533_v1  ;;  %v8939_v27 = vld [vmem:[#allocation24_spill] sm:$0xff]  ;;  %v2537_v40 = vadd.f32 %v8944_v38, %v1879_v47 }
 0x20e   : > { %6239 = vmatmul.msk.f32.vlgmr.msra.gmra.mxu0 %vm318_vm1, %v8261_v3  ;;  %5199 = vmatpush.msrb.mxu1 %v5038_v42  ;;  %v3144_v58 = vadd.f32 %v8939_v27, %v2536_v9  ;;  %v6738_v42 = vunpack.i.h.bf16 %v8237_v32  ;;  %v8954_v47 = vld [vmem:[#allocation20_spill] sm:$0xff] }
 0x20f   : > { %5219 = vmatpush.msrb.mxu2 %v5039_v43  ;;  %5239 = vmatpush.msrb.mxu3 %v5040_v48  ;;  %v8945_v43 = vld [vmem:[#allocation19_spill] sm:$0xff] }
 0x210   : > { %v3397_v51 = vpop.f32.mrf.mxu2  ;;  %v3417_v19 = vpop.f32.mrf.mxu3  ;;  %5259 = vmatpush.msra.mxu0 %v5041_v53  ;;  %v3145_v53 = vadd.f32 %v8105_v37, %v2537_v40  ;;  %v8949_v37 = vld [vmem:[#allocation26_spill] sm:$0xff] }
 0x211   : > { %v8290_v10 = vadd.f32 %v3397_v51, %v8074_v34  ;;  %v8293_v30 = vadd.f32 %v3417_v19, %v8936_v36  ;;  %v3457_v0 = vpop.f32.mrf.mxu1  ;;  %v5042_v34 = vsel %vm5032_vm8, %v6737_v2, %v6728_v22  ;;  %v8943_v2 = vld [vmem:[#allocation13_spill] sm:$0xff]  ;;  %v6743_v22 = vunpack.i.h.bf16 %v8271_v12 }
 0x212   : > { %v8299_v13 = vadd.f32 %v3457_v0, %v3141_v52  ;;  %v1882_v24 = vadd.f32 %v8943_v2, %v1143_v25  ;;  %v8946_v52 = vld [vmem:[#allocation25_spill] sm:$0xff]  ;;  %v6757_v19 = vunpack.i.l.bf16 %v8320_v11  ;;  %v1163_v36 = vadd.f32 %v8948_v63, %v8947_v18 }
 0x213   : > { %v3517_v26 = vpop.f32.mrf.mxu0  ;;  %v1223_v12 = vadd.f32 %v8951_v56, %v8950_v46  ;;  %v5047_v25 = vsel %vm5032_vm8, %v6738_v42, %v6742_v14  ;;  %v6758_v46 = vunpack.i.h.bf16 %v8320_v11 }
 0x214   : > { %v8305_v31 = vadd.f32 %v3517_v26, %v3144_v58  ;;  %6240 = vmatmul.msk.f32.vlgmr.msra.gmra.mxu1 %vm318_vm1, %v8261_v3  ;;  %v2540_v48 = vadd.f32 %v8945_v43, %v1882_v24  ;;  %v8952_v58 = vld [vmem:[#allocation14_spill] sm:$0xff]  ;;  %v5048_v26 = vsel %vm5032_vm8, %v6742_v14, %v6743_v22  ;;  %v6752_v43 = vunpack.i.l.bf16 %v6751_v41 }
 0x215   : > { %6241 = vmatmul.msk.f32.vlgmr.msra.gmra.mxu2 %vm318_vm1, %v8261_v3  ;;  %6242 = vmatmul.msk.f32.vlgmr.msra.gmra.mxu3 %vm318_vm1, %v8261_v3  ;;  %v1883_v5 = vadd.f32 %v8952_v58, %v1163_v36 }
 0x216   : > { %6243 = vmatmul.msk.f32.vlgmr.msrb.gmra.mxu0 %vm318_vm1, %v8261_v3  ;;  %5279 = vmatpush.msra.mxu1 %v5042_v34  ;;  %v3148_v0 = vadd.f32 %v8949_v37, %v2540_v48  ;;  %v5049_v34 = vsel %vm5032_vm8, %v6743_v22, %v6757_v19  ;;  %v8959_v37 = vld [vmem:[#allocation22_spill] sm:$0xff] }
 0x217   : > { %5299 = vmatpush.msra.mxu2 %v5043_v28  ;;  %5319 = vmatpush.msra.mxu3 %v5044_v45  ;;  %v2541_v28 = vadd.f32 %v8954_v47, %v1883_v5  ;;  %v6748_v45 = vunpack.i.h.bf16 %v8282_v7  ;;  %v8957_v7 = vld [vmem:[#allocation11_spill] sm:$0xff] }
 0x218   : > { %v3477_v17 = vpop.f32.mrf.mxu2  ;;  %v3497_v1 = vpop.f32.mrf.mxu3  ;;  %5339 = vmatpush.msrb.mxu0 %v5045_v6  ;;  %v8955_v6 = vld [vmem:[#allocation21_spill] sm:$0xff] }
 0x219   : > { %v8328_v9 = vadd.f32 %v3477_v17, %v8100_v15  ;;  %v8331_v51 = vadd.f32 %v3497_v1, %v8946_v52  ;;  %v3537_v32 = vpop.f32.mrf.mxu1  ;;  %v5046_v15 = vsel %vm5032_vm8, %v6747_v29, %v6738_v42  ;;  %v8953_v29 = vld [vmem:[#allocation15_spill] sm:$0xff]  ;;  %v3149_v24 = vadd.f32 %v8131_v57, %v2541_v28  ;;  %v8956_v1 = vld [vmem:[#allocation6_spill] sm:$0xff]  ;;  %v5025_v57 = vpop.permute.xlu2 %5024 }
 0x21a   : > { %v8337_v33 = vadd.f32 %v3537_v32, %v3145_v53  ;;  %v1886_v55 = vadd.f32 %v8953_v29, %v1223_v12  ;;  %v6753_v42 = vunpack.i.h.bf16 %v6751_v41  ;;  %v1243_v22 = vadd.f32 %v8957_v7, %v8956_v1  ;;  %v8958_v41 = vld [vmem:[#allocation16_spill] sm:$0xff] }
 0x21b   : > { %v3597_v27 = vpop.f32.mrf.mxu0  ;;  %v5050_v18 = vsel %vm5032_vm8, %v6757_v19, %v6748_v45  ;;  %v6761_v19 = vpop.permute.xlu1 %6760  ;;  %v5054_v11 = vsel %vm5032_vm8, %v5025_v57, %v6758_v46 }
 0x21c   : > { %v8343_v61 = vadd.f32 %v3597_v27, %v3148_v0  ;;  %6244 = vmatmul.msk.f32.vlgmr.msrb.gmra.mxu1 %vm318_vm1, %v8261_v3  ;;  %v2544_v2 = vadd.f32 %v8955_v6, %v1886_v55  ;;  %v1887_v63 = vadd.f32 %v8958_v41, %v1243_v22  ;;  %v6762_v58 = vunpack.i.l.bf16 %v6761_v19 }
 0x21d   : > { %6245 = vmatmul.msk.f32.vlgmr.msrb.gmra.mxu2 %vm318_vm1, %v8261_v3  ;;  %6246 = vmatmul.msk.f32.vlgmr.msrb.gmra.mxu3 %vm318_vm1, %v8261_v3 }
 0x21e   : > { %6247 = vmatmul.msk.f32.vlgmr.msra.gmra.mxu0 %vm318_vm1, %v8261_v3  ;;  %5359 = vmatpush.msrb.mxu1 %v5046_v15  ;;  %v3152_v14 = vadd.f32 %v8133_v50, %v2544_v2  ;;  %v5053_v50 = vsel %vm5032_vm8, %v6753_v42, %v5025_v57  ;;  %v2545_v0 = vadd.f32 %v8959_v37, %v1887_v63  ;;  %v6763_v15 = vunpack.i.h.bf16 %v6761_v19 }
 0x21f   : > { %5379 = vmatpush.msrb.mxu2 %v5047_v25  ;;  %5399 = vmatpush.msrb.mxu3 %v5048_v26 }
 0x220   : > { %v3557_v38 = vpop.f32.mrf.mxu2  ;;  %v3577_v40 = vpop.f32.mrf.mxu3  ;;  %5419 = vmatpush.msra.mxu0 %v5049_v34  ;;  %v3153_v56 = vadd.f32 %v8167_v60, %v2545_v0  ;;  %v5055_v60 = vsel %vm5032_vm8, %v6758_v46, %v6762_v58 }
 0x221   : > { %v8362_v48 = vadd.f32 %v3557_v38, %v8126_v35  ;;  %v8365_v53 = vadd.f32 %v3577_v40, %v8129_v54  ;;  %v3617_v17 = vpop.f32.mrf.mxu1  ;;  %v5051_v54 = vsel %vm5032_vm8, %v6748_v45, %v6752_v43  ;;  %v5052_v35 = vsel %vm5032_vm8, %v6752_v43, %v6753_v42 }
 0x222   : > { %v8370_v52 = vadd.f32 %v3617_v17, %v3149_v24 }
 0x223   : > { %v3677_v32 = vpop.f32.mrf.mxu0 }
 0x224   : > { %v8374_v36 = vadd.f32 %v3677_v32, %v3152_v14  ;;  %6248 = vmatmul.msk.f32.vlgmr.msra.gmra.mxu1 %vm318_vm1, %v8261_v3 }
 0x225   : > { %6249 = vmatmul.msk.f32.vlgmr.msra.gmra.mxu2 %vm318_vm1, %v8261_v3  ;;  %6250 = vmatmul.msk.f32.vlgmr.msra.gmra.mxu3 %vm318_vm1, %v8261_v3 }
 0x226   : > { %6251 = vmatmul.msk.f32.vlgmr.msrb.gmra.mxu0 %vm318_vm1, %v8261_v3  ;;  %5439 = vmatpush.msra.mxu1 %v5050_v18 }
 0x227   : > { %5459 = vmatpush.msra.mxu2 %v5051_v54  ;;  %5479 = vmatpush.msra.mxu3 %v5052_v35 }
 0x228   : > { %v3637_v12 = vpop.f32.mrf.mxu2  ;;  %v3657_v27 = vpop.f32.mrf.mxu3  ;;  %5499 = vmatpush.msrb.mxu0 %v5053_v50 }
 0x229   : > { %v8391_v5 = vadd.f32 %v3637_v12, %v8162_v4  ;;  %v8394_v25 = vadd.f32 %v3657_v27, %v8165_v44  ;;  %v3697_v26 = vpop.f32.mrf.mxu1  ;;  %v5056_v4 = vsel %vm5032_vm8, %v6762_v58, %v6763_v15 }
 0x22a   : > { %v8396_v34 = vadd.f32 %v3697_v26, %v3153_v56 }
 0x22b   : > { %v3885_v29 = vpop.f32.mrf.mxu0 }
 0x22c   : > { %v8400_v55 = vadd.f32 %v3885_v29, %v8180_v8  ;;  %6252 = vmatmul.msk.f32.vlgmr.msrb.gmra.mxu1 %vm318_vm1, %v8261_v3 }
 0x22d   : > { %6253 = vmatmul.msk.f32.vlgmr.msrb.gmra.mxu2 %vm318_vm1, %v8261_v3  ;;  %6254 = vmatmul.msk.f32.vlgmr.msrb.gmra.mxu3 %vm318_vm1, %v8261_v3 }
 0x22e   : > { %6255 = vmatmul.msk.f32.vlgmr.msra.gmra.mxu0 %vm318_vm1, %v8261_v3  ;;  %5519 = vmatpush.msrb.mxu1 %v5054_v11 }
 0x22f   : > { %5539 = vmatpush.msrb.mxu2 %v5055_v60  ;;  %5559 = vmatpush.msrb.mxu3 %v5056_v4 }
 0x230   : > { %v3717_v44 = vpop.f32.mrf.mxu2  ;;  %v3737_v8 = vpop.f32.mrf.mxu3 }
 0x231   : > { %v3762_v47 = vadd.f32 %v3717_v44, %v8206_v59  ;;  %v3763_v28 = vadd.f32 %v3737_v8, %v8209_v39  ;;  %v3905_v45 = vpop.f32.mrf.mxu1 }
 0x232   : > { %v8415_v6 = vadd.f32 %v3905_v45, %v8214_v49 }
 0x233   : > { %v3965_v2 = vpop.f32.mrf.mxu0 }
 0x234   : > { %v8418_v24 = vadd.f32 %v3965_v2, %v8220_v21  ;;  %6256 = vmatmul.msk.f32.vlgmr.msra.gmra.mxu1 %vm318_vm1, %v8261_v3 }
 0x235   : > { %6257 = vmatmul.msk.f32.vlgmr.msra.gmra.mxu2 %vm318_vm1, %v8261_v3  ;;  %6258 = vmatmul.msk.f32.vlgmr.msra.gmra.mxu3 %vm318_vm1, %v8261_v3 }
 0x236   : > { %6259 = vmatmul.msk.f32.vlgmr.msrb.gmra.mxu0 %vm318_vm1, %v8261_v3 }
 0x238   : > { %v3925_v59 = vpop.f32.mrf.mxu2  ;;  %v3945_v39 = vpop.f32.mrf.mxu3 }
 0x239   : > { %v8429_v49 = vadd.f32 %v3925_v59, %v8245_v23  ;;  %v8432_v21 = vadd.f32 %v3945_v39, %v8248_v20  ;;  %v3985_v38 = vpop.f32.mrf.mxu1 }
 0x23a   : > { %v8435_v40 = vadd.f32 %v3985_v38, %v8254_v16 }
 0x23b   : > { %v4045_v42 = vpop.f32.mrf.mxu0 }
 0x23c   : > { %v8438_v43 = vadd.f32 %v4045_v42, %v8265_v62  ;;  %6260 = vmatmul.msk.f32.vlgmr.msrb.gmra.mxu1 %vm318_vm1, %v8261_v3 }
 0x23d   : > { %6261 = vmatmul.msk.f32.vlgmr.msrb.gmra.mxu2 %vm318_vm1, %v8261_v3  ;;  %6262 = vmatmul.msk.f32.vlgmr.msrb.gmra.mxu3 %vm318_vm1, %v8261_v3 }
 0x240   : > { %v4005_v23 = vpop.f32.mrf.mxu2  ;;  %v4025_v20 = vpop.f32.mrf.mxu3 }
 0x241   : > { %v8447_v17 = vadd.f32 %v4005_v23, %v8290_v10  ;;  %v8450_v16 = vadd.f32 %v4025_v20, %v8293_v30  ;;  %v4065_v1 = vpop.f32.mrf.mxu1 }
 0x242   : > { %v8453_v62 = vadd.f32 %v4065_v1, %v8299_v13 }
 0x243   : > { %v4125_v7 = vpop.f32.mrf.mxu0 }
 0x244   : > { %v8456_v22 = vadd.f32 %v4125_v7, %v8305_v31 }
 0x248   : > { %v4085_v14 = vpop.f32.mrf.mxu2  ;;  %v4105_v57 = vpop.f32.mrf.mxu3 }
 0x249   : > { %v8459_v3 = vadd.f32 %v4085_v14, %v8328_v9  ;;  %v8462_v32 = vadd.f32 %v4105_v57, %v8331_v51  ;;  %v4145_v10 = vpop.f32.mrf.mxu1 }
 0x24a   : > { %v8465_v30 = vadd.f32 %v4145_v10, %v8337_v33 }
 0x24b   : > { %v4205_v18 = vpop.f32.mrf.mxu0 }
 0x24c   : > { %v8468_v13 = vadd.f32 %v4205_v18, %v8343_v61 }
 0x250   : > { %v4165_v41 = vpop.f32.mrf.mxu2  ;;  %v4185_v63 = vpop.f32.mrf.mxu3 }
 0x251   : > { %v8471_v31 = vadd.f32 %v4165_v41, %v8362_v48  ;;  %v8474_v54 = vadd.f32 %v4185_v63, %v8365_v53  ;;  %v4225_v9 = vpop.f32.mrf.mxu1 }
 0x252   : > { %v8477_v51 = vadd.f32 %v4225_v9, %v8370_v52 }
 0x253   : > { %v4285_v35 = vpop.f32.mrf.mxu0 }
 0x254   : > { %v4368_v33 = vadd.f32 %v4285_v35, %v8374_v36 }
 0x258   : > { %v4245_v50 = vpop.f32.mrf.mxu2  ;;  %v4265_v19 = vpop.f32.mrf.mxu3 }
 0x259   : > { %v8481_v61 = vadd.f32 %v4245_v50, %v8391_v5  ;;  %v8484_v37 = vadd.f32 %v4265_v19, %v8394_v25  ;;  %v4305_v48 = vpop.f32.mrf.mxu1 }
 0x25a   : > { %v8487_v0 = vadd.f32 %v4305_v48, %v8396_v34 }
 0x25b   : > { %v4493_v53 = vpop.f32.mrf.mxu0 }
 0x25c   : > { %v4956_v23 = vadd.f32 %v4493_v53, %v8400_v55 }
 0x260   : > { %v4325_v46 = vpop.f32.mrf.mxu2  ;;  %v4345_v56 = vpop.f32.mrf.mxu3 }
 0x261   : > { %v8489_v52 = vadd.f32 %v4325_v46, %v3762_v47  ;;  %v8491_v12 = vadd.f32 %v4345_v56, %v3763_v28  ;;  %v4513_v36 = vpop.f32.mrf.mxu1 }
 0x262   : > { %v4957_v57 = vadd.f32 %v4513_v36, %v8415_v6 }
 0x263   : > { %v4573_v27 = vpop.f32.mrf.mxu0 }
 0x264   : > { %v4960_v9 = vadd.f32 %v4573_v27, %v8418_v24 }
 0x268   : > { %v4533_v15 = vpop.f32.mrf.mxu2  ;;  %v4553_v58 = vpop.f32.mrf.mxu3 }
 0x269   : > { %v4593_v5 = vpop.f32.mrf.mxu1  ;;  %v4958_v53 = vadd.f32 %v4533_v15, %v8429_v49  ;;  %v4959_v46 = vadd.f32 %v4553_v58, %v8432_v21 }
 0x26b   : > { %v4653_v26 = vpop.f32.mrf.mxu0  ;;  %v8520_v1 = vpop.permute.xlu0 %5591 }
 0x270   : > { %v4613_v29 = vpop.f32.mrf.mxu2  ;;  %v4633_v25 = vpop.f32.mrf.mxu3 }
 0x271   : > { %v8493_v11 = vpop.f32.mrf.mxu1 }
 0x273   : > { %v8495_v60 = vpop.f32.mrf.mxu0 }
 0x278   : > { %v8497_v34 = vpop.f32.mrf.mxu2  ;;  %v8499_v4 = vpop.f32.mrf.mxu3 }
 0x279   : > { %v8501_v44 = vpop.f32.mrf.mxu1 }
 0x27b   : > { %v8503_v8 = vpop.f32.mrf.mxu0 }
 0x280   : > { %v8505_v47 = vpop.f32.mrf.mxu2  ;;  %v8507_v28 = vpop.f32.mrf.mxu3 }
 0x281   : > { %v8509_v45 = vpop.f32.mrf.mxu1 }
 0x283   : > { %v4893_v2 = vpop.f32.mrf.mxu0 }
 0x284   : > { %v8511_v59 = vadd.f32 %v4893_v2, %v4368_v33  ;;  %v4961_v2 = vadd.f32 %v4593_v5, %v8435_v40  ;;  %v4962_v40 = vadd.f32 %v4613_v29, %v8447_v17  ;;  %v4963_v5 = vadd.f32 %v4633_v25, %v8450_v16 }
 0x285   : > { %v4965_v17 = vadd.f32 %v8493_v11, %v8453_v62 }
 0x288   : > { %v8513_v39 = vpop.f32.mrf.mxu2  ;;  %v8515_v38 = vpop.f32.mrf.mxu3 }
 0x289   : > { %v8517_v42 = vpop.f32.mrf.mxu1 }
 0x28b   : > { %v5101_v20 = vpop.f32.mrf.mxu0 }
 0x28c   : > { %v5564_v7 = vadd.f32 %v5101_v20, %v4956_v23 }
 0x28e   : > { %v5594_v14 = vadd.f32 %v8520_v1, %v5564_v7 }
 0x290   : > { %v8524_v10 = vpop.f32.mrf.mxu2  ;;  %v8526_v18 = vpop.f32.mrf.mxu3  ;;  %v5618_v41 = vmul.f32 0.005, %v5594_v14 }
 0x291   : > { %v5121_v63 = vpop.f32.mrf.mxu1 }
 0x292   : > { %v5565_v35 = vadd.f32 %v5121_v63, %v4957_v57  ;;  %v8529_v33 = vmax.f32 %v5594_v14, %v5618_v41 }
 0x293   : > { %v5181_v55 = vpop.f32.mrf.mxu0 }
 0x294   : > { %v5595_v50 = vadd.f32 %v8520_v1, %v5565_v35  ;;  %v5568_v19 = vadd.f32 %v5181_v55, %v4960_v9  ;;  %5690 = vrot.lane.b32.xlu1 %v8529_v33, %s6796_s18 }
 0x296   : > { %v5619_v48 = vmul.f32 0.005, %v5595_v50  ;;  %v5598_v6 = vadd.f32 %v8520_v1, %v5568_v19  ;;  %v4964_v19 = vadd.f32 %v4653_v26, %v8438_v43 }
 0x298   : > { %v5622_v56 = vmul.f32 0.005, %v5598_v6  ;;  %v5141_v36 = vpop.f32.mrf.mxu2  ;;  %v5161_v24 = vpop.f32.mrf.mxu3  ;;  %v8537_v27 = vmax.f32 %v5595_v50, %v5619_v48 }
 0x299   : > { %v5566_v23 = vadd.f32 %v5141_v36, %v4958_v53  ;;  %v5567_v20 = vadd.f32 %v5161_v24, %v4959_v46  ;;  %v5201_v7 = vpop.f32.mrf.mxu1  ;;  %v4966_v24 = vadd.f32 %v8497_v34, %v8459_v3  ;;  %v4968_v34 = vadd.f32 %v8495_v60, %v8456_v22 }
 0x29a   : > { %5692 = vrot.lane.b32.xlu2 %v8537_v27, %s6796_s18  ;;  %v8542_v14 = vmax.f32 %v5598_v6, %v5622_v56  ;;  %v5569_v21 = vadd.f32 %v5201_v7, %v4961_v2 }
 0x29b   : > { %v5596_v57 = vadd.f32 %v8520_v1, %v5566_v23  ;;  %v5597_v49 = vadd.f32 %v8520_v1, %v5567_v20  ;;  %v5261_v15 = vpop.f32.mrf.mxu0 }
 0x29c   : > { %5698 = vrot.lane.b32.xlu0 %v8542_v14, %s6796_s18  ;;  %v5599_v63 = vadd.f32 %v8520_v1, %v5569_v21  ;;  %v5572_v29 = vadd.f32 %v5261_v15, %v4964_v19  ;;  %v4969_v21 = vadd.f32 %v8501_v44, %v8465_v30 }
 0x29d   : > { %v5620_v58 = vmul.f32 0.005, %v5596_v57  ;;  %v5621_v41 = vmul.f32 0.005, %v5597_v49 }
 0x29e   : > { %v5623_v16 = vmul.f32 0.005, %v5599_v63  ;;  %v5602_v2 = vadd.f32 %v8520_v1, %v5572_v29 }
 0x29f   : > { %v8551_v9 = vmax.f32 %v5596_v57, %v5620_v58  ;;  %v8553_v50 = vmax.f32 %v5597_v49, %v5621_v41  ;;  %v4967_v49 = vadd.f32 %v8499_v4, %v8462_v32 }
 0x2a0   : > { %v5221_v35 = vpop.f32.mrf.mxu2  ;;  %v5241_v55 = vpop.f32.mrf.mxu3  ;;  %v8569_v62 = vmax.f32 %v5599_v63, %v5623_v16  ;;  %v5626_v58 = vmul.f32 0.005, %v5602_v2  ;;  %v4971_v16 = vadd.f32 %v8507_v28, %v8474_v54 }
 0x2a1   : > { %v5570_v48 = vadd.f32 %v5221_v35, %v4962_v40  ;;  %v5571_v6 = vadd.f32 %v5241_v55, %v4963_v5  ;;  %5694 = vrot.lane.b32.xlu1 %v8551_v9, %s6796_s18  ;;  %v5281_v53 = vpop.f32.mrf.mxu1 }
 0x2a2   : > { %5696 = vrot.lane.b32.xlu2 %v8553_v50, %s6796_s18  ;;  %v5573_v56 = vadd.f32 %v5281_v53, %v4965_v17  ;;  %v8591_v19 = vmax.f32 %v5602_v2, %v5626_v58  ;;  %v4972_v53 = vadd.f32 %v8503_v8, %v8468_v13  ;;  %v4970_v17 = vadd.f32 %v8505_v47, %v8471_v31 }
 0x2a3   : > { %v5600_v25 = vadd.f32 %v8520_v1, %v5570_v48  ;;  %v5601_v46 = vadd.f32 %v8520_v1, %v5571_v6  ;;  %v5341_v36 = vpop.f32.mrf.mxu0 }
 0x2a4   : > { %v5603_v11 = vadd.f32 %v8520_v1, %v5573_v56  ;;  %v5576_v44 = vadd.f32 %v5341_v36, %v4968_v34 }
 0x2a5   : > { %v5624_v43 = vmul.f32 0.005, %v5600_v25  ;;  %v5625_v26 = vmul.f32 0.005, %v5601_v46 }
 0x2a6   : > { %v5627_v30 = vmul.f32 0.005, %v5603_v11  ;;  %v5606_v22 = vadd.f32 %v8520_v1, %v5576_v44  ;;  %v4977_v44 = vadd.f32 %v8517_v42, %v8487_v0 }
 0x2a7   : > { %v8567_v23 = vmax.f32 %v5601_v46, %v5625_v26  ;;  %v8572_v57 = vmax.f32 %v5600_v25, %v5624_v43 }
 0x2a8   : > { %v5301_v20 = vpop.f32.mrf.mxu2  ;;  %v5321_v7 = vpop.f32.mrf.mxu3  ;;  %v8594_v6 = vmax.f32 %v5603_v11, %v5627_v30  ;;  %v5630_v13 = vmul.f32 0.005, %v5606_v22  ;;  %v4973_v11 = vadd.f32 %v8509_v45, %v8477_v51 }
 0x2a9   : > { %v5574_v15 = vadd.f32 %v5301_v20, %v4966_v24  ;;  %5704 = vrot.lane.b32.xlu0 %v8567_v23, %s6796_s18  ;;  %5700 = vrot.lane.b32.xlu1 %v8569_v62, %s6796_s18  ;;  %v5361_v3 = vpop.f32.mrf.mxu1  ;;  %v5575_v4 = vadd.f32 %v5321_v7, %v4967_v49  ;;  %v4975_v20 = vadd.f32 %v8515_v38, %v8484_v37 }
 0x2aa   : > { %5702 = vrot.lane.b32.xlu2 %v8572_v57, %s6796_s18  ;;  %v5577_v41 = vadd.f32 %v5361_v3, %v4969_v21  ;;  %v8615_v2 = vmax.f32 %v5606_v22, %v5630_v13  ;;  %v4974_v7 = vadd.f32 %v8513_v39, %v8481_v61 }
 0x2ab   : > { %v5604_v32 = vadd.f32 %v8520_v1, %v5574_v15  ;;  %v5605_v5 = vadd.f32 %v8520_v1, %v5575_v4  ;;  %v5421_v35 = vpop.f32.mrf.mxu0 }
 0x2ac   : > { %v5607_v63 = vadd.f32 %v8520_v1, %v5577_v41  ;;  %v5580_v46 = vadd.f32 %v5421_v35, %v4972_v53  ;;  %v4978_v41 = vadd.f32 %v8524_v10, %v8489_v52 }
 0x2ad   : > { %v5628_v40 = vmul.f32 0.005, %v5604_v32  ;;  %v5629_v29 = vmul.f32 0.005, %v5605_v5 }
 0x2ae   : > { %v5631_v25 = vmul.f32 0.005, %v5607_v63  ;;  %v5610_v31 = vadd.f32 %v8520_v1, %v5580_v46 }
 0x2af   : > { %v8589_v55 = vmax.f32 %v5604_v32, %v5628_v40  ;;  %v8612_v36 = vmax.f32 %v5605_v5, %v5629_v29 }
 0x2b0   : > { %v5381_v60 = vpop.f32.mrf.mxu2  ;;  %v5401_v48 = vpop.f32.mrf.mxu3  ;;  %v8610_v26 = vmax.f32 %v5607_v63, %v5631_v25  ;;  %v5634_v49 = vmul.f32 0.005, %v5610_v31 }
 0x2b1   : > { %5710 = vrot.lane.b32.xlu0 %v8589_v55, %s6796_s18  ;;  %5706 = vrot.lane.b32.xlu1 %v8591_v19, %s6796_s18  ;;  %v5578_v56 = vadd.f32 %v5381_v60, %v4970_v17  ;;  %v5579_v8 = vadd.f32 %v5401_v48, %v4971_v16  ;;  %v5441_v43 = vpop.f32.mrf.mxu1 }
 0x2b2   : > { %5708 = vrot.lane.b32.xlu2 %v8594_v6, %s6796_s18  ;;  %v5581_v15 = vadd.f32 %v5441_v43, %v4973_v11  ;;  %v8631_v34 = vmax.f32 %v5610_v31, %v5634_v49 }
 0x2b3   : > { %v5608_v47 = vadd.f32 %v8520_v1, %v5578_v56  ;;  %v5609_v54 = vadd.f32 %v8520_v1, %v5579_v8  ;;  %v5501_v32 = vpop.f32.mrf.mxu0 }
 0x2b4   : > { %v5611_v37 = vadd.f32 %v8520_v1, %v5581_v15  ;;  %v5584_v5 = vadd.f32 %v5501_v32, %v8511_v59  ;;  %v4979_v59 = vadd.f32 %v8526_v18, %v8491_v12 }
 0x2b5   : > { %v5632_v21 = vmul.f32 0.005, %v5608_v47  ;;  %v5633_v51 = vmul.f32 0.005, %v5609_v54 }
 0x2b6   : > { %v5635_v40 = vmul.f32 0.005, %v5611_v37  ;;  %v5614_v10 = vadd.f32 %v8520_v1, %v5584_v5 }
 0x2b7   : > { %v8633_v58 = vmax.f32 %v5608_v47, %v5632_v21  ;;  %v8636_v4 = vmax.f32 %v5609_v54, %v5633_v51 }
 0x2b8   : > { %v5461_v28 = vpop.f32.mrf.mxu2  ;;  %v5481_v24 = vpop.f32.mrf.mxu3  ;;  %v8653_v53 = vmax.f32 %v5611_v37, %v5635_v40  ;;  %v5638_v16 = vmul.f32 0.005, %v5614_v10 }
 0x2b9   : > { %5716 = vrot.lane.b32.xlu0 %v8610_v26, %s6796_s18  ;;  %5712 = vrot.lane.b32.xlu1 %v8612_v36, %s6796_s18  ;;  %v5583_v3 = vadd.f32 %v5481_v24, %v4975_v20  ;;  %v5582_v45 = vadd.f32 %v5461_v28, %v4974_v7  ;;  %v5521_v30 = vpop.f32.mrf.mxu1 }
 0x2ba   : > { %5714 = vrot.lane.b32.xlu2 %v8615_v2, %s6796_s18  ;;  %v5585_v52 = vadd.f32 %v5521_v30, %v4977_v44  ;;  %v8669_v8 = vmax.f32 %v5614_v10, %v5638_v16 }
 0x2bb   : > { %v5613_v38 = vadd.f32 %v8520_v1, %v5583_v3  ;;  %v5612_v61 = vadd.f32 %v8520_v1, %v5582_v45 }
 0x2bc   : > { %v5615_v0 = vadd.f32 %v8520_v1, %v5585_v52 }
 0x2bd   : > { %v5637_v63 = vmul.f32 0.005, %v5613_v38  ;;  %v5636_v22 = vmul.f32 0.005, %v5612_v61 }
 0x2be   : > { %v5639_v46 = vmul.f32 0.005, %v5615_v0 }
 0x2bf   : > { %v8651_v48 = vmax.f32 %v5613_v38, %v5637_v63  ;;  %v8656_v17 = vmax.f32 %v5612_v61, %v5636_v22 }
 0x2c0   : > { %v5541_v39 = vpop.f32.mrf.mxu2  ;;  %v5561_v42 = vpop.f32.mrf.mxu3  ;;  %v8671_v12 = vmax.f32 %v5615_v0, %v5639_v46 }
 0x2c1   : > { %5722 = vrot.lane.b32.xlu0 %v8631_v34, %s6796_s18  ;;  %5718 = vrot.lane.b32.xlu1 %v8633_v58, %s6796_s18  ;;  %v5586_v35 = vadd.f32 %v5541_v39, %v4978_v41  ;;  %v5587_v25 = vadd.f32 %v5561_v42, %v4979_v59 }
 0x2c2   : > { %5720 = vrot.lane.b32.xlu2 %v8636_v4, %s6796_s18 }
 0x2c3   : > { %v5616_v60 = vadd.f32 %v8520_v1, %v5586_v35  ;;  %v5617_v56 = vadd.f32 %v8520_v1, %v5587_v25 }
 0x2c5   : > { %v5640_v29 = vmul.f32 0.005, %v5616_v60  ;;  %v5641_v18 = vmul.f32 0.005, %v5617_v56 }
 0x2c7   : > { %v8667_v13 = vmax.f32 %v5616_v60, %v5640_v29  ;;  %v8679_v31 = vmax.f32 %v5617_v56, %v5641_v18 }
 0x2c9   : > { %5728 = vrot.lane.b32.xlu0 %v8651_v48, %s6796_s18  ;;  %5724 = vrot.lane.b32.xlu1 %v8653_v53, %s6796_s18 }
 0x2ca   : > { %5726 = vrot.lane.b32.xlu2 %v8656_v17, %s6796_s18 }
 0x2d1   : > { %5734 = vrot.lane.b32.xlu0 %v8667_v13, %s6796_s18  ;;  %5730 = vrot.lane.b32.xlu1 %v8669_v8, %s6796_s18 }
 0x2d2   : > { %5732 = vrot.lane.b32.xlu2 %v8671_v12, %s6796_s18 }
 0x2d9   : > { %5736 = vrot.lane.b32.xlu1 %v8679_v31, %s6796_s18  ;;  %s6266_s18 = smul.u32 192, %s8961_s13 }
 0x2db   : > { %s8830_s25 = scalar_lea.vmem %s8909_s3, %s6266_s18 }
 0x2f4   : > { %v5693_v1 = vpop.permute.xlu2 %5692 }
 0x2fc   : > { %v5697_v47 = vpop.permute.xlu2 %5696 }
 0x304   : > { %v5703_v20 = vpop.permute.xlu2 %5702 }
 0x306   : > { %v5691_v43 = vpop.permute.xlu1 %5690 }
 0x307   : > { %v5738_v54 = vsel %vm270_vm0, %v5691_v43, %v5693_v1 }
 0x308   : > { %v8685_v28 = vmax.f32 %v8529_v33, %v5738_v54 }
 0x30a   : > { %5833 = vrot.lane.b32.xlu2 %v8685_v28, %s6798_s20 }
 0x30e   : > { %v5699_v24 = vpop.permute.xlu0 %5698 }
 0x30f   : > { %v5741_v11 = vsel %vm270_vm0, %v5697_v47, %v5699_v24 }
 0x310   : > { %v8691_v7 = vmax.f32 %v8553_v50, %v5741_v11  ;;  %v5709_v50 = vpop.permute.xlu2 %5708 }
 0x312   : > { %5839 = vrot.lane.b32.xlu2 %v8691_v7, %s6798_s20 }
 0x313   : > { %v5695_v49 = vpop.permute.xlu1 %5694 }
 0x314   : > { %v5739_v21 = vsel %vm270_vm0, %v5693_v1, %v5695_v49  ;;  %v5740_v15 = vsel %vm270_vm0, %v5695_v49, %v5697_v47 }
 0x315   : > { %v8698_v33 = vmax.f32 %v8537_v27, %v5739_v21  ;;  %v8701_v3 = vmax.f32 %v8551_v9, %v5740_v15 }
 0x317   : > { %5837 = vrot.lane.b32.xlu1 %v8701_v3, %s6798_s20  ;;  %5835 = vrot.lane.b32.xlu0 %v8698_v33, %s6798_s20 }
 0x318   : > { %v5715_v30 = vpop.permute.xlu2 %5714 }
 0x31b   : > { %v5705_v51 = vpop.permute.xlu0 %5704  ;;  %v5701_v45 = vpop.permute.xlu1 %5700 }
 0x31c   : > { %v5744_v37 = vsel %vm270_vm0, %v5703_v20, %v5705_v51  ;;  %v5742_v38 = vsel %vm270_vm0, %v5699_v24, %v5701_v45  ;;  %v5743_v32 = vsel %vm270_vm0, %v5701_v45, %v5703_v20 }
 0x31d   : > { %v8711_v27 = vmax.f32 %v8572_v57, %v5744_v37  ;;  %v8714_v9 = vmax.f32 %v8542_v14, %v5742_v38  ;;  %v8717_v61 = vmax.f32 %v8569_v62, %v5743_v32 }
 0x31f   : > { %5845 = vrot.lane.b32.xlu2 %v8711_v27, %s6798_s20  ;;  %5843 = vrot.lane.b32.xlu1 %v8717_v61, %s6798_s20 }
 0x320   : > { %5841 = vrot.lane.b32.xlu0 %v8714_v9, %s6798_s20  ;;  %v5721_v60 = vpop.permute.xlu2 %5720 }
 0x323   : > { %v5711_v39 = vpop.permute.xlu0 %5710  ;;  %v5707_v41 = vpop.permute.xlu1 %5706 }
 0x324   : > { %v5747_v57 = vsel %vm270_vm0, %v5709_v50, %v5711_v39  ;;  %v5745_v14 = vsel %vm270_vm0, %v5705_v51, %v5707_v41  ;;  %v5746_v44 = vsel %vm270_vm0, %v5707_v41, %v5709_v50 }
 0x325   : > { %v8729_v62 = vmax.f32 %v8594_v6, %v5747_v57  ;;  %v8732_v40 = vmax.f32 %v8567_v23, %v5745_v14  ;;  %v8735_v5 = vmax.f32 %v8591_v19, %v5746_v44 }
 0x327   : > { %5851 = vrot.lane.b32.xlu2 %v8729_v62, %s6798_s20  ;;  %5849 = vrot.lane.b32.xlu1 %v8735_v5, %s6798_s20 }
 0x328   : > { %5847 = vrot.lane.b32.xlu0 %v8732_v40, %s6798_s20  ;;  %v5727_v25 = vpop.permute.xlu2 %5726 }
 0x32b   : > { %v5717_v63 = vpop.permute.xlu0 %5716  ;;  %v5713_v35 = vpop.permute.xlu1 %5712 }
 0x32c   : > { %v5750_v6 = vsel %vm270_vm0, %v5715_v30, %v5717_v63  ;;  %v5748_v22 = vsel %vm270_vm0, %v5711_v39, %v5713_v35  ;;  %v5749_v23 = vsel %vm270_vm0, %v5713_v35, %v5715_v30 }
 0x32d   : > { %v8747_v19 = vmax.f32 %v8615_v2, %v5750_v6  ;;  %v8750_v52 = vmax.f32 %v8589_v55, %v5748_v22  ;;  %v8753_v10 = vmax.f32 %v8612_v36, %v5749_v23 }
 0x32f   : > { %5857 = vrot.lane.b32.xlu2 %v8747_v19, %s6798_s20  ;;  %5855 = vrot.lane.b32.xlu1 %v8753_v10, %s6798_s20 }
 0x330   : > { %5853 = vrot.lane.b32.xlu0 %v8750_v52, %s6798_s20  ;;  %v5733_v43 = vpop.permute.xlu2 %5732 }
 0x333   : > { %v5723_v0 = vpop.permute.xlu0 %5722  ;;  %v5719_v42 = vpop.permute.xlu1 %5718 }
 0x334   : > { %v5753_v2 = vsel %vm270_vm0, %v5721_v60, %v5723_v0  ;;  %v5751_v55 = vsel %vm270_vm0, %v5717_v63, %v5719_v42  ;;  %v5752_v59 = vsel %vm270_vm0, %v5719_v42, %v5721_v60 }
 0x335   : > { %v8765_v36 = vmax.f32 %v8636_v4, %v5753_v2  ;;  %v8768_v16 = vmax.f32 %v8610_v26, %v5751_v55  ;;  %v8771_v29 = vmax.f32 %v8633_v58, %v5752_v59 }
 0x337   : > { %5863 = vrot.lane.b32.xlu2 %v8765_v36, %s6798_s20  ;;  %5861 = vrot.lane.b32.xlu1 %v8771_v29, %s6798_s20 }
 0x338   : > { %5859 = vrot.lane.b32.xlu0 %v8768_v16, %s6798_s20 }
 0x33b   : > { %v5729_v46 = vpop.permute.xlu0 %5728  ;;  %v5725_v56 = vpop.permute.xlu1 %5724 }
 0x33c   : > { %v5756_v4 = vsel %vm270_vm0, %v5727_v25, %v5729_v46  ;;  %v5754_v26 = vsel %vm270_vm0, %v5723_v0, %v5725_v56  ;;  %v5755_v18 = vsel %vm270_vm0, %v5725_v56, %v5727_v25 }
 0x33d   : > { %v8783_v58 = vmax.f32 %v8656_v17, %v5756_v4  ;;  %v8786_v1 = vmax.f32 %v8631_v34, %v5754_v26  ;;  %v8789_v47 = vmax.f32 %v8653_v53, %v5755_v18 }
 0x33f   : > { %5869 = vrot.lane.b32.xlu2 %v8783_v58, %s6798_s20  ;;  %5867 = vrot.lane.b32.xlu1 %v8789_v47, %s6798_s20 }
 0x340   : > { %5865 = vrot.lane.b32.xlu0 %v8786_v1, %s6798_s20 }
 0x343   : > { %v5735_v54 = vpop.permute.xlu0 %5734  ;;  %v5731_v24 = vpop.permute.xlu1 %5730 }
 0x344   : > { %v5759_v17 = vsel %vm270_vm0, %v5733_v43, %v5735_v54  ;;  %v5757_v34 = vsel %vm270_vm0, %v5729_v46, %v5731_v24  ;;  %v5758_v53 = vsel %vm270_vm0, %v5731_v24, %v5733_v43 }
 0x345   : > { %v8801_v11 = vmax.f32 %v8671_v12, %v5759_v17  ;;  %v8804_v20 = vmax.f32 %v8651_v48, %v5757_v34  ;;  %v8807_v49 = vmax.f32 %v8669_v8, %v5758_v53 }
 0x347   : > { %5875 = vrot.lane.b32.xlu2 %v8801_v11, %s6798_s20  ;;  %5873 = vrot.lane.b32.xlu1 %v8807_v49, %s6798_s20 }
 0x348   : > { %5871 = vrot.lane.b32.xlu0 %v8804_v20, %s6798_s20 }
 0x34b   : > { %v5737_v21 = vpop.permute.xlu1 %5736 }
 0x34c   : > { %v5760_v15 = vsel %vm270_vm0, %v5735_v54, %v5737_v21  ;;  %v8817_v12 = vmax.f32 %v8679_v31, %v5737_v21 }
 0x34d   : > { %v8820_v48 = vmax.f32 %v8667_v13, %v5760_v15 }
 0x34f   : > { %5879 = vrot.lane.b32.xlu1 %v8817_v12, %s6798_s20 }
 0x350   : > { %5877 = vrot.lane.b32.xlu0 %v8820_v48, %s6798_s20 }
 0x364   : > { %v5834_v8 = vpop.permute.xlu2 %5833 }
 0x36c   : > { %v5840_v50 = vpop.permute.xlu2 %5839 }
 0x379   : > { %v5846_v51 = vpop.permute.xlu2 %5845 }
 0x381   : > { %v5852_v30 = vpop.permute.xlu2 %5851 }
 0x389   : > { %v5836_v45 = vpop.permute.xlu0 %5835  ;;  %v5838_v31 = vpop.permute.xlu1 %5837 }
 0x38a   : > { %v5881_v13 = vsel %vm1992_vm3, %v5834_v8, %v5836_v45  ;;  %v5882_v38 = vsel %vm1992_vm3, %v5836_v45, %v5838_v31  ;;  %v5883_v32 = vsel %vm1992_vm3, %v5838_v31, %v5840_v50  ;;  %v5858_v23 = vpop.permute.xlu2 %5857 }
 0x38b   : > { %v5928_v37 = vmax.f32 %v8685_v28, %v5881_v13  ;;  %v5929_v39 = vmax.f32 %v8698_v33, %v5882_v38  ;;  %v5930_v41 = vmax.f32 %v8701_v3, %v5883_v32 }
 0x38d   : > { %5952 = vst [vmem:[%s8830_s25] sm:$0xff] %v5928_v37 }
 0x38e   : > { %5953 = vst [vmem:[%s8830_s25 + $0x8] sm:$0xff] %v5929_v39 }
 0x38f   : > { %5954 = vst [vmem:[%s8830_s25 + $0x10] sm:$0xff] %v5930_v41 }
 0x391   : > { %v5844_v14 = vpop.permute.xlu1 %5843 }
 0x392   : > { %v5842_v57 = vpop.permute.xlu0 %5841  ;;  %v5886_v63 = vsel %vm1992_vm3, %v5844_v14, %v5846_v51 }
 0x393   : > { %v5884_v44 = vsel %vm1992_vm3, %v5840_v50, %v5842_v57  ;;  %v5885_v28 = vsel %vm1992_vm3, %v5842_v57, %v5844_v14  ;;  %v5933_v3 = vmax.f32 %v8717_v61, %v5886_v63 }
 0x394   : > { %v5931_v35 = vmax.f32 %v8691_v7, %v5884_v44  ;;  %v5932_v33 = vmax.f32 %v8714_v9, %v5885_v28 }
 0x395   : > { %5957 = vst [vmem:[%s8830_s25 + $0x28] sm:$0xff] %v5933_v3 }
 0x396   : > { %5955 = vst [vmem:[%s8830_s25 + $0x18] sm:$0xff] %v5931_v35 }
 0x397   : > { %5956 = vst [vmem:[%s8830_s25 + $0x20] sm:$0xff] %v5932_v33 }
 0x399   : > { %v5850_v22 = vpop.permute.xlu1 %5849 }
 0x39a   : > { %v5848_v6 = vpop.permute.xlu0 %5847  ;;  %v5889_v42 = vsel %vm1992_vm3, %v5850_v22, %v5852_v30 }
 0x39b   : > { %v5887_v60 = vsel %vm1992_vm3, %v5846_v51, %v5848_v6  ;;  %v5888_v0 = vsel %vm1992_vm3, %v5848_v6, %v5850_v22  ;;  %v5936_v61 = vmax.f32 %v8735_v5, %v5889_v42  ;;  %v5864_v5 = vpop.permute.xlu2 %5863 }
 0x39c   : > { %v5934_v7 = vmax.f32 %v8711_v27, %v5887_v60  ;;  %v5935_v9 = vmax.f32 %v8732_v40, %v5888_v0 }
 0x39d   : > { %5960 = vst [vmem:[%s8830_s25 + $0x40] sm:$0xff] %v5936_v61 }
 0x39e   : > { %5958 = vst [vmem:[%s8830_s25 + $0x30] sm:$0xff] %v5934_v7 }
 0x39f   : > { %5959 = vst [vmem:[%s8830_s25 + $0x38] sm:$0xff] %v5935_v9 }
 0x3a1   : > { %v5856_v55 = vpop.permute.xlu1 %5855 }
 0x3a2   : > { %v5854_v2 = vpop.permute.xlu0 %5853  ;;  %v5892_v46 = vsel %vm1992_vm3, %v5856_v55, %v5858_v23 }
 0x3a3   : > { %v5890_v59 = vsel %vm1992_vm3, %v5852_v30, %v5854_v2  ;;  %v5891_v25 = vsel %vm1992_vm3, %v5854_v2, %v5856_v55  ;;  %v5939_v40 = vmax.f32 %v8753_v10, %v5892_v46  ;;  %v5870_v24 = vpop.permute.xlu2 %5869 }
 0x3a4   : > { %v5937_v27 = vmax.f32 %v8729_v62, %v5890_v59  ;;  %v5938_v56 = vmax.f32 %v8750_v52, %v5891_v25 }
 0x3a5   : > { %5963 = vst [vmem:[%s8830_s25 + $0x58] sm:$0xff] %v5939_v40 }
 0x3a6   : > { %5961 = vst [vmem:[%s8830_s25 + $0x48] sm:$0xff] %v5937_v27 }
 0x3a7   : > { %5962 = vst [vmem:[%s8830_s25 + $0x50] sm:$0xff] %v5938_v56 }
 0x3a9   : > { %v5862_v26 = vpop.permute.xlu1 %5861 }
 0x3aa   : > { %v5860_v4 = vpop.permute.xlu0 %5859  ;;  %v5895_v54 = vsel %vm1992_vm3, %v5862_v26, %v5864_v5 }
 0x3ab   : > { %v5893_v18 = vsel %vm1992_vm3, %v5858_v23, %v5860_v4  ;;  %v5894_v43 = vsel %vm1992_vm3, %v5860_v4, %v5862_v26  ;;  %v5942_v10 = vmax.f32 %v8771_v29, %v5895_v54  ;;  %v5876_v8 = vpop.permute.xlu2 %5875 }
 0x3ac   : > { %v5940_v62 = vmax.f32 %v8747_v19, %v5893_v18  ;;  %v5941_v52 = vmax.f32 %v8768_v16, %v5894_v43 }
 0x3ad   : > { %5966 = vst [vmem:[%s8830_s25 + $0x70] sm:$0xff] %v5942_v10 }
 0x3ae   : > { %5964 = vst [vmem:[%s8830_s25 + $0x60] sm:$0xff] %v5940_v62 }
 0x3af   : > { %5965 = vst [vmem:[%s8830_s25 + $0x68] sm:$0xff] %v5941_v52 }
 0x3b1   : > { %v5868_v34 = vpop.permute.xlu1 %5867 }
 0x3b2   : > { %v5866_v17 = vpop.permute.xlu0 %5865  ;;  %v5898_v15 = vsel %vm1992_vm3, %v5868_v34, %v5870_v24 }
 0x3b3   : > { %v5896_v53 = vsel %vm1992_vm3, %v5864_v5, %v5866_v17  ;;  %v5897_v21 = vsel %vm1992_vm3, %v5866_v17, %v5868_v34  ;;  %v5945_v29 = vmax.f32 %v8789_v47, %v5898_v15 }
 0x3b4   : > { %v5943_v19 = vmax.f32 %v8765_v36, %v5896_v53  ;;  %v5944_v16 = vmax.f32 %v8786_v1, %v5897_v21 }
 0x3b5   : > { %5969 = vst [vmem:[%s8830_s25 + $0x88] sm:$0xff] %v5945_v29 }
 0x3b6   : > { %5967 = vst [vmem:[%s8830_s25 + $0x78] sm:$0xff] %v5943_v19 }
 0x3b7   : > { %5968 = vst [vmem:[%s8830_s25 + $0x80] sm:$0xff] %v5944_v16 }
 0x3b9   : > { %v5874_v51 = vpop.permute.xlu1 %5873 }
 0x3ba   : > { %v5872_v50 = vpop.permute.xlu0 %5871  ;;  %v5901_v31 = vsel %vm1992_vm3, %v5874_v51, %v5876_v8 }
 0x3bb   : > { %v5899_v45 = vsel %vm1992_vm3, %v5870_v24, %v5872_v50  ;;  %v5900_v13 = vsel %vm1992_vm3, %v5872_v50, %v5874_v51  ;;  %v5948_v47 = vmax.f32 %v8807_v49, %v5901_v31 }
 0x3bc   : > { %v5946_v36 = vmax.f32 %v8783_v58, %v5899_v45  ;;  %v5947_v1 = vmax.f32 %v8804_v20, %v5900_v13 }
 0x3bd   : > { %5972 = vst [vmem:[%s8830_s25 + $0xa0] sm:$0xff] %v5948_v47 }
 0x3be   : > { %5970 = vst [vmem:[%s8830_s25 + $0x90] sm:$0xff] %v5946_v36 }
 0x3bf   : > { %5971 = vst [vmem:[%s8830_s25 + $0x98] sm:$0xff] %v5947_v1 }
 0x3c1   : > { %v5880_v38 = vpop.permute.xlu1 %5879 }
 0x3c2   : > { %v5878_v37 = vpop.permute.xlu0 %5877  ;;  %v5951_v41 = vmax.f32 %v8817_v12, %v5880_v38 }
 0x3c3   : > { %v5902_v32 = vsel %vm1992_vm3, %v5876_v8, %v5878_v37  ;;  %v5903_v39 = vsel %vm1992_vm3, %v5878_v37, %v5880_v38 }
 0x3c4   : > { %v5949_v30 = vmax.f32 %v8801_v11, %v5902_v32  ;;  %v5950_v58 = vmax.f32 %v8820_v48, %v5903_v39  ;;  %5976 = vst.msk [vmem:[%s8830_s25 + $0xb8] sm:$0xff] %vm5975_vm9, %v5951_v41 }
 0x3c6   : > { %5973 = vst [vmem:[%s8830_s25 + $0xa8] sm:$0xff] %v5949_v30 }
 0x3c7   : > { %5974 = vst [vmem:[%s8830_s25 + $0xb0] sm:$0xff] %v5950_v58 }
 0x3c8 PF: > { %s13_s12 = sadd.s32 1, %s6794_s12  }
 0x3c9   : > { %p10_p4 = scmp.ge.s32.totalorder %s13_s12, 4  }
 0x3cb   :  { %12 = sbr.rel (!%p10_p4) target bundleno = 1 (0x1), region = 70 }

// kernel: fdfe_anomaly_net.5
= control target key start
LH: loop header
LB: loop body
LE: loop exit
PB: predicated region body
PF: predicated region fallthrough
CT: control target
= control target key end

     0   :  { %s5984_s12 = smov 0   ;;  %s7624_s0 = inlined_call_operand.vmem [shape: f32[2,8,2704], index: 0, kind: input, shape index: {}]   ;;  %s7625_s1 = inlined_call_operand.vmem [shape: f32[9,8,8], index: 1, kind: input, shape index: {}]   ;;  %s7626_s2 = inlined_call_operand.vmem [shape: f32[8,1], index: 2, kind: input, shape index: {}]   ;;  %s7627_s3 = inlined_call_operand.vmem [shape: f32[2,8,2623], index: 3, kind: output, shape index: {}]  }
   0x1 LB: > { %s5306_s13 = sadd.s32 4294967295, %s5953_s12   ;;  %p5310_p0 = scmp.ge.s32.totalorder %s5953_s12, 1  ;;  %s5953_s12 = sphi %s5984_s12, %s13_s12  }
   0x2   : > { %p137_p1 = scmp.lt.s32.totalorder %s5953_s12, 3 }
   0x4   : > { %p138_p2 = pnand %p5310_p0, %p137_p1 }
   0x5   : > { %p161_p3 = scmp.lt.s32.totalorder (!%p138_p2), %s5306_s13, 1  ;;  %s5955_s18 = smov (!%p138_p2), 127  }
   0x6   : > { %141 = sbr.rel (%p138_p2) target bundleno = 903 (0x387), region = 32  ;;  %s5956_s19 = smov (!%p138_p2), 126  }
   0x7   : > { %s5957_s20 = smov (!%p138_p2), 102   ;;  %s5958_s21 = smov (!%p138_p2), 101  }
   0x8   : > { %s5959_s26 = smov (!%p138_p2), 100   ;;  %s5960_s27 = smov (!%p138_p2), 76  }
   0x9   : > { %s5961_s5 = smov (!%p138_p2), 75   ;;  %s5962_s8 = smov (!%p138_p2), 74  }
   0xb   : > { %s7629_s13 = smov (!%p161_p3, %s5306_s13), 1  ;;  %vm258_vm0 = vcmask 1039360   ;;  %v6169_v40 = vld [vmem:[%s7625_s1 + $0x8] sm:$0xff]  ;;  %vm300_vm1 = vcmask 64512   ;;  %vm1191_vm2 = vcmask 1031168   ;;  %vm1721_vm3 = vcmask 834560  }
   0xc   : > { %s5512_s14 = smul.u32 176, %s7629_s13  ;;  %vm2251_vm4 = vcmask 826368   ;;  %vm2781_vm5 = vcmask 818176   ;;  %vm3357_vm6 = vcmask 621568   ;;  %vm3890_vm7 = vcmask 613376  }
   0xd   : > { %vm4423_vm8 = vcmask 605184   ;;  %vm5249_vm9 = vcmask 515072  }
   0xe   : > { %s5998_s17 = scalar_lea.vmem %s7624_s0, %s5512_s14 }
   0xf   : > { %v6001_v0 = vld [vmem:[%s5998_s17 + $0x20] sm:$0xff]  ;;  %v6004_v1 = vld [vmem:[%s5998_s17 + $0x28] sm:$0xff]  ;;  %v6023_v6 = vld [vmem:[%s5998_s17 + $0x30] sm:$0xff] }
  0x10   : > { %v6007_v2 = vld [vmem:[%s5998_s17] sm:$0xff]  ;;  %v6011_v3 = vpack.i.bf16 %v6004_v1, %v6001_v0  ;;  %v6014_v4 = vld [vmem:[%s5998_s17 + $0x8] sm:$0xff]  ;;  %v6028_v7 = vld [vmem:[%s5998_s17 + $0x38] sm:$0xff] }
  0x11   : > { %v6018_v5 = vpack.i.bf16 %v6014_v4, %v6007_v2  ;;  %v6031_v8 = vld [vmem:[%s5998_s17 + $0x40] sm:$0xff]  ;;  %v6034_v9 = vld [vmem:[%s5998_s17 + $0x48] sm:$0xff]  ;;  %v6037_v10 = vld [vmem:[%s5998_s17 + $0x10] sm:$0xff]  ;;  %v6048_v13 = vpack.i.bf16 %v6028_v7, %v6023_v6 }
  0x12   : > { %5542 = vrot.lane.b32.xlu1 %v6011_v3, %s5955_s18  ;;  %v6040_v11 = vld [vmem:[%s5998_s17 + $0x18] sm:$0xff]  ;;  %v6044_v12 = vpack.i.bf16 %v6034_v9, %v6031_v8  ;;  %v6057_v15 = vld [vmem:[%s5998_s17 + $0x50] sm:$0xff]  ;;  %v6077_v20 = vld [vmem:[%s5998_s17 + $0x60] sm:$0xff] }
  0x13   : > { %5532 = vrot.lane.b32.xlu0 %v6018_v5, %s5955_s18  ;;  %v6054_v14 = vpack.i.bf16 %v6040_v11, %v6037_v10  ;;  %v6060_v16 = vld [vmem:[%s5998_s17 + $0x58] sm:$0xff]  ;;  %v6071_v18 = vld [vmem:[%s5998_s17 + $0x70] sm:$0xff]  ;;  %v6080_v21 = vld [vmem:[%s5998_s17 + $0x68] sm:$0xff] }
  0x14   : > { %5552 = vrot.lane.b32.xlu2 %v6044_v12, %s5955_s18  ;;  %v6066_v17 = vpack.i.bf16 %v6060_v16, %v6057_v15  ;;  %v6074_v19 = vld [vmem:[%s5998_s17 + $0x78] sm:$0xff]  ;;  %v6090_v23 = vpack.i.bf16 %v6080_v21, %v6077_v20  ;;  %v6093_v24 = vld [vmem:[%s5998_s17 + $0x80] sm:$0xff]  ;;  %v6096_v25 = vld [vmem:[%s5998_s17 + $0x88] sm:$0xff] }
  0x15   : > { %v6084_v22 = vpack.i.bf16 %v6074_v19, %v6071_v18  ;;  %v6102_v26 = vpack.i.bf16 %v6096_v25, %v6093_v24  ;;  %v6107_v27 = vld [vmem:[%s5998_s17 + $0x90] sm:$0xff]  ;;  %v6110_v28 = vld [vmem:[%s5998_s17 + $0x98] sm:$0xff]  ;;  %v6119_v30 = vld [vmem:[%s5998_s17 + $0xa0] sm:$0xff] }
  0x16   : > { %v6116_v29 = vpack.i.bf16 %v6110_v28, %v6107_v27 }
  0x1a   : > { %5547 = vrot.lane.b32.xlu1 %v6048_v13, %s5955_s18 }
  0x1b   : > { %5537 = vrot.lane.b32.xlu0 %v6054_v14, %s5955_s18 }
  0x1c   : > { %5557 = vrot.lane.b32.xlu2 %v6066_v17, %s5955_s18 }
  0x22   : > { %5567 = vrot.lane.b32.xlu1 %v6084_v22, %s5955_s18 }
  0x23   : > { %5562 = vrot.lane.b32.xlu0 %v6090_v23, %s5955_s18 }
  0x24   : > { %5572 = vrot.lane.b32.xlu2 %v6102_v26, %s5955_s18 }
  0x2a   : > { %256 = vrot.lane.b32.xlu1 %v6119_v30, %s5955_s18 }
  0x2b   : > { %5577 = vrot.lane.b32.xlu0 %v6116_v29, %s5955_s18 }
  0x2c   : > { %5582 = vrot.lane.b32.xlu2 %v6018_v5, %s5956_s19 }
  0x32   : > { %5592 = vrot.lane.b32.xlu1 %v6011_v3, %s5956_s19 }
  0x33   : > { %5587 = vrot.lane.b32.xlu0 %v6054_v14, %s5956_s19 }
  0x34   : > { %5597 = vrot.lane.b32.xlu2 %v6048_v13, %s5956_s19 }
  0x3a   : > { %5607 = vrot.lane.b32.xlu1 %v6066_v17, %s5956_s19 }
  0x3b   : > { %5602 = vrot.lane.b32.xlu0 %v6044_v12, %s5956_s19 }
  0x3c   : > { %5612 = vrot.lane.b32.xlu2 %v6090_v23, %s5956_s19 }
  0x42   : > { %5622 = vrot.lane.b32.xlu1 %v6102_v26, %s5956_s19 }
  0x43   : > { %5617 = vrot.lane.b32.xlu0 %v6084_v22, %s5956_s19 }
  0x44   : > { %5627 = vrot.lane.b32.xlu2 %v6116_v29, %s5956_s19 }
  0x4a   : > { %5632 = vrot.lane.b32.xlu1 %v6018_v5, %s5957_s20 }
  0x4b   : > { %1189 = vrot.lane.b32.xlu0 %v6119_v30, %s5956_s19 }
  0x4c   : > { %5637 = vrot.lane.b32.xlu2 %v6054_v14, %s5957_s20 }
  0x52   : > { %5647 = vrot.lane.b32.xlu1 %v6048_v13, %s5957_s20 }
  0x53   : > { %5642 = vrot.lane.b32.xlu0 %v6011_v3, %s5957_s20 }
  0x54   : > { %5652 = vrot.lane.b32.xlu2 %v6044_v12, %s5957_s20 }
  0x5a   : > { %5662 = vrot.lane.b32.xlu1 %v6090_v23, %s5957_s20 }
  0x5b   : > { %5657 = vrot.lane.b32.xlu0 %v6066_v17, %s5957_s20 }
  0x5c   : > { %5667 = vrot.lane.b32.xlu2 %v6084_v22, %s5957_s20 }
  0x62   : > { %5677 = vrot.lane.b32.xlu1 %v6116_v29, %s5957_s20 }
  0x63   : > { %5672 = vrot.lane.b32.xlu0 %v6102_v26, %s5957_s20 }
  0x64   : > { %1719 = vrot.lane.b32.xlu2 %v6119_v30, %s5957_s20 }
  0x6a   : > { %5687 = vrot.lane.b32.xlu1 %v6054_v14, %s5958_s21 }
  0x6b   : > { %5682 = vrot.lane.b32.xlu0 %v6018_v5, %s5958_s21 }
  0x6c   : > { %5692 = vrot.lane.b32.xlu2 %v6011_v3, %s5958_s21 }
  0x6e   : > { %v5553_v31 = vpop.permute.xlu2 %5552 }
  0x6f   : > { %v5555_v36 = vunpack.i.h.bf16 %v5553_v31  ;;  %v5554_v37 = vunpack.i.l.bf16 %v5553_v31 }
  0x71   : > { %v267_v43 = vsel %vm258_vm0, %v5554_v37, %v5555_v36 }
  0x72   : > { %5702 = vrot.lane.b32.xlu1 %v6044_v12, %s5958_s21 }
  0x73   : > { %5697 = vrot.lane.b32.xlu0 %v6048_v13, %s5958_s21 }
  0x74   : > { %5707 = vrot.lane.b32.xlu2 %v6066_v17, %s5958_s21 }
  0x76   : > { %v5558_v44 = vpop.permute.xlu2 %5557 }
  0x77   : > { %v5560_v51 = vunpack.i.h.bf16 %v5558_v44  ;;  %v5559_v52 = vunpack.i.l.bf16 %v5558_v44 }
  0x79   : > { %v268_v59 = vsel %vm258_vm0, %v5555_v36, %v5559_v52  ;;  %v269_v60 = vsel %vm258_vm0, %v5559_v52, %v5560_v51 }
  0x7a   : > { %5717 = vrot.lane.b32.xlu1 %v6084_v22, %s5958_s21 }
  0x7b   : > { %5712 = vrot.lane.b32.xlu0 %v6090_v23, %s5958_s21 }
  0x7c   : > { %5722 = vrot.lane.b32.xlu2 %v6102_v26, %s5958_s21 }
  0x7e   : > { %v5573_v61 = vpop.permute.xlu2 %5572 }
  0x82   : > { %2249 = vrot.lane.b32.xlu1 %v6119_v30, %s5958_s21 }
  0x83   : > { %5727 = vrot.lane.b32.xlu0 %v6116_v29, %s5958_s21 }
  0x84   : > { %v5543_v32 = vpop.permute.xlu1 %5542 }
  0x85   : > { %v5545_v33 = vunpack.i.h.bf16 %v5543_v32  ;;  %v5544_v34 = vunpack.i.l.bf16 %v5543_v32  ;;  %v5533_v35 = vpop.permute.xlu0 %5532 }
  0x86   : > { %v5535_v38 = vunpack.i.h.bf16 %v5533_v35  ;;  %v5534_v39 = vunpack.i.l.bf16 %v5533_v35  ;;  %v5574_v35 = vunpack.i.l.bf16 %v5573_v61 }
  0x87   : > { %v263_v42 = vsel %vm258_vm0, %v5544_v34, %v5545_v33 }
  0x88   : > { %v259_v41 = vsel %vm258_vm0, %v5534_v39, %v5535_v38 }
  0x89   : > { %319 = vmatpush.msra.mxu0 %v259_v41 }
  0x8a   : > { %5314 = vmatmul.msk.f32.vlgmr.msra.gmra.mxu0 %vm300_vm1, %v6169_v40  ;;  %5742 = vrot.lane.b32.xlu1 %v6011_v3, %s5959_s26 }
  0x8b   : > { %399 = vmatpush.msrb.mxu0 %v263_v42 }
  0x8c   : > { %v5548_v45 = vpop.permute.xlu1 %5547 }
  0x8d   : > { %479 = vmatpush.msra.mxu0 %v267_v43  ;;  %v5549_v46 = vunpack.i.l.bf16 %v5548_v45  ;;  %v5538_v47 = vpop.permute.xlu0 %5537  ;;  %v5550_v48 = vunpack.i.h.bf16 %v5548_v45 }
  0x8e   : > { %v5540_v49 = vunpack.i.h.bf16 %v5538_v47  ;;  %v5539_v50 = vunpack.i.l.bf16 %v5538_v47 }
  0x8f   : > { %v264_v56 = vsel %vm258_vm0, %v5545_v33, %v5549_v46  ;;  %v265_v57 = vsel %vm258_vm0, %v5549_v46, %v5550_v48  ;;  %v266_v58 = vsel %vm258_vm0, %v5550_v48, %v5554_v37  ;;  %v5575_v37 = vunpack.i.h.bf16 %v5573_v61 }
  0x90   : > { %v260_v53 = vsel %vm258_vm0, %v5535_v38, %v5539_v50  ;;  %v261_v54 = vsel %vm258_vm0, %v5539_v50, %v5540_v49  ;;  %v262_v55 = vsel %vm258_vm0, %v5540_v49, %v5544_v34 }
  0x91   : > { %339 = vmatpush.msra.mxu1 %v260_v53  ;;  %359 = vmatpush.msra.mxu2 %v261_v54  ;;  %v275_v43 = vsel %vm258_vm0, %v5574_v35, %v5575_v37 }
  0x92   : > { %379 = vmatpush.msra.mxu3 %v262_v55  ;;  %5315 = vmatmul.msk.f32.vlgmr.msra.gmra.mxu1 %vm300_vm1, %v6169_v40  ;;  %v5731_v55 = vpack.i.bf16 %v6037_v10, %v6014_v4 }
  0x93   : > { %5316 = vmatmul.msk.f32.vlgmr.msra.gmra.mxu2 %vm300_vm1, %v6169_v40  ;;  %5317 = vmatmul.msk.f32.vlgmr.msra.gmra.mxu3 %vm300_vm1, %v6169_v40 }
  0x94   : > { %5318 = vmatmul.msk.f32.vlgmr.msrb.gmra.mxu0 %vm300_vm1, %v6169_v40  ;;  %419 = vmatpush.msrb.mxu1 %v264_v56  ;;  %v5568_v62 = vpop.permute.xlu1 %5567 }
  0x95   : > { %439 = vmatpush.msrb.mxu2 %v265_v57  ;;  %459 = vmatpush.msrb.mxu3 %v266_v58  ;;  %v5563_v63 = vpop.permute.xlu0 %5562  ;;  %v5569_v31 = vunpack.i.l.bf16 %v5568_v62  ;;  %v5570_v34 = vunpack.i.h.bf16 %v5568_v62 }
  0x96   : > { %499 = vmatpush.msra.mxu1 %v268_v59  ;;  %v5565_v32 = vunpack.i.h.bf16 %v5563_v63  ;;  %v5564_v33 = vunpack.i.l.bf16 %v5563_v63  ;;  %5757 = vrot.lane.b32.xlu1 %v6066_v17, %s5959_s26 }
  0x97   : > { %519 = vmatpush.msra.mxu2 %v269_v60  ;;  %v273_v41 = vsel %vm258_vm0, %v5569_v31, %v5570_v34  ;;  %v274_v42 = vsel %vm258_vm0, %v5570_v34, %v5574_v35  ;;  %5732 = vrot.lane.b32.xlu2 %v5731_v55, %s5959_s26  ;;  %v6343_v60 = vld [vmem:[%s7625_s1 + $0x10] sm:$0xff] }
  0x98   : > { %v270_v36 = vsel %vm258_vm0, %v5560_v51, %v5564_v33  ;;  %v271_v38 = vsel %vm258_vm0, %v5564_v33, %v5565_v32  ;;  %v272_v39 = vsel %vm258_vm0, %v5565_v32, %v5569_v31  ;;  %v6254_v51 = vld [vmem:[%s7625_s1] sm:$0xff] }
  0x99   : > { %539 = vmatpush.msra.mxu3 %v270_v36  ;;  %559 = vmatpush.msrb.mxu0 %v271_v38 }
  0x9a   : > { %5319 = vmatmul.msk.f32.vlgmr.msrb.gmra.mxu1 %vm300_vm1, %v6169_v40 }
  0x9b   : > { %5320 = vmatmul.msk.f32.vlgmr.msrb.gmra.mxu2 %vm300_vm1, %v6169_v40  ;;  %5321 = vmatmul.msk.f32.vlgmr.msrb.gmra.mxu3 %vm300_vm1, %v6169_v40 }
  0x9c   : > { %5322 = vmatmul.msk.f32.vlgmr.msra.gmra.mxu0 %vm300_vm1, %v6169_v40  ;;  %579 = vmatpush.msrb.mxu1 %v272_v39  ;;  %v257_v47 = vpop.permute.xlu1 %256 }
  0x9d   : > { %v5578_v44 = vpop.permute.xlu0 %5577  ;;  %599 = vmatpush.msrb.mxu2 %v273_v41  ;;  %619 = vmatpush.msrb.mxu3 %v274_v42 }
  0x9e   : > { %v5580_v45 = vunpack.i.h.bf16 %v5578_v44  ;;  %v5579_v46 = vunpack.i.l.bf16 %v5578_v44  ;;  %639 = vmatpush.msra.mxu0 %v275_v43  ;;  %5772 = vrot.lane.b32.xlu1 %v6102_v26, %s5959_s26 }
  0x9f   : > { %5747 = vrot.lane.b32.xlu2 %v6048_v13, %s5959_s26 }
  0xa0   : > { %v276_v48 = vsel %vm258_vm0, %v5575_v37, %v5579_v46  ;;  %v278_v49 = vsel %vm258_vm0, %v5580_v45, %v257_v47  ;;  %v277_v50 = vsel %vm258_vm0, %v5579_v46, %v5580_v45 }
  0xa2   : > { %5323 = vmatmul.msk.f32.vlgmr.msra.gmra.mxu1 %vm300_vm1, %v6169_v40 }
  0xa3   : > { %5324 = vmatmul.msk.f32.vlgmr.msra.gmra.mxu2 %vm300_vm1, %v6169_v40  ;;  %5325 = vmatmul.msk.f32.vlgmr.msra.gmra.mxu3 %vm300_vm1, %v6169_v40 }
  0xa4   : > { %5326 = vmatmul.msk.f32.vlgmr.msrb.gmra.mxu0 %vm300_vm1, %v6169_v40  ;;  %659 = vmatpush.msra.mxu1 %v276_v48 }
  0xa5   : > { %679 = vmatpush.msra.mxu2 %v277_v50  ;;  %699 = vmatpush.msra.mxu3 %v278_v49 }
  0xa6   : > { %719 = vmatpush.msrb.mxu0 %v257_v47  ;;  %5782 = vrot.lane.b32.xlu1 %v6018_v5, %s5960_s27 }
  0xa7   : > { %5762 = vrot.lane.b32.xlu2 %v6090_v23, %s5959_s26 }
  0xaa   : > { %5327 = vmatmul.msk.f32.vlgmr.msrb.gmra.mxu1 %vm300_vm1, %v6169_v40 }
  0xab   : > { %5328 = vmatmul.msk.f32.vlgmr.msrb.gmra.mxu2 %vm300_vm1, %v6169_v40  ;;  %5329 = vmatmul.msk.f32.vlgmr.msrb.gmra.mxu3 %vm300_vm1, %v6169_v40 }
  0xac   : > { %5330 = vmatmul.msk.f32.vlgmr.msra.gmra.mxu0 %vm300_vm1, %v6169_v40  ;;  %742 = vmatpush.msrb.mxu1 %v6007_v2 }
  0xad   : > { %762 = vmatpush.msrb.mxu2 %v6014_v4  ;;  %782 = vmatpush.msrb.mxu3 %v6037_v10 }
  0xae   : > { %802 = vmatpush.msra.mxu0 %v6040_v11  ;;  %5797 = vrot.lane.b32.xlu1 %v6048_v13, %s5960_s27 }
  0xaf   : > { %5777 = vrot.lane.b32.xlu2 %v6116_v29, %s5959_s26 }
  0xb2   : > { %5331 = vmatmul.msk.f32.vlgmr.msra.gmra.mxu1 %vm300_vm1, %v6169_v40 }
  0xb3   : > { %5332 = vmatmul.msk.f32.vlgmr.msra.gmra.mxu2 %vm300_vm1, %v6169_v40  ;;  %5333 = vmatmul.msk.f32.vlgmr.msra.gmra.mxu3 %vm300_vm1, %v6169_v40 }
  0xb4   : > { %5334 = vmatmul.msk.f32.vlgmr.msrb.gmra.mxu0 %vm300_vm1, %v6169_v40  ;;  %822 = vmatpush.msra.mxu1 %v6001_v0  ;;  %v5736_v0 = vpack.i.bf16 %v6007_v2, %v6040_v11  ;;  %v5588_v2 = vpop.permute.xlu0 %5587  ;;  %v5593_v11 = vpop.permute.xlu1 %5592 }
  0xb5   : > { %842 = vmatpush.msra.mxu2 %v6004_v1  ;;  %862 = vmatpush.msra.mxu3 %v6023_v6  ;;  %v5583_v1 = vpop.permute.xlu2 %5582 }
  0xb6   : > { %882 = vmatpush.msrb.mxu0 %v6028_v7  ;;  %5737 = vrot.lane.b32.xlu0 %v5736_v0, %s5959_s26  ;;  %v5585_v6 = vunpack.i.h.bf16 %v5583_v1  ;;  %v5584_v7 = vunpack.i.l.bf16 %v5583_v1 }
  0xb7   : > { %5812 = vrot.lane.b32.xlu1 %v6090_v23, %s5960_s27  ;;  %5787 = vrot.lane.b32.xlu2 %v6054_v14, %s5960_s27 }
  0xba   : > { %5335 = vmatmul.msk.f32.vlgmr.msrb.gmra.mxu1 %vm300_vm1, %v6254_v51 }
  0xbb   : > { %5336 = vmatmul.msk.f32.vlgmr.msrb.gmra.mxu2 %vm300_vm1, %v6254_v51  ;;  %5337 = vmatmul.msk.f32.vlgmr.msrb.gmra.mxu3 %vm300_vm1, %v6254_v51 }
  0xbc   : > { %5338 = vmatmul.msk.f32.vlgmr.msra.gmra.mxu0 %vm300_vm1, %v6254_v51  ;;  %902 = vmatpush.msrb.mxu1 %v6031_v8  ;;  %v5589_v8 = vunpack.i.l.bf16 %v5588_v2  ;;  %v5608_v54 = vpop.permute.xlu1 %5607 }
  0xbd   : > { %922 = vmatpush.msrb.mxu2 %v6034_v9  ;;  %942 = vmatpush.msrb.mxu3 %v6057_v15  ;;  %v5590_v9 = vunpack.i.h.bf16 %v5588_v2  ;;  %v1192_v15 = vsel %vm1191_vm2, %v5584_v7, %v5585_v6  ;;  %v5609_v58 = vunpack.i.l.bf16 %v5608_v54  ;;  %v5610_v59 = vunpack.i.h.bf16 %v5608_v54  ;;  %v6431_v54 = vld [vmem:[%s7625_s1 + $0x18] sm:$0xff] }
  0xbe   : > { %962 = vmatpush.msra.mxu0 %v6060_v16  ;;  %5752 = vrot.lane.b32.xlu0 %v6044_v12, %s5959_s26  ;;  %v1193_v16 = vsel %vm1191_vm2, %v5585_v6, %v5589_v8 }
  0xbf   : > { %5827 = vrot.lane.b32.xlu1 %v6116_v29, %s5960_s27  ;;  %5802 = vrot.lane.b32.xlu2 %v6044_v12, %s5960_s27 }
  0xc2   : > { %5339 = vmatmul.msk.f32.vlgmr.msra.gmra.mxu1 %vm300_vm1, %v6254_v51 }
  0xc3   : > { %5340 = vmatmul.msk.f32.vlgmr.msra.gmra.mxu2 %vm300_vm1, %v6254_v51  ;;  %5341 = vmatmul.msk.f32.vlgmr.msra.gmra.mxu3 %vm300_vm1, %v6254_v51 }
  0xc4   : > { %5342 = vmatmul.msk.f32.vlgmr.msrb.gmra.mxu0 %vm300_vm1, %v6254_v51  ;;  %982 = vmatpush.msra.mxu1 %v6077_v20  ;;  %v5594_v20 = vunpack.i.l.bf16 %v5593_v11  ;;  %v5623_v37 = vpop.permute.xlu1 %5622 }
  0xc5   : > { %1002 = vmatpush.msra.mxu2 %v6080_v21  ;;  %1022 = vmatpush.msra.mxu3 %v6071_v18  ;;  %v1194_v18 = vsel %vm1191_vm2, %v5589_v8, %v5590_v9  ;;  %v5595_v21 = vunpack.i.h.bf16 %v5593_v11  ;;  %v5624_v41 = vunpack.i.l.bf16 %v5623_v37  ;;  %v5625_v42 = vunpack.i.h.bf16 %v5623_v37 }
  0xc6   : > { %1042 = vmatpush.msrb.mxu0 %v6074_v19  ;;  %v5598_v19 = vpop.permute.xlu2 %5597  ;;  %5767 = vrot.lane.b32.xlu0 %v6084_v22, %s5959_s26  ;;  %v1202_v22 = vsel %vm1191_vm2, %v5609_v58, %v5610_v59 }
  0xc7   : > { %v1196_v40 = vsel %vm1191_vm2, %v5594_v20, %v5595_v21  ;;  %v1208_v47 = vsel %vm1191_vm2, %v5624_v41, %v5625_v42  ;;  %5842 = vrot.lane.b32.xlu1 %v6054_v14, %s5961_s5 }
  0xca   : > { %5343 = vmatmul.msk.f32.vlgmr.msrb.gmra.mxu1 %vm300_vm1, %v6254_v51 }
  0xcb   : > { %5344 = vmatmul.msk.f32.vlgmr.msrb.gmra.mxu2 %vm300_vm1, %v6254_v51  ;;  %5345 = vmatmul.msk.f32.vlgmr.msrb.gmra.mxu3 %vm300_vm1, %v6254_v51 }
  0xcc   : > { %5346 = vmatmul.msk.f32.vlgmr.msra.gmra.mxu0 %vm300_vm1, %v6254_v51  ;;  %1062 = vmatpush.msrb.mxu1 %v6093_v24  ;;  %v5599_v24 = vunpack.i.l.bf16 %v5598_v19  ;;  %v5633_v49 = vpop.permute.xlu1 %5632 }
  0xcd   : > { %1082 = vmatpush.msrb.mxu2 %v6096_v25  ;;  %1102 = vmatpush.msrb.mxu3 %v6107_v27  ;;  %v5600_v25 = vunpack.i.h.bf16 %v5598_v19  ;;  %v1195_v27 = vsel %vm1191_vm2, %v5590_v9, %v5594_v20  ;;  %v5635_v0 = vunpack.i.h.bf16 %v5633_v49  ;;  %v5634_v1 = vunpack.i.l.bf16 %v5633_v49 }
  0xce   : > { %1122 = vmatpush.msra.mxu0 %v6110_v28  ;;  %v5603_v28 = vpop.permute.xlu0 %5602  ;;  %v1197_v52 = vsel %vm1191_vm2, %v5595_v21, %v5599_v24  ;;  %v5613_v10 = vpop.permute.xlu2 %5612  ;;  %2779 = vrot.lane.b32.xlu0 %v6119_v30, %s5959_s26 }
  0xcf   : > { %v1198_v53 = vsel %vm1191_vm2, %v5599_v24, %v5600_v25  ;;  %v5604_v56 = vunpack.i.l.bf16 %v5603_v28  ;;  %v5605_v57 = vunpack.i.h.bf16 %v5603_v28  ;;  %v5614_v31 = vunpack.i.l.bf16 %v5613_v10  ;;  %5857 = vrot.lane.b32.xlu1 %v6044_v12, %s5961_s5 }
  0xd0   : > { %v5615_v32 = vunpack.i.h.bf16 %v5613_v10  ;;  %v1722_v7 = vsel %vm1721_vm3, %v5634_v1, %v5635_v0 }
  0xd1   : > { %v1199_v4 = vsel %vm1191_vm2, %v5600_v25, %v5604_v56  ;;  %v1200_v61 = vsel %vm1191_vm2, %v5604_v56, %v5605_v57  ;;  %v1201_v62 = vsel %vm1191_vm2, %v5605_v57, %v5609_v58  ;;  %v1203_v35 = vsel %vm1191_vm2, %v5610_v59, %v5614_v31 }
  0xd2   : > { %5347 = vmatmul.msk.f32.vlgmr.msra.gmra.mxu1 %vm300_vm1, %v6254_v51  ;;  %v1204_v36 = vsel %vm1191_vm2, %v5614_v31, %v5615_v32 }
  0xd3   : > { %5348 = vmatmul.msk.f32.vlgmr.msra.gmra.mxu2 %vm300_vm1, %v6254_v51  ;;  %5349 = vmatmul.msk.f32.vlgmr.msra.gmra.mxu3 %vm300_vm1, %v6254_v51 }
  0xd4   : > { %5350 = vmatmul.msk.f32.vlgmr.msrb.gmra.mxu0 %vm300_vm1, %v6254_v51  ;;  %1142 = vmatpush.msra.mxu1 %v6119_v30 }
  0xd5   : > { %1251 = vmatpush.msra.mxu2 %v1192_v15  ;;  %1271 = vmatpush.msra.mxu3 %v1193_v16 }
  0xd6   : > { %1291 = vmatpush.msrb.mxu0 %v1194_v18  ;;  %v5618_v63 = vpop.permute.xlu0 %5617  ;;  %v5628_v39 = vpop.permute.xlu2 %5627  ;;  %5792 = vrot.lane.b32.xlu0 %v6011_v3, %s5960_s27 }
  0xd7   : > { %v5619_v33 = vunpack.i.l.bf16 %v5618_v63  ;;  %v5620_v34 = vunpack.i.h.bf16 %v5618_v63  ;;  %v5629_v43 = vunpack.i.l.bf16 %v5628_v39  ;;  %v5630_v44 = vunpack.i.h.bf16 %v5628_v39 }
  0xd9   : > { %v1205_v38 = vsel %vm1191_vm2, %v5615_v32, %v5619_v33  ;;  %v1206_v30 = vsel %vm1191_vm2, %v5619_v33, %v5620_v34  ;;  %v1207_v45 = vsel %vm1191_vm2, %v5620_v34, %v5624_v41  ;;  %v1209_v48 = vsel %vm1191_vm2, %v5625_v42, %v5629_v43 }
  0xda   : > { %5351 = vmatmul.msk.f32.vlgmr.msrb.gmra.mxu1 %vm300_vm1, %v6254_v51  ;;  %v1210_v50 = vsel %vm1191_vm2, %v5629_v43, %v5630_v44 }
  0xdb   : > { %5352 = vmatmul.msk.f32.vlgmr.msrb.gmra.mxu2 %vm300_vm1, %v6254_v51  ;;  %5353 = vmatmul.msk.f32.vlgmr.msrb.gmra.mxu3 %vm300_vm1, %v6254_v51 }
  0xdc   : > { %5354 = vmatmul.msk.f32.vlgmr.msra.gmra.mxu0 %vm300_vm1, %v6254_v51  ;;  %1311 = vmatpush.msrb.mxu1 %v1195_v27 }
  0xdd   : > { %1331 = vmatpush.msrb.mxu2 %v1196_v40  ;;  %1351 = vmatpush.msrb.mxu3 %v1197_v52 }
  0xde   : > { %1371 = vmatpush.msra.mxu0 %v1198_v53  ;;  %v1190_v46 = vpop.permute.xlu0 %1189  ;;  %5807 = vrot.lane.b32.xlu0 %v6066_v17, %s5960_s27  ;;  %v5648_v17 = vpop.permute.xlu1 %5647 }
  0xdf   : > { %v1211_v6 = vsel %vm1191_vm2, %v5630_v44, %v1190_v46  ;;  %v5649_v18 = vunpack.i.l.bf16 %v5648_v17  ;;  %v5650_v27 = vunpack.i.h.bf16 %v5648_v17 }
  0xe1   : > { %v1728_v55 = vsel %vm1721_vm3, %v5649_v18, %v5650_v27 }
  0xe2   : > { %5355 = vmatmul.msk.f32.vlgmr.msra.gmra.mxu1 %vm300_vm1, %v6254_v51  ;;  %v5638_v51 = vpop.permute.xlu2 %5637 }
  0xe3   : > { %5357 = vmatmul.msk.f32.vlgmr.msra.gmra.mxu2 %vm300_vm1, %v6343_v60  ;;  %5358 = vmatmul.msk.f32.vlgmr.msra.gmra.mxu3 %vm300_vm1, %v6343_v60  ;;  %v5639_v2 = vunpack.i.l.bf16 %v5638_v51  ;;  %v5640_v11 = vunpack.i.h.bf16 %v5638_v51  ;;  %v3281_v51 = vld [vmem:[%s5998_s17 + $0x70] sm:$0xff] }
  0xe4   : > { %5359 = vmatmul.msk.f32.vlgmr.msrb.gmra.mxu0 %vm300_vm1, %v6343_v60  ;;  %1391 = vmatpush.msra.mxu1 %v1199_v4 }
  0xe5   : > { %1411 = vmatpush.msra.mxu2 %v1200_v61  ;;  %1431 = vmatpush.msra.mxu3 %v1201_v62  ;;  %v1723_v9 = vsel %vm1721_vm3, %v5635_v0, %v5639_v2  ;;  %v1724_v19 = vsel %vm1721_vm3, %v5639_v2, %v5640_v11  ;;  %v3282_v0 = vld [vmem:[%s5998_s17 + $0x78] sm:$0xff] }
  0xe6   : > { %1451 = vmatpush.msrb.mxu0 %v1202_v22  ;;  %v5643_v8 = vpop.permute.xlu0 %5642  ;;  %5822 = vrot.lane.b32.xlu0 %v6102_v26, %s5960_s27  ;;  %v5663_v58 = vpop.permute.xlu1 %5662  ;;  %v6487_v1 = vpack.i.bf16 %v3282_v0, %v3281_v51 }
  0xe7   : > { %v5645_v15 = vunpack.i.h.bf16 %v5643_v8  ;;  %v5644_v16 = vunpack.i.l.bf16 %v5643_v8  ;;  %v5665_v61 = vunpack.i.h.bf16 %v5663_v58  ;;  %v5664_v62 = vunpack.i.l.bf16 %v5663_v58 }
  0xe8   : > { %5817 = vrot.lane.b32.xlu2 %v6487_v1, %s5960_s27  ;;  %5872 = vrot.lane.b32.xlu1 %v6487_v1, %s5961_s5 }
  0xe9   : > { %v1725_v20 = vsel %vm1721_vm3, %v5640_v11, %v5644_v16  ;;  %v1726_v21 = vsel %vm1721_vm3, %v5644_v16, %v5645_v15  ;;  %v1727_v25 = vsel %vm1721_vm3, %v5645_v15, %v5649_v18  ;;  %v1734_v33 = vsel %vm1721_vm3, %v5664_v62, %v5665_v61 }
  0xea   : > { %5360 = vmatmul.msk.f32.vlgmr.msrb.gmra.mxu1 %vm300_vm1, %v6343_v60  ;;  %v5653_v24 = vpop.permute.xlu2 %5652 }
  0xeb   : > { %5361 = vmatmul.msk.f32.vlgmr.msrb.gmra.mxu2 %vm300_vm1, %v6343_v60  ;;  %5362 = vmatmul.msk.f32.vlgmr.msrb.gmra.mxu3 %vm300_vm1, %v6343_v60  ;;  %v5655_v28 = vunpack.i.h.bf16 %v5653_v24  ;;  %v5654_v40 = vunpack.i.l.bf16 %v5653_v24 }
  0xec   : > { %5363 = vmatmul.msk.f32.vlgmr.msra.gmra.mxu0 %vm300_vm1, %v6343_v60  ;;  %1471 = vmatpush.msrb.mxu1 %v1203_v35 }
  0xed   : > { %1491 = vmatpush.msrb.mxu2 %v1204_v36  ;;  %1511 = vmatpush.msrb.mxu3 %v1205_v38  ;;  %v1729_v56 = vsel %vm1721_vm3, %v5650_v27, %v5654_v40  ;;  %v1730_v57 = vsel %vm1721_vm3, %v5654_v40, %v5655_v28 }
  0xee   : > { %1531 = vmatpush.msra.mxu0 %v1206_v30  ;;  %v5658_v26 = vpop.permute.xlu0 %5657  ;;  %v5678_v37 = vpop.permute.xlu1 %5677  ;;  %5837 = vrot.lane.b32.xlu0 %v6018_v5, %s5961_s5 }
  0xef   : > { %v5659_v53 = vunpack.i.l.bf16 %v5658_v26  ;;  %v5660_v10 = vunpack.i.h.bf16 %v5658_v26  ;;  %v5679_v43 = vunpack.i.l.bf16 %v5678_v37 }
  0xf1   : > { %v1731_v59 = vsel %vm1721_vm3, %v5655_v28, %v5659_v53  ;;  %v1732_v31 = vsel %vm1721_vm3, %v5659_v53, %v5660_v10  ;;  %v1733_v32 = vsel %vm1721_vm3, %v5660_v10, %v5664_v62  ;;  %v6521_v53 = vld [vmem:[%s5998_s17 + $0xa0] sm:$0xff] }
  0xf2   : > { %5364 = vmatmul.msk.f32.vlgmr.msra.gmra.mxu1 %vm300_vm1, %v6343_v60  ;;  %v5668_v4 = vpop.permute.xlu2 %5667 }
  0xf3   : > { %5365 = vmatmul.msk.f32.vlgmr.msra.gmra.mxu2 %vm300_vm1, %v6343_v60  ;;  %5366 = vmatmul.msk.f32.vlgmr.msra.gmra.mxu3 %vm300_vm1, %v6343_v60  ;;  %v5669_v63 = vunpack.i.l.bf16 %v5668_v4  ;;  %v5670_v36 = vunpack.i.h.bf16 %v5668_v4 }
  0xf4   : > { %5367 = vmatmul.msk.f32.vlgmr.msrb.gmra.mxu0 %vm300_vm1, %v6343_v60  ;;  %1551 = vmatpush.msra.mxu1 %v1207_v45 }
  0xf5   : > { %1571 = vmatpush.msra.mxu2 %v1208_v47  ;;  %1591 = vmatpush.msra.mxu3 %v1209_v48  ;;  %v1735_v35 = vsel %vm1721_vm3, %v5665_v61, %v5669_v63  ;;  %v1736_v45 = vsel %vm1721_vm3, %v5669_v63, %v5670_v36 }
  0xf6   : > { %1611 = vmatpush.msrb.mxu0 %v1210_v50  ;;  %v5673_v34 = vpop.permute.xlu0 %5672  ;;  %v5688_v15 = vpop.permute.xlu1 %5687  ;;  %5852 = vrot.lane.b32.xlu0 %v6048_v13, %s5961_s5 }
  0xf7   : > { %v5675_v30 = vunpack.i.h.bf16 %v5673_v34  ;;  %v5674_v41 = vunpack.i.l.bf16 %v5673_v34  ;;  %v5690_v26 = vunpack.i.h.bf16 %v5688_v15 }
  0xf9   : > { %v1737_v47 = vsel %vm1721_vm3, %v5670_v36, %v5674_v41  ;;  %v1738_v48 = vsel %vm1721_vm3, %v5674_v41, %v5675_v30  ;;  %v1739_v49 = vsel %vm1721_vm3, %v5675_v30, %v5679_v43  ;;  %v6559_v30 = vld [vmem:[%s7625_s1 + $0x20] sm:$0xff] }
  0xfa   : > { %5368 = vmatmul.msk.f32.vlgmr.msrb.gmra.mxu1 %vm300_vm1, %v6343_v60 }
  0xfb   : > { %5369 = vmatmul.msk.f32.vlgmr.msrb.gmra.mxu2 %vm300_vm1, %v6343_v60  ;;  %5370 = vmatmul.msk.f32.vlgmr.msrb.gmra.mxu3 %vm300_vm1, %v6343_v60 }
  0xfc   : > { %5371 = vmatmul.msk.f32.vlgmr.msra.gmra.mxu0 %vm300_vm1, %v6343_v60  ;;  %1631 = vmatpush.msrb.mxu1 %v1211_v6 }
  0xfd   : > { %1651 = vmatpush.msrb.mxu2 %v1190_v46  ;;  %1781 = vmatpush.msrb.mxu3 %v1722_v7  ;;  %v1720_v46 = vpop.permute.xlu2 %1719  ;;  %v5680_v7 = vunpack.i.h.bf16 %v5678_v37 }
  0xfe   : > { %1801 = vmatpush.msra.mxu0 %v1723_v9  ;;  %v5683_v50 = vpop.permute.xlu0 %5682  ;;  %v5703_v62 = vpop.permute.xlu1 %5702  ;;  %5867 = vrot.lane.b32.xlu0 %v6090_v23, %s5961_s5 }
  0xff   : > { %v5685_v9 = vunpack.i.h.bf16 %v5683_v50  ;;  %v5684_v17 = vunpack.i.l.bf16 %v5683_v50  ;;  %v1741_v16 = vsel %vm1721_vm3, %v5680_v7, %v1720_v46  ;;  %v1740_v18 = vsel %vm1721_vm3, %v5679_v43, %v5680_v7 }
 0x100   : > { %v5704_v34 = vunpack.i.l.bf16 %v5703_v62  ;;  %v5705_v37 = vunpack.i.h.bf16 %v5703_v62 }
 0x102   : > { %5372 = vmatmul.msk.f32.vlgmr.msra.gmra.mxu1 %vm300_vm1, %v6343_v60 }
 0x103   : > { %5373 = vmatmul.msk.f32.vlgmr.msra.gmra.mxu2 %vm300_vm1, %v6343_v60  ;;  %5374 = vmatmul.msk.f32.vlgmr.msra.gmra.mxu3 %vm300_vm1, %v6343_v60 }
 0x104   : > { %5375 = vmatmul.msk.f32.vlgmr.msrb.gmra.mxu0 %vm300_vm1, %v6343_v60  ;;  %1821 = vmatpush.msra.mxu1 %v1724_v19 }
 0x105   : > { %1841 = vmatpush.msra.mxu2 %v1725_v20  ;;  %1861 = vmatpush.msra.mxu3 %v1726_v21  ;;  %v5693_v19 = vpop.permute.xlu2 %5692  ;;  %v2252_v20 = vsel %vm2251_vm4, %v5684_v17, %v5685_v9  ;;  %v5689_v21 = vunpack.i.l.bf16 %v5688_v15 }
 0x106   : > { %1881 = vmatpush.msrb.mxu0 %v1727_v25  ;;  %v5694_v27 = vunpack.i.l.bf16 %v5693_v19  ;;  %v5695_v40 = vunpack.i.h.bf16 %v5693_v19  ;;  %5882 = vrot.lane.b32.xlu0 %v6116_v29, %s5961_s5 }
 0x107   : > { %v6426_v52 = vpop.f32.mrf.mxu0  ;;  %v2253_v58 = vsel %vm2251_vm4, %v5685_v9, %v5689_v21  ;;  %v2254_v4 = vsel %vm2251_vm4, %v5689_v21, %v5690_v26 }
 0x108   : > { %v2255_v10 = vsel %vm2251_vm4, %v5690_v26, %v5694_v27  ;;  %v2256_v61 = vsel %vm2251_vm4, %v5694_v27, %v5695_v40 }
 0x10a   : > { %5376 = vmatmul.msk.f32.vlgmr.msrb.gmra.mxu1 %vm300_vm1, %v6343_v60 }
 0x10b   : > { %5377 = vmatmul.msk.f32.vlgmr.msrb.gmra.mxu2 %vm300_vm1, %v6343_v60  ;;  %5379 = vmatmul.msk.f32.vlgmr.msrb.gmra.mxu3 %vm300_vm1, %v6431_v54 }
 0x10c   : > { %5380 = vmatmul.msk.f32.vlgmr.msra.gmra.mxu0 %vm300_vm1, %v6431_v54  ;;  %1901 = vmatpush.msrb.mxu1 %v1728_v55  ;;  %v6524_v55 = vld [vmem:[%s5998_s17 + $0xa8] sm:$0xff] }
 0x10d   : > { %1921 = vmatpush.msrb.mxu2 %v1729_v56  ;;  %1941 = vmatpush.msrb.mxu3 %v1730_v57  ;;  %v6528_v56 = vpack.i.bf16 %v6524_v55, %v6521_v53  ;;  %v5708_v43 = vpop.permute.xlu2 %5707 }
 0x10e   : > { %1961 = vmatpush.msra.mxu0 %v1731_v59  ;;  %v5698_v59 = vpop.permute.xlu0 %5697  ;;  %v5710_v0 = vunpack.i.h.bf16 %v5708_v43  ;;  %5897 = vrot.lane.b32.xlu0 %v6054_v14, %s5962_s8 }
 0x10f   : > { %v6445_v22 = vpop.f32.mrf.mxu1  ;;  %5832 = vrot.lane.b32.xlu2 %v6528_v56, %s5960_s27  ;;  %v5699_v63 = vunpack.i.l.bf16 %v5698_v59  ;;  %5887 = vrot.lane.b32.xlu1 %v6528_v56, %s5961_s5 }
 0x111   : > { %v6447_v60 = vpop.f32.mrf.mxu0  ;;  %v2257_v41 = vsel %vm2251_vm4, %v5695_v40, %v5699_v63 }
 0x112   : > { %5381 = vmatmul.msk.f32.vlgmr.msra.gmra.mxu1 %vm300_vm1, %v6431_v54 }
 0x113   : > { %5382 = vmatmul.msk.f32.vlgmr.msra.gmra.mxu2 %vm300_vm1, %v6431_v54  ;;  %5383 = vmatmul.msk.f32.vlgmr.msra.gmra.mxu3 %vm300_vm1, %v6431_v54 }
 0x114   : > { %5384 = vmatmul.msk.f32.vlgmr.msrb.gmra.mxu0 %vm300_vm1, %v6431_v54  ;;  %1981 = vmatpush.msra.mxu1 %v1732_v31 }
 0x115   : > { %2001 = vmatpush.msra.mxu2 %v1733_v32  ;;  %2021 = vmatpush.msra.mxu3 %v1734_v33  ;;  %v5700_v33 = vunpack.i.h.bf16 %v5698_v59  ;;  %v5723_v21 = vpop.permute.xlu2 %5722 }
 0x116   : > { %v6461_v38 = vpop.f32.mrf.mxu2  ;;  %v6463_v39 = vpop.f32.mrf.mxu3  ;;  %2041 = vmatpush.msrb.mxu0 %v1735_v35  ;;  %v5724_v59 = vunpack.i.l.bf16 %v5723_v21  ;;  %v5725_v62 = vunpack.i.h.bf16 %v5723_v21  ;;  %5912 = vrot.lane.b32.xlu0 %v6044_v12, %s5962_s8  ;;  %v5945_v12 = vld [vmem:[%s5998_s17 + $0x80] sm:$0xff] }
 0x117   : > { %v6465_v42 = vpop.f32.mrf.mxu1  ;;  %5847 = vrot.lane.b32.xlu2 %v6011_v3, %s5961_s5  ;;  %5902 = vrot.lane.b32.xlu1 %v6011_v3, %s5962_s8 }
 0x119   : > { %v6471_v44 = vpop.f32.mrf.mxu0 }
 0x11a   : > { %5385 = vmatmul.msk.f32.vlgmr.msrb.gmra.mxu1 %vm300_vm1, %v6431_v54 }
 0x11b   : > { %5386 = vmatmul.msk.f32.vlgmr.msrb.gmra.mxu2 %vm300_vm1, %v6431_v54  ;;  %5387 = vmatmul.msk.f32.vlgmr.msrb.gmra.mxu3 %vm300_vm1, %v6431_v54 }
 0x11c   : > { %5388 = vmatmul.msk.f32.vlgmr.msra.gmra.mxu0 %vm300_vm1, %v6431_v54  ;;  %2061 = vmatpush.msrb.mxu1 %v1736_v45  ;;  %v2258_v45 = vsel %vm2251_vm4, %v5699_v63, %v5700_v33  ;;  %v5943_v63 = vld [vmem:[%s5998_s17 + $0x50] sm:$0xff] }
 0x11d   : > { %2081 = vmatpush.msrb.mxu2 %v1737_v47  ;;  %2101 = vmatpush.msrb.mxu3 %v1738_v48  ;;  %v2260_v47 = vsel %vm2251_vm4, %v5704_v34, %v5705_v37  ;;  %v5713_v48 = vpop.permute.xlu0 %5712 }
 0x11e   : > { %v6489_v2 = vpop.f32.mrf.mxu2  ;;  %v6491_v6 = vpop.f32.mrf.mxu3  ;;  %2121 = vmatpush.msra.mxu0 %v1739_v49  ;;  %v5709_v49 = vunpack.i.l.bf16 %v5708_v43  ;;  %v5714_v7 = vunpack.i.l.bf16 %v5713_v48  ;;  %v5715_v9 = vunpack.i.h.bf16 %v5713_v48  ;;  %5927 = vrot.lane.b32.xlu0 %v6487_v1, %s5962_s8 }
 0x11f   : > { %v6493_v8 = vpop.f32.mrf.mxu1 }
 0x120   : > { %v2261_v15 = vsel %vm2251_vm4, %v5705_v37, %v5709_v49  ;;  %v2263_v19 = vsel %vm2251_vm4, %v5710_v0, %v5714_v7 }
 0x121   : > { %v6497_v11 = vpop.f32.mrf.mxu0 }
 0x122   : > { %5389 = vmatmul.msk.f32.vlgmr.msra.gmra.mxu1 %vm300_vm1, %v6431_v54 }
 0x123   : > { %5390 = vmatmul.msk.f32.vlgmr.msra.gmra.mxu2 %vm300_vm1, %v6431_v54  ;;  %5391 = vmatmul.msk.f32.vlgmr.msra.gmra.mxu3 %vm300_vm1, %v6431_v54 }
 0x124   : > { %5392 = vmatmul.msk.f32.vlgmr.msrb.gmra.mxu0 %vm300_vm1, %v6431_v54  ;;  %2181 = vmatpush.msra.mxu3 %v1720_v46  ;;  %v2259_v46 = vsel %vm2251_vm4, %v5700_v33, %v5704_v34  ;;  %v5944_v33 = vld [vmem:[%s5998_s17 + $0x58] sm:$0xff] }
 0x125   : > { %2141 = vmatpush.msra.mxu1 %v1740_v18  ;;  %2161 = vmatpush.msra.mxu2 %v1741_v16  ;;  %v5718_v16 = vpop.permute.xlu1 %5717  ;;  %v2262_v18 = vsel %vm2251_vm4, %v5709_v49, %v5710_v0  ;;  %v5861_v34 = vpack.i.bf16 %v5944_v33, %v5943_v63 }
 0x126   : > { %v6512_v24 = vpop.f32.mrf.mxu2  ;;  %v6514_v25 = vpop.f32.mrf.mxu3  ;;  %2311 = vmatpush.msrb.mxu0 %v2252_v20  ;;  %v2264_v20 = vsel %vm2251_vm4, %v5714_v7, %v5715_v9  ;;  %v5719_v26 = vunpack.i.l.bf16 %v5718_v16  ;;  %4419 = vrot.lane.b32.xlu0 %v6521_v53, %s5962_s8 }
 0x127   : > { %v6518_v28 = vpop.f32.mrf.mxu1  ;;  %5862 = vrot.lane.b32.xlu2 %v5861_v34, %s5961_s5  ;;  %5917 = vrot.lane.b32.xlu1 %v5861_v34, %s5962_s8 }
 0x129   : > { %v6530_v57 = vpop.f32.mrf.mxu0 }
 0x12a   : > { %5393 = vmatmul.msk.f32.vlgmr.msrb.gmra.mxu1 %vm300_vm1, %v6431_v54 }
 0x12b   : > { %5394 = vmatmul.msk.f32.vlgmr.msrb.gmra.mxu2 %vm300_vm1, %v6431_v54  ;;  %5395 = vmatmul.msk.f32.vlgmr.msrb.gmra.mxu3 %vm300_vm1, %v6431_v54 }
 0x12c   : > { %5396 = vmatmul.msk.f32.vlgmr.msra.gmra.mxu0 %vm300_vm1, %v6431_v54  ;;  %2331 = vmatpush.msrb.mxu1 %v2253_v58  ;;  %v5720_v58 = vunpack.i.h.bf16 %v5718_v16 }
 0x12d   : > { %2351 = vmatpush.msrb.mxu2 %v2254_v4  ;;  %2371 = vmatpush.msrb.mxu3 %v2255_v10  ;;  %v2250_v43 = vpop.permute.xlu1 %2249 }
 0x12e   : > { %v6546_v31 = vpop.f32.mrf.mxu2  ;;  %v6548_v32 = vpop.f32.mrf.mxu3  ;;  %2391 = vmatpush.msra.mxu0 %v2256_v61  ;;  %v2267_v56 = vsel %vm2251_vm4, %v5720_v58, %v5724_v59 }
 0x12f   : > { %v6552_v35 = vpop.f32.mrf.mxu1 }
 0x131   : > { %v6554_v36 = vpop.f32.mrf.mxu0 }
 0x132   : > { %5397 = vmatmul.msk.f32.vlgmr.msra.gmra.mxu1 %vm300_vm1, %v6431_v54 }
 0x133   : > { %5398 = vmatmul.msk.f32.vlgmr.msra.gmra.mxu2 %vm300_vm1, %v6431_v54  ;;  %5399 = vmatmul.msk.f32.vlgmr.msra.gmra.mxu3 %vm300_vm1, %v6431_v54 }
 0x134   : > { %5401 = vmatmul.msk.f32.vlgmr.msrb.gmra.mxu0 %vm300_vm1, %v6559_v30  ;;  %2411 = vmatpush.msra.mxu1 %v2257_v41  ;;  %v2265_v41 = vsel %vm2251_vm4, %v5715_v9, %v5719_v26  ;;  %v5733_v9 = vpop.permute.xlu2 %5732 }
 0x135   : > { %2431 = vmatpush.msra.mxu2 %v2258_v45  ;;  %2451 = vmatpush.msra.mxu3 %v2259_v46  ;;  %v2268_v45 = vsel %vm2251_vm4, %v5724_v59, %v5725_v62  ;;  %v5734_v21 = vunpack.i.l.bf16 %v5733_v9 }
 0x136   : > { %v6575_v50 = vpop.f32.mrf.mxu2  ;;  %v6577_v51 = vpop.f32.mrf.mxu3  ;;  %2471 = vmatpush.msrb.mxu0 %v2260_v47 }
 0x137   : > { %v6581_v54 = vpop.f32.mrf.mxu1 }
 0x139   : > { %v6583_v17 = vpop.f32.mrf.mxu0 }
 0x13a   : > { %5402 = vmatmul.msk.f32.vlgmr.msrb.gmra.mxu1 %vm300_vm1, %v6559_v30 }
 0x13b   : > { %5403 = vmatmul.msk.f32.vlgmr.msrb.gmra.mxu2 %vm300_vm1, %v6559_v30  ;;  %5404 = vmatmul.msk.f32.vlgmr.msrb.gmra.mxu3 %vm300_vm1, %v6559_v30 }
 0x13c   : > { %5405 = vmatmul.msk.f32.vlgmr.msra.gmra.mxu0 %vm300_vm1, %v6559_v30  ;;  %2491 = vmatpush.msrb.mxu1 %v2261_v15 }
 0x13d   : > { %2511 = vmatpush.msrb.mxu2 %v2262_v18  ;;  %2531 = vmatpush.msrb.mxu3 %v2263_v19  ;;  %v5743_v18 = vpop.permute.xlu1 %5742  ;;  %v5946_v19 = vld [vmem:[%s5998_s17 + $0x88] sm:$0xff] }
 0x13e   : > { %v764_v27 = vpop.f32.mrf.mxu2  ;;  %v784_v40 = vpop.f32.mrf.mxu3  ;;  %2551 = vmatpush.msra.mxu0 %v2264_v20  ;;  %v5876_v20 = vpack.i.bf16 %v5946_v19, %v5945_v12 }
 0x13f   : > { %v6602_v4 = vadd.f32 %v764_v27, %v6445_v22  ;;  %v6605_v10 = vadd.f32 %v784_v40, %v6461_v38  ;;  %v6607_v61 = vpop.f32.mrf.mxu1  ;;  %v5728_v22 = vpop.permute.xlu0 %5727  ;;  %v2266_v38 = vsel %vm2251_vm4, %v5719_v26, %v5720_v58  ;;  %v5735_v58 = vunpack.i.h.bf16 %v5733_v9 }
 0x140   : > { %v5729_v14 = vunpack.i.l.bf16 %v5728_v22  ;;  %v5730_v48 = vunpack.i.h.bf16 %v5728_v22  ;;  %5877 = vrot.lane.b32.xlu2 %v5876_v20, %s5961_s5  ;;  %5932 = vrot.lane.b32.xlu1 %v5876_v20, %s5962_s8  ;;  %v825_v53 = vadd.f32 %v6607_v61, %v6447_v60 }
 0x141   : > { %v6611_v37 = vpop.f32.mrf.mxu0 }
 0x142   : > { %5406 = vmatmul.msk.f32.vlgmr.msra.gmra.mxu1 %vm300_vm1, %v6559_v30  ;;  %v2269_v16 = vsel %vm2251_vm4, %v5725_v62, %v5729_v14  ;;  %v2271_v3 = vsel %vm2251_vm4, %v5730_v48, %v2250_v43 }
 0x143   : > { %5407 = vmatmul.msk.f32.vlgmr.msra.gmra.mxu2 %vm300_vm1, %v6559_v30  ;;  %5408 = vmatmul.msk.f32.vlgmr.msra.gmra.mxu3 %vm300_vm1, %v6559_v30 }
 0x144   : > { %5409 = vmatmul.msk.f32.vlgmr.msrb.gmra.mxu0 %vm300_vm1, %v6559_v30  ;;  %2571 = vmatpush.msra.mxu1 %v2265_v41  ;;  %v5744_v41 = vunpack.i.l.bf16 %v5743_v18 }
 0x145   : > { %2591 = vmatpush.msra.mxu2 %v2266_v38  ;;  %2611 = vmatpush.msra.mxu3 %v2267_v56  ;;  %v2783_v56 = vsel %vm2781_vm5, %v5734_v21, %v5735_v58  ;;  %v5758_v12 = vpop.permute.xlu1 %5757 }
 0x146   : > { %v844_v46 = vpop.f32.mrf.mxu2  ;;  %v864_v47 = vpop.f32.mrf.mxu3  ;;  %2631 = vmatpush.msrb.mxu0 %v2268_v45  ;;  %v5745_v45 = vunpack.i.h.bf16 %v5743_v18 }
 0x147   : > { %v6631_v49 = vadd.f32 %v844_v46, %v6465_v42  ;;  %v6634_v0 = vadd.f32 %v864_v47, %v6489_v2  ;;  %v6636_v7 = vpop.f32.mrf.mxu1  ;;  %v2270_v42 = vsel %vm2251_vm4, %v5729_v14, %v5730_v48  ;;  %v5738_v2 = vpop.permute.xlu0 %5737 }
 0x148   : > { %v5740_v26 = vunpack.i.h.bf16 %v5738_v2  ;;  %v5739_v59 = vunpack.i.l.bf16 %v5738_v2  ;;  %5892 = vrot.lane.b32.xlu2 %v6018_v5, %s5962_s8  ;;  %v2786_v18 = vsel %vm2781_vm5, %v5744_v41, %v5745_v45  ;;  %4421 = vrot.lane.b32.xlu1 %v6524_v55, %s5962_s8 }
 0x149   : > { %v6638_v15 = vpop.f32.mrf.mxu0 }
 0x14a   : > { %5410 = vmatmul.msk.f32.vlgmr.msrb.gmra.mxu1 %vm300_vm1, %v6559_v30  ;;  %v2782_v38 = vsel %vm2781_vm5, %v5740_v26, %v5734_v21 }
 0x14b   : > { %5411 = vmatmul.msk.f32.vlgmr.msrb.gmra.mxu2 %vm300_vm1, %v6559_v30  ;;  %5412 = vmatmul.msk.f32.vlgmr.msrb.gmra.mxu3 %vm300_vm1, %v6559_v30 }
 0x14c   : > { %5413 = vmatmul.msk.f32.vlgmr.msra.gmra.mxu0 %vm300_vm1, %v6559_v30  ;;  %2651 = vmatpush.msrb.mxu1 %v2269_v16 }
 0x14d   : > { %2671 = vmatpush.msrb.mxu2 %v2270_v42  ;;  %2691 = vmatpush.msrb.mxu3 %v2271_v3  ;;  %v5773_v1 = vpop.permute.xlu1 %5772 }
 0x14e   : > { %v924_v27 = vpop.f32.mrf.mxu2  ;;  %v944_v40 = vpop.f32.mrf.mxu3  ;;  %2711 = vmatpush.msra.mxu0 %v2250_v43 }
 0x14f   : > { %v6657_v62 = vadd.f32 %v924_v27, %v6493_v8  ;;  %v6660_v63 = vadd.f32 %v944_v40, %v6512_v24  ;;  %v6662_v33 = vpop.f32.mrf.mxu1  ;;  %v2784_v8 = vsel %vm2781_vm5, %v5735_v58, %v5739_v59  ;;  %v5748_v43 = vpop.permute.xlu2 %5747  ;;  %v2785_v24 = vsel %vm2781_vm5, %v5739_v59, %v5744_v41  ;;  %v6717_v41 = vld [vmem:[%s7625_s1 + $0x28] sm:$0xff] }
 0x150   : > { %v5753_v34 = vpop.permute.xlu0 %5752  ;;  %v5750_v47 = vunpack.i.h.bf16 %v5748_v43  ;;  %v5749_v48 = vunpack.i.l.bf16 %v5748_v43  ;;  %v5760_v27 = vunpack.i.h.bf16 %v5758_v12  ;;  %v5759_v40 = vunpack.i.l.bf16 %v5758_v12  ;;  %5907 = vrot.lane.b32.xlu2 %v6048_v13, %s5962_s8 }
 0x151   : > { %v6665_v22 = vpop.f32.mrf.mxu0  ;;  %v5754_v42 = vunpack.i.l.bf16 %v5753_v34  ;;  %v5755_v20 = vunpack.i.h.bf16 %v5753_v34  ;;  %v745_v43 = vadd.f32 %v6581_v54, %v6426_v52  ;;  %v5775_v12 = vunpack.i.h.bf16 %v5773_v1 }
 0x152   : > { %5414 = vmatmul.msk.f32.vlgmr.msra.gmra.mxu1 %vm300_vm1, %v6559_v30  ;;  %v2787_v5 = vsel %vm2781_vm5, %v5745_v45, %v5749_v48 }
 0x153   : > { %5415 = vmatmul.msk.f32.vlgmr.msra.gmra.mxu2 %vm300_vm1, %v6559_v30  ;;  %5416 = vmatmul.msk.f32.vlgmr.msra.gmra.mxu3 %vm300_vm1, %v6559_v30  ;;  %v2790_v13 = vsel %vm2781_vm5, %v5754_v42, %v5755_v20 }
 0x154   : > { %5417 = vmatmul.msk.f32.vlgmr.msrb.gmra.mxu0 %vm300_vm1, %v6559_v30  ;;  %2841 = vmatpush.msra.mxu1 %v2782_v38 }
 0x155   : > { %2861 = vmatpush.msra.mxu2 %v2783_v56  ;;  %2881 = vmatpush.msra.mxu3 %v2784_v8 }
 0x156   : > { %v1004_v14 = vpop.f32.mrf.mxu2  ;;  %v1024_v46 = vpop.f32.mrf.mxu3  ;;  %2901 = vmatpush.msrb.mxu0 %v2785_v24 }
 0x157   : > { %v6682_v9 = vadd.f32 %v1004_v14, %v6518_v28  ;;  %v6685_v16 = vadd.f32 %v1024_v46, %v6546_v31  ;;  %v6687_v3 = vpop.f32.mrf.mxu1  ;;  %v2788_v28 = vsel %vm2781_vm5, %v5749_v48, %v5750_v47  ;;  %v2789_v31 = vsel %vm2781_vm5, %v5750_v47, %v5754_v42  ;;  %v5763_v19 = vpop.permute.xlu2 %5762 }
 0x158   : > { %v5764_v38 = vunpack.i.l.bf16 %v5763_v19  ;;  %v5768_v8 = vpop.permute.xlu0 %5767  ;;  %v5765_v24 = vunpack.i.h.bf16 %v5763_v19  ;;  %5922 = vrot.lane.b32.xlu2 %v6090_v23, %s5962_s8 }
 0x159   : > { %v6690_v2 = vpop.f32.mrf.mxu0  ;;  %v5770_v14 = vunpack.i.h.bf16 %v5768_v8  ;;  %v5769_v46 = vunpack.i.l.bf16 %v5768_v8 }
 0x15a   : > { %5418 = vmatmul.msk.f32.vlgmr.msrb.gmra.mxu1 %vm300_vm1, %v6559_v30  ;;  %v2793_v55 = vsel %vm2781_vm5, %v5760_v27, %v5764_v38  ;;  %v2794_v54 = vsel %vm2781_vm5, %v5764_v38, %v5765_v24 }
 0x15b   : > { %5419 = vmatmul.msk.f32.vlgmr.msrb.gmra.mxu2 %vm300_vm1, %v6559_v30  ;;  %5420 = vmatmul.msk.f32.vlgmr.msrb.gmra.mxu3 %vm300_vm1, %v6559_v30  ;;  %v2795_v23 = vsel %vm2781_vm5, %v5765_v24, %v5769_v46 }
 0x15c   : > { %5421 = vmatmul.msk.f32.vlgmr.msra.gmra.mxu0 %vm300_vm1, %v6559_v30  ;;  %2921 = vmatpush.msrb.mxu1 %v2786_v18  ;;  %v5774_v18 = vunpack.i.l.bf16 %v5773_v1 }
 0x15d   : > { %2941 = vmatpush.msrb.mxu2 %v2787_v5  ;;  %2961 = vmatpush.msrb.mxu3 %v2788_v28  ;;  %v2796_v28 = vsel %vm2781_vm5, %v5769_v46, %v5770_v14 }
 0x15e   : > { %v1084_v21 = vpop.f32.mrf.mxu2  ;;  %v1104_v26 = vpop.f32.mrf.mxu3  ;;  %2981 = vmatpush.msra.mxu0 %v2789_v31  ;;  %v2798_v61 = vsel %vm2781_vm5, %v5774_v18, %v5775_v12 }
 0x15f   : > { %v6707_v58 = vadd.f32 %v1084_v21, %v6552_v35  ;;  %v6710_v59 = vadd.f32 %v1104_v26, %v6575_v50  ;;  %v6712_v30 = vpop.f32.mrf.mxu1  ;;  %v2791_v35 = vsel %vm2781_vm5, %v5755_v20, %v5759_v40  ;;  %v2792_v50 = vsel %vm2781_vm5, %v5759_v40, %v5760_v27  ;;  %v5778_v5 = vpop.permute.xlu2 %5777 }
 0x160   : > { %v5780_v20 = vunpack.i.h.bf16 %v5778_v5  ;;  %v5779_v21 = vunpack.i.l.bf16 %v5778_v5  ;;  %5937 = vrot.lane.b32.xlu2 %v6116_v29, %s5962_s8  ;;  %v2780_v38 = vpop.permute.xlu0 %2779 }
 0x161   : > { %v6721_v56 = vpop.f32.mrf.mxu0 }
 0x162   : > { %5423 = vmatmul.msk.f32.vlgmr.msra.gmra.mxu1 %vm300_vm1, %v6717_v41  ;;  %v2800_v29 = vsel %vm2781_vm5, %v5779_v21, %v5780_v20 }
 0x163   : > { %5424 = vmatmul.msk.f32.vlgmr.msra.gmra.mxu2 %vm300_vm1, %v6717_v41  ;;  %5425 = vmatmul.msk.f32.vlgmr.msra.gmra.mxu3 %vm300_vm1, %v6717_v41 }
 0x164   : > { %5426 = vmatmul.msk.f32.vlgmr.msrb.gmra.mxu0 %vm300_vm1, %v6717_v41  ;;  %3001 = vmatpush.msra.mxu1 %v2790_v13  ;;  %v5783_v13 = vpop.permute.xlu1 %5782 }
 0x165   : > { %3021 = vmatpush.msra.mxu2 %v2791_v35  ;;  %3041 = vmatpush.msra.mxu3 %v2792_v50  ;;  %v2799_v35 = vsel %vm2781_vm5, %v5775_v12, %v5779_v21  ;;  %v5784_v24 = vunpack.i.l.bf16 %v5783_v13 }
 0x166   : > { %v1253_v34 = vpop.f32.mrf.mxu2  ;;  %v1273_v45 = vpop.f32.mrf.mxu3  ;;  %3061 = vmatpush.msrb.mxu0 %v2793_v55  ;;  %v905_v55 = vadd.f32 %v6636_v7, %v6471_v44 }
 0x167   : > { %v6741_v47 = vadd.f32 %v1253_v34, %v745_v43  ;;  %v6744_v48 = vadd.f32 %v1273_v45, %v6602_v4  ;;  %v6746_v42 = vpop.f32.mrf.mxu1  ;;  %v2797_v4 = vsel %vm2781_vm5, %v5770_v14, %v5774_v18  ;;  %v5788_v50 = vpop.permute.xlu2 %5787  ;;  %v5785_v43 = vunpack.i.h.bf16 %v5783_v13 }
 0x168   : > { %v5789_v34 = vunpack.i.l.bf16 %v5788_v50  ;;  %v5790_v18 = vunpack.i.h.bf16 %v5788_v50  ;;  %v5793_v44 = vpop.permute.xlu0 %5792  ;;  %v1065_v50 = vadd.f32 %v6687_v3, %v6530_v57  ;;  %v6846_v57 = vld [vmem:[%s7625_s1 + $0x30] sm:$0xff] }
 0x169   : > { %v6748_v52 = vpop.f32.mrf.mxu0  ;;  %v3358_v7 = vsel %vm3357_vm6, %v5784_v24, %v5785_v43 }
 0x16a   : > { %5427 = vmatmul.msk.f32.vlgmr.msrb.gmra.mxu1 %vm300_vm1, %v6717_v41  ;;  %v3359_v5 = vsel %vm3357_vm6, %v5785_v43, %v5789_v34 }
 0x16b   : > { %5428 = vmatmul.msk.f32.vlgmr.msrb.gmra.mxu2 %vm300_vm1, %v6717_v41  ;;  %5429 = vmatmul.msk.f32.vlgmr.msrb.gmra.mxu3 %vm300_vm1, %v6717_v41 }
 0x16c   : > { %5430 = vmatmul.msk.f32.vlgmr.msra.gmra.mxu0 %vm300_vm1, %v6717_v41  ;;  %3081 = vmatpush.msrb.mxu1 %v2794_v54 }
 0x16d   : > { %3101 = vmatpush.msrb.mxu2 %v2795_v23  ;;  %3121 = vmatpush.msrb.mxu3 %v2796_v28  ;;  %v5798_v23 = vpop.permute.xlu1 %5797  ;;  %v985_v28 = vadd.f32 %v6662_v33, %v6497_v11 }
 0x16e   : > { %v1333_v31 = vpop.f32.mrf.mxu2  ;;  %v1353_v19 = vpop.f32.mrf.mxu3  ;;  %3141 = vmatpush.msra.mxu0 %v2797_v4  ;;  %v5794_v4 = vunpack.i.l.bf16 %v5793_v44  ;;  %v5800_v13 = vunpack.i.h.bf16 %v5798_v23 }
 0x16f   : > { %v6768_v26 = vadd.f32 %v1333_v31, %v825_v53  ;;  %v6771_v27 = vadd.f32 %v1353_v19, %v6631_v49  ;;  %v6773_v40 = vpop.f32.mrf.mxu1  ;;  %v2801_v49 = vsel %vm2781_vm5, %v5780_v20, %v2780_v38  ;;  %v5795_v31 = vunpack.i.h.bf16 %v5793_v44  ;;  %v5803_v33 = vpop.permute.xlu2 %5802 }
 0x170   : > { %v5799_v19 = vunpack.i.l.bf16 %v5798_v23  ;;  %v3361_v11 = vsel %vm3357_vm6, %v5790_v18, %v5794_v4  ;;  %v5805_v43 = vunpack.i.h.bf16 %v5803_v33 }
 0x171   : > { %v6775_v60 = vpop.f32.mrf.mxu0 }
 0x172   : > { %5431 = vmatmul.msk.f32.vlgmr.msra.gmra.mxu1 %vm300_vm1, %v6717_v41 }
 0x173   : > { %5432 = vmatmul.msk.f32.vlgmr.msra.gmra.mxu2 %vm300_vm1, %v6717_v41  ;;  %5433 = vmatmul.msk.f32.vlgmr.msra.gmra.mxu3 %vm300_vm1, %v6717_v41 }
 0x174   : > { %5434 = vmatmul.msk.f32.vlgmr.msrb.gmra.mxu0 %vm300_vm1, %v6717_v41  ;;  %3161 = vmatpush.msra.mxu1 %v2798_v61 }
 0x175   : > { %3181 = vmatpush.msra.mxu2 %v2799_v35  ;;  %3201 = vmatpush.msra.mxu3 %v2800_v29  ;;  %v3362_v35 = vsel %vm3357_vm6, %v5794_v4, %v5795_v31  ;;  %v3363_v29 = vsel %vm3357_vm6, %v5795_v31, %v5799_v19 }
 0x176   : > { %v1413_v8 = vpop.f32.mrf.mxu2  ;;  %v1433_v1 = vpop.f32.mrf.mxu3  ;;  %3221 = vmatpush.msrb.mxu0 %v2801_v49 }
 0x177   : > { %v6791_v45 = vadd.f32 %v1413_v8, %v905_v55  ;;  %v6794_v14 = vadd.f32 %v1433_v1, %v6657_v62  ;;  %v6796_v46 = vpop.f32.mrf.mxu1  ;;  %v3360_v62 = vsel %vm3357_vm6, %v5789_v34, %v5790_v18  ;;  %v5808_v49 = vpop.permute.xlu0 %5807  ;;  %v5804_v55 = vunpack.i.l.bf16 %v5803_v33 }
 0x178   : > { %v5809_v24 = vunpack.i.l.bf16 %v5808_v49  ;;  %v5818_v4 = vpop.permute.xlu2 %5817 }
 0x179   : > { %v6798_v54 = vpop.f32.mrf.mxu0  ;;  %v3366_v23 = vsel %vm3357_vm6, %v5804_v55, %v5805_v43 }
 0x17a   : > { %5435 = vmatmul.msk.f32.vlgmr.msrb.gmra.mxu1 %vm300_vm1, %v6717_v41 }
 0x17b   : > { %5436 = vmatmul.msk.f32.vlgmr.msrb.gmra.mxu2 %vm300_vm1, %v6717_v41  ;;  %5437 = vmatmul.msk.f32.vlgmr.msrb.gmra.mxu3 %vm300_vm1, %v6717_v41 }
 0x17c   : > { %5438 = vmatmul.msk.f32.vlgmr.msra.gmra.mxu0 %vm300_vm1, %v6717_v41  ;;  %3241 = vmatpush.msrb.mxu1 %v2780_v38 }
 0x17d   : > { %3418 = vmatpush.msrb.mxu2 %v3358_v7  ;;  %3438 = vmatpush.msrb.mxu3 %v3359_v5  ;;  %v5810_v7 = vunpack.i.h.bf16 %v5808_v49  ;;  %v3365_v5 = vsel %vm3357_vm6, %v5800_v13, %v5804_v55 }
 0x17e   : > { %v1493_v53 = vpop.f32.mrf.mxu2  ;;  %v1513_v12 = vpop.f32.mrf.mxu3  ;;  %3458 = vmatpush.msra.mxu0 %v3360_v62 }
 0x17f   : > { %v6813_v20 = vadd.f32 %v1493_v53, %v985_v28  ;;  %v6816_v21 = vadd.f32 %v1513_v12, %v6682_v9  ;;  %v6818_v61 = vpop.f32.mrf.mxu1  ;;  %v3364_v9 = vsel %vm3357_vm6, %v5799_v19, %v5800_v13  ;;  %v5813_v62 = vpop.permute.xlu1 %5812  ;;  %v3368_v28 = vsel %vm3357_vm6, %v5809_v24, %v5810_v7 }
 0x180   : > { %v5814_v53 = vunpack.i.l.bf16 %v5813_v62  ;;  %v5815_v19 = vunpack.i.h.bf16 %v5813_v62  ;;  %v5819_v13 = vunpack.i.l.bf16 %v5818_v4 }
 0x181   : > { %v6820_v38 = vpop.f32.mrf.mxu0 }
 0x182   : > { %5439 = vmatmul.msk.f32.vlgmr.msra.gmra.mxu1 %vm300_vm1, %v6717_v41  ;;  %v3370_v49 = vsel %vm3357_vm6, %v5814_v53, %v5815_v19 }
 0x183   : > { %5440 = vmatmul.msk.f32.vlgmr.msra.gmra.mxu2 %vm300_vm1, %v6717_v41  ;;  %5441 = vmatmul.msk.f32.vlgmr.msra.gmra.mxu3 %vm300_vm1, %v6717_v41 }
 0x184   : > { %5442 = vmatmul.msk.f32.vlgmr.msrb.gmra.mxu0 %vm300_vm1, %v6717_v41  ;;  %3478 = vmatpush.msra.mxu1 %v3361_v11 }
 0x185   : > { %3498 = vmatpush.msra.mxu2 %v3362_v35  ;;  %3518 = vmatpush.msra.mxu3 %v3363_v29  ;;  %v5820_v29 = vunpack.i.h.bf16 %v5818_v4  ;;  %v5833_v4 = vpop.permute.xlu2 %5832 }
 0x186   : > { %v1573_v8 = vpop.f32.mrf.mxu2  ;;  %v1593_v1 = vpop.f32.mrf.mxu3  ;;  %3538 = vmatpush.msrb.mxu0 %v3364_v9 }
 0x187   : > { %v6836_v34 = vadd.f32 %v1573_v8, %v1065_v50  ;;  %v6839_v18 = vadd.f32 %v1593_v1, %v6707_v58  ;;  %v6841_v44 = vpop.f32.mrf.mxu1  ;;  %v3367_v58 = vsel %vm3357_vm6, %v5805_v43, %v5809_v24  ;;  %v3371_v50 = vsel %vm3357_vm6, %v5815_v19, %v5819_v13  ;;  %v5828_v55 = vpop.permute.xlu1 %5827 }
 0x188   : > { %v3372_v8 = vsel %vm3357_vm6, %v5819_v13, %v5820_v29 }
 0x189   : > { %v6848_v3 = vpop.f32.mrf.mxu0 }
 0x18a   : > { %5443 = vmatmul.msk.f32.vlgmr.msrb.gmra.mxu1 %vm300_vm1, %v6717_v41  ;;  %v1145_v41 = vadd.f32 %v6712_v30, %v6554_v36  ;;  %v3369_v36 = vsel %vm3357_vm6, %v5810_v7, %v5814_v53  ;;  %v5823_v30 = vpop.permute.xlu0 %5822 }
 0x18b   : > { %5445 = vmatmul.msk.f32.vlgmr.msrb.gmra.mxu2 %vm300_vm1, %v6846_v57  ;;  %5446 = vmatmul.msk.f32.vlgmr.msrb.gmra.mxu3 %vm300_vm1, %v6846_v57  ;;  %v5824_v43 = vunpack.i.l.bf16 %v5823_v30 }
 0x18c   : > { %5447 = vmatmul.msk.f32.vlgmr.msra.gmra.mxu0 %vm300_vm1, %v6846_v57  ;;  %3558 = vmatpush.msrb.mxu1 %v3365_v5 }
 0x18d   : > { %3578 = vmatpush.msrb.mxu2 %v3366_v23  ;;  %3598 = vmatpush.msrb.mxu3 %v3367_v58  ;;  %v5830_v58 = vunpack.i.h.bf16 %v5828_v55 }
 0x18e   : > { %v1653_v12 = vpop.f32.mrf.mxu2  ;;  %v1783_v31 = vpop.f32.mrf.mxu3  ;;  %3618 = vmatpush.msra.mxu0 %v3368_v28 }
 0x18f   : > { %v6864_v11 = vadd.f32 %v1653_v12, %v1145_v41  ;;  %v6867_v33 = vadd.f32 %v1783_v31, %v6741_v47  ;;  %v6869_v35 = vpop.f32.mrf.mxu1  ;;  %v805_v47 = vadd.f32 %v6583_v17, %v6463_v39  ;;  %v5825_v39 = vunpack.i.h.bf16 %v5823_v30  ;;  %v5843_v19 = vpop.permute.xlu1 %5842 }
 0x190   : > { %v5829_v17 = vunpack.i.l.bf16 %v5828_v55 }
 0x191   : > { %v6871_v9 = vpop.f32.mrf.mxu0  ;;  %v1659_v1 = vadd.f32 %v6746_v42, %v805_v47  ;;  %v3373_v42 = vsel %vm3357_vm6, %v5820_v29, %v5824_v43  ;;  %v3374_v41 = vsel %vm3357_vm6, %v5824_v43, %v5825_v39  ;;  %v5834_v29 = vunpack.i.l.bf16 %v5833_v4 }
 0x192   : > { %5448 = vmatmul.msk.f32.vlgmr.msra.gmra.mxu1 %vm300_vm1, %v6846_v57  ;;  %v3375_v53 = vsel %vm3357_vm6, %v5825_v39, %v5829_v17  ;;  %v5838_v12 = vpop.permute.xlu0 %5837  ;;  %v3376_v31 = vsel %vm3357_vm6, %v5829_v17, %v5830_v58 }
 0x193   : > { %5449 = vmatmul.msk.f32.vlgmr.msra.gmra.mxu2 %vm300_vm1, %v6846_v57  ;;  %5450 = vmatmul.msk.f32.vlgmr.msra.gmra.mxu3 %vm300_vm1, %v6846_v57  ;;  %v5840_v30 = vunpack.i.h.bf16 %v5838_v12 }
 0x194   : > { %5451 = vmatmul.msk.f32.vlgmr.msrb.gmra.mxu0 %vm300_vm1, %v6846_v57  ;;  %3638 = vmatpush.msra.mxu1 %v3369_v36 }
 0x195   : > { %3658 = vmatpush.msra.mxu2 %v3370_v49  ;;  %3678 = vmatpush.msra.mxu3 %v3371_v50  ;;  %v5839_v49 = vunpack.i.l.bf16 %v5838_v12 }
 0x196   : > { %v1843_v24 = vpop.f32.mrf.mxu2  ;;  %v1863_v7 = vpop.f32.mrf.mxu3  ;;  %3698 = vmatpush.msrb.mxu0 %v3372_v8  ;;  %v5844_v8 = vunpack.i.l.bf16 %v5843_v19 }
 0x197   : > { %v6888_v5 = vadd.f32 %v1843_v24, %v1659_v1  ;;  %v6891_v62 = vadd.f32 %v1863_v7, %v6768_v26  ;;  %v6893_v23 = vpop.f32.mrf.mxu1  ;;  %v885_v26 = vadd.f32 %v6611_v37, %v6491_v6  ;;  %v5835_v37 = vunpack.i.h.bf16 %v5833_v4  ;;  %v5848_v7 = vpop.permute.xlu2 %5847 }
 0x198   : > { %v3891_v24 = vsel %vm3890_vm7, %v5839_v49, %v5840_v30  ;;  %v3892_v39 = vsel %vm3890_vm7, %v5840_v30, %v5844_v8 }
 0x199   : > { %v6895_v28 = vpop.f32.mrf.mxu0  ;;  %v1663_v13 = vadd.f32 %v6773_v40, %v885_v26  ;;  %v3377_v40 = vsel %vm3357_vm6, %v5830_v58, %v5834_v29  ;;  %v3378_v43 = vsel %vm3357_vm6, %v5834_v29, %v5835_v37 }
 0x19a   : > { %5452 = vmatmul.msk.f32.vlgmr.msrb.gmra.mxu1 %vm300_vm1, %v6846_v57  ;;  %v5853_v17 = vpop.permute.xlu0 %5852 }
 0x19b   : > { %5453 = vmatmul.msk.f32.vlgmr.msrb.gmra.mxu2 %vm300_vm1, %v6846_v57  ;;  %5454 = vmatmul.msk.f32.vlgmr.msrb.gmra.mxu3 %vm300_vm1, %v6846_v57  ;;  %v5855_v49 = vunpack.i.h.bf16 %v5853_v17 }
 0x19c   : > { %5455 = vmatmul.msk.f32.vlgmr.msra.gmra.mxu0 %vm300_vm1, %v6846_v57  ;;  %3718 = vmatpush.msrb.mxu1 %v3373_v42  ;;  %v5845_v42 = vunpack.i.h.bf16 %v5843_v19 }
 0x19d   : > { %3738 = vmatpush.msrb.mxu2 %v3374_v41  ;;  %3758 = vmatpush.msrb.mxu3 %v3375_v53  ;;  %v5849_v41 = vunpack.i.l.bf16 %v5848_v7 }
 0x19e   : > { %v1923_v36 = vpop.f32.mrf.mxu2  ;;  %v1943_v6 = vpop.f32.mrf.mxu3  ;;  %3778 = vmatpush.msra.mxu0 %v3376_v31  ;;  %v5854_v31 = vunpack.i.l.bf16 %v5853_v17 }
 0x19f   : > { %v6912_v50 = vadd.f32 %v1923_v36, %v1663_v13  ;;  %v6915_v55 = vadd.f32 %v1943_v6, %v6791_v45  ;;  %v6917_v47 = vpop.f32.mrf.mxu1  ;;  %v965_v45 = vadd.f32 %v6638_v15, %v6514_v25  ;;  %v5850_v15 = vunpack.i.h.bf16 %v5848_v7  ;;  %v5858_v36 = vpop.permute.xlu1 %5857 }
 0x1a0   : > { %v3894_v19 = vsel %vm3890_vm7, %v5845_v42, %v5849_v41  ;;  %v1045_v6 = vadd.f32 %v6665_v22, %v6548_v32  ;;  %v5863_v37 = vpop.permute.xlu2 %5862  ;;  %v5860_v22 = vunpack.i.h.bf16 %v5858_v36  ;;  %v3897_v17 = vsel %vm3890_vm7, %v5854_v31, %v5855_v49 }
 0x1a1   : > { %v6919_v1 = vpop.f32.mrf.mxu0  ;;  %v1667_v58 = vadd.f32 %v6796_v46, %v965_v45  ;;  %v3893_v46 = vsel %vm3890_vm7, %v5844_v8, %v5845_v42  ;;  %v3895_v29 = vsel %vm3890_vm7, %v5849_v41, %v5850_v15  ;;  %v5864_v45 = vunpack.i.l.bf16 %v5863_v37 }
 0x1a2   : > { %5456 = vmatmul.msk.f32.vlgmr.msra.gmra.mxu1 %vm300_vm1, %v6846_v57  ;;  %v1671_v30 = vadd.f32 %v6818_v61, %v1045_v6  ;;  %v6970_v61 = vld [vmem:[%s7625_s1 + $0x38] sm:$0xff]  ;;  %v5868_v42 = vpop.permute.xlu0 %5867 }
 0x1a3   : > { %5457 = vmatmul.msk.f32.vlgmr.msra.gmra.mxu2 %vm300_vm1, %v6846_v57  ;;  %5458 = vmatmul.msk.f32.vlgmr.msra.gmra.mxu3 %vm300_vm1, %v6846_v57 }
 0x1a4   : > { %5459 = vmatmul.msk.f32.vlgmr.msrb.gmra.mxu0 %vm300_vm1, %v6846_v57  ;;  %3798 = vmatpush.msra.mxu1 %v3377_v40  ;;  %v5859_v40 = vunpack.i.l.bf16 %v5858_v36 }
 0x1a5   : > { %3818 = vmatpush.msra.mxu2 %v3378_v43  ;;  %3951 = vmatpush.msra.mxu3 %v3891_v24 }
 0x1a6   : > { %v2003_v4 = vpop.f32.mrf.mxu2  ;;  %v2023_v25 = vpop.f32.mrf.mxu3  ;;  %3971 = vmatpush.msrb.mxu0 %v3892_v39 }
 0x1a7   : > { %v6936_v53 = vadd.f32 %v2003_v4, %v1667_v58  ;;  %v6939_v12 = vadd.f32 %v2023_v25, %v6813_v20  ;;  %v6941_v26 = vpop.f32.mrf.mxu1  ;;  %v3896_v20 = vsel %vm3890_vm7, %v5850_v15, %v5854_v31  ;;  %v3898_v58 = vsel %vm3890_vm7, %v5855_v49, %v5859_v40  ;;  %v5873_v15 = vpop.permute.xlu1 %5872 }
 0x1a8   : > { %v1125_v4 = vadd.f32 %v6690_v2, %v6577_v51  ;;  %v3900_v25 = vsel %vm3890_vm7, %v5860_v22, %v5864_v45  ;;  %v5865_v31 = vunpack.i.h.bf16 %v5863_v37  ;;  %v5870_v2 = vunpack.i.h.bf16 %v5868_v42  ;;  %v5878_v49 = vpop.permute.xlu2 %5877 }
 0x1a9   : > { %v6943_v13 = vpop.f32.mrf.mxu0  ;;  %v5874_v6 = vunpack.i.l.bf16 %v5873_v15 }
 0x1aa   : > { %5460 = vmatmul.msk.f32.vlgmr.msrb.gmra.mxu1 %vm300_vm1, %v6846_v57  ;;  %v1675_v41 = vadd.f32 %v6841_v44, %v1125_v4  ;;  %v3901_v44 = vsel %vm3890_vm7, %v5864_v45, %v5865_v31 }
 0x1ab   : > { %5461 = vmatmul.msk.f32.vlgmr.msrb.gmra.mxu2 %vm300_vm1, %v6846_v57  ;;  %5462 = vmatmul.msk.f32.vlgmr.msrb.gmra.mxu3 %vm300_vm1, %v6846_v57 }
 0x1ac   : > { %5463 = vmatmul.msk.f32.vlgmr.msra.gmra.mxu0 %vm300_vm1, %v6846_v57  ;;  %3991 = vmatpush.msrb.mxu1 %v3893_v46 }
 0x1ad   : > { %4011 = vmatpush.msrb.mxu2 %v3894_v19  ;;  %4031 = vmatpush.msrb.mxu3 %v3895_v29 }
 0x1ae   : > { %v2083_v8 = vpop.f32.mrf.mxu2  ;;  %v2103_v32 = vpop.f32.mrf.mxu3  ;;  %4051 = vmatpush.msra.mxu0 %v3896_v20 }
 0x1af   : > { %v6960_v43 = vadd.f32 %v2083_v8, %v1671_v30  ;;  %v6963_v24 = vadd.f32 %v2103_v32, %v6836_v34  ;;  %v6965_v7 = vpop.f32.mrf.mxu1  ;;  %v3899_v34 = vsel %vm3890_vm7, %v5859_v40, %v5860_v22  ;;  %v1658_v8 = vadd.f32 %v6721_v56, %v6605_v10  ;;  %v5883_v32 = vpop.permute.xlu0 %5882 }
 0x1b0   : > { %v5875_v40 = vunpack.i.h.bf16 %v5873_v15  ;;  %v5880_v56 = vunpack.i.h.bf16 %v5878_v49  ;;  %v5884_v4 = vunpack.i.l.bf16 %v5883_v32  ;;  %v5888_v15 = vpop.permute.xlu1 %5887 }
 0x1b1   : > { %v6972_v39 = vpop.f32.mrf.mxu0  ;;  %v2188_v22 = vadd.f32 %v6869_v35, %v1658_v8 }
 0x1b2   : > { %5464 = vmatmul.msk.f32.vlgmr.msra.gmra.mxu1 %vm300_vm1, %v6846_v57  ;;  %v3905_v35 = vsel %vm3890_vm7, %v5874_v6, %v5875_v40 }
 0x1b3   : > { %5465 = vmatmul.msk.f32.vlgmr.msra.gmra.mxu2 %vm300_vm1, %v6846_v57  ;;  %5467 = vmatmul.msk.f32.vlgmr.msra.gmra.mxu3 %vm300_vm1, %v6970_v61  ;;  %v5869_v57 = vunpack.i.l.bf16 %v5868_v42 }
 0x1b4   : > { %5468 = vmatmul.msk.f32.vlgmr.msrb.gmra.mxu0 %vm300_vm1, %v6970_v61  ;;  %4071 = vmatpush.msra.mxu1 %v3897_v17  ;;  %v5879_v17 = vunpack.i.l.bf16 %v5878_v49 }
 0x1b5   : > { %4091 = vmatpush.msra.mxu2 %v3898_v58  ;;  %4111 = vmatpush.msra.mxu3 %v3899_v34  ;;  %v3902_v37 = vsel %vm3890_vm7, %v5865_v31, %v5869_v57  ;;  %v3903_v30 = vsel %vm3890_vm7, %v5869_v57, %v5870_v2  ;;  %v5885_v57 = vunpack.i.h.bf16 %v5883_v32 }
 0x1b6   : > { %v2163_v46 = vpop.f32.mrf.mxu2  ;;  %v2183_v51 = vpop.f32.mrf.mxu3  ;;  %4131 = vmatpush.msrb.mxu0 %v3900_v25  ;;  %v3907_v31 = vsel %vm3890_vm7, %v5879_v17, %v5880_v56 }
 0x1b7   : > { %v6989_v19 = vadd.f32 %v2163_v46, %v1675_v41  ;;  %v6992_v29 = vadd.f32 %v2183_v51, %v6864_v11  ;;  %v6994_v36 = vpop.f32.mrf.mxu1  ;;  %v3904_v11 = vsel %vm3890_vm7, %v5870_v2, %v5874_v6  ;;  %v3906_v41 = vsel %vm3890_vm7, %v5875_v40, %v5879_v17  ;;  %v5893_v51 = vpop.permute.xlu2 %5892 }
 0x1b8   : > { %v1662_v46 = vadd.f32 %v6748_v52, %v6634_v0  ;;  %v2195_v0 = vadd.f32 %v6895_v28, %v6794_v14  ;;  %v3909_v40 = vsel %vm3890_vm7, %v5884_v4, %v5885_v57  ;;  %v5898_v14 = vpop.permute.xlu0 %5897 }
 0x1b9   : > { %v6996_v20 = vpop.f32.mrf.mxu0 }
 0x1ba   : > { %5469 = vmatmul.msk.f32.vlgmr.msrb.gmra.mxu1 %vm300_vm1, %v6970_v61  ;;  %v2192_v2 = vadd.f32 %v6893_v23, %v1662_v46 }
 0x1bb   : > { %5470 = vmatmul.msk.f32.vlgmr.msrb.gmra.mxu2 %vm300_vm1, %v6970_v61  ;;  %5471 = vmatmul.msk.f32.vlgmr.msrb.gmra.mxu3 %vm300_vm1, %v6970_v61 }
 0x1bc   : > { %5472 = vmatmul.msk.f32.vlgmr.msra.gmra.mxu0 %vm300_vm1, %v6970_v61  ;;  %4151 = vmatpush.msrb.mxu1 %v3901_v44  ;;  %v5890_v44 = vunpack.i.h.bf16 %v5888_v15 }
 0x1bd   : > { %4171 = vmatpush.msrb.mxu2 %v3902_v37  ;;  %4191 = vmatpush.msrb.mxu3 %v3903_v30  ;;  %v5889_v37 = vunpack.i.l.bf16 %v5888_v15 }
 0x1be   : > { %v2353_v45 = vpop.f32.mrf.mxu2  ;;  %v2373_v10 = vpop.f32.mrf.mxu3  ;;  %4211 = vmatpush.msra.mxu0 %v3904_v11  ;;  %v5895_v11 = vunpack.i.h.bf16 %v5893_v51 }
 0x1bf   : > { %v7013_v58 = vadd.f32 %v2353_v45, %v2188_v22  ;;  %v7016_v34 = vadd.f32 %v2373_v10, %v6888_v5  ;;  %v7018_v42 = vpop.f32.mrf.mxu1  ;;  %v3908_v5 = vsel %vm3890_vm7, %v5880_v56, %v5884_v4  ;;  %v5894_v22 = vunpack.i.l.bf16 %v5893_v51  ;;  %v5903_v56 = vpop.permute.xlu1 %5902 }
 0x1c0   : > { %v3910_v45 = vsel %vm3890_vm7, %v5885_v57, %v5889_v37  ;;  %v1666_v10 = vadd.f32 %v6775_v60, %v6660_v63  ;;  %v5899_v4 = vunpack.i.l.bf16 %v5898_v14  ;;  %v2199_v63 = vadd.f32 %v6919_v1, %v6816_v21  ;;  %v5908_v21 = vpop.permute.xlu2 %5907 }
 0x1c1   : > { %v7020_v25 = vpop.f32.mrf.mxu0  ;;  %v5904_v15 = vunpack.i.l.bf16 %v5903_v56  ;;  %v5905_v51 = vunpack.i.h.bf16 %v5903_v56 }
 0x1c2   : > { %5473 = vmatmul.msk.f32.vlgmr.msra.gmra.mxu1 %vm300_vm1, %v6970_v61  ;;  %v2196_v17 = vadd.f32 %v6917_v47, %v1666_v10  ;;  %v4425_v57 = vsel %vm4423_vm8, %v5895_v11, %v5899_v4  ;;  %v7103_v10 = vld [vmem:[%s7625_s1 + $0x40] sm:$0xff] }
 0x1c3   : > { %5474 = vmatmul.msk.f32.vlgmr.msra.gmra.mxu2 %vm300_vm1, %v6970_v61  ;;  %5475 = vmatmul.msk.f32.vlgmr.msra.gmra.mxu3 %vm300_vm1, %v6970_v61 }
 0x1c4   : > { %5476 = vmatmul.msk.f32.vlgmr.msrb.gmra.mxu0 %vm300_vm1, %v6970_v61  ;;  %4231 = vmatpush.msra.mxu1 %v3905_v35 }
 0x1c5   : > { %4251 = vmatpush.msra.mxu2 %v3906_v41  ;;  %4271 = vmatpush.msra.mxu3 %v3907_v31  ;;  %v5900_v41 = vunpack.i.h.bf16 %v5898_v14 }
 0x1c6   : > { %v2433_v52 = vpop.f32.mrf.mxu2  ;;  %v2453_v6 = vpop.f32.mrf.mxu3  ;;  %4291 = vmatpush.msrb.mxu0 %v3908_v5 }
 0x1c7   : > { %v7039_v30 = vadd.f32 %v2433_v52, %v2192_v2  ;;  %v7042_v49 = vadd.f32 %v2453_v6, %v6912_v50  ;;  %v2493_v8 = vpop.f32.mrf.mxu1  ;;  %v3911_v50 = vsel %vm3890_vm7, %v5889_v37, %v5890_v44  ;;  %v4426_v1 = vsel %vm4423_vm8, %v5899_v4, %v5900_v41  ;;  %v5913_v6 = vpop.permute.xlu0 %5912 }
 0x1c8   : > { %v7044_v23 = vadd.f32 %v2493_v8, %v2195_v0  ;;  %v4427_v52 = vsel %vm4423_vm8, %v5900_v41, %v5904_v15  ;;  %v5909_v37 = vunpack.i.l.bf16 %v5908_v21  ;;  %v5923_v4 = vpop.permute.xlu2 %5922 }
 0x1c9   : > { %v2553_v32 = vpop.f32.mrf.mxu0 }
 0x1ca   : > { %v7048_v28 = vadd.f32 %v2553_v32, %v6939_v12  ;;  %5477 = vmatmul.msk.f32.vlgmr.msrb.gmra.mxu1 %vm300_vm1, %v6970_v61  ;;  %v4424_v12 = vsel %vm4423_vm8, %v5894_v22, %v5895_v11  ;;  %v5910_v11 = vunpack.i.h.bf16 %v5908_v21  ;;  %v5914_v22 = vunpack.i.l.bf16 %v5913_v6 }
 0x1cb   : > { %5478 = vmatmul.msk.f32.vlgmr.msrb.gmra.mxu2 %vm300_vm1, %v6970_v61  ;;  %5479 = vmatmul.msk.f32.vlgmr.msrb.gmra.mxu3 %vm300_vm1, %v6970_v61  ;;  %v5963_v21 = vmov 0  }
 0x1cc   : > { %5480 = vmatmul.msk.f32.vlgmr.msra.gmra.mxu0 %vm300_vm1, %v6970_v61  ;;  %4311 = vmatpush.msrb.mxu1 %v3909_v40  ;;  %v4430_v56 = vsel %vm4423_vm8, %v5909_v37, %v5910_v11 }
 0x1cd   : > { %4331 = vmatpush.msrb.mxu2 %v3910_v45  ;;  %4351 = vmatpush.msrb.mxu3 %v3911_v50  ;;  %v5915_v45 = vunpack.i.h.bf16 %v5913_v6 }
 0x1ce   : > { %v2513_v60 = vpop.f32.mrf.mxu2  ;;  %v2533_v35 = vpop.f32.mrf.mxu3  ;;  %4484 = vmatpush.msra.mxu0 %v4424_v12  ;;  %v4431_v12 = vsel %vm4423_vm8, %v5910_v11, %v5914_v22  ;;  %5941 = vset.pattern.permute.xlu2 %v5963_v21 }
 0x1cf   : > { %v7066_v31 = vadd.f32 %v2513_v60, %v2196_v17  ;;  %v7069_v46 = vadd.f32 %v2533_v35, %v6936_v53  ;;  %v2573_v5 = vpop.f32.mrf.mxu1  ;;  %v1670_v53 = vadd.f32 %v6798_v54, %v6685_v16  ;;  %v2203_v16 = vadd.f32 %v6943_v13, %v6839_v18  ;;  %5942 = vset.pattern.permute.xlu0 %v5963_v21 }
 0x1d0   : > { %v7071_v2 = vadd.f32 %v2573_v5, %v2199_v63  ;;  %v4429_v18 = vsel %vm4423_vm8, %v5905_v51, %v5909_v37  ;;  %v1674_v17 = vadd.f32 %v6820_v38, %v6710_v59  ;;  %v2716_v59 = vadd.f32 %v6972_v39, %v6867_v33 }
 0x1d1   : > { %v2633_v47 = vpop.f32.mrf.mxu0  ;;  %v2200_v44 = vadd.f32 %v6941_v26, %v1670_v53  ;;  %v5928_v53 = vpop.permute.xlu0 %5927 }
 0x1d2   : > { %v7075_v0 = vadd.f32 %v2633_v47, %v6963_v24  ;;  %5481 = vmatmul.msk.f32.vlgmr.msra.gmra.mxu1 %vm300_vm1, %v6970_v61  ;;  %v4428_v24 = vsel %vm4423_vm8, %v5904_v15, %v5905_v51  ;;  %v2204_v63 = vadd.f32 %v6965_v7, %v1674_v17  ;;  %v5925_v47 = vunpack.i.h.bf16 %v5923_v4  ;;  %v4910_v7 = vld [vmem:[%s7626_s2] sm:$0xff] }
 0x1d3   : > { %5482 = vmatmul.msk.f32.vlgmr.msra.gmra.mxu2 %vm300_vm1, %v6970_v61  ;;  %5483 = vmatmul.msk.f32.vlgmr.msra.gmra.mxu3 %vm300_vm1, %v6970_v61  ;;  %v5929_v37 = vunpack.i.l.bf16 %v5928_v53 }
 0x1d4   : > { %5484 = vmatmul.msk.f32.vlgmr.msrb.gmra.mxu0 %vm300_vm1, %v6970_v61  ;;  %4504 = vmatpush.msra.mxu1 %v4425_v57 }
 0x1d5   : > { %4524 = vmatpush.msra.mxu2 %v4426_v1  ;;  %4544 = vmatpush.msra.mxu3 %v4427_v52 }
 0x1d6   : > { %v2593_v54 = vpop.f32.mrf.mxu2  ;;  %v2613_v8 = vpop.f32.mrf.mxu3  ;;  %4564 = vmatpush.msrb.mxu0 %v4428_v24  ;;  %4913 = vperm.xlu2 %5941, %v4910_v7   ;;  %v2187_v24 = vadd.f32 %v6848_v3, %v6744_v48  ;;  %v2720_v48 = vadd.f32 %v6996_v20, %v6891_v62 }
 0x1d7   : > { %v7093_v32 = vadd.f32 %v2593_v54, %v2200_v44  ;;  %v7096_v40 = vadd.f32 %v2613_v8, %v6960_v43  ;;  %v2653_v14 = vpop.f32.mrf.mxu1  ;;  %v5918_v43 = vpop.permute.xlu1 %5917  ;;  %v5930_v54 = vunpack.i.h.bf16 %v5928_v53 }
 0x1d8   : > { %v7098_v50 = vadd.f32 %v2653_v14, %v2203_v16  ;;  %v5919_v60 = vunpack.i.l.bf16 %v5918_v43  ;;  %v5920_v15 = vunpack.i.h.bf16 %v5918_v43  ;;  %v2717_v44 = vadd.f32 %v6994_v36, %v2187_v24  ;;  %v5938_v62 = vpop.permute.xlu2 %5937 }
 0x1d9   : > { %v2713_v26 = vpop.f32.mrf.mxu0  ;;  %v4438_v20 = vsel %vm4423_vm8, %v5929_v37, %v5930_v54  ;;  %v5939_v17 = vunpack.i.l.bf16 %v5938_v62 }
 0x1da   : > { %v7107_v13 = vadd.f32 %v2713_v26, %v6992_v29  ;;  %5485 = vmatmul.msk.f32.vlgmr.msrb.gmra.mxu1 %vm300_vm1, %v6970_v61  ;;  %v4432_v29 = vsel %vm4423_vm8, %v5914_v22, %v5915_v45  ;;  %v4433_v39 = vsel %vm4423_vm8, %v5915_v45, %v5919_v60 }
 0x1db   : > { %5486 = vmatmul.msk.f32.vlgmr.msrb.gmra.mxu2 %vm300_vm1, %v6970_v61  ;;  %5487 = vmatmul.msk.f32.vlgmr.msrb.gmra.mxu3 %vm300_vm1, %v6970_v61  ;;  %v5924_v61 = vunpack.i.l.bf16 %v5923_v4  ;;  %v5940_v4 = vunpack.i.h.bf16 %v5938_v62 }
 0x1dc   : > { %5489 = vmatmul.msk.f32.vlgmr.msra.gmra.mxu0 %vm300_vm1, %v7103_v10  ;;  %4584 = vmatpush.msrb.mxu1 %v4429_v18  ;;  %v4437_v18 = vsel %vm4423_vm8, %v5925_v47, %v5929_v37 }
 0x1dd   : > { %4604 = vmatpush.msrb.mxu2 %v4430_v56  ;;  %4624 = vmatpush.msrb.mxu3 %v4431_v12  ;;  %v4435_v52 = vsel %vm4423_vm8, %v5920_v15, %v5924_v61 }
 0x1de   : > { %v2673_v38 = vpop.f32.mrf.mxu2  ;;  %v2693_v35 = vpop.f32.mrf.mxu3  ;;  %4644 = vmatpush.msra.mxu0 %v4432_v29 }
 0x1df   : > { %v7125_v41 = vadd.f32 %v2673_v38, %v2204_v63  ;;  %v7128_v5 = vadd.f32 %v2693_v35, %v6989_v19  ;;  %v2843_v51 = vpop.f32.mrf.mxu1  ;;  %v4434_v19 = vsel %vm4423_vm8, %v5919_v60, %v5920_v15  ;;  %v5933_v6 = vpop.permute.xlu1 %5932 }
 0x1e0   : > { %v7133_v57 = vadd.f32 %v2843_v51, %v2716_v59  ;;  %v5934_v8 = vunpack.i.l.bf16 %v5933_v6  ;;  %v5935_v45 = vunpack.i.h.bf16 %v5933_v6  ;;  %v4420_v38 = vpop.permute.xlu0 %4419 }
 0x1e1   : > { %v2903_v33 = vpop.f32.mrf.mxu0 }
 0x1e2   : > { %v7137_v1 = vadd.f32 %v2903_v33, %v7016_v34  ;;  %5490 = vmatmul.msk.f32.vlgmr.msra.gmra.mxu1 %vm300_vm1, %v7103_v10  ;;  %v4436_v34 = vsel %vm4423_vm8, %v5924_v61, %v5925_v47  ;;  %v4439_v56 = vsel %vm4423_vm8, %v5930_v54, %v5934_v8  ;;  %v4441_v61 = vsel %vm4423_vm8, %v5935_v45, %v5939_v17 }
 0x1e3   : > { %5491 = vmatmul.msk.f32.vlgmr.msra.gmra.mxu2 %vm300_vm1, %v7103_v10  ;;  %5492 = vmatmul.msk.f32.vlgmr.msra.gmra.mxu3 %vm300_vm1, %v7103_v10 }
 0x1e4   : > { %5493 = vmatmul.msk.f32.vlgmr.msrb.gmra.mxu0 %vm300_vm1, %v7103_v10  ;;  %4664 = vmatpush.msra.mxu1 %v4433_v39 }
 0x1e5   : > { %4684 = vmatpush.msra.mxu2 %v4434_v19  ;;  %4704 = vmatpush.msra.mxu3 %v4435_v52 }
 0x1e6   : > { %v2863_v3 = vpop.f32.mrf.mxu2  ;;  %v2883_v16 = vpop.f32.mrf.mxu3  ;;  %4724 = vmatpush.msrb.mxu0 %v4436_v34 }
 0x1e7   : > { %v7155_v11 = vadd.f32 %v2863_v3, %v2717_v44  ;;  %v7158_v22 = vadd.f32 %v2883_v16, %v7013_v58  ;;  %v2923_v14 = vpop.f32.mrf.mxu1  ;;  %v2191_v58 = vadd.f32 %v6871_v9, %v6771_v27  ;;  %v2724_v27 = vadd.f32 %v7020_v25, %v6915_v55  ;;  %v4422_v15 = vpop.permute.xlu1 %4421 }
 0x1e8   : > { %v7160_v26 = vadd.f32 %v2923_v14, %v2720_v48  ;;  %v4443_v55 = vsel %vm4423_vm8, %v5940_v4, %v4420_v38  ;;  %v4442_v25 = vsel %vm4423_vm8, %v5939_v17, %v5940_v4 }
 0x1e9   : > { %v2983_v36 = vpop.f32.mrf.mxu0  ;;  %v2721_v12 = vadd.f32 %v7018_v42, %v2191_v58 }
 0x1ea   : > { %v7164_v43 = vadd.f32 %v2983_v36, %v7042_v49  ;;  %5494 = vmatmul.msk.f32.vlgmr.msrb.gmra.mxu1 %vm300_vm1, %v7103_v10  ;;  %v4440_v49 = vsel %vm4423_vm8, %v5934_v8, %v5935_v45 }
 0x1eb   : > { %5495 = vmatmul.msk.f32.vlgmr.msrb.gmra.mxu2 %vm300_vm1, %v7103_v10  ;;  %5496 = vmatmul.msk.f32.vlgmr.msrb.gmra.mxu3 %vm300_vm1, %v7103_v10 }
 0x1ec   : > { %5497 = vmatmul.msk.f32.vlgmr.msra.gmra.mxu0 %vm300_vm1, %v7103_v10  ;;  %4744 = vmatpush.msrb.mxu1 %v4437_v18 }
 0x1ed   : > { %4764 = vmatpush.msrb.mxu2 %v4438_v20  ;;  %4784 = vmatpush.msrb.mxu3 %v4439_v56 }
 0x1ee   : > { %v2943_v9 = vpop.f32.mrf.mxu2  ;;  %v2963_v29 = vpop.f32.mrf.mxu3  ;;  %4804 = vmatpush.msra.mxu0 %v4440_v49 }
 0x1ef   : > { %v7182_v63 = vadd.f32 %v2943_v9, %v2721_v12  ;;  %v3252_v60 = vadd.f32 %v2963_v29, %v7039_v30  ;;  %v3003_v59 = vpop.f32.mrf.mxu1  ;;  %v4444_v30 = vsel %vm4423_vm8, %v4420_v38, %v4422_v15 }
 0x1f0   : > { %v7185_v35 = vadd.f32 %v3003_v59, %v2724_v27 }
 0x1f1   : > { %v3063_v42 = vpop.f32.mrf.mxu0 }
 0x1f2   : > { %v7189_v51 = vadd.f32 %v3063_v42, %v7069_v46  ;;  %5498 = vmatmul.msk.f32.vlgmr.msra.gmra.mxu1 %vm300_vm1, %v7103_v10 }
 0x1f3   : > { %5499 = vmatmul.msk.f32.vlgmr.msra.gmra.mxu2 %vm300_vm1, %v7103_v10  ;;  %5500 = vmatmul.msk.f32.vlgmr.msra.gmra.mxu3 %vm300_vm1, %v7103_v10 }
 0x1f4   : > { %5501 = vmatmul.msk.f32.vlgmr.msrb.gmra.mxu0 %vm300_vm1, %v7103_v10  ;;  %4824 = vmatpush.msra.mxu1 %v4441_v61 }
 0x1f5   : > { %4844 = vmatpush.msra.mxu2 %v4442_v25  ;;  %4864 = vmatpush.msra.mxu3 %v4443_v55 }
 0x1f6   : > { %v3023_v46 = vpop.f32.mrf.mxu2  ;;  %v3043_v47 = vpop.f32.mrf.mxu3  ;;  %4884 = vmatpush.msrb.mxu0 %v4444_v30 }
 0x1f7   : > { %v3255_v7 = vadd.f32 %v3023_v46, %v7044_v23  ;;  %v3256_v21 = vadd.f32 %v3043_v47, %v7066_v31  ;;  %v3083_v33 = vpop.f32.mrf.mxu1 }
 0x1f8   : > { %v3258_v39 = vadd.f32 %v3083_v33, %v7048_v28 }
 0x1f9   : > { %v3143_v19 = vpop.f32.mrf.mxu0 }
 0x1fa   : > { %v3261_v52 = vadd.f32 %v3143_v19, %v7096_v40  ;;  %5502 = vmatmul.msk.f32.vlgmr.msrb.gmra.mxu1 %vm300_vm1, %v7103_v10 }
 0x1fb   : > { %5503 = vmatmul.msk.f32.vlgmr.msrb.gmra.mxu2 %vm300_vm1, %v7103_v10  ;;  %5504 = vmatmul.msk.f32.vlgmr.msrb.gmra.mxu3 %vm300_vm1, %v7103_v10 }
 0x1fc   : > { %5505 = vmatmul.msk.f32.vlgmr.msra.gmra.mxu0 %vm300_vm1, %v7103_v10 }
 0x1fe   : > { %v3103_v23 = vpop.f32.mrf.mxu2  ;;  %v3123_v31 = vpop.f32.mrf.mxu3 }
 0x1ff   : > { %v3259_v53 = vadd.f32 %v3103_v23, %v7071_v2  ;;  %v3260_v28 = vadd.f32 %v3123_v31, %v7093_v32  ;;  %v3163_v24 = vpop.f32.mrf.mxu1 }
 0x200   : > { %v3262_v40 = vadd.f32 %v3163_v24, %v7075_v0 }
 0x201   : > { %v3223_v34 = vpop.f32.mrf.mxu0 }
 0x202   : > { %v3265_v6 = vadd.f32 %v3223_v34, %v7128_v5  ;;  %5506 = vmatmul.msk.f32.vlgmr.msra.gmra.mxu1 %vm300_vm1, %v7103_v10 }
 0x203   : > { %5507 = vmatmul.msk.f32.vlgmr.msra.gmra.mxu2 %vm300_vm1, %v7103_v10  ;;  %5508 = vmatmul.msk.f32.vlgmr.msra.gmra.mxu3 %vm300_vm1, %v7103_v10 }
 0x204   : > { %5509 = vmatmul.msk.f32.vlgmr.msrb.gmra.mxu0 %vm300_vm1, %v7103_v10 }
 0x206   : > { %v3183_v2 = vpop.f32.mrf.mxu2  ;;  %v3203_v32 = vpop.f32.mrf.mxu3 }
 0x207   : > { %v3263_v44 = vadd.f32 %v3183_v2, %v7098_v50  ;;  %v3264_v0 = vadd.f32 %v3203_v32, %v7125_v41  ;;  %v3243_v37 = vpop.f32.mrf.mxu1 }
 0x208   : > { %v3266_v5 = vadd.f32 %v3243_v37, %v7107_v13 }
 0x209   : > { %v3460_v48 = vpop.f32.mrf.mxu0 }
 0x20a   : > { %v7230_v3 = vadd.f32 %v3460_v48, %v7158_v22 }
 0x20e   : > { %v3420_v16 = vpop.f32.mrf.mxu2  ;;  %v3440_v54 = vpop.f32.mrf.mxu3 }
 0x20f   : > { %v3823_v8 = vadd.f32 %v3420_v16, %v7133_v57  ;;  %v3824_v14 = vadd.f32 %v3440_v54, %v7155_v11  ;;  %v3480_v10 = vpop.f32.mrf.mxu1 }
 0x210   : > { %v7235_v45 = vadd.f32 %v3480_v10, %v7137_v1 }
 0x211   : > { %v3540_v50 = vpop.f32.mrf.mxu0 }
 0x212   : > { %v7237_v36 = vadd.f32 %v3540_v50, %v3252_v60 }
 0x216   : > { %v3500_v41 = vpop.f32.mrf.mxu2  ;;  %v3520_v18 = vpop.f32.mrf.mxu3 }
 0x217   : > { %v3827_v13 = vadd.f32 %v3500_v41, %v7160_v26  ;;  %v7241_v22 = vadd.f32 %v3520_v18, %v7182_v63  ;;  %v3560_v62 = vpop.f32.mrf.mxu1 }
 0x218   : > { %v7244_v20 = vadd.f32 %v3560_v62, %v7164_v43 }
 0x219   : > { %v3620_v57 = vpop.f32.mrf.mxu0 }
 0x21a   : > { %v7246_v11 = vadd.f32 %v3620_v57, %v3256_v21 }
 0x21e   : > { %v3580_v56 = vpop.f32.mrf.mxu2  ;;  %v3600_v1 = vpop.f32.mrf.mxu3 }
 0x21f   : > { %v7249_v58 = vadd.f32 %v3580_v56, %v7185_v35  ;;  %v7251_v49 = vadd.f32 %v3600_v1, %v3255_v7  ;;  %v3640_v12 = vpop.f32.mrf.mxu1 }
 0x220   : > { %v7254_v26 = vadd.f32 %v3640_v12, %v7189_v51 }
 0x221   : > { %v3700_v17 = vpop.f32.mrf.mxu0 }
 0x222   : > { %v7256_v27 = vadd.f32 %v3700_v17, %v3260_v28 }
 0x226   : > { %v3660_v9 = vpop.f32.mrf.mxu2  ;;  %v3680_v43 = vpop.f32.mrf.mxu3 }
 0x227   : > { %v7258_v29 = vadd.f32 %v3660_v9, %v3258_v39  ;;  %v7260_v4 = vadd.f32 %v3680_v43, %v3259_v53  ;;  %v3720_v63 = vpop.f32.mrf.mxu1 }
 0x228   : > { %v7262_v60 = vadd.f32 %v3720_v63, %v3261_v52 }
 0x229   : > { %v3780_v59 = vpop.f32.mrf.mxu0 }
 0x22a   : > { %v7264_v38 = vadd.f32 %v3780_v59, %v3264_v0 }
 0x22e   : > { %v3740_v35 = vpop.f32.mrf.mxu2  ;;  %v3760_v15 = vpop.f32.mrf.mxu3 }
 0x22f   : > { %v7266_v42 = vadd.f32 %v3740_v35, %v3262_v40  ;;  %v7268_v61 = vadd.f32 %v3760_v15, %v3263_v44  ;;  %v3800_v51 = vpop.f32.mrf.mxu1 }
 0x230   : > { %v7270_v55 = vadd.f32 %v3800_v51, %v3265_v6 }
 0x231   : > { %v3973_v25 = vpop.f32.mrf.mxu0 }
 0x232   : > { %v4357_v54 = vadd.f32 %v3973_v25, %v3824_v14 }
 0x236   : > { %v3820_v30 = vpop.f32.mrf.mxu2  ;;  %v3953_v46 = vpop.f32.mrf.mxu3 }
 0x237   : > { %v7272_v47 = vadd.f32 %v3820_v30, %v3266_v5  ;;  %v3993_v7 = vpop.f32.mrf.mxu1  ;;  %v4356_v0 = vadd.f32 %v3953_v46, %v3823_v8  ;;  %v7292_v5 = vpop.permute.xlu2 %4913 }
 0x238   : > { %v4358_v14 = vadd.f32 %v3993_v7, %v7230_v3 }
 0x239   : > { %v4053_v21 = vpop.f32.mrf.mxu0 }
 0x23a   : > { %v4361_v35 = vadd.f32 %v4053_v21, %v7241_v22 }
 0x23e   : > { %v4013_v33 = vpop.f32.mrf.mxu2  ;;  %v4033_v39 = vpop.f32.mrf.mxu3 }
 0x23f   : > { %v4073_v19 = vpop.f32.mrf.mxu1  ;;  %v4360_v62 = vadd.f32 %v4033_v39, %v3827_v13  ;;  %v4359_v9 = vadd.f32 %v4013_v33, %v7235_v45 }
 0x241   : > { %v4133_v52 = vpop.f32.mrf.mxu0 }
 0x246   : > { %v4093_v23 = vpop.f32.mrf.mxu2  ;;  %v4113_v31 = vpop.f32.mrf.mxu3 }
 0x247   : > { %v7274_v53 = vpop.f32.mrf.mxu1 }
 0x249   : > { %v7276_v28 = vpop.f32.mrf.mxu0 }
 0x24e   : > { %v7278_v24 = vpop.f32.mrf.mxu2  ;;  %v7280_v40 = vpop.f32.mrf.mxu3 }
 0x24f   : > { %v7282_v34 = vpop.f32.mrf.mxu1 }
 0x251   : > { %v7284_v6 = vpop.f32.mrf.mxu0 }
 0x256   : > { %v7286_v2 = vpop.f32.mrf.mxu2  ;;  %v7288_v32 = vpop.f32.mrf.mxu3 }
 0x257   : > { %v7290_v44 = vpop.f32.mrf.mxu1 }
 0x259   : > { %v4486_v37 = vpop.f32.mrf.mxu0 }
 0x25a   : > { %v4889_v48 = vadd.f32 %v4486_v37, %v4356_v0  ;;  %v4362_v0 = vadd.f32 %v4073_v19, %v7237_v36  ;;  %v4363_v37 = vadd.f32 %v4093_v23, %v7244_v20 }
 0x25c   : > { %v4916_v16 = vadd.f32 %v7292_v5, %v4889_v48 }
 0x25e   : > { %v7295_v10 = vpop.f32.mrf.mxu2  ;;  %v7297_v50 = vpop.f32.mrf.mxu3  ;;  %v4937_v41 = vmul.f32 0.005, %v4916_v16 }
 0x25f   : > { %v4506_v18 = vpop.f32.mrf.mxu1 }
 0x260   : > { %v4890_v57 = vadd.f32 %v4506_v18, %v4357_v54  ;;  %v7299_v56 = vmax.f32 %v4916_v16, %v4937_v41  ;;  %v4364_v16 = vadd.f32 %v4113_v31, %v7249_v58 }
 0x261   : > { %v4566_v1 = vpop.f32.mrf.mxu0 }
 0x262   : > { %v4917_v8 = vadd.f32 %v7292_v5, %v4890_v57  ;;  %v4893_v12 = vadd.f32 %v4566_v1, %v4360_v62  ;;  %5000 = vrot.lane.b32.xlu0 %v7299_v56, %s5955_s18  ;;  %v4365_v62 = vadd.f32 %v4133_v52, %v7251_v49 }
 0x264   : > { %v4938_v17 = vmul.f32 0.005, %v4917_v8  ;;  %v4920_v43 = vadd.f32 %v7292_v5, %v4893_v12  ;;  %v4366_v12 = vadd.f32 %v7274_v53, %v7246_v11  ;;  %v4369_v53 = vadd.f32 %v7276_v28, %v7260_v4 }
 0x266   : > { %v4526_v63 = vpop.f32.mrf.mxu2  ;;  %v4546_v59 = vpop.f32.mrf.mxu3  ;;  %v7307_v13 = vmax.f32 %v4917_v8, %v4938_v17  ;;  %v4941_v45 = vmul.f32 0.005, %v4920_v43 }
 0x267   : > { %v4891_v15 = vadd.f32 %v4526_v63, %v4358_v14  ;;  %v4892_v51 = vadd.f32 %v4546_v59, %v4359_v9  ;;  %v4586_v25 = vpop.f32.mrf.mxu1 }
 0x268   : > { %5002 = vrot.lane.b32.xlu1 %v7307_v13, %s5955_s18  ;;  %v4894_v46 = vadd.f32 %v4586_v25, %v4361_v35  ;;  %v7322_v18 = vmax.f32 %v4920_v43, %v4941_v45 }
 0x269   : > { %v4918_v30 = vadd.f32 %v7292_v5, %v4891_v15  ;;  %v4919_v3 = vadd.f32 %v7292_v5, %v4892_v51  ;;  %v4646_v39 = vpop.f32.mrf.mxu0  ;;  %v4367_v15 = vadd.f32 %v7278_v24, %v7254_v26  ;;  %v4368_v51 = vadd.f32 %v7280_v40, %v7258_v29 }
 0x26a   : > { %v4921_v22 = vadd.f32 %v7292_v5, %v4894_v46  ;;  %v4897_v20 = vadd.f32 %v4646_v39, %v4364_v16  ;;  %v4371_v16 = vadd.f32 %v7286_v2, %v7262_v60 }
 0x26b   : > { %v4939_v7 = vmul.f32 0.005, %v4918_v30  ;;  %v4940_v33 = vmul.f32 0.005, %v4919_v3 }
 0x26c   : > { %v4942_v58 = vmul.f32 0.005, %v4921_v22  ;;  %v4924_v8 = vadd.f32 %v7292_v5, %v4897_v20 }
 0x26d   : > { %v7317_v21 = vmax.f32 %v4918_v30, %v4939_v7  ;;  %v7319_v48 = vmax.f32 %v4919_v3, %v4940_v33 }
 0x26e   : > { %v4606_v54 = vpop.f32.mrf.mxu2  ;;  %v4626_v41 = vpop.f32.mrf.mxu3  ;;  %v7337_v9 = vmax.f32 %v4921_v22, %v4942_v58  ;;  %v4945_v30 = vmul.f32 0.005, %v4924_v8  ;;  %v4370_v22 = vadd.f32 %v7282_v34, %v7256_v27 }
 0x26f   : > { %v4895_v57 = vadd.f32 %v4606_v54, %v4362_v0  ;;  %v4896_v1 = vadd.f32 %v4626_v41, %v4363_v37  ;;  %5004 = vrot.lane.b32.xlu2 %v7317_v21, %s5955_s18  ;;  %5006 = vrot.lane.b32.xlu0 %v7319_v48, %s5955_s18  ;;  %v4666_v36 = vpop.f32.mrf.mxu1  ;;  %v4372_v41 = vadd.f32 %v7288_v32, %v7266_v42 }
 0x270   : > { %5008 = vrot.lane.b32.xlu1 %v7322_v18, %s5955_s18  ;;  %v4898_v31 = vadd.f32 %v4666_v36, %v4365_v62  ;;  %v7358_v33 = vmax.f32 %v4924_v8, %v4945_v30  ;;  %v4375_v8 = vadd.f32 %v7295_v10, %v7270_v55 }
 0x271   : > { %v4922_v19 = vadd.f32 %v7292_v5, %v4895_v57  ;;  %v4923_v23 = vadd.f32 %v7292_v5, %v4896_v1  ;;  %v4726_v14 = vpop.f32.mrf.mxu0 }
 0x272   : > { %v4925_v17 = vadd.f32 %v7292_v5, %v4898_v31  ;;  %v4901_v26 = vadd.f32 %v4726_v14, %v4368_v51  ;;  %v4373_v31 = vadd.f32 %v7284_v6, %v7268_v61 }
 0x273   : > { %v4943_v49 = vmul.f32 0.005, %v4922_v19  ;;  %v4944_v52 = vmul.f32 0.005, %v4923_v23 }
 0x274   : > { %v4946_v3 = vmul.f32 0.005, %v4925_v17  ;;  %v4928_v45 = vadd.f32 %v7292_v5, %v4901_v26 }
 0x275   : > { %v7339_v43 = vmax.f32 %v4922_v19, %v4943_v49  ;;  %v7341_v35 = vmax.f32 %v4923_v23, %v4944_v52  ;;  %v4374_v49 = vadd.f32 %v7290_v44, %v7264_v38 }
 0x276   : > { %v4686_v63 = vpop.f32.mrf.mxu2  ;;  %v4706_v59 = vpop.f32.mrf.mxu3  ;;  %v7360_v39 = vmax.f32 %v4925_v17, %v4946_v3  ;;  %v4949_v62 = vmul.f32 0.005, %v4928_v45 }
 0x277   : > { %v4899_v25 = vadd.f32 %v4686_v63, %v4366_v12  ;;  %5010 = vrot.lane.b32.xlu2 %v7337_v9, %s5955_s18  ;;  %5012 = vrot.lane.b32.xlu0 %v7339_v43, %s5955_s18  ;;  %v4746_v11 = vpop.f32.mrf.mxu1  ;;  %v4900_v29 = vadd.f32 %v4706_v59, %v4367_v15 }
 0x278   : > { %5014 = vrot.lane.b32.xlu1 %v7341_v35, %s5955_s18  ;;  %v4902_v40 = vadd.f32 %v4746_v11, %v4369_v53  ;;  %v7381_v58 = vmax.f32 %v4928_v45, %v4949_v62 }
 0x279   : > { %v4926_v24 = vadd.f32 %v7292_v5, %v4899_v25  ;;  %v4927_v7 = vadd.f32 %v7292_v5, %v4900_v29  ;;  %v4806_v54 = vpop.f32.mrf.mxu0  ;;  %v4376_v25 = vadd.f32 %v7297_v50, %v7272_v47 }
 0x27a   : > { %v4929_v4 = vadd.f32 %v7292_v5, %v4902_v40  ;;  %v4905_v36 = vadd.f32 %v4806_v54, %v4372_v41 }
 0x27b   : > { %v4947_v46 = vmul.f32 0.005, %v4926_v24  ;;  %v4948_v57 = vmul.f32 0.005, %v4927_v7 }
 0x27c   : > { %v4950_v34 = vmul.f32 0.005, %v4929_v4  ;;  %v4932_v19 = vadd.f32 %v7292_v5, %v4905_v36 }
 0x27d   : > { %v7363_v37 = vmax.f32 %v4926_v24, %v4947_v46  ;;  %v7379_v20 = vmax.f32 %v4927_v7, %v4948_v57 }
 0x27e   : > { %v4766_v28 = vpop.f32.mrf.mxu2  ;;  %v4786_v0 = vpop.f32.mrf.mxu3  ;;  %v7384_v23 = vmax.f32 %v4929_v4, %v4950_v34  ;;  %v4953_v6 = vmul.f32 0.005, %v4932_v19 }
 0x27f   : > { %5016 = vrot.lane.b32.xlu2 %v7358_v33, %s5955_s18  ;;  %5018 = vrot.lane.b32.xlu0 %v7360_v39, %s5955_s18  ;;  %v4903_v1 = vadd.f32 %v4766_v28, %v4370_v22  ;;  %v4904_v27 = vadd.f32 %v4786_v0, %v4371_v16  ;;  %v4826_v42 = vpop.f32.mrf.mxu1 }
 0x280   : > { %5020 = vrot.lane.b32.xlu1 %v7363_v37, %s5955_s18  ;;  %v4906_v14 = vadd.f32 %v4826_v42, %v4373_v31  ;;  %v7405_v10 = vmax.f32 %v4932_v19, %v4953_v6 }
 0x281   : > { %v4930_v60 = vadd.f32 %v7292_v5, %v4903_v1  ;;  %v4931_v2 = vadd.f32 %v7292_v5, %v4904_v27  ;;  %v4886_v51 = vpop.f32.mrf.mxu0 }
 0x282   : > { %v4933_v38 = vadd.f32 %v7292_v5, %v4906_v14  ;;  %v4909_v53 = vadd.f32 %v4886_v51, %v4376_v25 }
 0x283   : > { %v4951_v12 = vmul.f32 0.005, %v4930_v60  ;;  %v4952_v17 = vmul.f32 0.005, %v4931_v2 }
 0x284   : > { %v4954_v11 = vmul.f32 0.005, %v4933_v38  ;;  %v4936_v26 = vadd.f32 %v7292_v5, %v4909_v53 }
 0x285   : > { %v7400_v59 = vmax.f32 %v4930_v60, %v4951_v12  ;;  %v7402_v15 = vmax.f32 %v4931_v2, %v4952_v17 }
 0x286   : > { %v4846_v32 = vpop.f32.mrf.mxu2  ;;  %v4866_v52 = vpop.f32.mrf.mxu3  ;;  %v7416_v24 = vmax.f32 %v4933_v38, %v4954_v11  ;;  %v4957_v50 = vmul.f32 0.005, %v4936_v26 }
 0x287   : > { %5022 = vrot.lane.b32.xlu2 %v7379_v20, %s5955_s18  ;;  %5024 = vrot.lane.b32.xlu0 %v7381_v58, %s5955_s18  ;;  %v4907_v61 = vadd.f32 %v4846_v32, %v4374_v49  ;;  %v4908_v63 = vadd.f32 %v4866_v52, %v4375_v8 }
 0x288   : > { %5026 = vrot.lane.b32.xlu1 %v7384_v23, %s5955_s18  ;;  %v7428_v40 = vmax.f32 %v4936_v26, %v4957_v50 }
 0x289   : > { %v4934_v44 = vadd.f32 %v7292_v5, %v4907_v61  ;;  %v4935_v55 = vadd.f32 %v7292_v5, %v4908_v63 }
 0x28b   : > { %v4955_v30 = vmul.f32 0.005, %v4934_v44  ;;  %v4956_v3 = vmul.f32 0.005, %v4935_v55 }
 0x28d   : > { %v7418_v29 = vmax.f32 %v4934_v44, %v4955_v30  ;;  %v7420_v47 = vmax.f32 %v4935_v55, %v4956_v3 }
 0x28f   : > { %5028 = vrot.lane.b32.xlu2 %v7400_v59, %s5955_s18  ;;  %5030 = vrot.lane.b32.xlu0 %v7402_v15, %s5955_s18 }
 0x290   : > { %5032 = vrot.lane.b32.xlu1 %v7405_v10, %s5955_s18 }
 0x297   : > { %5034 = vrot.lane.b32.xlu2 %v7416_v24, %s5955_s18  ;;  %5036 = vrot.lane.b32.xlu0 %v7418_v29, %s5955_s18 }
 0x298   : > { %5038 = vrot.lane.b32.xlu1 %v7420_v47, %s5955_s18 }
 0x29f   : > { %5040 = vrot.lane.b32.xlu2 %v7428_v40, %s5955_s18  ;;  %s5513_s18 = smul.u32 168, %s7629_s13 }
 0x2a1   : > { %s7558_s25 = scalar_lea.vmem %s7627_s3, %s5513_s18 }
 0x2c9   : > { %v5005_v5 = vpop.permute.xlu2 %5004 }
 0x2d1   : > { %v5011_v46 = vpop.permute.xlu2 %5010 }
 0x2d4   : > { %v5001_v45 = vpop.permute.xlu0 %5000 }
 0x2d9   : > { %v5017_v54 = vpop.permute.xlu2 %5016 }
 0x2da   : > { %v5003_v7 = vpop.permute.xlu1 %5002 }
 0x2db   : > { %v5042_v4 = vsel %vm258_vm0, %v5001_v45, %v5003_v7  ;;  %v5043_v28 = vsel %vm258_vm0, %v5003_v7, %v5005_v5 }
 0x2dc   : > { %v7435_v0 = vmax.f32 %v7299_v56, %v5042_v4  ;;  %v7438_v22 = vmax.f32 %v7307_v13, %v5043_v28 }
 0x2de   : > { %5127 = vrot.lane.b32.xlu1 %v7438_v22, %s5957_s20  ;;  %5125 = vrot.lane.b32.xlu0 %v7435_v0, %s5957_s20 }
 0x2e1   : > { %v5007_v16 = vpop.permute.xlu0 %5006  ;;  %v5023_v2 = vpop.permute.xlu2 %5022 }
 0x2e2   : > { %v5044_v41 = vsel %vm258_vm0, %v5005_v5, %v5007_v16  ;;  %v5009_v62 = vpop.permute.xlu1 %5008 }
 0x2e3   : > { %v7446_v57 = vmax.f32 %v7317_v21, %v5044_v41  ;;  %v5045_v56 = vsel %vm258_vm0, %v5007_v16, %v5009_v62  ;;  %v5046_v1 = vsel %vm258_vm0, %v5009_v62, %v5011_v46 }
 0x2e4   : > { %v7451_v13 = vmax.f32 %v7319_v48, %v5045_v56  ;;  %v7454_v27 = vmax.f32 %v7322_v18, %v5046_v1 }
 0x2e5   : > { %5129 = vrot.lane.b32.xlu2 %v7446_v57, %s5957_s20 }
 0x2e6   : > { %5133 = vrot.lane.b32.xlu1 %v7454_v27, %s5957_s20  ;;  %5131 = vrot.lane.b32.xlu0 %v7451_v13, %s5957_s20 }
 0x2e9   : > { %v5013_v21 = vpop.permute.xlu0 %5012  ;;  %v5029_v12 = vpop.permute.xlu2 %5028 }
 0x2ea   : > { %v5047_v34 = vsel %vm258_vm0, %v5011_v46, %v5013_v21  ;;  %v5015_v36 = vpop.permute.xlu1 %5014 }
 0x2eb   : > { %v7464_v60 = vmax.f32 %v7337_v9, %v5047_v34  ;;  %v5048_v48 = vsel %vm258_vm0, %v5013_v21, %v5015_v36  ;;  %v5049_v18 = vsel %vm258_vm0, %v5015_v36, %v5017_v54 }
 0x2ec   : > { %v7469_v19 = vmax.f32 %v7339_v43, %v5048_v48  ;;  %v7472_v42 = vmax.f32 %v7341_v35, %v5049_v18 }
 0x2ed   : > { %5135 = vrot.lane.b32.xlu2 %v7464_v60, %s5957_s20 }
 0x2ee   : > { %5139 = vrot.lane.b32.xlu1 %v7472_v42, %s5957_s20  ;;  %5137 = vrot.lane.b32.xlu0 %v7469_v19, %s5957_s20 }
 0x2f1   : > { %v5019_v9 = vpop.permute.xlu0 %5018 }
 0x2f2   : > { %v5050_v32 = vsel %vm258_vm0, %v5017_v54, %v5019_v9  ;;  %v5021_v31 = vpop.permute.xlu1 %5020 }
 0x2f3   : > { %v7482_v49 = vmax.f32 %v7358_v33, %v5050_v32  ;;  %v5051_v43 = vsel %vm258_vm0, %v5019_v9, %v5021_v31  ;;  %v5052_v35 = vsel %vm258_vm0, %v5021_v31, %v5023_v2 }
 0x2f4   : > { %v7487_v52 = vmax.f32 %v7360_v39, %v5051_v43  ;;  %v7490_v8 = vmax.f32 %v7363_v37, %v5052_v35 }
 0x2f5   : > { %5141 = vrot.lane.b32.xlu2 %v7482_v49, %s5957_s20 }
 0x2f6   : > { %5145 = vrot.lane.b32.xlu1 %v7490_v8, %s5957_s20  ;;  %5143 = vrot.lane.b32.xlu0 %v7487_v52, %s5957_s20 }
 0x2f9   : > { %v5025_v33 = vpop.permute.xlu0 %5024 }
 0x2fa   : > { %v5053_v17 = vsel %vm258_vm0, %v5023_v2, %v5025_v33  ;;  %v5027_v14 = vpop.permute.xlu1 %5026 }
 0x2fb   : > { %v7500_v39 = vmax.f32 %v7379_v20, %v5053_v17  ;;  %v5054_v37 = vsel %vm258_vm0, %v5025_v33, %v5027_v14  ;;  %v5055_v61 = vsel %vm258_vm0, %v5027_v14, %v5029_v12  ;;  %v5035_v20 = vpop.permute.xlu2 %5034 }
 0x2fc   : > { %v7505_v6 = vmax.f32 %v7381_v58, %v5054_v37  ;;  %v7508_v63 = vmax.f32 %v7384_v23, %v5055_v61 }
 0x2fd   : > { %5147 = vrot.lane.b32.xlu2 %v7500_v39, %s5957_s20 }
 0x2fe   : > { %5151 = vrot.lane.b32.xlu1 %v7508_v63, %s5957_s20  ;;  %5149 = vrot.lane.b32.xlu0 %v7505_v6, %s5957_s20 }
 0x301   : > { %v5031_v38 = vpop.permute.xlu0 %5030 }
 0x302   : > { %v5056_v44 = vsel %vm258_vm0, %v5029_v12, %v5031_v38  ;;  %v5033_v51 = vpop.permute.xlu1 %5032 }
 0x303   : > { %v7518_v58 = vmax.f32 %v7400_v59, %v5056_v44  ;;  %v5057_v23 = vsel %vm258_vm0, %v5031_v38, %v5033_v51  ;;  %v5058_v55 = vsel %vm258_vm0, %v5033_v51, %v5035_v20  ;;  %v5041_v53 = vpop.permute.xlu2 %5040 }
 0x304   : > { %v7523_v25 = vmax.f32 %v7402_v15, %v5057_v23  ;;  %v7526_v11 = vmax.f32 %v7405_v10, %v5058_v55 }
 0x305   : > { %5153 = vrot.lane.b32.xlu2 %v7518_v58, %s5957_s20 }
 0x306   : > { %5157 = vrot.lane.b32.xlu1 %v7526_v11, %s5957_s20  ;;  %5155 = vrot.lane.b32.xlu0 %v7523_v25, %s5957_s20 }
 0x309   : > { %v5037_v59 = vpop.permute.xlu0 %5036 }
 0x30a   : > { %v5059_v30 = vsel %vm258_vm0, %v5035_v20, %v5037_v59  ;;  %v5039_v3 = vpop.permute.xlu1 %5038 }
 0x30b   : > { %v7536_v15 = vmax.f32 %v7416_v24, %v5059_v30  ;;  %v5060_v10 = vsel %vm258_vm0, %v5037_v59, %v5039_v3  ;;  %v5061_v26 = vsel %vm258_vm0, %v5039_v3, %v5041_v53  ;;  %v5103_v24 = vmax.f32 %v7428_v40, %v5041_v53 }
 0x30c   : > { %v7541_v50 = vmax.f32 %v7418_v29, %v5060_v10  ;;  %v7544_v5 = vmax.f32 %v7420_v47, %v5061_v26 }
 0x30d   : > { %5159 = vrot.lane.b32.xlu2 %v7536_v15, %s5957_s20 }
 0x30e   : > { %5163 = vrot.lane.b32.xlu1 %v7544_v5, %s5957_s20  ;;  %5161 = vrot.lane.b32.xlu0 %v7541_v50, %s5957_s20 }
 0x315   : > { %5165 = vrot.lane.b32.xlu2 %v5103_v24, %s5957_s20 }
 0x33f   : > { %v5130_v46 = vpop.permute.xlu2 %5129 }
 0x347   : > { %v5136_v45 = vpop.permute.xlu2 %5135 }
 0x34f   : > { %v5142_v29 = vpop.permute.xlu2 %5141 }
 0x350   : > { %v5128_v7 = vpop.permute.xlu1 %5127  ;;  %v5126_v47 = vpop.permute.xlu0 %5125 }
 0x351   : > { %v5168_v4 = vsel %vm1721_vm3, %v5128_v7, %v5130_v46  ;;  %v5167_v40 = vsel %vm1721_vm3, %v5126_v47, %v5128_v7 }
 0x352   : > { %v5209_v28 = vmax.f32 %v7438_v22, %v5168_v4  ;;  %v5208_v16 = vmax.f32 %v7435_v0, %v5167_v40 }
 0x354   : > { %5230 = vst [vmem:[%s7558_s25 + $0x8] sm:$0xff] %v5209_v28 }
 0x355   : > { %5229 = vst [vmem:[%s7558_s25] sm:$0xff] %v5208_v16 }
 0x357   : > { %v5148_v54 = vpop.permute.xlu2 %5147 }
 0x358   : > { %v5134_v41 = vpop.permute.xlu1 %5133  ;;  %v5132_v62 = vpop.permute.xlu0 %5131 }
 0x359   : > { %v5171_v56 = vsel %vm1721_vm3, %v5134_v41, %v5136_v45  ;;  %v5169_v1 = vsel %vm1721_vm3, %v5130_v46, %v5132_v62  ;;  %v5170_v21 = vsel %vm1721_vm3, %v5132_v62, %v5134_v41 }
 0x35a   : > { %v5212_v34 = vmax.f32 %v7454_v27, %v5171_v56  ;;  %v5210_v36 = vmax.f32 %v7446_v57, %v5169_v1  ;;  %v5211_v0 = vmax.f32 %v7451_v13, %v5170_v21 }
 0x35c   : > { %5233 = vst [vmem:[%s7558_s25 + $0x20] sm:$0xff] %v5212_v34 }
 0x35d   : > { %5231 = vst [vmem:[%s7558_s25 + $0x10] sm:$0xff] %v5210_v36 }
 0x35e   : > { %5232 = vst [vmem:[%s7558_s25 + $0x18] sm:$0xff] %v5211_v0 }
 0x35f   : > { %v5154_v22 = vpop.permute.xlu2 %5153 }
 0x360   : > { %v5140_v48 = vpop.permute.xlu1 %5139  ;;  %v5138_v18 = vpop.permute.xlu0 %5137 }
 0x361   : > { %v5174_v2 = vsel %vm1721_vm3, %v5140_v48, %v5142_v29  ;;  %v5172_v9 = vsel %vm1721_vm3, %v5136_v45, %v5138_v18  ;;  %v5173_v32 = vsel %vm1721_vm3, %v5138_v18, %v5140_v48 }
 0x362   : > { %v5215_v27 = vmax.f32 %v7472_v42, %v5174_v2  ;;  %v5213_v57 = vmax.f32 %v7464_v60, %v5172_v9  ;;  %v5214_v13 = vmax.f32 %v7469_v19, %v5173_v32 }
 0x364   : > { %5236 = vst [vmem:[%s7558_s25 + $0x38] sm:$0xff] %v5215_v27 }
 0x365   : > { %5234 = vst [vmem:[%s7558_s25 + $0x28] sm:$0xff] %v5213_v57 }
 0x366   : > { %5235 = vst [vmem:[%s7558_s25 + $0x30] sm:$0xff] %v5214_v13 }
 0x367   : > { %v5160_v31 = vpop.permute.xlu2 %5159 }
 0x368   : > { %v5146_v43 = vpop.permute.xlu1 %5145  ;;  %v5144_v35 = vpop.permute.xlu0 %5143 }
 0x369   : > { %v5177_v12 = vsel %vm1721_vm3, %v5146_v43, %v5148_v54  ;;  %v5175_v33 = vsel %vm1721_vm3, %v5142_v29, %v5144_v35  ;;  %v5176_v17 = vsel %vm1721_vm3, %v5144_v35, %v5146_v43 }
 0x36a   : > { %v5218_v42 = vmax.f32 %v7490_v8, %v5177_v12  ;;  %v5216_v60 = vmax.f32 %v7482_v49, %v5175_v33  ;;  %v5217_v14 = vmax.f32 %v7487_v52, %v5176_v17 }
 0x36c   : > { %5239 = vst [vmem:[%s7558_s25 + $0x50] sm:$0xff] %v5218_v42 }
 0x36d   : > { %5237 = vst [vmem:[%s7558_s25 + $0x40] sm:$0xff] %v5216_v60 }
 0x36e   : > { %5238 = vst [vmem:[%s7558_s25 + $0x48] sm:$0xff] %v5217_v14 }
 0x36f   : > { %v5166_v19 = vpop.permute.xlu2 %5165 }
 0x370   : > { %v5228_v37 = vmax.f32 %v5103_v24, %v5166_v19  ;;  %v5152_v61 = vpop.permute.xlu1 %5151  ;;  %v5150_v20 = vpop.permute.xlu0 %5149 }
 0x371   : > { %v5180_v38 = vsel %vm1721_vm3, %v5152_v61, %v5154_v22  ;;  %v5178_v44 = vsel %vm1721_vm3, %v5148_v54, %v5150_v20  ;;  %v5179_v8 = vsel %vm1721_vm3, %v5150_v20, %v5152_v61 }
 0x372   : > { %5250 = vst.msk [vmem:[%s7558_s25 + $0xa0] sm:$0xff] %vm5249_vm9, %v5228_v37  ;;  %v5221_v49 = vmax.f32 %v7508_v63, %v5180_v38  ;;  %v5219_v52 = vmax.f32 %v7500_v39, %v5178_v44  ;;  %v5220_v51 = vmax.f32 %v7505_v6, %v5179_v8 }
 0x374   : > { %5242 = vst [vmem:[%s7558_s25 + $0x68] sm:$0xff] %v5221_v49 }
 0x375   : > { %5240 = vst [vmem:[%s7558_s25 + $0x58] sm:$0xff] %v5219_v52 }
 0x376   : > { %5241 = vst [vmem:[%s7558_s25 + $0x60] sm:$0xff] %v5220_v51 }
 0x378   : > { %v5158_v23 = vpop.permute.xlu1 %5157  ;;  %v5156_v55 = vpop.permute.xlu0 %5155 }
 0x379   : > { %v5183_v59 = vsel %vm1721_vm3, %v5158_v23, %v5160_v31  ;;  %v5181_v53 = vsel %vm1721_vm3, %v5154_v22, %v5156_v55  ;;  %v5182_v30 = vsel %vm1721_vm3, %v5156_v55, %v5158_v23 }
 0x37a   : > { %v5224_v63 = vmax.f32 %v7526_v11, %v5183_v59  ;;  %v5222_v39 = vmax.f32 %v7518_v58, %v5181_v53  ;;  %v5223_v6 = vmax.f32 %v7523_v25, %v5182_v30 }
 0x37c   : > { %5245 = vst [vmem:[%s7558_s25 + $0x80] sm:$0xff] %v5224_v63 }
 0x37d   : > { %5243 = vst [vmem:[%s7558_s25 + $0x70] sm:$0xff] %v5222_v39 }
 0x37e   : > { %5244 = vst [vmem:[%s7558_s25 + $0x78] sm:$0xff] %v5223_v6 }
 0x380   : > { %v5164_v3 = vpop.permute.xlu1 %5163  ;;  %v5162_v10 = vpop.permute.xlu0 %5161 }
 0x381   : > { %v5186_v26 = vsel %vm1721_vm3, %v5164_v3, %v5166_v19  ;;  %v5184_v24 = vsel %vm1721_vm3, %v5160_v31, %v5162_v10  ;;  %v5185_v46 = vsel %vm1721_vm3, %v5162_v10, %v5164_v3 }
 0x382   : > { %v5227_v45 = vmax.f32 %v7544_v5, %v5186_v26  ;;  %v5225_v11 = vmax.f32 %v7536_v15, %v5184_v24  ;;  %v5226_v29 = vmax.f32 %v7541_v50, %v5185_v46 }
 0x384   : > { %5248 = vst [vmem:[%s7558_s25 + $0x98] sm:$0xff] %v5227_v45 }
 0x385   : > { %5246 = vst [vmem:[%s7558_s25 + $0x88] sm:$0xff] %v5225_v11 }
 0x386   : > { %5247 = vst [vmem:[%s7558_s25 + $0x90] sm:$0xff] %v5226_v29 }
 0x387 PF: > { %s13_s12 = sadd.s32 1, %s5953_s12  }
 0x388   : > { %p10_p4 = scmp.ge.s32.totalorder %s13_s12, 4  }
 0x38a   :  { %12 = sbr.rel (!%p10_p4) target bundleno = 1 (0x1), region = 70 }

// kernel: fdfe_anomaly_net.6
= control target key start
LH: loop header
LB: loop body
LE: loop exit
PB: predicated region body
PF: predicated region fallthrough
CT: control target
= control target key end

     0   :  { %s5222_s12 = smov 0   ;;  %s7417_s0 = inlined_call_operand.vmem [shape: f32[2,8,1936], index: 0, kind: input, shape index: {}]   ;;  %s7418_s1 = inlined_call_operand.vmem [shape: f32[9,16,8], index: 1, kind: input, shape index: {}]   ;;  %s7419_s2 = inlined_call_operand.vmem [shape: f32[16,1], index: 2, kind: input, shape index: {}]   ;;  %s7420_s3 = inlined_call_operand.vmem [shape: f32[2,16,1900], index: 3, kind: output, shape index: {}]  }
   0x1 LB: > { %s4671_s13 = sadd.s32 4294967295, %s5191_s12   ;;  %p4675_p0 = scmp.ge.s32.totalorder %s5191_s12, 1  ;;  %s5191_s12 = sphi %s5222_s12, %s13_s12  }
   0x2   : > { %p137_p1 = scmp.lt.s32.totalorder %s5191_s12, 3 }
   0x4   : > { %p138_p2 = pnand %p4675_p0, %p137_p1 }
   0x6   : > { %141 = sbr.rel (%p138_p2) target bundleno = 1081 (0x439), region = 32 }
   0xb   : > { %p161_p3 = scmp.lt.s32.totalorder %s4671_s13, 1  ;;  %s5193_s18 = smov 127   ;;  %vm236_vm0 = vcmask 1039360   ;;  %v5367_v28 = vld [vmem:[%s7418_s1 + $0x10] sm:$0xff]  ;;  %vm266_vm1 = vcmask 64512   ;;  %v5380_v41 = vld [vmem:[%s7418_s1 + $0x18] sm:$0xff] }
   0xc   : > { %s5194_s19 = smov 126   ;;  %s5195_s20 = smov 117   ;;  %v5496_v63 = vld [vmem:[%s7418_s1] sm:$0xff]  ;;  %vm1002_vm2 = vcmask 1031168   ;;  %vm1480_vm3 = vcmask 957440   ;;  %vm1927_vm4 = vcmask 949248  }
   0xd   : > { %s7456_s13 = smov (!%p161_p3, %s4671_s13), 1  ;;  %s5196_s21 = smov 116   ;;  %vm2374_vm5 = vcmask 941056   ;;  %vm2821_vm6 = vcmask 867328   ;;  %vm3268_vm7 = vcmask 859136   ;;  %vm3715_vm8 = vcmask 850944  }
   0xe   : > { %s4967_s14 = sshll.u32 %s7456_s13, 7  ;;  %s5197_s26 = smov 115   ;;  %vm4599_vm9 = vcmask 883712  }
   0xf   : > { %s5236_s17 = scalar_lea.vmem %s7417_s0, %s4967_s14  ;;  %s5198_s8 = smov 106  }
  0x10   : > { %v5239_v0 = vld [vmem:[%s5236_s17 + $0x20] sm:$0xff]  ;;  %v5242_v1 = vld [vmem:[%s5236_s17 + $0x30] sm:$0xff]  ;;  %v5252_v4 = vld [vmem:[%s5236_s17 + $0x18] sm:$0xff]  ;;  %s5199_s15 = smov 105   ;;  %s5200_s27 = smov 104  }
  0x11   : > { %v5245_v2 = vld [vmem:[%s5236_s17 + $0x10] sm:$0xff]  ;;  %v5249_v3 = vpack.i.bf16 %v5242_v1, %v5239_v0  ;;  %v5261_v6 = vld [vmem:[%s5236_s17 + $0x28] sm:$0xff]  ;;  %v5266_v7 = vld [vmem:[%s5236_s17] sm:$0xff] }
  0x12   : > { %v5256_v5 = vpack.i.bf16 %v5252_v4, %v5245_v2  ;;  %216 = vrot.lane.b32.xlu2 %v5261_v6, %s5193_s18  ;;  %v5271_v8 = vld [vmem:[%s5236_s17 + $0x8] sm:$0xff]  ;;  %v5274_v9 = vld [vmem:[%s5236_s17 + $0x40] sm:$0xff]  ;;  %v5277_v10 = vld [vmem:[%s5236_s17 + $0x50] sm:$0xff]  ;;  %v5350_v21 = vpack.i.bf16 %v5239_v0, %v5245_v2  ;;  %v5456_v61 = vpack.i.bf16 %v5261_v6, %v5252_v4 }
  0x13   : > { %4998 = vrot.lane.b32.xlu1 %v5249_v3, %s5193_s18  ;;  %v5280_v11 = vld [vmem:[%s5236_s17 + $0x38] sm:$0xff]  ;;  %v4992_v12 = vpack.i.bf16 %v5266_v7, %v5271_v8  ;;  %v5286_v13 = vpack.i.bf16 %v5277_v10, %v5274_v9  ;;  %v5294_v14 = vld [vmem:[%s5236_s17 + $0x60] sm:$0xff]  ;;  %v5297_v15 = vld [vmem:[%s5236_s17 + $0x70] sm:$0xff]  ;;  %v5317_v19 = vpack.i.bf16 %v5271_v8, %v5266_v7  ;;  %v5358_v24 = vpack.i.bf16 %v5274_v9, %v5242_v1 }
  0x14   : > { %4988 = vrot.lane.b32.xlu0 %v5256_v5, %s5193_s18  ;;  %v5300_v16 = vld [vmem:[%s5236_s17 + $0x48] sm:$0xff]  ;;  %v5304_v17 = vpack.i.bf16 %v5297_v15, %v5294_v14  ;;  %v5307_v18 = vld [vmem:[%s5236_s17 + $0x58] sm:$0xff]  ;;  %v5396_v49 = vpack.i.bf16 %v5294_v14, %v5277_v10  ;;  %v5414_v57 = vpack.i.bf16 %v5245_v2, %v5271_v8 }
  0x15   : > { %v5320_v20 = vld [vmem:[%s5236_s17 + $0x68] sm:$0xff]  ;;  %v5042_v62 = vpack.i.bf16 %v5300_v16, %v5280_v11 }
  0x1a   : > { %5003 = vrot.lane.b32.xlu2 %v5286_v13, %s5193_s18 }
  0x1b   : > { %220 = vrot.lane.b32.xlu1 %v5280_v11, %s5193_s18 }
  0x1c   : > { %4993 = vrot.lane.b32.xlu0 %v4992_v12, %s5193_s18 }
  0x22   : > { %5008 = vrot.lane.b32.xlu2 %v5304_v17, %s5193_s18 }
  0x23   : > { %224 = vrot.lane.b32.xlu1 %v5300_v16, %s5193_s18 }
  0x24   : > { %228 = vrot.lane.b32.xlu0 %v5307_v18, %s5193_s18 }
  0x2a   : > { %5018 = vrot.lane.b32.xlu2 %v5350_v21, %s5194_s19 }
  0x2b   : > { %5013 = vrot.lane.b32.xlu1 %v5317_v19, %s5194_s19 }
  0x2c   : > { %232 = vrot.lane.b32.xlu0 %v5320_v20, %s5193_s18 }
  0x32   : > { %5023 = vrot.lane.b32.xlu2 %v5358_v24, %s5194_s19 }
  0x33   : > { %978 = vrot.lane.b32.xlu1 %v5252_v4, %s5194_s19 }
  0x34   : > { %982 = vrot.lane.b32.xlu0 %v5261_v6, %s5194_s19 }
  0x3a   : > { %5028 = vrot.lane.b32.xlu2 %v5396_v49, %s5194_s19 }
  0x3b   : > { %986 = vrot.lane.b32.xlu1 %v5280_v11, %s5194_s19 }
  0x3c   : > { %990 = vrot.lane.b32.xlu0 %v5300_v16, %s5194_s19 }
  0x42   : > { %1000 = vrot.lane.b32.xlu2 %v5297_v15, %s5194_s19 }
  0x43   : > { %994 = vrot.lane.b32.xlu1 %v5307_v18, %s5194_s19 }
  0x44   : > { %998 = vrot.lane.b32.xlu0 %v5320_v20, %s5194_s19 }
  0x4a   : > { %5038 = vrot.lane.b32.xlu2 %v5456_v61, %s5195_s20 }
  0x4b   : > { %1448 = vrot.lane.b32.xlu1 %v5266_v7, %s5195_s20 }
  0x4c   : > { %5033 = vrot.lane.b32.xlu0 %v5414_v57, %s5195_s20 }
  0x52   : > { %5043 = vrot.lane.b32.xlu2 %v5042_v62, %s5195_s20 }
  0x53   : > { %1456 = vrot.lane.b32.xlu1 %v5239_v0, %s5195_s20 }
  0x54   : > { %1460 = vrot.lane.b32.xlu0 %v5242_v1, %s5195_s20 }
  0x5b   : > { %1464 = vrot.lane.b32.xlu1 %v5274_v9, %s5195_s20 }
  0x5c   : > { %1468 = vrot.lane.b32.xlu0 %v5277_v10, %s5195_s20 }
  0x63   : > { %1472 = vrot.lane.b32.xlu1 %v5294_v14, %s5195_s20 }
  0x64   : > { %1476 = vrot.lane.b32.xlu0 %v5297_v15, %s5195_s20 }
  0x6b   : > { %5058 = vrot.lane.b32.xlu1 %v5317_v19, %s5196_s21 }
  0x6c   : > { %v217_v22 = vpop.permute.xlu2 %216  ;;  %5053 = vrot.lane.b32.xlu0 %v5256_v5, %s5196_s21 }
  0x73   : > { %1905 = vrot.lane.b32.xlu1 %v5261_v6, %s5196_s21 }
  0x74   : > { %v5004_v31 = vpop.permute.xlu2 %5003  ;;  %1909 = vrot.lane.b32.xlu0 %v5280_v11, %s5196_s21 }
  0x75   : > { %v5005_v38 = vunpack.i.l.bf16 %v5004_v31  ;;  %v5006_v42 = vunpack.i.h.bf16 %v5004_v31 }
  0x7b   : > { %1913 = vrot.lane.b32.xlu1 %v5300_v16, %s5196_s21 }
  0x7c   : > { %v5009_v45 = vpop.permute.xlu2 %5008  ;;  %1917 = vrot.lane.b32.xlu0 %v5307_v18, %s5196_s21 }
  0x7d   : > { %v5010_v53 = vunpack.i.l.bf16 %v5009_v45  ;;  %v5011_v55 = vunpack.i.h.bf16 %v5009_v45 }
  0x83   : > { %1921 = vrot.lane.b32.xlu1 %v5320_v20, %s5196_s21 }
  0x85   : > { %v4999_v23 = vpop.permute.xlu1 %4998 }
  0x86   : > { %v4989_v25 = vpop.permute.xlu0 %4988  ;;  %v5001_v30 = vunpack.i.h.bf16 %v4999_v23  ;;  %v5000_v37 = vunpack.i.l.bf16 %v4999_v23 }
  0x87   : > { %v4991_v26 = vunpack.i.h.bf16 %v4989_v25  ;;  %v4990_v27 = vunpack.i.l.bf16 %v4989_v25  ;;  %v5019_v25 = vpop.permute.xlu2 %5018 }
  0x88   : > { %v241_v43 = vsel %vm236_vm0, %v5000_v37, %v217_v22  ;;  %v242_v44 = vsel %vm236_vm0, %v217_v22, %v5001_v30 }
  0x89   : > { %v239_v29 = vsel %vm236_vm0, %v4990_v27, %v4991_v26  ;;  %v240_v46 = vsel %vm236_vm0, %v4991_v26, %v5000_v37  ;;  %v5551_v26 = vld [vmem:[%s5236_s17 + $0x78] sm:$0xff] }
  0x8a   : > { %334 = vmatpush.msra.mxu2 %v239_v29  ;;  %1925 = vrot.lane.b32.xlu0 %v5551_v26, %s5196_s21 }
  0x8b   : > { %4685 = vmatmul.msk.f32.vlgmr.msra.gmra.mxu2 %vm266_vm1, %v5367_v28  ;;  %2346 = vrot.lane.b32.xlu1 %v5245_v2, %s5197_s26 }
  0x8d   : > { %v221_v32 = vpop.permute.xlu1 %220 }
  0x8e   : > { %v4994_v33 = vpop.permute.xlu0 %4993  ;;  %v243_v34 = vsel %vm236_vm0, %v5001_v30, %v221_v32  ;;  %v244_v47 = vsel %vm236_vm0, %v221_v32, %v5005_v38 }
  0x8f   : > { %v4996_v35 = vunpack.i.h.bf16 %v4994_v33  ;;  %v4995_v36 = vunpack.i.l.bf16 %v4994_v33  ;;  %426 = vmatpush.msrb.mxu2 %v243_v34 }
  0x91   : > { %v237_v39 = vsel %vm236_vm0, %v4996_v35, %v4995_v36  ;;  %v238_v40 = vsel %vm236_vm0, %v4995_v36, %v4990_v27  ;;  %v5020_v27 = vunpack.i.l.bf16 %v5019_v25  ;;  %v5024_v35 = vpop.permute.xlu2 %5023 }
  0x92   : > { %288 = vmatpush.msra.mxu0 %v237_v39  ;;  %4968 = vmatpush.msra.mxu3 %v237_v39  ;;  %v5025_v36 = vunpack.i.l.bf16 %v5024_v35  ;;  %v5026_v37 = vunpack.i.h.bf16 %v5024_v35  ;;  %v5584_v39 = vld [vmem:[%s7418_s1 + $0x20] sm:$0xff] }
  0x93   : > { %311 = vmatpush.msra.mxu1 %v238_v40  ;;  %4681 = vmatmul.msk.f32.vlgmr.msra.gmra.mxu0 %vm266_vm1, %v5367_v28 }
  0x94   : > { %4682 = vmatmul.msk.f32.vlgmr.msra.gmra.mxu3 %vm266_vm1, %v5380_v41  ;;  %4683 = vmatmul.msk.f32.vlgmr.msra.gmra.mxu1 %vm266_vm1, %v5367_v28 }
  0x95   : > { %4686 = vmatmul.msk.f32.gmra.mxu2 %vm266_vm1, %v5380_v41  ;;  %357 = vmatpush.msrb.mxu3 %v240_v46  ;;  %v225_v48 = vpop.permute.xlu1 %224 }
  0x96   : > { %380 = vmatpush.msrb.mxu0 %v241_v43  ;;  %403 = vmatpush.msrb.mxu1 %v242_v44  ;;  %v245_v50 = vsel %vm236_vm0, %v5005_v38, %v225_v48  ;;  %v246_v51 = vsel %vm236_vm0, %v225_v48, %v5006_v42  ;;  %v229_v52 = vpop.permute.xlu0 %228 }
  0x97   : > { %449 = vmatpush.msra.mxu3 %v244_v47  ;;  %v247_v54 = vsel %vm236_vm0, %v5006_v42, %v229_v52  ;;  %v248_v56 = vsel %vm236_vm0, %v229_v52, %v5010_v53  ;;  %2354 = vrot.lane.b32.xlu1 %v5242_v1, %s5197_s26 }
  0x98   : > { %472 = vmatpush.msra.mxu0 %v245_v50  ;;  %495 = vmatpush.msra.mxu1 %v246_v51 }
  0x99   : > { %518 = vmatpush.msra.mxu2 %v247_v54  ;;  %v5029_v44 = vpop.permute.xlu2 %5028 }
  0x9a   : > { %v5031_v45 = vunpack.i.h.bf16 %v5029_v44 }
  0x9b   : > { %4689 = vmatmul.msk.f32.vlgmr.msrb.gmra.mxu0 %vm266_vm1, %v5367_v28 }
  0x9c   : > { %4684 = vmatmul.msk.f32.gmra.mxu1 %vm266_vm1, %v5380_v41  ;;  %4687 = vmatmul.msk.f32.vlgmr.msrb.gmra.mxu3 %vm266_vm1, %v5367_v28 }
  0x9d   : > { %4693 = vmatmul.msk.f32.vlgmr.msrb.gmra.mxu2 %vm266_vm1, %v5367_v28  ;;  %541 = vmatpush.msrb.mxu3 %v248_v56  ;;  %v5014_v5 = vpop.permute.xlu1 %5013 }
  0x9e   : > { %v233_v58 = vpop.permute.xlu0 %232  ;;  %610 = vmatpush.msrb.mxu2 %v5011_v55  ;;  %v5016_v12 = vunpack.i.h.bf16 %v5014_v5  ;;  %v5015_v22 = vunpack.i.l.bf16 %v5014_v5 }
  0x9f   : > { %v249_v59 = vsel %vm236_vm0, %v5010_v53, %v233_v58  ;;  %v250_v60 = vsel %vm236_vm0, %v233_v58, %v5011_v55  ;;  %2362 = vrot.lane.b32.xlu1 %v5277_v10, %s5197_s26  ;;  %v5082_v58 = vpack.i.bf16 %v5239_v0, %v5252_v4 }
  0xa0   : > { %564 = vmatpush.msrb.mxu0 %v249_v59  ;;  %v1003_v23 = vsel %vm1002_vm2, %v5015_v22, %v5016_v12  ;;  %v1004_v31 = vsel %vm1002_vm2, %v5016_v12, %v5020_v27 }
  0xa1   : > { %5083 = vrot.lane.b32.xlu0 %v5082_v58, %s5197_s26  ;;  %v5737_v58 = vld [vmem:[%s7418_s1 + $0x30] sm:$0xff] }
  0xa3   : > { %4690 = vmatmul.msk.f32.gmra.mxu0 %vm266_vm1, %v5380_v41 }
  0xa4   : > { %4688 = vmatmul.msk.f32.gmra.mxu3 %vm266_vm1, %v5380_v41  ;;  %4691 = vmatmul.msk.f32.vlgmr.msrb.gmra.mxu1 %vm266_vm1, %v5367_v28 }
  0xa5   : > { %4694 = vmatmul.msk.f32.gmra.mxu2 %vm266_vm1, %v5380_v41  ;;  %587 = vmatpush.msrb.mxu1 %v250_v60  ;;  %v979_v29 = vpop.permute.xlu1 %978  ;;  %v1001_v60 = vpop.permute.xlu2 %1000 }
  0xa6   : > { %v983_v30 = vpop.permute.xlu0 %982  ;;  %v1005_v32 = vsel %vm1002_vm2, %v5020_v27, %v979_v29 }
  0xa7   : > { %v1008_v40 = vsel %vm1002_vm2, %v983_v30, %v5025_v36 }
  0xa9   : > { %2358 = vrot.lane.b32.xlu0 %v5274_v9, %s5197_s26 }
  0xab   : > { %4697 = vmatmul.msk.f32.vlgmr.msra.gmra.mxu0 %vm266_vm1, %v5367_v28 }
  0xac   : > { %4692 = vmatmul.msk.f32.gmra.mxu1 %vm266_vm1, %v5380_v41  ;;  %4695 = vmatmul.msk.f32.vlgmr.msra.gmra.mxu3 %vm266_vm1, %v5367_v28 }
  0xad   : > { %4701 = vmatmul.msk.f32.vlgmr.msra.gmra.mxu2 %vm266_vm1, %v5367_v28  ;;  %662 = vmatpush.msra.mxu0 %v5271_v8  ;;  %v5047_v8 = vpack.i.bf16 %v5320_v20, %v5307_v18 }
  0xae   : > { %639 = vmatpush.msra.mxu3 %v5266_v7  ;;  %708 = vmatpush.msra.mxu2 %v5252_v4  ;;  %v991_v38 = vpop.permute.xlu0 %990 }
  0xaf   : > { %5048 = vrot.lane.b32.xlu2 %v5047_v8, %s5195_s20  ;;  %v1011_v42 = vsel %vm1002_vm2, %v5026_v37, %v991_v38 }
  0xb1   : > { %2366 = vrot.lane.b32.xlu0 %v5294_v14, %s5197_s26 }
  0xb3   : > { %4698 = vmatmul.msk.f32.gmra.mxu0 %vm266_vm1, %v5380_v41 }
  0xb4   : > { %4696 = vmatmul.msk.f32.gmra.mxu3 %vm266_vm1, %v5380_v41  ;;  %4699 = vmatmul.msk.f32.vlgmr.msra.gmra.mxu1 %vm266_vm1, %v5367_v28 }
  0xb5   : > { %4702 = vmatmul.msk.f32.gmra.mxu2 %vm266_vm1, %v5380_v41  ;;  %685 = vmatpush.msra.mxu1 %v5245_v2  ;;  %v5516_v2 = vld [vmem:[%s7418_s1 + $0x8] sm:$0xff] }
  0xb6   : > { %v999_v47 = vpop.permute.xlu0 %998 }
  0xb7   : > { %1478 = vrot.lane.b32.xlu2 %v5551_v26, %s5195_s20  ;;  %v1015_v51 = vsel %vm1002_vm2, %v5031_v45, %v999_v47  ;;  %v1016_v12 = vsel %vm1002_vm2, %v999_v47, %v1001_v60 }
  0xb9   : > { %5098 = vrot.lane.b32.xlu0 %v5317_v19, %s5198_s8 }
  0xbb   : > { %4705 = vmatmul.msk.f32.vlgmr.msrb.gmra.mxu0 %vm266_vm1, %v5367_v28 }
  0xbc   : > { %4700 = vmatmul.msk.f32.gmra.mxu1 %vm266_vm1, %v5380_v41  ;;  %4703 = vmatmul.msk.f32.vlgmr.msrb.gmra.mxu3 %vm266_vm1, %v5367_v28 }
  0xbd   : > { %4709 = vmatmul.msk.f32.vlgmr.msrb.gmra.mxu2 %vm266_vm1, %v5367_v28  ;;  %754 = vmatpush.msrb.mxu0 %v5261_v6 }
  0xbe   : > { %731 = vmatpush.msrb.mxu3 %v5239_v0  ;;  %800 = vmatpush.msrb.mxu2 %v5280_v11  ;;  %v5034_v56 = vpop.permute.xlu0 %5033 }
  0xbf   : > { %5063 = vrot.lane.b32.xlu2 %v5249_v3, %s5196_s21  ;;  %v987_v3 = vpop.permute.xlu1 %986  ;;  %v5036_v62 = vunpack.i.h.bf16 %v5034_v56 }
  0xc0   : > { %v1010_v43 = vsel %vm1002_vm2, %v987_v3, %v5026_v37 }
  0xc1   : > { %2799 = vrot.lane.b32.xlu0 %v5261_v6, %s5198_s8 }
  0xc3   : > { %4706 = vmatmul.msk.f32.gmra.mxu0 %vm266_vm1, %v5380_v41 }
  0xc4   : > { %4704 = vmatmul.msk.f32.gmra.mxu3 %vm266_vm1, %v5380_v41  ;;  %4707 = vmatmul.msk.f32.vlgmr.msrb.gmra.mxu1 %vm266_vm1, %v5367_v28  ;;  %v5021_v28 = vunpack.i.h.bf16 %v5019_v25 }
  0xc5   : > { %4710 = vmatmul.msk.f32.gmra.mxu2 %vm266_vm1, %v5380_v41  ;;  %777 = vmatpush.msrb.mxu1 %v5242_v1 }
  0xc6   : > { %v1007_v33 = vsel %vm1002_vm2, %v5021_v28, %v983_v30  ;;  %v1006_v34 = vsel %vm1002_vm2, %v979_v29, %v5021_v28  ;;  %v5039_v30 = vpop.permute.xlu2 %5038 }
  0xc7   : > { %5068 = vrot.lane.b32.xlu2 %v5286_v13, %s5196_s21  ;;  %v5602_v13 = vld [vmem:[%s7418_s1 + $0x28] sm:$0xff]  ;;  %v995_v46 = vpop.permute.xlu1 %994 }
  0xc8   : > { %v1014_v55 = vsel %vm1002_vm2, %v995_v46, %v5031_v45 }
  0xc9   : > { %2807 = vrot.lane.b32.xlu0 %v5300_v16, %s5198_s8 }
  0xcb   : > { %4713 = vmatmul.msk.f32.vlgmr.msra.gmra.mxu0 %vm266_vm1, %v5496_v63 }
  0xcc   : > { %4708 = vmatmul.msk.f32.gmra.mxu1 %vm266_vm1, %v5380_v41  ;;  %4711 = vmatmul.msk.f32.vlgmr.msra.gmra.mxu3 %vm266_vm1, %v5496_v63  ;;  %v1009_v41 = vsel %vm1002_vm2, %v5025_v36, %v987_v3 }
  0xcd   : > { %4717 = vmatmul.msk.f32.vlgmr.msra.gmra.mxu2 %vm266_vm1, %v5496_v63  ;;  %846 = vmatpush.msra.mxu0 %v5300_v16 }
  0xce   : > { %823 = vmatpush.msra.mxu3 %v5274_v9  ;;  %892 = vmatpush.msra.mxu2 %v5307_v18 }
  0xcf   : > { %5073 = vrot.lane.b32.xlu2 %v5304_v17, %s5196_s21  ;;  %v5030_v17 = vunpack.i.l.bf16 %v5029_v44  ;;  %v1449_v22 = vpop.permute.xlu1 %1448 }
  0xd1   : > { %v1012_v48 = vsel %vm1002_vm2, %v991_v38, %v5030_v17  ;;  %v1013_v50 = vsel %vm1002_vm2, %v5030_v17, %v995_v46  ;;  %v5044_v17 = vpop.permute.xlu2 %5043  ;;  %2815 = vrot.lane.b32.xlu0 %v5320_v20, %s5198_s8 }
  0xd2   : > { %v5045_v45 = vunpack.i.l.bf16 %v5044_v17 }
  0xd3   : > { %4714 = vmatmul.msk.f32.gmra.mxu0 %vm266_vm1, %v5516_v2 }
  0xd4   : > { %4712 = vmatmul.msk.f32.gmra.mxu3 %vm266_vm1, %v5516_v2  ;;  %4715 = vmatmul.msk.f32.vlgmr.msra.gmra.mxu1 %vm266_vm1, %v5496_v63 }
  0xd5   : > { %4718 = vmatmul.msk.f32.gmra.mxu2 %vm266_vm1, %v5516_v2  ;;  %869 = vmatpush.msra.mxu1 %v5277_v10 }
  0xd7   : > { %5078 = vrot.lane.b32.xlu2 %v5317_v19, %s5197_s26  ;;  %v1457_v9 = vpop.permute.xlu1 %1456  ;;  %v5087_v19 = vpack.i.bf16 %v5280_v11, %v5261_v6 }
  0xd9   : > { %5123 = vrot.lane.b32.xlu0 %v5414_v57, %s5199_s15 }
  0xdb   : > { %4721 = vmatmul.msk.f32.vlgmr.msrb.gmra.mxu0 %vm266_vm1, %v5496_v63 }
  0xdc   : > { %4716 = vmatmul.msk.f32.gmra.mxu1 %vm266_vm1, %v5516_v2  ;;  %4719 = vmatmul.msk.f32.vlgmr.msrb.gmra.mxu3 %vm266_vm1, %v5496_v63 }
  0xdd   : > { %4725 = vmatmul.msk.f32.vlgmr.msrb.gmra.mxu2 %vm266_vm1, %v5496_v63  ;;  %938 = vmatpush.msrb.mxu0 %v5320_v20 }
  0xde   : > { %915 = vmatpush.msrb.mxu3 %v5294_v14  ;;  %1053 = vmatpush.msrb.mxu2 %v1003_v23 }
  0xdf   : > { %v1465_v46 = vpop.permute.xlu1 %1464  ;;  %5088 = vrot.lane.b32.xlu2 %v5087_v19, %s5197_s26 }
  0xe1   : > { %5128 = vrot.lane.b32.xlu0 %v5456_v61, %s5199_s15 }
  0xe3   : > { %4722 = vmatmul.msk.f32.gmra.mxu0 %vm266_vm1, %v5516_v2 }
  0xe4   : > { %4720 = vmatmul.msk.f32.gmra.mxu3 %vm266_vm1, %v5516_v2  ;;  %4723 = vmatmul.msk.f32.vlgmr.msrb.gmra.mxu1 %vm266_vm1, %v5496_v63 }
  0xe5   : > { %4726 = vmatmul.msk.f32.gmra.mxu2 %vm266_vm1, %v5516_v2  ;;  %961 = vmatpush.msrb.mxu1 %v5297_v15 }
  0xeb   : > { %4729 = vmatmul.msk.f32.vlgmr.msra.gmra.mxu0 %vm266_vm1, %v5496_v63 }
  0xec   : > { %4724 = vmatmul.msk.f32.gmra.mxu1 %vm266_vm1, %v5516_v2  ;;  %4727 = vmatmul.msk.f32.vlgmr.msra.gmra.mxu3 %vm266_vm1, %v5496_v63 }
  0xed   : > { %4733 = vmatmul.msk.f32.vlgmr.msra.gmra.mxu2 %vm266_vm1, %v5496_v63  ;;  %1076 = vmatpush.msra.mxu3 %v1004_v31  ;;  %v5040_v31 = vunpack.i.l.bf16 %v5039_v30 }
  0xee   : > { %1099 = vmatpush.msra.mxu0 %v1005_v32  ;;  %1145 = vmatpush.msra.mxu2 %v1007_v33  ;;  %v5041_v33 = vunpack.i.h.bf16 %v5039_v30 }
  0xef   : > { %v1483_v3 = vsel %vm1480_vm3, %v5036_v62, %v5040_v31  ;;  %v1484_v38 = vsel %vm1480_vm3, %v5040_v31, %v1457_v9  ;;  %v5102_v31 = vpack.i.bf16 %v5551_v26, %v5297_v15 }
  0xf0   : > { %v1485_v44 = vsel %vm1480_vm3, %v1457_v9, %v5041_v33 }
  0xf1   : > { %5103 = vrot.lane.b32.xlu1 %v5102_v31, %s5197_s26 }
  0xf3   : > { %4730 = vmatmul.msk.f32.gmra.mxu0 %vm266_vm1, %v5516_v2 }
  0xf4   : > { %4728 = vmatmul.msk.f32.gmra.mxu3 %vm266_vm1, %v5516_v2  ;;  %4731 = vmatmul.msk.f32.vlgmr.msra.gmra.mxu1 %vm266_vm1, %v5496_v63 }
  0xf5   : > { %4734 = vmatmul.msk.f32.gmra.mxu2 %vm266_vm1, %v5516_v2  ;;  %1122 = vmatpush.msra.mxu1 %v1006_v34  ;;  %v1461_v34 = vpop.permute.xlu0 %1460 }
  0xf9   : > { %2795 = vrot.lane.b32.xlu1 %v5252_v4, %s5198_s8 }
  0xfb   : > { %4737 = vmatmul.msk.f32.vlgmr.msrb.gmra.mxu0 %vm266_vm1, %v5496_v63 }
  0xfc   : > { %4732 = vmatmul.msk.f32.gmra.mxu1 %vm266_vm1, %v5516_v2  ;;  %4735 = vmatmul.msk.f32.vlgmr.msrb.gmra.mxu3 %vm266_vm1, %v5496_v63 }
  0xfd   : > { %4743 = vmatmul.msk.f32.vlgmr.msrb.gmra.mxu2 %vm266_vm1, %v5584_v39  ;;  %1168 = vmatpush.msrb.mxu3 %v1008_v40  ;;  %v1486_v40 = vsel %vm1480_vm3, %v5041_v33, %v1461_v34  ;;  %v1473_v33 = vpop.permute.xlu1 %1472 }
  0xfe   : > { %1191 = vmatpush.msrb.mxu0 %v1009_v41  ;;  %1237 = vmatpush.msrb.mxu2 %v1011_v42 }
 0x101   : > { %2803 = vrot.lane.b32.xlu1 %v5280_v11, %s5198_s8 }
 0x103   : > { %4738 = vmatmul.msk.f32.gmra.mxu0 %vm266_vm1, %v5516_v2 }
 0x104   : > { %4736 = vmatmul.msk.f32.gmra.mxu3 %vm266_vm1, %v5516_v2  ;;  %4739 = vmatmul.msk.f32.vlgmr.msrb.gmra.mxu1 %vm266_vm1, %v5496_v63  ;;  %v5035_v63 = vunpack.i.l.bf16 %v5034_v56 }
 0x105   : > { %4744 = vmatmul.msk.f32.gmra.mxu2 %vm266_vm1, %v5602_v13  ;;  %1214 = vmatpush.msrb.mxu1 %v1010_v43  ;;  %v5059_v4 = vpop.permute.xlu1 %5058 }
 0x106   : > { %v1482_v0 = vsel %vm1480_vm3, %v5035_v63, %v5036_v62  ;;  %v1481_v29 = vsel %vm1480_vm3, %v1449_v22, %v5035_v63  ;;  %v1488_v62 = vsel %vm1480_vm3, %v5045_v45, %v1465_v46  ;;  %v5060_v31 = vunpack.i.l.bf16 %v5059_v4 }
 0x109   : > { %v5049_v30 = vpop.permute.xlu2 %5048  ;;  %2811 = vrot.lane.b32.xlu1 %v5307_v18, %s5198_s8 }
 0x10a   : > { %v5050_v9 = vunpack.i.l.bf16 %v5049_v30 }
 0x10b   : > { %4747 = vmatmul.msk.f32.vlgmr.msra.gmra.mxu0 %vm266_vm1, %v5584_v39 }
 0x10c   : > { %4740 = vmatmul.msk.f32.gmra.mxu1 %vm266_vm1, %v5516_v2  ;;  %4745 = vmatmul.msk.f32.vlgmr.msra.gmra.mxu3 %vm266_vm1, %v5584_v39 }
 0x10d   : > { %4751 = vmatmul.msk.f32.vlgmr.msra.gmra.mxu2 %vm266_vm1, %v5584_v39  ;;  %1260 = vmatpush.msra.mxu3 %v1012_v48  ;;  %v5046_v48 = vunpack.i.h.bf16 %v5044_v17  ;;  %v5092_v17 = vpack.i.bf16 %v5307_v18, %v5300_v16 }
 0x10e   : > { %v5626_v52 = vpop.f32.mrf.mxu2  ;;  %1283 = vmatpush.msra.mxu0 %v1013_v50  ;;  %1329 = vmatpush.msra.mxu2 %v1015_v51  ;;  %v1469_v50 = vpop.permute.xlu0 %1468 }
 0x10f   : > { %v1490_v63 = vsel %vm1480_vm3, %v5046_v48, %v1469_v50  ;;  %v1491_v19 = vsel %vm1480_vm3, %v1469_v50, %v5050_v9  ;;  %5093 = vrot.lane.b32.xlu2 %v5092_v17, %s5197_s26 }
 0x110   : > { %v5628_v53 = vpop.f32.mrf.mxu0 }
 0x111   : > { %v5630_v54 = vpop.f32.mrf.mxu1  ;;  %2819 = vrot.lane.b32.xlu1 %v5551_v26, %s5198_s8 }
 0x113   : > { %4748 = vmatmul.msk.f32.gmra.mxu0 %vm266_vm1, %v5602_v13 }
 0x114   : > { %4746 = vmatmul.msk.f32.gmra.mxu3 %vm266_vm1, %v5602_v13  ;;  %4749 = vmatmul.msk.f32.vlgmr.msra.gmra.mxu1 %vm266_vm1, %v5584_v39 }
 0x115   : > { %4752 = vmatmul.msk.f32.gmra.mxu2 %vm266_vm1, %v5602_v13  ;;  %1306 = vmatpush.msra.mxu1 %v1014_v55 }
 0x117   : > { %v5643_v59 = vpop.f32.mrf.mxu3  ;;  %2368 = vrot.lane.b32.xlu2 %v5320_v20, %s5197_s26 }
 0x118   : > { %v5645_v2 = vpop.f32.mrf.mxu2  ;;  %v5647_v5 = vpop.f32.mrf.mxu0 }
 0x119   : > { %v5650_v8 = vpop.f32.mrf.mxu1  ;;  %3248 = vrot.lane.b32.xlu1 %v5242_v1, %s5199_s15 }
 0x11b   : > { %4755 = vmatmul.msk.f32.vlgmr.msrb.gmra.mxu0 %vm266_vm1, %v5584_v39 }
 0x11c   : > { %4750 = vmatmul.msk.f32.gmra.mxu1 %vm266_vm1, %v5602_v13  ;;  %4753 = vmatmul.msk.f32.vlgmr.msrb.gmra.mxu3 %vm266_vm1, %v5584_v39 }
 0x11d   : > { %4759 = vmatmul.msk.f32.vlgmr.msrb.gmra.mxu2 %vm266_vm1, %v5584_v39  ;;  %1352 = vmatpush.msrb.mxu3 %v1016_v12 }
 0x11e   : > { %1375 = vmatpush.msrb.mxu0 %v1001_v60  ;;  %1555 = vmatpush.msrb.mxu2 %v1482_v0  ;;  %v1487_v60 = vsel %vm1480_vm3, %v1461_v34, %v5045_v45  ;;  %v1492_v45 = vsel %vm1480_vm3, %v5050_v9, %v1473_v33 }
 0x11f   : > { %v5662_v23 = vpop.f32.mrf.mxu3  ;;  %5108 = vrot.lane.b32.xlu2 %v5350_v21, %s5198_s8 }
 0x120   : > { %v5664_v25 = vpop.f32.mrf.mxu2  ;;  %v5666_v27 = vpop.f32.mrf.mxu0 }
 0x121   : > { %v5670_v28 = vpop.f32.mrf.mxu1  ;;  %3256 = vrot.lane.b32.xlu1 %v5277_v10, %s5199_s15 }
 0x123   : > { %4756 = vmatmul.msk.f32.gmra.mxu0 %vm266_vm1, %v5602_v13 }
 0x124   : > { %4754 = vmatmul.msk.f32.gmra.mxu3 %vm266_vm1, %v5602_v13  ;;  %4757 = vmatmul.msk.f32.vlgmr.msrb.gmra.mxu1 %vm266_vm1, %v5584_v39 }
 0x125   : > { %4760 = vmatmul.msk.f32.gmra.mxu2 %vm266_vm1, %v5602_v13  ;;  %1532 = vmatpush.msrb.mxu1 %v1481_v29  ;;  %v1489_v29 = vsel %vm1480_vm3, %v1465_v46, %v5046_v48 }
 0x127   : > { %v5681_v32 = vpop.f32.mrf.mxu3  ;;  %5113 = vrot.lane.b32.xlu2 %v5358_v24, %s5198_s8 }
 0x128   : > { %v5683_v35 = vpop.f32.mrf.mxu2  ;;  %v5685_v36 = vpop.f32.mrf.mxu0 }
 0x129   : > { %v5689_v37 = vpop.f32.mrf.mxu1  ;;  %3264 = vrot.lane.b32.xlu1 %v5297_v15, %s5199_s15 }
 0x12b   : > { %4763 = vmatmul.msk.f32.vlgmr.msra.gmra.mxu0 %vm266_vm1, %v5584_v39 }
 0x12c   : > { %4758 = vmatmul.msk.f32.gmra.mxu1 %vm266_vm1, %v5602_v13  ;;  %4761 = vmatmul.msk.f32.vlgmr.msra.gmra.mxu3 %vm266_vm1, %v5584_v39 }
 0x12d   : > { %4767 = vmatmul.msk.f32.vlgmr.msra.gmra.mxu2 %vm266_vm1, %v5584_v39  ;;  %1578 = vmatpush.msra.mxu3 %v1483_v3  ;;  %v5051_v3 = vunpack.i.h.bf16 %v5049_v30  ;;  %v5061_v30 = vunpack.i.h.bf16 %v5059_v4 }
 0x12e   : > { %1601 = vmatpush.msra.mxu0 %v1484_v38  ;;  %1647 = vmatpush.msra.mxu2 %v1486_v40  ;;  %v1477_v38 = vpop.permute.xlu0 %1476 }
 0x12f   : > { %v5702_v14 = vpop.f32.mrf.mxu3  ;;  %v1494_v46 = vsel %vm1480_vm3, %v5051_v3, %v1477_v38  ;;  %v1928_v11 = vsel %vm1927_vm4, %v5060_v31, %v5061_v30  ;;  %5118 = vrot.lane.b32.xlu2 %v5396_v49, %s5198_s8 }
 0x130   : > { %v5704_v41 = vpop.f32.mrf.mxu2  ;;  %v5706_v42 = vpop.f32.mrf.mxu0 }
 0x131   : > { %v5710_v43 = vpop.f32.mrf.mxu1 }
 0x133   : > { %4764 = vmatmul.msk.f32.gmra.mxu0 %vm266_vm1, %v5602_v13 }
 0x134   : > { %4762 = vmatmul.msk.f32.gmra.mxu3 %vm266_vm1, %v5602_v13  ;;  %4765 = vmatmul.msk.f32.vlgmr.msra.gmra.mxu1 %vm266_vm1, %v5584_v39 }
 0x135   : > { %4768 = vmatmul.msk.f32.gmra.mxu2 %vm266_vm1, %v5602_v13  ;;  %1624 = vmatpush.msra.mxu1 %v1485_v44 }
 0x136   : > { %v5054_v57 = vpop.permute.xlu0 %5053 }
 0x137   : > { %v5723_v47 = vpop.f32.mrf.mxu3  ;;  %v5056_v9 = vunpack.i.h.bf16 %v5054_v57  ;;  %2817 = vrot.lane.b32.xlu2 %v5297_v15, %s5198_s8 }
 0x138   : > { %v5726_v51 = vpop.f32.mrf.mxu2  ;;  %v5728_v55 = vpop.f32.mrf.mxu0 }
 0x139   : > { %v5732_v56 = vpop.f32.mrf.mxu1 }
 0x13b   : > { %4771 = vmatmul.msk.f32.vlgmr.msrb.gmra.mxu0 %vm266_vm1, %v5584_v39 }
 0x13c   : > { %4766 = vmatmul.msk.f32.gmra.mxu1 %vm266_vm1, %v5602_v13  ;;  %4769 = vmatmul.msk.f32.vlgmr.msrb.gmra.mxu3 %vm266_vm1, %v5584_v39  ;;  %v5763_v39 = vld [vmem:[%s7418_s1 + $0x38] sm:$0xff] }
 0x13d   : > { %4777 = vmatmul.msk.f32.vlgmr.msrb.gmra.mxu2 %vm266_vm1, %v5737_v58  ;;  %1670 = vmatpush.msrb.mxu3 %v1487_v60 }
 0x13e   : > { %1693 = vmatpush.msrb.mxu0 %v1488_v62  ;;  %1739 = vmatpush.msrb.mxu2 %v1490_v63 }
 0x13f   : > { %v5750_v6 = vpop.f32.mrf.mxu3  ;;  %3236 = vrot.lane.b32.xlu2 %v5266_v7, %s5199_s15 }
 0x140   : > { %v5752_v12 = vpop.f32.mrf.mxu2  ;;  %v5754_v0 = vpop.f32.mrf.mxu0 }
 0x141   : > { %v5758_v22 = vpop.f32.mrf.mxu1 }
 0x143   : > { %4772 = vmatmul.msk.f32.gmra.mxu0 %vm266_vm1, %v5602_v13 }
 0x144   : > { %4770 = vmatmul.msk.f32.gmra.mxu3 %vm266_vm1, %v5602_v13  ;;  %4775 = vmatmul.msk.f32.vlgmr.msrb.gmra.mxu1 %vm266_vm1, %v5737_v58 }
 0x145   : > { %4778 = vmatmul.msk.f32.gmra.mxu2 %vm266_vm1, %v5763_v39  ;;  %1716 = vmatpush.msrb.mxu1 %v1489_v29  ;;  %v1493_v29 = vsel %vm1480_vm3, %v1473_v33, %v5051_v3  ;;  %v5055_v33 = vunpack.i.l.bf16 %v5054_v57 }
 0x147   : > { %v5776_v34 = vpop.f32.mrf.mxu3 }
 0x148   : > { %v5779_v40 = vpop.f32.mrf.mxu2  ;;  %v5781_v13 = vpop.f32.mrf.mxu0 }
 0x149   : > { %v5785_v44 = vpop.f32.mrf.mxu1 }
 0x14b   : > { %4781 = vmatmul.msk.f32.vlgmr.msra.gmra.mxu0 %vm266_vm1, %v5737_v58 }
 0x14c   : > { %4776 = vmatmul.msk.f32.gmra.mxu1 %vm266_vm1, %v5763_v39  ;;  %4779 = vmatmul.msk.f32.vlgmr.msra.gmra.mxu3 %vm266_vm1, %v5737_v58 }
 0x14d   : > { %4785 = vmatmul.msk.f32.vlgmr.msra.gmra.mxu2 %vm266_vm1, %v5737_v58  ;;  %1762 = vmatpush.msra.mxu3 %v1491_v19 }
 0x14e   : > { %1785 = vmatpush.msra.mxu0 %v1492_v45  ;;  %1831 = vmatpush.msra.mxu2 %v1494_v46 }
 0x14f   : > { %v641_v16 = vpop.f32.mrf.mxu3 }
 0x150   : > { %v5804_v48 = vadd.f32 %v641_v16, %v5628_v53  ;;  %v710_v50 = vpop.f32.mrf.mxu2  ;;  %v5806_v60 = vpop.f32.mrf.mxu0 }
 0x151   : > { %v5811_v62 = vadd.f32 %v710_v50, %v5662_v23  ;;  %v5813_v63 = vpop.f32.mrf.mxu1  ;;  %v1479_v23 = vpop.permute.xlu2 %1478 }
 0x152   : > { %v1495_v46 = vsel %vm1480_vm3, %v1477_v38, %v1479_v23 }
 0x153   : > { %4782 = vmatmul.msk.f32.gmra.mxu0 %vm266_vm1, %v5763_v39 }
 0x154   : > { %4780 = vmatmul.msk.f32.gmra.mxu3 %vm266_vm1, %v5763_v39  ;;  %4783 = vmatmul.msk.f32.vlgmr.msra.gmra.mxu1 %vm266_vm1, %v5737_v58 }
 0x155   : > { %4786 = vmatmul.msk.f32.gmra.mxu2 %vm266_vm1, %v5763_v39  ;;  %1808 = vmatpush.msra.mxu1 %v1493_v29  ;;  %v1929_v29 = vsel %vm1927_vm4, %v5061_v30, %v5055_v33 }
 0x157   : > { %v644_v53 = vpop.f32.mrf.mxu3 }
 0x158   : > { %v5829_v20 = vadd.f32 %v644_v53, %v5643_v59  ;;  %v713_v3 = vpop.f32.mrf.mxu2  ;;  %v5831_v17 = vpop.f32.mrf.mxu0  ;;  %v1930_v59 = vsel %vm1927_vm4, %v5055_v33, %v5056_v9 }
 0x159   : > { %v5836_v19 = vadd.f32 %v713_v3, %v5681_v32  ;;  %v5838_v45 = vpop.f32.mrf.mxu1  ;;  %v5064_v4 = vpop.permute.xlu2 %5063 }
 0x15a   : > { %v5065_v18 = vunpack.i.l.bf16 %v5064_v4  ;;  %v5066_v57 = vunpack.i.h.bf16 %v5064_v4  ;;  %v1910_v53 = vpop.permute.xlu0 %1909 }
 0x15b   : > { %4789 = vmatmul.msk.f32.vlgmr.msrb.gmra.mxu0 %vm266_vm1, %v5737_v58 }
 0x15c   : > { %4784 = vmatmul.msk.f32.gmra.mxu1 %vm266_vm1, %v5763_v39  ;;  %4787 = vmatmul.msk.f32.vlgmr.msrb.gmra.mxu3 %vm266_vm1, %v5737_v58  ;;  %v1931_v3 = vsel %vm1927_vm4, %v5056_v9, %v5065_v18 }
 0x15d   : > { %4793 = vmatmul.msk.f32.vlgmr.msrb.gmra.mxu2 %vm266_vm1, %v5737_v58  ;;  %1854 = vmatpush.msrb.mxu3 %v1495_v46 }
 0x15e   : > { %1979 = vmatpush.msrb.mxu0 %v1928_v11  ;;  %2025 = vmatpush.msrb.mxu2 %v1930_v59  ;;  %v1934_v11 = vsel %vm1927_vm4, %v5066_v57, %v1910_v53 }
 0x15f   : > { %v733_v61 = vpop.f32.mrf.mxu3 }
 0x160   : > { %v5856_v32 = vadd.f32 %v733_v61, %v5647_v5  ;;  %v802_v21 = vpop.f32.mrf.mxu2  ;;  %v5858_v38 = vpop.f32.mrf.mxu0 }
 0x161   : > { %v5861_v16 = vadd.f32 %v802_v21, %v5702_v14  ;;  %v5863_v50 = vpop.f32.mrf.mxu1  ;;  %v1906_v5 = vpop.permute.xlu1 %1905 }
 0x162   : > { %v1932_v46 = vsel %vm1927_vm4, %v5065_v18, %v1906_v5  ;;  %v1933_v21 = vsel %vm1927_vm4, %v1906_v5, %v5066_v57  ;;  %v1918_v18 = vpop.permute.xlu0 %1917 }
 0x163   : > { %4790 = vmatmul.msk.f32.gmra.mxu0 %vm266_vm1, %v5763_v39 }
 0x164   : > { %4788 = vmatmul.msk.f32.gmra.mxu3 %vm266_vm1, %v5763_v39  ;;  %4791 = vmatmul.msk.f32.vlgmr.msrb.gmra.mxu1 %vm266_vm1, %v5737_v58 }
 0x165   : > { %4794 = vmatmul.msk.f32.gmra.mxu2 %vm266_vm1, %v5763_v39  ;;  %2002 = vmatpush.msrb.mxu1 %v1929_v29  ;;  %v5069_v29 = vpop.permute.xlu2 %5068 }
 0x166   : > { %v5070_v1 = vunpack.i.l.bf16 %v5069_v29  ;;  %v5071_v4 = vunpack.i.h.bf16 %v5069_v29 }
 0x167   : > { %v736_v14 = vpop.f32.mrf.mxu3 }
 0x168   : > { %v5879_v24 = vadd.f32 %v736_v14, %v5666_v27  ;;  %v805_v23 = vpop.f32.mrf.mxu2  ;;  %v5881_v30 = vpop.f32.mrf.mxu0 }
 0x169   : > { %v5884_v31 = vadd.f32 %v805_v23, %v5723_v47  ;;  %v5886_v33 = vpop.f32.mrf.mxu1  ;;  %v5934_v23 = vld [vmem:[%s7418_s1 + $0x40] sm:$0xff] }
 0x16b   : > { %7421 = vst [vmem:[#allocation2_spill] sm:$0xff] %v5884_v31  ;;  %4797 = vmatmul.msk.f32.vlgmr.msra.gmra.mxu0 %vm266_vm1, %v5737_v58 }
 0x16c   : > { %4792 = vmatmul.msk.f32.gmra.mxu1 %vm266_vm1, %v5763_v39  ;;  %4795 = vmatmul.msk.f32.vlgmr.msra.gmra.mxu3 %vm266_vm1, %v5737_v58 }
 0x16d   : > { %4801 = vmatmul.msk.f32.vlgmr.msra.gmra.mxu2 %vm266_vm1, %v5737_v58  ;;  %2048 = vmatpush.msra.mxu3 %v1931_v3  ;;  %v5074_v15 = vpop.permute.xlu2 %5073 }
 0x16e   : > { %2071 = vmatpush.msra.mxu0 %v1932_v46  ;;  %2117 = vmatpush.msra.mxu2 %v1934_v11  ;;  %v1935_v11 = vsel %vm1927_vm4, %v1910_v53, %v5070_v1 }
 0x16f   : > { %v825_v27 = vpop.f32.mrf.mxu3 }
 0x170   : > { %v5904_v47 = vadd.f32 %v825_v27, %v5685_v36  ;;  %v894_v49 = vpop.f32.mrf.mxu2  ;;  %v5906_v9 = vpop.f32.mrf.mxu0 }
 0x171   : > { %v5909_v59 = vadd.f32 %v894_v49, %v5750_v6  ;;  %v5911_v61 = vpop.f32.mrf.mxu1  ;;  %v1914_v36 = vpop.permute.xlu1 %1913 }
 0x172   : > { %v1936_v10 = vsel %vm1927_vm4, %v5070_v1, %v1914_v36  ;;  %v1937_v29 = vsel %vm1927_vm4, %v1914_v36, %v5071_v4 }
 0x173   : > { %7422 = vst [vmem:[#allocation3_spill] sm:$0xff] %v5909_v59  ;;  %4798 = vmatmul.msk.f32.gmra.mxu0 %vm266_vm1, %v5763_v39 }
 0x174   : > { %4796 = vmatmul.msk.f32.gmra.mxu3 %vm266_vm1, %v5763_v39  ;;  %4799 = vmatmul.msk.f32.vlgmr.msra.gmra.mxu1 %vm266_vm1, %v5737_v58 }
 0x175   : > { %4802 = vmatmul.msk.f32.gmra.mxu2 %vm266_vm1, %v5763_v39  ;;  %2094 = vmatpush.msra.mxu1 %v1933_v21 }
 0x177   : > { %v828_v6 = vpop.f32.mrf.mxu3 }
 0x178   : > { %v5927_v5 = vadd.f32 %v828_v6, %v5706_v42  ;;  %v897_v14 = vpop.f32.mrf.mxu2  ;;  %v5929_v57 = vpop.f32.mrf.mxu0  ;;  %v1938_v42 = vsel %vm1927_vm4, %v5071_v4, %v1918_v18  ;;  %v5076_v6 = vunpack.i.h.bf16 %v5074_v15 }
 0x179   : > { %v5937_v3 = vadd.f32 %v897_v14, %v5776_v34  ;;  %v5939_v46 = vpop.f32.mrf.mxu1  ;;  %v1922_v1 = vpop.permute.xlu1 %1921 }
 0x17a   : > { %v1926_v4 = vpop.permute.xlu0 %1925 }
 0x17b   : > { %7423 = vst [vmem:[#allocation4_spill] sm:$0xff] %v5937_v3  ;;  %4807 = vmatmul.msk.f32.vlgmr.msrb.gmra.mxu0 %vm266_vm1, %v5934_v23 }
 0x17c   : > { %4800 = vmatmul.msk.f32.gmra.mxu1 %vm266_vm1, %v5763_v39  ;;  %4803 = vmatmul.msk.f32.vlgmr.msrb.gmra.mxu3 %vm266_vm1, %v5737_v58  ;;  %v5964_v58 = vld [vmem:[%s7418_s1 + $0x48] sm:$0xff] }
 0x17d   : > { %4811 = vmatmul.msk.f32.vlgmr.msrb.gmra.mxu2 %vm266_vm1, %v5934_v23  ;;  %2140 = vmatpush.msrb.mxu3 %v1935_v11 }
 0x17e   : > { %2163 = vmatpush.msrb.mxu0 %v1936_v10  ;;  %2209 = vmatpush.msrb.mxu2 %v1938_v42 }
 0x17f   : > { %v917_v34 = vpop.f32.mrf.mxu3 }
 0x180   : > { %v5957_v53 = vadd.f32 %v917_v34, %v5728_v55  ;;  %v1055_v7 = vpop.f32.mrf.mxu2  ;;  %v5959_v27 = vpop.f32.mrf.mxu0  ;;  %v5975_v55 = vld [vmem:[%s5236_s17 + $0x20] sm:$0xff] }
 0x181   : > { %v5967_v49 = vadd.f32 %v1055_v7, %v5804_v48  ;;  %v5969_v21 = vpop.f32.mrf.mxu1  ;;  %3244 = vrot.lane.b32.xlu2 %v5975_v55, %s5199_s15  ;;  %v5075_v48 = vunpack.i.l.bf16 %v5074_v15  ;;  %v6001_v15 = vld [vmem:[%s5236_s17 + $0x40] sm:$0xff] }
 0x183   : > { %7424 = vst [vmem:[#allocation5_spill] sm:$0xff] %v5967_v49  ;;  %4808 = vmatmul.msk.f32.gmra.mxu0 %vm266_vm1, %v5964_v58  ;;  %v1939_v34 = vsel %vm1927_vm4, %v1918_v18, %v5075_v48  ;;  %v1940_v7 = vsel %vm1927_vm4, %v5075_v48, %v1922_v1 }
 0x184   : > { %4804 = vmatmul.msk.f32.gmra.mxu3 %vm266_vm1, %v5763_v39  ;;  %4809 = vmatmul.msk.f32.vlgmr.msrb.gmra.mxu1 %vm266_vm1, %v5934_v23 }
 0x185   : > { %4812 = vmatmul.msk.f32.gmra.mxu2 %vm266_vm1, %v5964_v58  ;;  %2186 = vmatpush.msrb.mxu1 %v1937_v29  ;;  %v1942_v29 = vsel %vm1927_vm4, %v5076_v6, %v1926_v4 }
 0x187   : > { %v920_v36 = vpop.f32.mrf.mxu3 }
 0x188   : > { %v5986_v14 = vadd.f32 %v920_v36, %v5754_v0  ;;  %v1058_v11 = vpop.f32.mrf.mxu2  ;;  %v5988_v10 = vpop.f32.mrf.mxu0  ;;  %v665_v0 = vadd.f32 %v5781_v13, %v5630_v54  ;;  %v6026_v54 = vld [vmem:[%s5236_s17 + $0x60] sm:$0xff] }
 0x189   : > { %v5991_v39 = vadd.f32 %v1058_v11, %v5829_v20  ;;  %v5993_v42 = vpop.f32.mrf.mxu1  ;;  %3252 = vrot.lane.b32.xlu2 %v6001_v15, %s5199_s15  ;;  %v5084_v13 = vpop.permute.xlu0 %5083 }
 0x18b   : > { %7425 = vst [vmem:[#allocation6_spill] sm:$0xff] %v5991_v39  ;;  %4815 = vmatmul.msk.f32.vlgmr.msra.gmra.mxu0 %vm266_vm1, %v5934_v23  ;;  %v1941_v39 = vsel %vm1927_vm4, %v1922_v1, %v5076_v6 }
 0x18c   : > { %4810 = vmatmul.msk.f32.gmra.mxu1 %vm266_vm1, %v5964_v58  ;;  %4813 = vmatmul.msk.f32.vlgmr.msra.gmra.mxu3 %vm266_vm1, %v5934_v23 }
 0x18d   : > { %4819 = vmatmul.msk.f32.vlgmr.msra.gmra.mxu2 %vm266_vm1, %v5934_v23  ;;  %2232 = vmatpush.msra.mxu3 %v1939_v34  ;;  %v5079_v34 = vpop.permute.xlu2 %5078 }
 0x18e   : > { %2255 = vmatpush.msra.mxu0 %v1940_v7  ;;  %2301 = vmatpush.msra.mxu2 %v1942_v29  ;;  %v5081_v1 = vunpack.i.h.bf16 %v5079_v34  ;;  %v5080_v6 = vunpack.i.l.bf16 %v5079_v34  ;;  %v5086_v29 = vunpack.i.h.bf16 %v5084_v13 }
 0x18f   : > { %v1078_v20 = vpop.f32.mrf.mxu3 }
 0x190   : > { %v6013_v18 = vadd.f32 %v1078_v20, %v665_v0  ;;  %v1147_v48 = vpop.f32.mrf.mxu2  ;;  %v6015_v36 = vpop.f32.mrf.mxu0  ;;  %v5085_v0 = vunpack.i.l.bf16 %v5084_v13 }
 0x191   : > { %v6018_v4 = vadd.f32 %v1147_v48, %v5856_v32  ;;  %v6020_v11 = vpop.f32.mrf.mxu1  ;;  %3260 = vrot.lane.b32.xlu2 %v6026_v54, %s5199_s15  ;;  %v668_v32 = vadd.f32 %v5806_v60, %v5650_v8  ;;  %v2347_v20 = vpop.permute.xlu1 %2346 }
 0x192   : > { %v2376_v8 = vsel %vm2374_vm5, %v5081_v1, %v2347_v20  ;;  %v2378_v60 = vsel %vm2374_vm5, %v5085_v0, %v5086_v29 }
 0x193   : > { %7426 = vst [vmem:[#allocation7_spill] sm:$0xff] %v6018_v4  ;;  %4816 = vmatmul.msk.f32.gmra.mxu0 %vm266_vm1, %v5964_v58 }
 0x194   : > { %4814 = vmatmul.msk.f32.gmra.mxu3 %vm266_vm1, %v5964_v58  ;;  %4817 = vmatmul.msk.f32.vlgmr.msra.gmra.mxu1 %vm266_vm1, %v5934_v23 }
 0x195   : > { %4820 = vmatmul.msk.f32.gmra.mxu2 %vm266_vm1, %v5964_v58  ;;  %2278 = vmatpush.msra.mxu1 %v1941_v39  ;;  %v2375_v39 = vsel %vm2374_vm5, %v5080_v6, %v5081_v1 }
 0x197   : > { %v1081_v7 = vpop.f32.mrf.mxu3 }
 0x198   : > { %v6038_v48 = vadd.f32 %v1081_v7, %v668_v32  ;;  %v1150_v4 = vpop.f32.mrf.mxu2  ;;  %v6040_v49 = vpop.f32.mrf.mxu0  ;;  %v6070_v7 = vld [vmem:[%s5236_s17 + $0x38] sm:$0xff] }
 0x199   : > { %v6043_v3 = vadd.f32 %v1150_v4, %v5879_v24  ;;  %v6045_v59 = vpop.f32.mrf.mxu1  ;;  %v757_v24 = vadd.f32 %v5831_v17, %v5670_v28  ;;  %v2377_v17 = vsel %vm2374_vm5, %v2347_v20, %v5085_v0  ;;  %v2355_v20 = vpop.permute.xlu1 %2354 }
 0x19b   : > { %7427 = vst [vmem:[#allocation8_spill] sm:$0xff] %v6043_v3  ;;  %4823 = vmatmul.msk.f32.vlgmr.msrb.gmra.mxu0 %vm266_vm1, %v5934_v23  ;;  %v6073_v3 = vld [vmem:[%s5236_s17 + $0x48] sm:$0xff] }
 0x19c   : > { %4818 = vmatmul.msk.f32.gmra.mxu1 %vm266_vm1, %v5964_v58  ;;  %4821 = vmatmul.msk.f32.vlgmr.msrb.gmra.mxu3 %vm266_vm1, %v5934_v23  ;;  %v5132_v28 = vpack.i.bf16 %v6073_v3, %v6070_v7 }
 0x19d   : > { %4827 = vmatmul.msk.f32.vlgmr.msrb.gmra.mxu2 %vm266_vm1, %v5934_v23  ;;  %2426 = vmatpush.msrb.mxu3 %v2375_v39  ;;  %v5089_v39 = vpop.permute.xlu2 %5088 }
 0x19e   : > { %2449 = vmatpush.msrb.mxu0 %v2376_v8  ;;  %2495 = vmatpush.msrb.mxu2 %v2378_v60  ;;  %v5090_v0 = vunpack.i.l.bf16 %v5089_v39  ;;  %v5091_v60 = vunpack.i.h.bf16 %v5089_v39 }
 0x19f   : > { %v1170_v4 = vpop.f32.mrf.mxu3  ;;  %5133 = vrot.lane.b32.xlu0 %v5132_v28, %s5199_s15 }
 0x1a0   : > { %v6060_v34 = vadd.f32 %v1170_v4, %v757_v24  ;;  %v1239_v13 = vpop.f32.mrf.mxu2  ;;  %v6062_v32 = vpop.f32.mrf.mxu0 }
 0x1a1   : > { %v6065_v1 = vadd.f32 %v1239_v13, %v5904_v47  ;;  %v6067_v6 = vpop.f32.mrf.mxu1  ;;  %v760_v47 = vadd.f32 %v5858_v38, %v5689_v37  ;;  %v2359_v24 = vpop.permute.xlu0 %2358  ;;  %v2380_v37 = vsel %vm2374_vm5, %v5090_v0, %v2355_v20 }
 0x1a2   : > { %v2382_v38 = vsel %vm2374_vm5, %v5091_v60, %v2359_v24 }
 0x1a3   : > { %7428 = vst [vmem:[#allocation9_spill] sm:$0xff] %v6065_v1  ;;  %4824 = vmatmul.msk.f32.gmra.mxu0 %vm266_vm1, %v5964_v58 }
 0x1a4   : > { %4822 = vmatmul.msk.f32.gmra.mxu3 %vm266_vm1, %v5964_v58  ;;  %4825 = vmatmul.msk.f32.vlgmr.msrb.gmra.mxu1 %vm266_vm1, %v5934_v23 }
 0x1a5   : > { %4828 = vmatmul.msk.f32.gmra.mxu2 %vm266_vm1, %v5964_v58  ;;  %2472 = vmatpush.msrb.mxu1 %v2377_v17  ;;  %v2379_v17 = vsel %vm2374_vm5, %v5086_v29, %v5090_v0 }
 0x1a7   : > { %v1173_v8 = vpop.f32.mrf.mxu3 }
 0x1a8   : > { %v6089_v4 = vadd.f32 %v1173_v8, %v760_v47  ;;  %v1242_v13 = vpop.f32.mrf.mxu2  ;;  %v6091_v28 = vpop.f32.mrf.mxu0 }
 0x1a9   : > { %v6094_v1 = vadd.f32 %v1242_v13, %v5927_v5  ;;  %v6096_v31 = vpop.f32.mrf.mxu1  ;;  %v849_v5 = vadd.f32 %v5881_v30, %v5710_v43  ;;  %v2381_v30 = vsel %vm2374_vm5, %v2355_v20, %v5091_v60  ;;  %v2363_v60 = vpop.permute.xlu1 %2362 }
 0x1aa   : > { %7430 = vst [vmem:[#allocation11_spill] sm:$0xff] %v6096_v31  ;;  %v6124_v31 = vld [vmem:[%s5236_s17 + $0x68] sm:$0xff] }
 0x1ab   : > { %7429 = vst [vmem:[#allocation10_spill] sm:$0xff] %v6094_v1  ;;  %4831 = vmatmul.msk.f32.vlgmr.msra.gmra.mxu0 %vm266_vm1, %v5934_v23  ;;  %v6121_v1 = vld [vmem:[%s5236_s17 + $0x58] sm:$0xff] }
 0x1ac   : > { %4826 = vmatmul.msk.f32.gmra.mxu1 %vm266_vm1, %v5964_v58  ;;  %4829 = vmatmul.msk.f32.vlgmr.msra.gmra.mxu3 %vm266_vm1, %v5934_v23  ;;  %v5137_v43 = vpack.i.bf16 %v6124_v31, %v6121_v1 }
 0x1ad   : > { %4835 = vmatmul.msk.f32.vlgmr.msra.gmra.mxu2 %vm266_vm1, %v5934_v23  ;;  %2518 = vmatpush.msra.mxu3 %v2379_v17  ;;  %v5094_v17 = vpop.permute.xlu2 %5093 }
 0x1ae   : > { %2541 = vmatpush.msra.mxu0 %v2380_v37  ;;  %2587 = vmatpush.msra.mxu2 %v2382_v38  ;;  %v5095_v20 = vunpack.i.l.bf16 %v5094_v17  ;;  %v5096_v38 = vunpack.i.h.bf16 %v5094_v17 }
 0x1af   : > { %v1262_v29 = vpop.f32.mrf.mxu3  ;;  %5138 = vrot.lane.b32.xlu0 %v5137_v43, %s5199_s15 }
 0x1b0   : > { %v6111_v39 = vadd.f32 %v1262_v29, %v849_v5  ;;  %v1331_v47 = vpop.f32.mrf.mxu2  ;;  %v6113_v0 = vpop.f32.mrf.mxu0 }
 0x1b1   : > { %v6116_v8 = vadd.f32 %v1331_v47, %v5957_v53  ;;  %v6118_v13 = vpop.f32.mrf.mxu1  ;;  %v852_v53 = vadd.f32 %v5906_v9, %v5732_v56  ;;  %v2367_v5 = vpop.permute.xlu0 %2366  ;;  %v2383_v56 = vsel %vm2374_vm5, %v2359_v24, %v5095_v20  ;;  %v2384_v9 = vsel %vm2374_vm5, %v5095_v20, %v2363_v60 }
 0x1b2   : > { %v2386_v17 = vsel %vm2374_vm5, %v5096_v38, %v2367_v5 }
 0x1b3   : > { %7431 = vst [vmem:[#allocation12_spill] sm:$0xff] %v6116_v8  ;;  %4832 = vmatmul.msk.f32.gmra.mxu0 %vm266_vm1, %v5964_v58 }
 0x1b4   : > { %4830 = vmatmul.msk.f32.gmra.mxu3 %vm266_vm1, %v5964_v58  ;;  %4833 = vmatmul.msk.f32.vlgmr.msra.gmra.mxu1 %vm266_vm1, %v5934_v23  ;;  %v6147_v23 = vld [vmem:[%s7418_s1 + $0x50] sm:$0xff] }
 0x1b5   : > { %4836 = vmatmul.msk.f32.gmra.mxu2 %vm266_vm1, %v5964_v58  ;;  %2564 = vmatpush.msra.mxu1 %v2381_v30 }
 0x1b7   : > { %v1265_v37 = vpop.f32.mrf.mxu3  ;;  %3266 = vrot.lane.b32.xlu0 %v5551_v26, %s5199_s15 }
 0x1b8   : > { %v6140_v29 = vadd.f32 %v1265_v37, %v852_v53  ;;  %v1334_v47 = vpop.f32.mrf.mxu2  ;;  %v6142_v43 = vpop.f32.mrf.mxu0 }
 0x1b9   : > { %v6150_v30 = vadd.f32 %v1334_v47, %v5986_v14  ;;  %v6152_v8 = vpop.f32.mrf.mxu1  ;;  %v941_v14 = vadd.f32 %v5929_v57, %v5758_v22  ;;  %v2385_v22 = vsel %vm2374_vm5, %v2363_v60, %v5096_v38  ;;  %v5104_v57 = vpop.permute.xlu1 %5103  ;;  %v944_v60 = vadd.f32 %v5959_v27, %v5785_v44 }
 0x1bb   : > { %7432 = vst [vmem:[#allocation13_spill] sm:$0xff] %v6150_v30  ;;  %4841 = vmatmul.msk.f32.vlgmr.msrb.gmra.mxu0 %vm266_vm1, %v6147_v23 }
 0x1bc   : > { %4834 = vmatmul.msk.f32.gmra.mxu1 %vm266_vm1, %v5964_v58  ;;  %4839 = vmatmul.msk.f32.vlgmr.msrb.gmra.mxu3 %vm266_vm1, %v6147_v23  ;;  %v6176_v58 = vld [vmem:[%s7418_s1 + $0x58] sm:$0xff] }
 0x1bd   : > { %4845 = vmatmul.msk.f32.vlgmr.msrb.gmra.mxu2 %vm266_vm1, %v6147_v23  ;;  %2610 = vmatpush.msrb.mxu3 %v2383_v56  ;;  %v6190_v56 = vpop.permute.xlu0 %5098 }
 0x1be   : > { %2633 = vmatpush.msrb.mxu0 %v2384_v9  ;;  %2679 = vmatpush.msrb.mxu2 %v2386_v17  ;;  %v5177_v9 = vld [vmem:[%s5236_s17 + $0x18] sm:$0xff] }
 0x1bf   : > { %v1354_v24 = vpop.f32.mrf.mxu3 }
 0x1c0   : > { %v6169_v53 = vadd.f32 %v1354_v24, %v941_v14  ;;  %v1557_v26 = vpop.f32.mrf.mxu2  ;;  %v6171_v20 = vpop.f32.mrf.mxu0  ;;  %v5105_v24 = vunpack.i.l.bf16 %v5104_v57 }
 0x1c1   : > { %v6179_v37 = vadd.f32 %v1557_v26, %v6013_v18  ;;  %v6181_v47 = vpop.f32.mrf.mxu1  ;;  %v5176_v18 = vld [vmem:[%s5236_s17 + $0x10] sm:$0xff]  ;;  %v2369_v14 = vpop.permute.xlu2 %2368  ;;  %v5101_v26 = vunpack.i.h.bf16 %v6190_v56 }
 0x1c2   : > { %7434 = vst [vmem:[#allocation15_spill] sm:$0xff] %v6181_v47  ;;  %v5142_v17 = vpack.i.bf16 %v5177_v9, %v5176_v18  ;;  %v2387_v27 = vsel %vm2374_vm5, %v2367_v5, %v2369_v14 }
 0x1c3   : > { %7433 = vst [vmem:[#allocation14_spill] sm:$0xff] %v6179_v37  ;;  %4842 = vmatmul.msk.f32.gmra.mxu0 %vm266_vm1, %v6176_v58  ;;  %v5100_v37 = vunpack.i.l.bf16 %v6190_v56  ;;  %v2388_v56 = vsel %vm2374_vm5, %v2369_v14, %v5105_v24 }
 0x1c4   : > { %4840 = vmatmul.msk.f32.gmra.mxu3 %vm266_vm1, %v6176_v58  ;;  %4843 = vmatmul.msk.f32.vlgmr.msrb.gmra.mxu1 %vm266_vm1, %v6147_v23 }
 0x1c5   : > { %4846 = vmatmul.msk.f32.gmra.mxu2 %vm266_vm1, %v6176_v58  ;;  %2656 = vmatpush.msrb.mxu1 %v2385_v22  ;;  %v2822_v9 = vsel %vm2821_vm6, %v5100_v37, %v5101_v26 }
 0x1c6   : > { %5143 = vrot.lane.b32.xlu1 %v5142_v17, %s5200_s27  ;;  %v688_v17 = vadd.f32 %v5813_v63, %v5626_v52 }
 0x1c7   : > { %v1357_v38 = vpop.f32.mrf.mxu3 }
 0x1c8   : > { %v6201_v30 = vadd.f32 %v1357_v38, %v944_v60  ;;  %v1560_v22 = vpop.f32.mrf.mxu2  ;;  %v6203_v47 = vpop.f32.mrf.mxu0  ;;  %v1385_v60 = vadd.f32 %v5988_v10, %v688_v17  ;;  %v5106_v38 = vunpack.i.h.bf16 %v5104_v57 }
 0x1c9   : > { %v6206_v18 = vadd.f32 %v1560_v22, %v6038_v48  ;;  %v6208_v44 = vpop.f32.mrf.mxu1  ;;  %v5178_v48 = vld [vmem:[%s5236_s17 + $0x30] sm:$0xff]  ;;  %v5109_v57 = vpop.permute.xlu2 %5108 }
 0x1ca   : > { %v5152_v5 = vpack.i.bf16 %v5178_v48, %v5975_v55  ;;  %v2389_v10 = vsel %vm2374_vm5, %v5105_v24, %v5106_v38  ;;  %v2796_v24 = vpop.permute.xlu1 %2795  ;;  %v2800_v17 = vpop.permute.xlu0 %2799 }
 0x1cb   : > { %4849 = vmatmul.msk.f32.vlgmr.msra.gmra.mxu0 %vm266_vm1, %v6147_v23 }
 0x1cc   : > { %4844 = vmatmul.msk.f32.gmra.mxu1 %vm266_vm1, %v6176_v58  ;;  %4847 = vmatmul.msk.f32.vlgmr.msra.gmra.mxu3 %vm266_vm1, %v6147_v23 }
 0x1cd   : > { %4853 = vmatmul.msk.f32.vlgmr.msra.gmra.mxu2 %vm266_vm1, %v6147_v23  ;;  %2702 = vmatpush.msra.mxu3 %v2387_v27  ;;  %v691_v27 = vadd.f32 %v5838_v45, %v5645_v2 }
 0x1ce   : > { %2725 = vmatpush.msra.mxu0 %v2388_v56  ;;  %2873 = vmatpush.msra.mxu2 %v2822_v9  ;;  %v5111_v9 = vunpack.i.h.bf16 %v5109_v57 }
 0x1cf   : > { %v1580_v37 = vpop.f32.mrf.mxu3  ;;  %5153 = vrot.lane.b32.xlu0 %v5152_v5, %s5200_s27  ;;  %3697 = vrot.lane.b32.xlu1 %v6070_v7, %s5200_s27  ;;  %v5110_v7 = vunpack.i.l.bf16 %v5109_v57 }
 0x1d0   : > { %v6229_v52 = vadd.f32 %v1580_v37, %v1385_v60  ;;  %v1649_v63 = vpop.f32.mrf.mxu2  ;;  %v6231_v14 = vpop.f32.mrf.mxu0  ;;  %v780_v37 = vadd.f32 %v5863_v50, %v5664_v25  ;;  %v5181_v25 = vld [vmem:[%s5236_s17 + $0x78] sm:$0xff] }
 0x1d1   : > { %v6234_v22 = vadd.f32 %v1649_v63, %v6060_v34  ;;  %v6236_v55 = vpop.f32.mrf.mxu1  ;;  %v1400_v34 = vadd.f32 %v6015_v36, %v691_v27  ;;  %v2823_v36 = vsel %vm2821_vm6, %v5101_v26, %v5110_v7  ;;  %v2824_v38 = vsel %vm2821_vm6, %v5110_v7, %v2796_v24  ;;  %v5180_v26 = vld [vmem:[%s5236_s17 + $0x8] sm:$0xff] }
 0x1d3   : > { %4850 = vmatmul.msk.f32.gmra.mxu0 %vm266_vm1, %v6176_v58 }
 0x1d4   : > { %4848 = vmatmul.msk.f32.gmra.mxu3 %vm266_vm1, %v6176_v58  ;;  %4851 = vmatmul.msk.f32.vlgmr.msra.gmra.mxu1 %vm266_vm1, %v6147_v23 }
 0x1d5   : > { %4854 = vmatmul.msk.f32.gmra.mxu2 %vm266_vm1, %v6176_v58  ;;  %2748 = vmatpush.msra.mxu1 %v2389_v10  ;;  %v1389_v10 = vadd.f32 %v6040_v49, %v780_v37 }
 0x1d7   : > { %v1583_v56 = vpop.f32.mrf.mxu3  ;;  %3705 = vrot.lane.b32.xlu1 %v6121_v1, %s5200_s27  ;;  %v2826_v1 = vsel %vm2821_vm6, %v5111_v9, %v2800_v17 }
 0x1d8   : > { %v6252_v2 = vadd.f32 %v1583_v56, %v1400_v34  ;;  %v1652_v45 = vpop.f32.mrf.mxu2  ;;  %v6254_v48 = vpop.f32.mrf.mxu0 }
 0x1d9   : > { %v6257_v5 = vadd.f32 %v1652_v45, %v6089_v4  ;;  %v6259_v60 = vpop.f32.mrf.mxu1  ;;  %v5179_v4 = vld [vmem:[%s5236_s17] sm:$0xff]  ;;  %v5182_v45 = vld [vmem:[%s5236_s17 + $0x50] sm:$0xff] }
 0x1da   : > { %v5147_v63 = vpack.i.bf16 %v5180_v26, %v5179_v4  ;;  %v5157_v49 = vpack.i.bf16 %v5182_v45, %v6001_v15  ;;  %v2808_v4 = vpop.permute.xlu0 %2807  ;;  %v5183_v26 = vld [vmem:[%s5236_s17 + $0x28] sm:$0xff] }
 0x1db   : > { %4857 = vmatmul.msk.f32.vlgmr.msrb.gmra.mxu0 %vm266_vm1, %v6147_v23 }
 0x1dc   : > { %4852 = vmatmul.msk.f32.gmra.mxu1 %vm266_vm1, %v6176_v58  ;;  %4855 = vmatmul.msk.f32.vlgmr.msrb.gmra.mxu3 %vm266_vm1, %v6147_v23 }
 0x1dd   : > { %4861 = vmatmul.msk.f32.vlgmr.msrb.gmra.mxu2 %vm266_vm1, %v6147_v23  ;;  %2896 = vmatpush.msrb.mxu3 %v2823_v36  ;;  %v2825_v36 = vsel %vm2821_vm6, %v2796_v24, %v5111_v9  ;;  %v2804_v24 = vpop.permute.xlu1 %2803 }
 0x1de   : > { %2919 = vmatpush.msrb.mxu0 %v2824_v38  ;;  %2965 = vmatpush.msrb.mxu2 %v2826_v1  ;;  %v5114_v38 = vpop.permute.xlu2 %5113  ;;  %v783_v1 = vadd.f32 %v5886_v33, %v5683_v35 }
 0x1df   : > { %v1672_v57 = vpop.f32.mrf.mxu3  ;;  %5148 = vrot.lane.b32.xlu2 %v5147_v63, %s5200_s27  ;;  %3713 = vrot.lane.b32.xlu1 %v5181_v25, %s5200_s27  ;;  %v5116_v37 = vunpack.i.h.bf16 %v5114_v38 }
 0x1e0   : > { %v6280_v50 = vadd.f32 %v1672_v57, %v1389_v10  ;;  %v1741_v27 = vpop.f32.mrf.mxu2  ;;  %v6282_v34 = vpop.f32.mrf.mxu0  ;;  %5158 = vrot.lane.b32.xlu0 %v5157_v49, %s5200_s27  ;;  %v1404_v15 = vadd.f32 %v6062_v32, %v783_v1  ;;  %v6318_v32 = vld [vmem:[%s7418_s1 + $0x60] sm:$0xff] }
 0x1e1   : > { %v6285_v7 = vadd.f32 %v1741_v27, %v6111_v39  ;;  %v6287_v56 = vpop.f32.mrf.mxu1  ;;  %v5115_v39 = vunpack.i.l.bf16 %v5114_v38  ;;  %v2830_v45 = vsel %vm2821_vm6, %v5116_v37, %v2808_v4 }
 0x1e3   : > { %4858 = vmatmul.msk.f32.gmra.mxu0 %vm266_vm1, %v6176_v58  ;;  %v2827_v25 = vsel %vm2821_vm6, %v2800_v17, %v5115_v39  ;;  %v2828_v27 = vsel %vm2821_vm6, %v5115_v39, %v2804_v24 }
 0x1e4   : > { %4856 = vmatmul.msk.f32.gmra.mxu3 %vm266_vm1, %v6176_v58  ;;  %4859 = vmatmul.msk.f32.vlgmr.msrb.gmra.mxu1 %vm266_vm1, %v6147_v23 }
 0x1e5   : > { %4862 = vmatmul.msk.f32.gmra.mxu2 %vm266_vm1, %v6176_v58  ;;  %2942 = vmatpush.msrb.mxu1 %v2825_v36 }
 0x1e7   : > { %v1675_v9 = vpop.f32.mrf.mxu3  ;;  %3693 = vrot.lane.b32.xlu2 %v5183_v26, %s5200_s27 }
 0x1e8   : > { %v6306_v35 = vadd.f32 %v1675_v9, %v1404_v15  ;;  %v1744_v33 = vpop.f32.mrf.mxu2  ;;  %v6308_v63 = vpop.f32.mrf.mxu0  ;;  %v5184_v15 = vld [vmem:[%s5236_s17 + $0x70] sm:$0xff] }
 0x1e9   : > { %v6311_v10 = vadd.f32 %v1744_v33, %v6140_v29  ;;  %v6313_v57 = vpop.f32.mrf.mxu1  ;;  %v872_v29 = vadd.f32 %v5911_v61, %v5704_v41  ;;  %v5162_v39 = vpack.i.bf16 %v5184_v15, %v6026_v54  ;;  %v5119_v9 = vpop.permute.xlu2 %5118 }
 0x1ea   : > { %v5121_v33 = vunpack.i.h.bf16 %v5119_v9 }
 0x1eb   : > { %7435 = vst [vmem:[#allocation16_spill] sm:$0xff] %v6311_v10  ;;  %4865 = vmatmul.msk.f32.vlgmr.msra.gmra.mxu0 %vm266_vm1, %v6147_v23  ;;  %v1393_v17 = vadd.f32 %v6091_v28, %v872_v29  ;;  %v6350_v28 = vld [vmem:[%s7418_s1 + $0x68] sm:$0xff]  ;;  %5163 = vrot.lane.b32.xlu0 %v5162_v39, %s5200_s27  ;;  %v5201_v10 = vmov 0  }
 0x1ec   : > { %4860 = vmatmul.msk.f32.gmra.mxu1 %vm266_vm1, %v6176_v58  ;;  %4863 = vmatmul.msk.f32.vlgmr.msra.gmra.mxu3 %vm266_vm1, %v6147_v23 }
 0x1ed   : > { %4871 = vmatmul.msk.f32.vlgmr.msra.gmra.mxu2 %vm266_vm1, %v6318_v32  ;;  %2988 = vmatpush.msra.mxu3 %v2827_v25  ;;  %v2816_v25 = vpop.permute.xlu0 %2815 }
 0x1ee   : > { %3011 = vmatpush.msra.mxu0 %v2828_v27  ;;  %3057 = vmatpush.msra.mxu2 %v2830_v45 }
 0x1ef   : > { %v1764_v49 = vpop.f32.mrf.mxu3  ;;  %3701 = vrot.lane.b32.xlu2 %v6073_v3, %s5200_s27  ;;  %v2829_v3 = vsel %vm2821_vm6, %v2804_v24, %v5116_v37  ;;  %v5120_v24 = vunpack.i.l.bf16 %v5119_v9  ;;  %v2812_v37 = vpop.permute.xlu1 %2811  ;;  %5167 = vset.pattern.permute.xlu0 %v5201_v10 }
 0x1f0   : > { %v6336_v36 = vadd.f32 %v1764_v49, %v1393_v17  ;;  %v1833_v41 = vpop.f32.mrf.mxu2  ;;  %v6338_v61 = vpop.f32.mrf.mxu0  ;;  %v2834_v17 = vsel %vm2821_vm6, %v5121_v33, %v2816_v25  ;;  %5168 = vset.pattern.permute.xlu1 %v5201_v10 }
 0x1f1   : > { %v6341_v38 = vadd.f32 %v1833_v41, %v6169_v53  ;;  %v6343_v1 = vpop.f32.mrf.mxu1  ;;  %v875_v53 = vadd.f32 %v5939_v46, %v5726_v51  ;;  %v2832_v29 = vsel %vm2821_vm6, %v5120_v24, %v2812_v37  ;;  %v2818_v39 = vpop.permute.xlu2 %2817 }
 0x1f3   : > { %4866 = vmatmul.msk.f32.gmra.mxu0 %vm266_vm1, %v6176_v58  ;;  %v1408_v54 = vadd.f32 %v6113_v0, %v875_v53  ;;  %v2831_v0 = vsel %vm2821_vm6, %v2808_v4, %v5120_v24 }
 0x1f4   : > { %4864 = vmatmul.msk.f32.gmra.mxu3 %vm266_vm1, %v6176_v58  ;;  %4867 = vmatmul.msk.f32.vlgmr.msra.gmra.mxu1 %vm266_vm1, %v6147_v23 }
 0x1f5   : > { %4872 = vmatmul.msk.f32.gmra.mxu2 %vm266_vm1, %v6350_v28  ;;  %3034 = vmatpush.msra.mxu1 %v2829_v3  ;;  %v5124_v3 = vpop.permute.xlu0 %5123 }
 0x1f6   : > { %v5126_v53 = vunpack.i.h.bf16 %v5124_v3 }
 0x1f7   : > { %v1767_v26 = vpop.f32.mrf.mxu3  ;;  %3709 = vrot.lane.b32.xlu2 %v6124_v31, %s5200_s27  ;;  %v964_v31 = vadd.f32 %v5969_v21, %v5752_v12  ;;  %v2820_v24 = vpop.permute.xlu1 %2819 }
 0x1f8   : > { %v6367_v51 = vadd.f32 %v1767_v26, %v1408_v54  ;;  %v1836_v46 = vpop.f32.mrf.mxu2  ;;  %v6369_v27 = vpop.f32.mrf.mxu0  ;;  %v5125_v54 = vunpack.i.l.bf16 %v5124_v3 }
 0x1f9   : > { %v6372_v23 = vadd.f32 %v1836_v46, %v6201_v30  ;;  %v6374_v45 = vpop.f32.mrf.mxu1  ;;  %v1397_v30 = vadd.f32 %v6142_v43, %v964_v31  ;;  %v967_v43 = vadd.f32 %v5993_v42, %v5779_v40  ;;  %v2835_v46 = vsel %vm2821_vm6, %v2816_v25, %v2818_v39 }
 0x1fb   : > { %4875 = vmatmul.msk.f32.vlgmr.msrb.gmra.mxu0 %vm266_vm1, %v6318_v32 }
 0x1fc   : > { %4868 = vmatmul.msk.f32.gmra.mxu1 %vm266_vm1, %v6176_v58  ;;  %4873 = vmatmul.msk.f32.vlgmr.msrb.gmra.mxu3 %vm266_vm1, %v6318_v32  ;;  %v2833_v58 = vsel %vm2821_vm6, %v2812_v37, %v5121_v33 }
 0x1fd   : > { %4879 = vmatmul.msk.f32.vlgmr.msrb.gmra.mxu2 %vm266_vm1, %v6318_v32  ;;  %3080 = vmatpush.msrb.mxu3 %v2831_v0  ;;  %v3270_v0 = vsel %vm3268_vm7, %v5125_v54, %v5126_v53 }
 0x1fe   : > { %3103 = vmatpush.msrb.mxu0 %v2832_v29  ;;  %3149 = vmatpush.msrb.mxu2 %v2834_v17  ;;  %v1386_v29 = vadd.f32 %v6020_v11, %v5811_v62 }
 0x1ff   : > { %v1856_v4 = vpop.f32.mrf.mxu3 }
 0x200   : > { %v6390_v49 = vadd.f32 %v1856_v4, %v1397_v30  ;;  %v2027_v41 = vpop.f32.mrf.mxu2  ;;  %v6392_v15 = vpop.f32.mrf.mxu0  ;;  %v1865_v25 = vadd.f32 %v6203_v47, %v1386_v29  ;;  %v1401_v47 = vadd.f32 %v6045_v59, %v5836_v19 }
 0x201   : > { %v6395_v12 = vadd.f32 %v2027_v41, %v6229_v52  ;;  %v6397_v21 = vpop.f32.mrf.mxu1  ;;  %v1412_v52 = vadd.f32 %v6171_v20, %v967_v43  ;;  %v2836_v20 = vsel %vm2821_vm6, %v2818_v39, %v2820_v24 }
 0x203   : > { %4876 = vmatmul.msk.f32.gmra.mxu0 %vm266_vm1, %v6350_v28 }
 0x204   : > { %4874 = vmatmul.msk.f32.gmra.mxu3 %vm266_vm1, %v6350_v28  ;;  %4877 = vmatmul.msk.f32.vlgmr.msrb.gmra.mxu1 %vm266_vm1, %v6318_v32 }
 0x205   : > { %4880 = vmatmul.msk.f32.gmra.mxu2 %vm266_vm1, %v6350_v28  ;;  %3126 = vmatpush.msrb.mxu1 %v2833_v58  ;;  %v5129_v58 = vpop.permute.xlu0 %5128 }
 0x206   : > { %v5130_v43 = vunpack.i.l.bf16 %v5129_v58 }
 0x207   : > { %v1859_v9 = vpop.f32.mrf.mxu3 }
 0x208   : > { %v6411_v37 = vadd.f32 %v1859_v9, %v1412_v52  ;;  %v2030_v40 = vpop.f32.mrf.mxu2  ;;  %v6413_v42 = vpop.f32.mrf.mxu0  ;;  %v5131_v52 = vunpack.i.h.bf16 %v5129_v58 }
 0x209   : > { %v6416_v26 = vadd.f32 %v2030_v40, %v6252_v2  ;;  %v6418_v33 = vpop.f32.mrf.mxu1  ;;  %v3237_v2 = vpop.permute.xlu2 %3236 }
 0x20a   : > { %v3269_v41 = vsel %vm3268_vm7, %v3237_v2, %v5125_v54  ;;  %v3249_v9 = vpop.permute.xlu1 %3248 }
 0x20b   : > { %4883 = vmatmul.msk.f32.vlgmr.msra.gmra.mxu0 %vm266_vm1, %v6318_v32 }
 0x20c   : > { %4878 = vmatmul.msk.f32.gmra.mxu1 %vm266_vm1, %v6350_v28  ;;  %4881 = vmatmul.msk.f32.vlgmr.msra.gmra.mxu3 %vm266_vm1, %v6318_v32 }
 0x20d   : > { %4887 = vmatmul.msk.f32.vlgmr.msra.gmra.mxu2 %vm266_vm1, %v6318_v32  ;;  %3172 = vmatpush.msra.mxu3 %v2835_v46  ;;  %v3271_v46 = vsel %vm3268_vm7, %v5126_v53, %v5130_v43 }
 0x20e   : > { %3195 = vmatpush.msra.mxu0 %v2836_v20  ;;  %3343 = vmatpush.msra.mxu2 %v3270_v0  ;;  %v3274_v20 = vsel %vm3268_vm7, %v5131_v52, %v3249_v9  ;;  %v1390_v0 = vadd.f32 %v6067_v6, %v5861_v16 }
 0x20f   : > { %v2050_v17 = vpop.f32.mrf.mxu3 }
 0x210   : > { %v6434_v31 = vadd.f32 %v2050_v17, %v1865_v25  ;;  %v2119_v30 = vpop.f32.mrf.mxu2  ;;  %v6436_v62 = vpop.f32.mrf.mxu0 }
 0x211   : > { %v6439_v11 = vadd.f32 %v2119_v30, %v6280_v50  ;;  %v6441_v4 = vpop.f32.mrf.mxu1  ;;  %v1880_v50 = vadd.f32 %v6231_v14, %v1401_v47  ;;  %v3245_v39 = vpop.permute.xlu2 %3244 }
 0x212   : > { %v3272_v14 = vsel %vm3268_vm7, %v5130_v43, %v3245_v39  ;;  %v3273_v17 = vsel %vm3268_vm7, %v3245_v39, %v5131_v52  ;;  %v5134_v30 = vpop.permute.xlu0 %5133 }
 0x213   : > { %4884 = vmatmul.msk.f32.gmra.mxu0 %vm266_vm1, %v6350_v28  ;;  %v5135_v47 = vunpack.i.l.bf16 %v5134_v30  ;;  %v5136_v39 = vunpack.i.h.bf16 %v5134_v30 }
 0x214   : > { %4882 = vmatmul.msk.f32.gmra.mxu3 %vm266_vm1, %v6350_v28  ;;  %4885 = vmatmul.msk.f32.vlgmr.msra.gmra.mxu1 %vm266_vm1, %v6318_v32 }
 0x215   : > { %4888 = vmatmul.msk.f32.gmra.mxu2 %vm266_vm1, %v6350_v28  ;;  %3320 = vmatpush.msra.mxu1 %v3269_v41  ;;  %v7437_v41 = vld [vmem:[#allocation11_spill] sm:$0xff] }
 0x217   : > { %v2053_v3 = vpop.f32.mrf.mxu3 }
 0x218   : > { %v6455_v54 = vadd.f32 %v2053_v3, %v1880_v50  ;;  %v2122_v19 = vpop.f32.mrf.mxu2  ;;  %v6457_v59 = vpop.f32.mrf.mxu0 }
 0x219   : > { %v6460_v24 = vadd.f32 %v2122_v19, %v6306_v35  ;;  %v6462_v40 = vpop.f32.mrf.mxu1  ;;  %v1869_v35 = vadd.f32 %v6254_v48, %v1390_v0  ;;  %v7436_v48 = vld [vmem:[#allocation2_spill] sm:$0xff]  ;;  %v3253_v50 = vpop.permute.xlu2 %3252  ;;  %v6511_v0 = vld [vmem:[%s7418_s1 + $0x70] sm:$0xff] }
 0x21a   : > { %v1405_v58 = vadd.f32 %v7437_v41, %v7436_v48  ;;  %v3257_v3 = vpop.permute.xlu1 %3256 }
 0x21b   : > { %4891 = vmatmul.msk.f32.vlgmr.msrb.gmra.mxu0 %vm266_vm1, %v6318_v32 }
 0x21c   : > { %4886 = vmatmul.msk.f32.gmra.mxu1 %vm266_vm1, %v6350_v28  ;;  %4889 = vmatmul.msk.f32.vlgmr.msrb.gmra.mxu3 %vm266_vm1, %v6318_v32 }
 0x21d   : > { %4895 = vmatmul.msk.f32.vlgmr.msrb.gmra.mxu2 %vm266_vm1, %v6318_v32  ;;  %3366 = vmatpush.msrb.mxu3 %v3271_v46 }
 0x21e   : > { %3389 = vmatpush.msrb.mxu0 %v3272_v14  ;;  %3435 = vmatpush.msrb.mxu2 %v3274_v20 }
 0x21f   : > { %v2142_v53 = vpop.f32.mrf.mxu3 }
 0x220   : > { %v6478_v29 = vadd.f32 %v2142_v53, %v1869_v35  ;;  %v2211_v2 = vpop.f32.mrf.mxu2  ;;  %v6480_v25 = vpop.f32.mrf.mxu0  ;;  %v3276_v35 = vsel %vm3268_vm7, %v5135_v47, %v3253_v50  ;;  %v3278_v53 = vsel %vm3268_vm7, %v5136_v39, %v3257_v3 }
 0x221   : > { %v6483_v16 = vadd.f32 %v2211_v2, %v6336_v36  ;;  %v6485_v6 = vpop.f32.mrf.mxu1  ;;  %v1884_v36 = vadd.f32 %v6282_v34, %v1405_v58  ;;  %v3275_v34 = vsel %vm3268_vm7, %v3249_v9, %v5135_v47  ;;  %v7439_v2 = vld [vmem:[#allocation3_spill] sm:$0xff]  ;;  %v7440_v47 = vld [vmem:[#allocation4_spill] sm:$0xff] }
 0x223   : > { %4892 = vmatmul.msk.f32.gmra.mxu0 %vm266_vm1, %v6350_v28 }
 0x224   : > { %4890 = vmatmul.msk.f32.gmra.mxu3 %vm266_vm1, %v6350_v28  ;;  %4893 = vmatmul.msk.f32.vlgmr.msrb.gmra.mxu1 %vm266_vm1, %v6318_v32 }
 0x225   : > { %4896 = vmatmul.msk.f32.gmra.mxu2 %vm266_vm1, %v6350_v28  ;;  %3412 = vmatpush.msrb.mxu1 %v3273_v17 }
 0x227   : > { %v2145_v43 = vpop.f32.mrf.mxu3 }
 0x228   : > { %v6499_v52 = vadd.f32 %v2145_v43, %v1884_v36  ;;  %v2214_v19 = vpop.f32.mrf.mxu2  ;;  %v6501_v46 = vpop.f32.mrf.mxu0  ;;  %v1409_v43 = vadd.f32 %v6152_v8, %v7440_v47 }
 0x229   : > { %v6504_v14 = vadd.f32 %v2214_v19, %v6367_v51  ;;  %v6506_v20 = vpop.f32.mrf.mxu1  ;;  %v1394_v51 = vadd.f32 %v6118_v13, %v7439_v2  ;;  %v5139_v36 = vpop.permute.xlu0 %5138 }
 0x22a   : > { %7438 = vst [vmem:[#allocation2_spill] sm:$0xff] %v6506_v20 }
 0x22b   : > { %4899 = vmatmul.msk.f32.vlgmr.msra.gmra.mxu0 %vm266_vm1, %v6318_v32  ;;  %v1873_v9 = vadd.f32 %v6308_v63, %v1394_v51  ;;  %v3277_v63 = vsel %vm3268_vm7, %v3253_v50, %v5136_v39  ;;  %v5140_v50 = vunpack.i.l.bf16 %v5139_v36  ;;  %v3261_v39 = vpop.permute.xlu2 %3260 }
 0x22c   : > { %4894 = vmatmul.msk.f32.gmra.mxu1 %vm266_vm1, %v6350_v28  ;;  %4897 = vmatmul.msk.f32.vlgmr.msra.gmra.mxu3 %vm266_vm1, %v6318_v32  ;;  %v6539_v32 = vld [vmem:[%s7418_s1 + $0x78] sm:$0xff] }
 0x22d   : > { %4905 = vmatmul.msk.f32.vlgmr.msra.gmra.mxu2 %vm266_vm1, %v6511_v0  ;;  %3458 = vmatpush.msra.mxu3 %v3275_v34  ;;  %v5141_v34 = vunpack.i.h.bf16 %v5139_v36 }
 0x22e   : > { %3481 = vmatpush.msra.mxu0 %v3276_v35  ;;  %3527 = vmatpush.msra.mxu2 %v3278_v53  ;;  %v3265_v35 = vpop.permute.xlu1 %3264 }
 0x22f   : > { %v2234_v17 = vpop.f32.mrf.mxu3 }
 0x230   : > { %v6527_v30 = vadd.f32 %v2234_v17, %v1873_v9  ;;  %v2303_v48 = vpop.f32.mrf.mxu2  ;;  %v6529_v41 = vpop.f32.mrf.mxu0  ;;  %v3279_v9 = vsel %vm3268_vm7, %v3257_v3, %v5140_v50  ;;  %v3282_v17 = vsel %vm3268_vm7, %v5141_v34, %v3265_v35 }
 0x231   : > { %v6532_v13 = vadd.f32 %v2303_v48, %v6390_v49  ;;  %v6534_v58 = vpop.f32.mrf.mxu1  ;;  %v1888_v49 = vadd.f32 %v6338_v61, %v1409_v43  ;;  %v3280_v61 = vsel %vm3268_vm7, %v5140_v50, %v3261_v39  ;;  %v7441_v48 = vld [vmem:[#allocation5_spill] sm:$0xff] }
 0x233   : > { %4900 = vmatmul.msk.f32.gmra.mxu0 %vm266_vm1, %v6350_v28 }
 0x234   : > { %4898 = vmatmul.msk.f32.gmra.mxu3 %vm266_vm1, %v6350_v28  ;;  %4903 = vmatmul.msk.f32.vlgmr.msra.gmra.mxu1 %vm266_vm1, %v6511_v0 }
 0x235   : > { %4906 = vmatmul.msk.f32.gmra.mxu2 %vm266_vm1, %v6539_v32  ;;  %3504 = vmatpush.msra.mxu1 %v3277_v63  ;;  %v7442_v63 = vld [vmem:[#allocation15_spill] sm:$0xff] }
 0x236   : > { %v1862_v36 = vadd.f32 %v7442_v63, %v7441_v48 }
 0x237   : > { %v2237_v19 = vpop.f32.mrf.mxu3 }
 0x238   : > { %v6553_v53 = vadd.f32 %v2237_v19, %v1888_v49  ;;  %v2306_v8 = vpop.f32.mrf.mxu2  ;;  %v6555_v2 = vpop.f32.mrf.mxu0 }
 0x239   : > { %v6558_v28 = vadd.f32 %v2306_v8, %v6411_v37  ;;  %v6560_v51 = vpop.f32.mrf.mxu1  ;;  %v2309_v37 = vadd.f32 %v6369_v27, %v1862_v36  ;;  %v3281_v8 = vsel %vm3268_vm7, %v3261_v39, %v5141_v34  ;;  %v3267_v34 = vpop.permute.xlu0 %3266 }
 0x23b   : > { %4909 = vmatmul.msk.f32.vlgmr.msrb.gmra.mxu0 %vm266_vm1, %v6511_v0 }
 0x23c   : > { %4904 = vmatmul.msk.f32.gmra.mxu1 %vm266_vm1, %v6539_v32  ;;  %4907 = vmatmul.msk.f32.vlgmr.msrb.gmra.mxu3 %vm266_vm1, %v6511_v0 }
 0x23d   : > { %4913 = vmatmul.msk.f32.vlgmr.msrb.gmra.mxu2 %vm266_vm1, %v6511_v0  ;;  %3550 = vmatpush.msrb.mxu3 %v3279_v9  ;;  %v7443_v9 = vld [vmem:[#allocation6_spill] sm:$0xff] }
 0x23e   : > { %3573 = vmatpush.msrb.mxu0 %v3280_v61  ;;  %3619 = vmatpush.msrb.mxu2 %v3282_v17  ;;  %v1877_v27 = vadd.f32 %v6208_v44, %v7443_v9  ;;  %v5149_v61 = vpop.permute.xlu2 %5148  ;;  %v5144_v17 = vpop.permute.xlu1 %5143 }
 0x23f   : > { %v2428_v3 = vpop.f32.mrf.mxu3  ;;  %v5151_v48 = vunpack.i.h.bf16 %v5149_v61  ;;  %v5150_v63 = vunpack.i.l.bf16 %v5149_v61  ;;  %v5146_v36 = vunpack.i.h.bf16 %v5144_v17  ;;  %v5145_v44 = vunpack.i.l.bf16 %v5144_v17  ;;  %v7444_v61 = vld [vmem:[#allocation7_spill] sm:$0xff] }
 0x240   : > { %v6576_v47 = vadd.f32 %v2428_v3, %v2309_v37  ;;  %v2497_v43 = vpop.f32.mrf.mxu2  ;;  %v6578_v49 = vpop.f32.mrf.mxu0  ;;  %v1866_v17 = vadd.f32 %v6236_v55, %v7444_v61 }
 0x241   : > { %v6581_v50 = vadd.f32 %v2497_v43, %v6434_v31  ;;  %v6583_v19 = vpop.f32.mrf.mxu1  ;;  %v2324_v31 = vadd.f32 %v6392_v15, %v1877_v27  ;;  %v3716_v15 = vsel %vm3715_vm8, %v5150_v63, %v5151_v48  ;;  %v3718_v27 = vsel %vm3715_vm8, %v5145_v44, %v5146_v36 }
 0x243   : > { %4910 = vmatmul.msk.f32.gmra.mxu0 %vm266_vm1, %v6539_v32 }
 0x244   : > { %4908 = vmatmul.msk.f32.gmra.mxu3 %vm266_vm1, %v6539_v32  ;;  %4911 = vmatmul.msk.f32.vlgmr.msrb.gmra.mxu1 %vm266_vm1, %v6511_v0 }
 0x245   : > { %4914 = vmatmul.msk.f32.gmra.mxu2 %vm266_vm1, %v6539_v32  ;;  %3596 = vmatpush.msrb.mxu1 %v3281_v8  ;;  %v3283_v8 = vsel %vm3268_vm7, %v3265_v35, %v3267_v34 }
 0x247   : > { %v2431_v39 = vpop.f32.mrf.mxu3 }
 0x248   : > { %v6597_v37 = vadd.f32 %v2431_v39, %v2324_v31  ;;  %v2500_v3 = vpop.f32.mrf.mxu2  ;;  %v6599_v43 = vpop.f32.mrf.mxu0 }
 0x249   : > { %v6602_v9 = vadd.f32 %v2500_v3, %v6455_v54  ;;  %v6604_v20 = vpop.f32.mrf.mxu1  ;;  %v2313_v54 = vadd.f32 %v6413_v42, %v1866_v17  ;;  %v3717_v3 = vsel %vm3715_vm8, %v5151_v48, %v5145_v44  ;;  %v7445_v42 = vld [vmem:[#allocation8_spill] sm:$0xff]  ;;  %v3694_v44 = vpop.permute.xlu2 %3693 }
 0x24a   : > { %v3698_v17 = vpop.permute.xlu1 %3697 }
 0x24b   : > { %4917 = vmatmul.msk.f32.vlgmr.msra.gmra.mxu0 %vm266_vm1, %v6511_v0 }
 0x24c   : > { %4912 = vmatmul.msk.f32.gmra.mxu1 %vm266_vm1, %v6539_v32  ;;  %4915 = vmatmul.msk.f32.vlgmr.msra.gmra.mxu3 %vm266_vm1, %v6511_v0 }
 0x24d   : > { %4921 = vmatmul.msk.f32.vlgmr.msra.gmra.mxu2 %vm266_vm1, %v6511_v0  ;;  %3642 = vmatpush.msra.mxu3 %v3283_v8  ;;  %v5154_v8 = vpop.permute.xlu0 %5153 }
 0x24e   : > { %3767 = vmatpush.msra.mxu0 %v3716_v15  ;;  %3813 = vmatpush.msra.mxu2 %v3718_v27  ;;  %v1881_v15 = vadd.f32 %v6259_v60, %v7445_v42  ;;  %v5155_v48 = vunpack.i.l.bf16 %v5154_v8  ;;  %v5156_v61 = vunpack.i.h.bf16 %v5154_v8 }
 0x24f   : > { %v2520_v35 = vpop.f32.mrf.mxu3 }
 0x250   : > { %v6620_v31 = vadd.f32 %v2520_v35, %v2313_v54  ;;  %v2589_v39 = vpop.f32.mrf.mxu2  ;;  %v6622_v34 = vpop.f32.mrf.mxu0  ;;  %v3720_v8 = vsel %vm3715_vm8, %v5155_v48, %v3694_v44 }
 0x251   : > { %v6625_v55 = vadd.f32 %v2589_v39, %v6478_v29  ;;  %v6627_v63 = vpop.f32.mrf.mxu1  ;;  %v2328_v29 = vadd.f32 %v6436_v62, %v1881_v15  ;;  %v4127_v62 = vld [vmem:[%s7419_s2] sm:$0xff]  ;;  %v7446_v15 = vld [vmem:[#allocation9_spill] sm:$0xff] }
 0x252   : > { %4131 = vperm.xlu0 %5167, %v4127_v62  }
 0x253   : > { %4918 = vmatmul.msk.f32.gmra.mxu0 %vm266_vm1, %v6539_v32 }
 0x254   : > { %4916 = vmatmul.msk.f32.gmra.mxu3 %vm266_vm1, %v6539_v32  ;;  %4919 = vmatmul.msk.f32.vlgmr.msra.gmra.mxu1 %vm266_vm1, %v6511_v0 }
 0x255   : > { %4922 = vmatmul.msk.f32.gmra.mxu2 %vm266_vm1, %v6539_v32  ;;  %3790 = vmatpush.msra.mxu1 %v3717_v3  ;;  %v3719_v3 = vsel %vm3715_vm8, %v5146_v36, %v5155_v48 }
 0x257   : > { %v2523_v27 = vpop.f32.mrf.mxu3 }
 0x258   : > { %v6641_v54 = vadd.f32 %v2523_v27, %v2328_v29  ;;  %v2592_v60 = vpop.f32.mrf.mxu2  ;;  %v6643_v35 = vpop.f32.mrf.mxu0  ;;  %v1870_v29 = vadd.f32 %v6287_v56, %v7446_v15  ;;  %v4128_v15 = vld [vmem:[%s7419_s2 + $0x8] sm:$0xff] }
 0x259   : > { %v6646_v39 = vadd.f32 %v2592_v60, %v6499_v52  ;;  %v6648_v42 = vpop.f32.mrf.mxu1  ;;  %v3722_v52 = vsel %vm3715_vm8, %v5156_v61, %v3698_v17  ;;  %4136 = vperm.xlu1 %5168, %v4128_v15  }
 0x25a   : > { %v2317_v10 = vadd.f32 %v6457_v59, %v1870_v29  ;;  %v5159_v59 = vpop.permute.xlu0 %5158  ;;  %v2322_v29 = vadd.f32 %v6534_v58, %v6341_v38 }
 0x25b   : > { %4925 = vmatmul.msk.f32.vlgmr.msrb.gmra.mxu0 %vm266_vm1, %v6511_v0 }
 0x25c   : > { %4920 = vmatmul.msk.f32.gmra.mxu1 %vm266_vm1, %v6539_v32  ;;  %4923 = vmatmul.msk.f32.vlgmr.msrb.gmra.mxu3 %vm266_vm1, %v6511_v0 }
 0x25d   : > { %4929 = vmatmul.msk.f32.vlgmr.msrb.gmra.mxu2 %vm266_vm1, %v6511_v0  ;;  %3836 = vmatpush.msrb.mxu3 %v3719_v3  ;;  %v3721_v3 = vsel %vm3715_vm8, %v3694_v44, %v5156_v61  ;;  %v5160_v44 = vunpack.i.l.bf16 %v5159_v59  ;;  %v3702_v61 = vpop.permute.xlu2 %3701 }
 0x25e   : > { %3859 = vmatpush.msrb.mxu0 %v3720_v8  ;;  %3905 = vmatpush.msrb.mxu2 %v3722_v52  ;;  %v7448_v8 = vld [vmem:[#allocation10_spill] sm:$0xff] }
 0x25f   : > { %v2612_v36 = vpop.f32.mrf.mxu3  ;;  %v1885_v52 = vadd.f32 %v6313_v57, %v7448_v8  ;;  %v3706_v57 = vpop.permute.xlu1 %3705  ;;  %v3723_v38 = vsel %vm3715_vm8, %v3698_v17, %v5160_v44  ;;  %v3724_v58 = vsel %vm3715_vm8, %v5160_v44, %v3702_v61  ;;  %v2337_v17 = vadd.f32 %v6560_v51, %v6372_v23 }
 0x260   : > { %v6667_v48 = vadd.f32 %v2612_v36, %v2317_v10  ;;  %v2681_v27 = vpop.f32.mrf.mxu2  ;;  %v6669_v60 = vpop.f32.mrf.mxu0  ;;  %v5161_v36 = vunpack.i.h.bf16 %v5159_v59 }
 0x261   : > { %7447 = vst [vmem:[#allocation11_spill] sm:$0xff] %v6669_v60  ;;  %v6672_v56 = vadd.f32 %v2681_v27, %v6527_v30  ;;  %v6674_v62 = vpop.f32.mrf.mxu1  ;;  %v2332_v30 = vadd.f32 %v6480_v25, %v1885_v52  ;;  %v6698_v60 = vld [vmem:[%s7418_s1 + $0x80] sm:$0xff] }
 0x262   : > { %v3726_v59 = vsel %vm3715_vm8, %v5161_v36, %v3706_v57  ;;  %v3725_v23 = vsel %vm3715_vm8, %v3702_v61, %v5161_v36  ;;  %v5164_v51 = vpop.permute.xlu0 %5163  ;;  %v2758_v61 = vadd.f32 %v6583_v19, %v6395_v12 }
 0x263   : > { %4926 = vmatmul.msk.f32.gmra.mxu0 %vm266_vm1, %v6539_v32 }
 0x264   : > { %4924 = vmatmul.msk.f32.gmra.mxu3 %vm266_vm1, %v6539_v32  ;;  %4927 = vmatmul.msk.f32.vlgmr.msrb.gmra.mxu1 %vm266_vm1, %v6511_v0 }
 0x265   : > { %4930 = vmatmul.msk.f32.gmra.mxu2 %vm266_vm1, %v6539_v32  ;;  %3882 = vmatpush.msrb.mxu1 %v3721_v3 }
 0x267   : > { %v2615_v10 = vpop.f32.mrf.mxu3 }
 0x268   : > { %v6693_v27 = vadd.f32 %v2615_v10, %v2332_v30  ;;  %v2684_v15 = vpop.f32.mrf.mxu2  ;;  %v2727_v8 = vpop.f32.mrf.mxu0  ;;  %v7449_v30 = vld [vmem:[#allocation12_spill] sm:$0xff] }
 0x269   : > { %v6701_v3 = vadd.f32 %v2684_v15, %v6553_v53  ;;  %v6703_v25 = vpop.f32.mrf.mxu1  ;;  %v6705_v52 = vadd.f32 %v2727_v8, %v2322_v29  ;;  %v1874_v10 = vadd.f32 %v6343_v1, %v7449_v30 }
 0x26b   : > { %4935 = vmatmul.msk.f32.vlgmr.msra.gmra.mxu0 %vm266_vm1, %v6698_v60  ;;  %v2321_v53 = vadd.f32 %v6501_v46, %v1874_v10  ;;  %v5166_v10 = vunpack.i.h.bf16 %v5164_v51 }
 0x26c   : > { %4928 = vmatmul.msk.f32.gmra.mxu1 %vm266_vm1, %v6539_v32  ;;  %4931 = vmatmul.msk.f32.vlgmr.msra.gmra.mxu3 %vm266_vm1, %v6511_v0  ;;  %v6728_v0 = vld [vmem:[%s7418_s1 + $0x88] sm:$0xff] }
 0x26d   : > { %4939 = vmatmul.msk.f32.vlgmr.msra.gmra.mxu2 %vm266_vm1, %v6698_v60  ;;  %3928 = vmatpush.msra.mxu3 %v3723_v38 }
 0x26e   : > { %3951 = vmatpush.msra.mxu0 %v3724_v58  ;;  %3997 = vmatpush.msra.mxu2 %v3726_v59  ;;  %v7450_v59 = vld [vmem:[#allocation13_spill] sm:$0xff] }
 0x26f   : > { %v2704_v44 = vpop.f32.mrf.mxu3  ;;  %v1889_v30 = vadd.f32 %v6374_v45, %v7450_v59 }
 0x270   : > { %v6723_v29 = vadd.f32 %v2704_v44, %v2321_v53  ;;  %v2875_v1 = vpop.f32.mrf.mxu2  ;;  %v2730_v15 = vpop.f32.mrf.mxu0 }
 0x271   : > { %v6731_v8 = vadd.f32 %v2875_v1, %v6576_v47  ;;  %v6733_v38 = vadd.f32 %v2730_v15, %v2337_v17  ;;  %v2750_v46 = vpop.f32.mrf.mxu1  ;;  %v5165_v47 = vunpack.i.l.bf16 %v5164_v51  ;;  %v3710_v15 = vpop.permute.xlu2 %3709  ;;  %v7451_v51 = vld [vmem:[#allocation14_spill] sm:$0xff] }
 0x272   : > { %v6736_v58 = vadd.f32 %v2750_v46, %v6532_v13  ;;  %v2336_v13 = vadd.f32 %v6529_v41, %v1889_v30 }
 0x273   : > { %4936 = vmatmul.msk.f32.gmra.mxu0 %vm266_vm1, %v6728_v0  ;;  %v3727_v41 = vsel %vm3715_vm8, %v3706_v57, %v5165_v47  ;;  %v3728_v12 = vsel %vm3715_vm8, %v5165_v47, %v3710_v15  ;;  %v2773_v57 = vadd.f32 %v6604_v20, %v6416_v26  ;;  %v2325_v26 = vadd.f32 %v6418_v33, %v6206_v18 }
 0x274   : > { %4932 = vmatmul.msk.f32.gmra.mxu3 %vm266_vm1, %v6539_v32  ;;  %4937 = vmatmul.msk.f32.vlgmr.msra.gmra.mxu1 %vm266_vm1, %v6698_v60 }
 0x275   : > { %4940 = vmatmul.msk.f32.gmra.mxu2 %vm266_vm1, %v6728_v0  ;;  %3974 = vmatpush.msra.mxu1 %v3725_v23  ;;  %v3714_v23 = vpop.permute.xlu1 %3713  ;;  %v2772_v20 = vadd.f32 %v6578_v49, %v2325_v26  ;;  %v7452_v26 = vld [vmem:[#allocation16_spill] sm:$0xff] }
 0x276   : > { %v3730_v19 = vsel %vm3715_vm8, %v5166_v10, %v3714_v23 }
 0x277   : > { %v2707_v36 = vpop.f32.mrf.mxu3 }
 0x278   : > { %v6752_v53 = vadd.f32 %v2707_v36, %v2336_v13  ;;  %v2878_v45 = vpop.f32.mrf.mxu2  ;;  %v2921_v17 = vpop.f32.mrf.mxu0 }
 0x279   : > { %v6755_v32 = vadd.f32 %v2878_v45, %v6597_v37  ;;  %v2753_v44 = vpop.f32.mrf.mxu1  ;;  %v6757_v1 = vadd.f32 %v2921_v17, %v2758_v61  ;;  %v2310_v37 = vadd.f32 %v6397_v21, %v7451_v51 }
 0x27a   : > { %v6760_v46 = vadd.f32 %v2753_v44, %v6558_v28 }
 0x27b   : > { %4943 = vmatmul.msk.f32.vlgmr.msrb.gmra.mxu0 %vm266_vm1, %v6698_v60  ;;  %v2757_v28 = vadd.f32 %v6555_v2, %v2310_v37  ;;  %v3729_v2 = vsel %vm3715_vm8, %v3710_v15, %v5166_v10 }
 0x27c   : > { %4938 = vmatmul.msk.f32.gmra.mxu1 %vm266_vm1, %v6728_v0  ;;  %4941 = vmatmul.msk.f32.vlgmr.msrb.gmra.mxu3 %vm266_vm1, %v6698_v60 }
 0x27d   : > { %4947 = vmatmul.msk.f32.vlgmr.msrb.gmra.mxu2 %vm266_vm1, %v6698_v60  ;;  %4020 = vmatpush.msrb.mxu3 %v3727_v41 }
 0x27e   : > { %4043 = vmatpush.msrb.mxu0 %v3728_v12  ;;  %4089 = vmatpush.msrb.mxu2 %v3730_v19 }
 0x27f   : > { %v2898_v59 = vpop.f32.mrf.mxu3 }
 0x280   : > { %v6778_v30 = vadd.f32 %v2898_v59, %v2757_v28  ;;  %v2967_v21 = vpop.f32.mrf.mxu2  ;;  %v2924_v13 = vpop.f32.mrf.mxu0 }
 0x281   : > { %v6781_v47 = vadd.f32 %v2967_v21, %v6620_v31  ;;  %v6783_v61 = vadd.f32 %v2924_v13, %v2773_v57  ;;  %v2944_v36 = vpop.f32.mrf.mxu1 }
 0x282   : > { %v6786_v45 = vadd.f32 %v2944_v36, %v6581_v50  ;;  %v2762_v50 = vadd.f32 %v6627_v63, %v6439_v11  ;;  %v2314_v11 = vadd.f32 %v6441_v4, %v6234_v22 }
 0x283   : > { %4944 = vmatmul.msk.f32.gmra.mxu0 %vm266_vm1, %v6728_v0 }
 0x284   : > { %4942 = vmatmul.msk.f32.gmra.mxu3 %vm266_vm1, %v6728_v0  ;;  %4945 = vmatmul.msk.f32.vlgmr.msrb.gmra.mxu1 %vm266_vm1, %v6698_v60  ;;  %v2761_v49 = vadd.f32 %v6599_v43, %v2314_v11 }
 0x285   : > { %4948 = vmatmul.msk.f32.gmra.mxu2 %vm266_vm1, %v6728_v0  ;;  %4066 = vmatpush.msrb.mxu1 %v3729_v2 }
 0x287   : > { %v2901_v31 = vpop.f32.mrf.mxu3 }
 0x288   : > { %v6802_v10 = vadd.f32 %v2901_v31, %v2772_v20  ;;  %v2970_v17 = vpop.f32.mrf.mxu2  ;;  %v3013_v18 = vpop.f32.mrf.mxu0  ;;  %v7453_v20 = vld [vmem:[#allocation2_spill] sm:$0xff] }
 0x289   : > { %v6805_v33 = vadd.f32 %v2970_v17, %v6641_v54  ;;  %v2947_v44 = vpop.f32.mrf.mxu1  ;;  %v6807_v15 = vadd.f32 %v3013_v18, %v2762_v50 }
 0x28a   : > { %v6810_v41 = vadd.f32 %v2947_v44, %v6602_v9  ;;  %v2777_v9 = vadd.f32 %v6648_v42, %v6460_v24  ;;  %v2329_v24 = vadd.f32 %v6462_v40, %v6257_v5 }
 0x28b   : > { %4951 = vmatmul.msk.f32.vlgmr.msra.gmra.mxu0 %vm266_vm1, %v6698_v60 }
 0x28c   : > { %4946 = vmatmul.msk.f32.gmra.mxu1 %vm266_vm1, %v6728_v0  ;;  %4949 = vmatmul.msk.f32.vlgmr.msra.gmra.mxu3 %vm266_vm1, %v6698_v60  ;;  %v2776_v43 = vadd.f32 %v6622_v34, %v2329_v24  ;;  %v2318_v34 = vadd.f32 %v6485_v6, %v6285_v7 }
 0x28d   : > { %4955 = vmatmul.msk.f32.vlgmr.msra.gmra.mxu2 %vm266_vm1, %v6698_v60 }
 0x28f   : > { %v2990_v63 = vpop.f32.mrf.mxu3 }
 0x290   : > { %v6825_v54 = vadd.f32 %v2990_v63, %v2761_v49  ;;  %v3059_v23 = vpop.f32.mrf.mxu2  ;;  %v3016_v12 = vpop.f32.mrf.mxu0 }
 0x291   : > { %v6828_v22 = vadd.f32 %v3059_v23, %v6667_v48  ;;  %v6830_v4 = vadd.f32 %v3016_v12, %v2777_v9  ;;  %v3036_v19 = vpop.f32.mrf.mxu1 }
 0x292   : > { %v6833_v51 = vadd.f32 %v3036_v19, %v6625_v55  ;;  %v2766_v55 = vadd.f32 %v6674_v62, %v6483_v16  ;;  %v2765_v16 = vadd.f32 %v6643_v35, %v2318_v34  ;;  %v2333_v35 = vadd.f32 %v7453_v20, %v7452_v26 }
 0x293   : > { %4952 = vmatmul.msk.f32.gmra.mxu0 %vm266_vm1, %v6728_v0 }
 0x294   : > { %4950 = vmatmul.msk.f32.gmra.mxu3 %vm266_vm1, %v6728_v0  ;;  %4953 = vmatmul.msk.f32.vlgmr.msra.gmra.mxu1 %vm266_vm1, %v6698_v60 }
 0x295   : > { %4956 = vmatmul.msk.f32.gmra.mxu2 %vm266_vm1, %v6728_v0 }
 0x297   : > { %v2993_v42 = vpop.f32.mrf.mxu3 }
 0x298   : > { %v3223_v48 = vadd.f32 %v2993_v42, %v2776_v43  ;;  %v3062_v37 = vpop.f32.mrf.mxu2  ;;  %v3105_v28 = vpop.f32.mrf.mxu0 }
 0x299   : > { %v6849_v5 = vadd.f32 %v3062_v37, %v6693_v27  ;;  %v3039_v40 = vpop.f32.mrf.mxu1  ;;  %v6851_v57 = vadd.f32 %v3105_v28, %v2766_v55 }
 0x29a   : > { %v3225_v59 = vadd.f32 %v3039_v40, %v6646_v39  ;;  %v2781_v39 = vadd.f32 %v6703_v25, %v6504_v14  ;;  %v7454_v14 = vld [vmem:[#allocation11_spill] sm:$0xff] }
 0x29b   : > { %4959 = vmatmul.msk.f32.vlgmr.msrb.gmra.mxu0 %vm266_vm1, %v6698_v60  ;;  %v2780_v25 = vadd.f32 %v7454_v14, %v2333_v35 }
 0x29c   : > { %4954 = vmatmul.msk.f32.gmra.mxu1 %vm266_vm1, %v6728_v0  ;;  %4957 = vmatmul.msk.f32.vlgmr.msrb.gmra.mxu3 %vm266_vm1, %v6698_v60 }
 0x29d   : > { %4963 = vmatmul.msk.f32.vlgmr.msrb.gmra.mxu2 %vm266_vm1, %v6698_v60 }
 0x29f   : > { %v3082_v62 = vpop.f32.mrf.mxu3 }
 0x2a0   : > { %v3212_v27 = vadd.f32 %v3082_v62, %v2765_v16  ;;  %v3151_v21 = vpop.f32.mrf.mxu2  ;;  %v3108_v13 = vpop.f32.mrf.mxu0 }
 0x2a1   : > { %v3215_v7 = vadd.f32 %v3151_v21, %v6723_v29  ;;  %v6868_v6 = vadd.f32 %v3108_v13, %v2781_v39  ;;  %v3128_v36 = vpop.f32.mrf.mxu1 }
 0x2a2   : > { %v3214_v2 = vadd.f32 %v3128_v36, %v6672_v56 }
 0x2a3   : > { %4960 = vmatmul.msk.f32.gmra.mxu0 %vm266_vm1, %v6728_v0 }
 0x2a4   : > { %4958 = vmatmul.msk.f32.gmra.mxu3 %vm266_vm1, %v6728_v0  ;;  %4961 = vmatmul.msk.f32.vlgmr.msrb.gmra.mxu1 %vm266_vm1, %v6698_v60 }
 0x2a5   : > { %4964 = vmatmul.msk.f32.gmra.mxu2 %vm266_vm1, %v6728_v0 }
 0x2a7   : > { %v3085_v29 = vpop.f32.mrf.mxu3 }
 0x2a8   : > { %v3227_v50 = vadd.f32 %v3085_v29, %v2780_v25  ;;  %v3154_v56 = vpop.f32.mrf.mxu2  ;;  %v3197_v31 = vpop.f32.mrf.mxu0 }
 0x2a9   : > { %v3230_v17 = vadd.f32 %v3154_v56, %v6752_v53  ;;  %v3131_v18 = vpop.f32.mrf.mxu1  ;;  %v6884_v44 = vadd.f32 %v3197_v31, %v6736_v58 }
 0x2aa   : > { %v3229_v11 = vadd.f32 %v3131_v18, %v6701_v3 }
 0x2ac   : > { %4962 = vmatmul.msk.f32.gmra.mxu1 %vm266_vm1, %v6728_v0 }
 0x2af   : > { %v3174_v60 = vpop.f32.mrf.mxu3 }
 0x2b0   : > { %v3216_v49 = vadd.f32 %v3174_v60, %v6705_v52  ;;  %v3345_v9 = vpop.f32.mrf.mxu2  ;;  %v3200_v63 = vpop.f32.mrf.mxu0 }
 0x2b1   : > { %v6891_v23 = vadd.f32 %v3200_v63, %v6760_v46  ;;  %v3322_v12 = vpop.f32.mrf.mxu1 }
 0x2b2   : > { %v3650_v18 = vadd.f32 %v3322_v12, %v6731_v8 }
 0x2b7   : > { %v3177_v19 = vpop.f32.mrf.mxu3 }
 0x2b8   : > { %v3231_v53 = vadd.f32 %v3177_v19, %v6733_v38  ;;  %v3348_v24 = vpop.f32.mrf.mxu2  ;;  %v3391_v58 = vpop.f32.mrf.mxu0 }
 0x2b9   : > { %v6895_v43 = vadd.f32 %v3348_v24, %v6802_v10  ;;  %v3325_v3 = vpop.f32.mrf.mxu1  ;;  %v6898_v0 = vadd.f32 %v3391_v58, %v6786_v45 }
 0x2bf   : > { %v3368_v55 = vpop.f32.mrf.mxu3 }
 0x2c0   : > { %v6900_v52 = vpop.f32.mrf.mxu2  ;;  %v3394_v42 = vpop.f32.mrf.mxu0  ;;  %v3652_v8 = vadd.f32 %v3368_v55, %v6757_v1 }
 0x2c1   : > { %v6903_v46 = vadd.f32 %v3394_v42, %v6810_v41  ;;  %v3414_v37 = vpop.f32.mrf.mxu1 }
 0x2c7   : > { %v3371_v28 = vpop.f32.mrf.mxu3 }
 0x2c8   : > { %v3440_v40 = vpop.f32.mrf.mxu2  ;;  %v3483_v38 = vpop.f32.mrf.mxu0 }
 0x2c9   : > { %v6905_v34 = vadd.f32 %v3440_v40, %v3223_v48  ;;  %v6907_v16 = vpop.f32.mrf.mxu1  ;;  %v6910_v10 = vadd.f32 %v3483_v38, %v6833_v51  ;;  %v3665_v40 = vadd.f32 %v3325_v3, %v6755_v32 }
 0x2cf   : > { %v6912_v45 = vpop.f32.mrf.mxu3 }
 0x2d0   : > { %v3529_v39 = vpop.f32.mrf.mxu2  ;;  %v3486_v62 = vpop.f32.mrf.mxu0 }
 0x2d1   : > { %v6914_v21 = vadd.f32 %v3529_v39, %v3212_v27  ;;  %v6916_v13 = vadd.f32 %v3486_v62, %v3225_v59  ;;  %v6918_v41 = vpop.f32.mrf.mxu1 }
 0x2d7   : > { %v6920_v36 = vpop.f32.mrf.mxu3 }
 0x2d8   : > { %v3532_v26 = vpop.f32.mrf.mxu2  ;;  %v3575_v48 = vpop.f32.mrf.mxu0 }
 0x2d9   : > { %v6922_v20 = vadd.f32 %v3532_v26, %v3227_v50  ;;  %v6924_v35 = vpop.f32.mrf.mxu1  ;;  %v6926_v51 = vadd.f32 %v3575_v48, %v3214_v2  ;;  %v6937_v50 = vpop.permute.xlu0 %4131 }
 0x2df   : > { %v6928_v14 = vpop.f32.mrf.mxu3 }
 0x2e0   : > { %v3621_v25 = vpop.f32.mrf.mxu2  ;;  %v3578_v29 = vpop.f32.mrf.mxu0 }
 0x2e1   : > { %v6930_v27 = vadd.f32 %v3621_v25, %v3216_v49  ;;  %v6932_v59 = vadd.f32 %v3578_v29, %v3229_v11  ;;  %v3598_v56 = vpop.f32.mrf.mxu1 }
 0x2e2   : > { %v6934_v31 = vadd.f32 %v3598_v56, %v3215_v7 }
 0x2e7   : > { %v3555_v60 = vpop.f32.mrf.mxu3 }
 0x2e8   : > { %v6940_v63 = vadd.f32 %v3555_v60, %v6868_v6  ;;  %v3624_v2 = vpop.f32.mrf.mxu2  ;;  %v3769_v19 = vpop.f32.mrf.mxu0 }
 0x2e9   : > { %v6942_v24 = vadd.f32 %v3624_v2, %v3231_v53  ;;  %v3601_v58 = vpop.f32.mrf.mxu1  ;;  %v4097_v49 = vadd.f32 %v3769_v19, %v3650_v18  ;;  %v6953_v6 = vpop.permute.xlu1 %4136  ;;  %v3651_v53 = vadd.f32 %v3345_v9, %v6778_v30  ;;  %v3654_v30 = vadd.f32 %v3414_v37, %v6781_v47 }
 0x2ea   : > { %v6944_v42 = vadd.f32 %v3601_v58, %v3230_v17  ;;  %v3667_v9 = vadd.f32 %v3371_v28, %v6783_v61 }
 0x2eb   : > { %v4139_v11 = vadd.f32 %v6937_v50, %v4097_v49 }
 0x2ed   : > { %v4169_v7 = vmul.f32 0.005, %v4139_v11 }
 0x2ef   : > { %v6949_v12 = vpop.f32.mrf.mxu3  ;;  %v6951_v38 = vmax.f32 %v4139_v11, %v4169_v7 }
 0x2f0   : > { %v3815_v39 = vpop.f32.mrf.mxu2  ;;  %v3772_v62 = vpop.f32.mrf.mxu0 }
 0x2f1   : > { %v4099_v26 = vadd.f32 %v3815_v39, %v3652_v8  ;;  %v4112_v17 = vadd.f32 %v3772_v62, %v3665_v40  ;;  %v3792_v48 = vpop.f32.mrf.mxu1  ;;  %4259 = vrot.lane.b32.xlu2 %v6951_v38, %s5193_s18 }
 0x2f2   : > { %v4098_v25 = vadd.f32 %v3792_v48, %v3651_v53 }
 0x2f3   : > { %v4141_v32 = vadd.f32 %v6937_v50, %v4099_v26  ;;  %v4154_v1 = vadd.f32 %v6953_v6, %v4112_v17  ;;  %v3655_v26 = vadd.f32 %v6900_v52, %v6825_v54  ;;  %v3656_v17 = vadd.f32 %v6912_v45, %v6807_v15 }
 0x2f4   : > { %v4140_v3 = vadd.f32 %v6937_v50, %v4098_v25 }
 0x2f5   : > { %v4171_v55 = vmul.f32 0.005, %v4141_v32  ;;  %v4184_v29 = vmul.f32 0.005, %v4154_v1 }
 0x2f6   : > { %v4170_v56 = vmul.f32 0.005, %v4140_v3 }
 0x2f7   : > { %v3647_v18 = vpop.f32.mrf.mxu3  ;;  %v6963_v60 = vmax.f32 %v4141_v32, %v4171_v55  ;;  %v6965_v2 = vmax.f32 %v4154_v1, %v4184_v29 }
 0x2f8   : > { %v6968_v19 = vadd.f32 %v3647_v18, %v6891_v23  ;;  %v3818_v58 = vpop.f32.mrf.mxu2  ;;  %v3861_v49 = vpop.f32.mrf.mxu0  ;;  %v6970_v11 = vmax.f32 %v4140_v3, %v4170_v56  ;;  %v3669_v3 = vadd.f32 %v6907_v16, %v6805_v33  ;;  %v3658_v33 = vadd.f32 %v6918_v41, %v6828_v22 }
 0x2f9   : > { %v4114_v7 = vadd.f32 %v3818_v58, %v3667_v9  ;;  %v3795_v40 = vpop.f32.mrf.mxu1  ;;  %v4101_v8 = vadd.f32 %v3861_v49, %v3654_v30  ;;  %4263 = vrot.lane.b32.xlu2 %v6963_v60, %s5193_s18  ;;  %4289 = vrot.lane.b32.xlu0 %v6965_v2, %s5193_s18 }
 0x2fa   : > { %4261 = vrot.lane.b32.xlu1 %v6970_v11, %s5193_s18  ;;  %v4113_v23 = vadd.f32 %v3795_v40, %v6895_v43 }
 0x2fb   : > { %v4156_v47 = vadd.f32 %v6953_v6, %v4114_v7  ;;  %v4143_v61 = vadd.f32 %v6937_v50, %v4101_v8 }
 0x2fc   : > { %v4155_v48 = vadd.f32 %v6953_v6, %v4113_v23 }
 0x2fd   : > { %v4186_v37 = vmul.f32 0.005, %v4156_v47  ;;  %v4173_v28 = vmul.f32 0.005, %v4143_v61 }
 0x2fe   : > { %v4185_v15 = vmul.f32 0.005, %v4155_v48 }
 0x2ff   : > { %v3838_v53 = vpop.f32.mrf.mxu3  ;;  %v6981_v39 = vmax.f32 %v4156_v47, %v4186_v37  ;;  %v6983_v62 = vmax.f32 %v4143_v61, %v4173_v28 }
 0x300   : > { %v4100_v25 = vadd.f32 %v3838_v53, %v6898_v0  ;;  %v3907_v32 = vpop.f32.mrf.mxu2  ;;  %v3864_v1 = vpop.f32.mrf.mxu0  ;;  %v7009_v40 = vmax.f32 %v4155_v48, %v4185_v15 }
 0x301   : > { %v3884_v43 = vpop.f32.mrf.mxu1  ;;  %4293 = vrot.lane.b32.xlu2 %v6981_v39, %s5193_s18  ;;  %v4103_v29 = vadd.f32 %v3907_v32, %v3656_v17  ;;  %v4116_v45 = vadd.f32 %v3864_v1, %v3669_v3 }
 0x302   : > { %v4142_v55 = vadd.f32 %v6937_v50, %v4100_v25  ;;  %v4102_v54 = vadd.f32 %v3884_v43, %v3655_v26  ;;  %4267 = vrot.lane.b32.xlu1 %v6983_v62, %s5193_s18  ;;  %v3673_v43 = vadd.f32 %v6924_v35, %v6849_v5 }
 0x303   : > { %v4145_v56 = vadd.f32 %v6937_v50, %v4103_v29  ;;  %v4158_v18 = vadd.f32 %v6953_v6, %v4116_v45 }
 0x304   : > { %v4172_v52 = vmul.f32 0.005, %v4142_v55  ;;  %v4144_v0 = vadd.f32 %v6937_v50, %v4102_v54 }
 0x305   : > { %v4175_v61 = vmul.f32 0.005, %v4145_v56  ;;  %v4188_v41 = vmul.f32 0.005, %v4158_v18 }
 0x306   : > { %v4174_v30 = vmul.f32 0.005, %v4144_v0  ;;  %v7000_v9 = vmax.f32 %v4142_v55, %v4172_v52  ;;  %v3660_v55 = vadd.f32 %v6928_v14, %v6851_v57 }
 0x307   : > { %v3841_v16 = vpop.f32.mrf.mxu3  ;;  %v7019_v26 = vmax.f32 %v4145_v56, %v4175_v61 }
 0x308   : > { %v3910_v58 = vpop.f32.mrf.mxu2  ;;  %4265 = vrot.lane.b32.xlu0 %v7000_v9, %s5193_s18  ;;  %v3953_v49 = vpop.f32.mrf.mxu0  ;;  %v7007_v7 = vmax.f32 %v4144_v0, %v4174_v30  ;;  %v4115_v23 = vadd.f32 %v3841_v16, %v6903_v46  ;;  %v3671_v46 = vadd.f32 %v6920_v36, %v6830_v4 }
 0x309   : > { %v3887_v8 = vpop.f32.mrf.mxu1  ;;  %v4105_v47 = vadd.f32 %v3953_v49, %v3658_v33 }
 0x30a   : > { %4269 = vrot.lane.b32.xlu2 %v7007_v7, %s5193_s18  ;;  %4291 = vrot.lane.b32.xlu1 %v7009_v40, %s5193_s18  ;;  %v4117_v37 = vadd.f32 %v3887_v8, %v6905_v34  ;;  %v4157_v53 = vadd.f32 %v6953_v6, %v4115_v23  ;;  %v7029_v34 = vmax.f32 %v4158_v18, %v4188_v41 }
 0x30b   : > { %v4147_v22 = vadd.f32 %v6937_v50, %v4105_v47  ;;  %v4118_v54 = vadd.f32 %v3910_v58, %v3671_v46 }
 0x30c   : > { %v4159_v25 = vadd.f32 %v6953_v6, %v4117_v37  ;;  %v4187_v29 = vmul.f32 0.005, %v4157_v53 }
 0x30d   : > { %v4177_v28 = vmul.f32 0.005, %v4147_v22  ;;  %v4160_v5 = vadd.f32 %v6953_v6, %v4118_v54 }
 0x30e   : > { %v4189_v36 = vmul.f32 0.005, %v4159_v25  ;;  %v7041_v35 = vmax.f32 %v4157_v53, %v4187_v29 }
 0x30f   : > { %v3930_v17 = vpop.f32.mrf.mxu3  ;;  %v7021_v48 = vmax.f32 %v4147_v22, %v4177_v28  ;;  %v4190_v16 = vmul.f32 0.005, %v4160_v5 }
 0x310   : > { %v4104_v32 = vadd.f32 %v3930_v17, %v6910_v10  ;;  %v3999_v1 = vpop.f32.mrf.mxu2  ;;  %4271 = vrot.lane.b32.xlu0 %v7019_v26, %s5193_s18  ;;  %v3956_v3 = vpop.f32.mrf.mxu0  ;;  %v7047_v30 = vmax.f32 %v4159_v25, %v4189_v36 }
 0x311   : > { %v3976_v10 = vpop.f32.mrf.mxu1  ;;  %v4107_v52 = vadd.f32 %v3999_v1, %v3660_v55  ;;  %v4120_v45 = vadd.f32 %v3956_v3, %v3673_v43  ;;  %v7058_v23 = vmax.f32 %v4160_v5, %v4190_v16 }
 0x312   : > { %v4146_v4 = vadd.f32 %v6937_v50, %v4104_v32  ;;  %4275 = vrot.lane.b32.xlu2 %v7021_v48, %s5193_s18  ;;  %4297 = vrot.lane.b32.xlu1 %v7029_v34, %s5193_s18  ;;  %v4106_v18 = vadd.f32 %v3976_v10, %v6914_v21 }
 0x313   : > { %v4149_v14 = vadd.f32 %v6937_v50, %v4107_v52  ;;  %v4162_v0 = vadd.f32 %v6953_v6, %v4120_v45 }
 0x314   : > { %v4176_v15 = vmul.f32 0.005, %v4146_v4  ;;  %v4148_v61 = vadd.f32 %v6937_v50, %v4106_v18 }
 0x315   : > { %v4179_v58 = vmul.f32 0.005, %v4149_v14  ;;  %v4192_v49 = vmul.f32 0.005, %v4162_v0 }
 0x316   : > { %v7049_v33 = vmax.f32 %v4146_v4, %v4176_v15  ;;  %v4178_v46 = vmul.f32 0.005, %v4148_v61 }
 0x317   : > { %v3933_v57 = vpop.f32.mrf.mxu3  ;;  %v7064_v28 = vmax.f32 %v4162_v0, %v4192_v49  ;;  %v7066_v53 = vmax.f32 %v4149_v14, %v4179_v58 }
 0x318   : > { %v4002_v56 = vpop.f32.mrf.mxu2  ;;  %4295 = vrot.lane.b32.xlu0 %v7041_v35, %s5193_s18  ;;  %v4119_v8 = vadd.f32 %v3933_v57, %v6916_v13  ;;  %v4045_v22 = vpop.f32.mrf.mxu0  ;;  %v3664_v13 = vadd.f32 %v6949_v12, %v6884_v44  ;;  %v7078_v29 = vmax.f32 %v4148_v61, %v4178_v46 }
 0x319   : > { %v3979_v47 = vpop.f32.mrf.mxu1  ;;  %v4109_v25 = vadd.f32 %v4045_v22, %v6934_v31  ;;  %v4122_v1 = vadd.f32 %v4002_v56, %v6940_v63 }
 0x31a   : > { %4299 = vrot.lane.b32.xlu2 %v7047_v30, %s5193_s18  ;;  %4273 = vrot.lane.b32.xlu1 %v7049_v33, %s5193_s18  ;;  %v4161_v37 = vadd.f32 %v6953_v6, %v4119_v8  ;;  %v4121_v63 = vadd.f32 %v3979_v47, %v6922_v20 }
 0x31b   : > { %v4151_v55 = vadd.f32 %v6937_v50, %v4109_v25  ;;  %v4164_v31 = vadd.f32 %v6953_v6, %v4122_v1 }
 0x31c   : > { %v4163_v57 = vadd.f32 %v6953_v6, %v4121_v63 }
 0x31d   : > { %v4181_v36 = vmul.f32 0.005, %v4151_v55  ;;  %v4194_v15 = vmul.f32 0.005, %v4164_v31 }
 0x31e   : > { %v4193_v49 = vmul.f32 0.005, %v4163_v57 }
 0x31f   : > { %v4022_v41 = vpop.f32.mrf.mxu3  ;;  %v7096_v14 = vmax.f32 %v4151_v55, %v4181_v36  ;;  %v7104_v18 = vmax.f32 %v4164_v31, %v4194_v15 }
 0x320   : > { %v4108_v21 = vadd.f32 %v4022_v41, %v6926_v51  ;;  %4301 = vrot.lane.b32.xlu0 %v7058_v23, %s5193_s18  ;;  %v4091_v17 = vpop.f32.mrf.mxu2  ;;  %v4191_v51 = vmul.f32 0.005, %v4161_v37  ;;  %v4048_v0 = vpop.f32.mrf.mxu0  ;;  %v7114_v41 = vmax.f32 %v4163_v57, %v4193_v49 }
 0x321   : > { %v4111_v3 = vadd.f32 %v4091_v17, %v3664_v13  ;;  %v4068_v44 = vpop.f32.mrf.mxu1 }
 0x322   : > { %v4150_v32 = vadd.f32 %v6937_v50, %v4108_v21  ;;  %4305 = vrot.lane.b32.xlu2 %v7064_v28, %s5193_s18  ;;  %4279 = vrot.lane.b32.xlu1 %v7066_v53, %s5193_s18  ;;  %v7086_v4 = vmax.f32 %v4161_v37, %v4191_v51  ;;  %v4110_v45 = vadd.f32 %v4068_v44, %v6930_v27 }
 0x323   : > { %v4153_v12 = vadd.f32 %v6937_v50, %v4111_v3 }
 0x324   : > { %v4180_v43 = vmul.f32 0.005, %v4150_v32  ;;  %v4152_v20 = vadd.f32 %v6937_v50, %v4110_v45 }
 0x325   : > { %v4183_v52 = vmul.f32 0.005, %v4153_v12 }
 0x326   : > { %v7084_v54 = vmax.f32 %v4150_v32, %v4180_v43  ;;  %v4182_v50 = vmul.f32 0.005, %v4152_v20 }
 0x327   : > { %v4025_v10 = vpop.f32.mrf.mxu3  ;;  %v7102_v16 = vmax.f32 %v4153_v12, %v4183_v52 }
 0x328   : > { %4277 = vrot.lane.b32.xlu0 %v7078_v29, %s5193_s18  ;;  %v4123_v5 = vadd.f32 %v4025_v10, %v6932_v59  ;;  %v4094_v58 = vpop.f32.mrf.mxu2  ;;  %v4124_v59 = vadd.f32 %v4048_v0, %v6944_v42  ;;  %v7122_v17 = vmax.f32 %v4152_v20, %v4182_v50 }
 0x329   : > { %v4071_v27 = vpop.f32.mrf.mxu1  ;;  %v4126_v47 = vadd.f32 %v4094_v58, %v6968_v19 }
 0x32a   : > { %4281 = vrot.lane.b32.xlu2 %v7084_v54, %s5193_s18  ;;  %4303 = vrot.lane.b32.xlu1 %v7086_v4, %s5193_s18  ;;  %v4165_v56 = vadd.f32 %v6953_v6, %v4123_v5  ;;  %v4125_v61 = vadd.f32 %v4071_v27, %v6942_v24  ;;  %v4166_v22 = vadd.f32 %v6953_v6, %v4124_v59 }
 0x32b   : > { %v4168_v37 = vadd.f32 %v6953_v6, %v4126_v47 }
 0x32c   : > { %v4195_v8 = vmul.f32 0.005, %v4165_v56  ;;  %v4167_v42 = vadd.f32 %v6953_v6, %v4125_v61  ;;  %v4196_v13 = vmul.f32 0.005, %v4166_v22 }
 0x32d   : > { %v4198_v24 = vmul.f32 0.005, %v4168_v37 }
 0x32e   : > { %v7120_v21 = vmax.f32 %v4165_v56, %v4195_v8  ;;  %v4197_v19 = vmul.f32 0.005, %v4167_v42  ;;  %v7128_v46 = vmax.f32 %v4166_v22, %v4196_v13 }
 0x32f   : > { %v7132_v6 = vmax.f32 %v4168_v37, %v4198_v24 }
 0x330   : > { %4283 = vrot.lane.b32.xlu0 %v7096_v14, %s5193_s18  ;;  %v7134_v25 = vmax.f32 %v4167_v42, %v4197_v19 }
 0x332   : > { %4287 = vrot.lane.b32.xlu2 %v7102_v16, %s5193_s18  ;;  %4309 = vrot.lane.b32.xlu1 %v7104_v18, %s5193_s18 }
 0x338   : > { %4307 = vrot.lane.b32.xlu0 %v7114_v41, %s5193_s18 }
 0x33a   : > { %4311 = vrot.lane.b32.xlu2 %v7120_v21, %s5193_s18  ;;  %4285 = vrot.lane.b32.xlu1 %v7122_v17, %s5193_s18 }
 0x340   : > { %4313 = vrot.lane.b32.xlu0 %v7128_v46, %s5193_s18 }
 0x342   : > { %4317 = vrot.lane.b32.xlu2 %v7132_v6, %s5193_s18  ;;  %4315 = vrot.lane.b32.xlu1 %v7134_v25, %s5193_s18  ;;  %s4969_s18 = smul.u32 240, %s7456_s13 }
 0x344   : > { %s7322_s23 = scalar_lea.vmem %s7420_s3, %s4969_s18 }
 0x34b   : > { %v4260_v32 = vpop.permute.xlu2 %4259 }
 0x353   : > { %v4264_v51 = vpop.permute.xlu2 %4263 }
 0x35b   : > { %v4294_v1 = vpop.permute.xlu2 %4293 }
 0x364   : > { %v4270_v10 = vpop.permute.xlu2 %4269 }
 0x36b   : > { %v4290_v12 = vpop.permute.xlu0 %4289 }
 0x36c   : > { %v4262_v43 = vpop.permute.xlu1 %4261  ;;  %v4276_v5 = vpop.permute.xlu2 %4275 }
 0x36d   : > { %v4319_v3 = vsel %vm236_vm0, %v4260_v32, %v4262_v43  ;;  %v4320_v55 = vsel %vm236_vm0, %v4262_v43, %v4264_v51 }
 0x36e   : > { %v7143_v44 = vmax.f32 %v6951_v38, %v4319_v3  ;;  %v7146_v31 = vmax.f32 %v6970_v11, %v4320_v55 }
 0x370   : > { %4439 = vrot.lane.b32.xlu1 %v7146_v31, %s5195_s20  ;;  %4437 = vrot.lane.b32.xlu0 %v7143_v44, %s5195_s20 }
 0x374   : > { %v4268_v63 = vpop.permute.xlu1 %4267  ;;  %v4300_v59 = vpop.permute.xlu2 %4299 }
 0x375   : > { %v4323_v20 = vsel %vm236_vm0, %v4268_v63, %v4270_v10 }
 0x376   : > { %v7177_v27 = vmax.f32 %v6983_v62, %v4323_v20 }
 0x37a   : > { %v4266_v36 = vpop.permute.xlu0 %4265 }
 0x37b   : > { %v4321_v15 = vsel %vm236_vm0, %v4264_v51, %v4266_v36  ;;  %v4322_v56 = vsel %vm236_vm0, %v4266_v36, %v4268_v63 }
 0x37c   : > { %v7154_v52 = vmax.f32 %v6963_v60, %v4321_v15  ;;  %v4292_v38 = vpop.permute.xlu1 %4291  ;;  %v7180_v49 = vmax.f32 %v7000_v9, %v4322_v56  ;;  %v4306_v37 = vpop.permute.xlu2 %4305 }
 0x37d   : > { %v4333_v45 = vsel %vm236_vm0, %v4290_v12, %v4292_v38  ;;  %v4334_v11 = vsel %vm236_vm0, %v4292_v38, %v4294_v1 }
 0x37e   : > { %v7159_v57 = vmax.f32 %v6965_v2, %v4333_v45  ;;  %v7162_v0 = vmax.f32 %v7009_v40, %v4334_v11  ;;  %4441 = vrot.lane.b32.xlu2 %v7154_v52, %s5195_s20 }
 0x380   : > { %4469 = vrot.lane.b32.xlu1 %v7162_v0, %s5195_s20  ;;  %4467 = vrot.lane.b32.xlu0 %v7159_v57, %s5195_s20 }
 0x382   : > { %v4272_v60 = vpop.permute.xlu0 %4271 }
 0x383   : > { %v4324_v2 = vsel %vm236_vm0, %v4270_v10, %v4272_v60 }
 0x384   : > { %v7174_v58 = vmax.f32 %v7007_v7, %v4324_v2  ;;  %v4298_v40 = vpop.permute.xlu1 %4297  ;;  %v4282_v43 = vpop.permute.xlu2 %4281 }
 0x385   : > { %v4337_v7 = vsel %vm236_vm0, %v4298_v40, %v4300_v59 }
 0x386   : > { %4447 = vrot.lane.b32.xlu2 %v7174_v58, %s5195_s20  ;;  %v7195_v61 = vmax.f32 %v7029_v34, %v4337_v7 }
 0x388   : > { %4445 = vrot.lane.b32.xlu1 %v7177_v27, %s5195_s20  ;;  %4443 = vrot.lane.b32.xlu0 %v7180_v49, %s5195_s20 }
 0x38a   : > { %v4296_v50 = vpop.permute.xlu0 %4295 }
 0x38b   : > { %v4335_v8 = vsel %vm236_vm0, %v4294_v1, %v4296_v50  ;;  %v4336_v62 = vsel %vm236_vm0, %v4296_v50, %v4298_v40 }
 0x38c   : > { %v7192_v9 = vmax.f32 %v6981_v39, %v4335_v8  ;;  %v4274_v47 = vpop.permute.xlu1 %4273  ;;  %v7198_v22 = vmax.f32 %v7041_v35, %v4336_v62 }
 0x38d   : > { %v4325_v39 = vsel %vm236_vm0, %v4272_v60, %v4274_v47  ;;  %v4326_v13 = vsel %vm236_vm0, %v4274_v47, %v4276_v5 }
 0x38e   : > { %4471 = vrot.lane.b32.xlu2 %v7192_v9, %s5195_s20  ;;  %v7213_v19 = vmax.f32 %v7019_v26, %v4325_v39  ;;  %v7216_v32 = vmax.f32 %v7049_v33, %v4326_v13 }
 0x390   : > { %4475 = vrot.lane.b32.xlu1 %v7195_v61, %s5195_s20  ;;  %4473 = vrot.lane.b32.xlu0 %v7198_v22, %s5195_s20 }
 0x392   : > { %v4302_v42 = vpop.permute.xlu0 %4301 }
 0x393   : > { %v4338_v34 = vsel %vm236_vm0, %v4300_v59, %v4302_v42 }
 0x394   : > { %v7210_v35 = vmax.f32 %v7047_v30, %v4338_v34  ;;  %v4280_v24 = vpop.permute.xlu1 %4279 }
 0x395   : > { %v4329_v10 = vsel %vm236_vm0, %v4280_v24, %v4282_v43 }
 0x396   : > { %4477 = vrot.lane.b32.xlu2 %v7210_v35, %s5195_s20  ;;  %v7245_v15 = vmax.f32 %v7066_v53, %v4329_v10 }
 0x398   : > { %4451 = vrot.lane.b32.xlu1 %v7216_v32, %s5195_s20  ;;  %4449 = vrot.lane.b32.xlu0 %v7213_v19, %s5195_s20 }
 0x39a   : > { %v4278_v51 = vpop.permute.xlu0 %4277 }
 0x39b   : > { %v4327_v30 = vsel %vm236_vm0, %v4276_v5, %v4278_v51  ;;  %v4328_v1 = vsel %vm236_vm0, %v4278_v51, %v4280_v24 }
 0x39c   : > { %v7227_v26 = vmax.f32 %v7021_v48, %v4327_v30  ;;  %v4304_v33 = vpop.permute.xlu1 %4303  ;;  %v7231_v55 = vmax.f32 %v7078_v29, %v4328_v1  ;;  %v4288_v29 = vpop.permute.xlu2 %4287 }
 0x39d   : > { %v4340_v3 = vsel %vm236_vm0, %v4304_v33, %v4306_v37  ;;  %v4339_v63 = vsel %vm236_vm0, %v4302_v42, %v4304_v33 }
 0x39e   : > { %v7234_v12 = vmax.f32 %v7086_v4, %v4340_v3  ;;  %4453 = vrot.lane.b32.xlu2 %v7227_v26, %s5195_s20  ;;  %v7248_v4 = vmax.f32 %v7058_v23, %v4339_v63 }
 0x3a0   : > { %4455 = vrot.lane.b32.xlu0 %v7231_v55, %s5195_s20  ;;  %4481 = vrot.lane.b32.xlu1 %v7234_v12, %s5195_s20 }
 0x3a2   : > { %v4284_v48 = vpop.permute.xlu0 %4283 }
 0x3a4   : > { %v4310_v36 = vpop.permute.xlu1 %4309  ;;  %v4312_v56 = vpop.permute.xlu2 %4311 }
 0x3a5   : > { %v4343_v2 = vsel %vm236_vm0, %v4310_v36, %v4312_v56 }
 0x3a8   : > { %4457 = vrot.lane.b32.xlu1 %v7245_v15, %s5195_s20  ;;  %4479 = vrot.lane.b32.xlu0 %v7248_v4, %s5195_s20 }
 0x3aa   : > { %v4308_v38 = vpop.permute.xlu0 %4307 }
 0x3ab   : > { %v4341_v45 = vsel %vm236_vm0, %v4306_v37, %v4308_v38  ;;  %v4342_v11 = vsel %vm236_vm0, %v4308_v38, %v4310_v36 }
 0x3ac   : > { %v7257_v5 = vmax.f32 %v7064_v28, %v4341_v45  ;;  %v4286_v60 = vpop.permute.xlu1 %4285  ;;  %v7261_v23 = vmax.f32 %v7114_v41, %v4342_v11  ;;  %v4330_v28 = vsel %vm236_vm0, %v4282_v43, %v4284_v48  ;;  %v4318_v7 = vpop.permute.xlu2 %4317 }
 0x3ad   : > { %v4332_v53 = vsel %vm236_vm0, %v4286_v60, %v4288_v29  ;;  %v4331_v41 = vsel %vm236_vm0, %v4284_v48, %v4286_v60  ;;  %v7276_v40 = vmax.f32 %v7084_v54, %v4330_v28 }
 0x3ae   : > { %v7264_v20 = vmax.f32 %v7122_v17, %v4332_v53  ;;  %4483 = vrot.lane.b32.xlu2 %v7257_v5, %s5195_s20  ;;  %v7279_v17 = vmax.f32 %v7104_v18, %v4343_v2  ;;  %v7282_v59 = vmax.f32 %v7096_v14, %v4331_v41  ;;  %v7293_v14 = vmax.f32 %v7102_v16, %v4288_v29 }
 0x3b0   : > { %4485 = vrot.lane.b32.xlu0 %v7261_v23, %s5195_s20  ;;  %4463 = vrot.lane.b32.xlu1 %v7264_v20, %s5195_s20 }
 0x3b2   : > { %v4314_v54 = vpop.permute.xlu0 %4313 }
 0x3b3   : > { %v4344_v37 = vsel %vm236_vm0, %v4312_v56, %v4314_v54 }
 0x3b4   : > { %v4316_v50 = vpop.permute.xlu1 %4315  ;;  %v7309_v16 = vmax.f32 %v7120_v21, %v4344_v37 }
 0x3b5   : > { %v4345_v8 = vsel %vm236_vm0, %v4314_v54, %v4316_v50  ;;  %v4346_v18 = vsel %vm236_vm0, %v4316_v50, %v4318_v7 }
 0x3b6   : > { %4459 = vrot.lane.b32.xlu2 %v7276_v40, %s5195_s20  ;;  %v7296_v62 = vmax.f32 %v7128_v46, %v4345_v8  ;;  %v7299_v47 = vmax.f32 %v7134_v25, %v4346_v18  ;;  %v7314_v46 = vmax.f32 %v7132_v6, %v4318_v7 }
 0x3b8   : > { %4487 = vrot.lane.b32.xlu1 %v7279_v17, %s5195_s20  ;;  %4461 = vrot.lane.b32.xlu0 %v7282_v59, %s5195_s20 }
 0x3be   : > { %4465 = vrot.lane.b32.xlu2 %v7293_v14, %s5195_s20 }
 0x3c0   : > { %4493 = vrot.lane.b32.xlu1 %v7299_v47, %s5195_s20  ;;  %4491 = vrot.lane.b32.xlu0 %v7296_v62, %s5195_s20 }
 0x3c6   : > { %4489 = vrot.lane.b32.xlu2 %v7309_v16, %s5195_s20 }
 0x3ce   : > { %4495 = vrot.lane.b32.xlu2 %v7314_v46, %s5195_s20 }
 0x3d8   : > { %v4442_v25 = vpop.permute.xlu2 %4441 }
 0x3e0   : > { %v4448_v42 = vpop.permute.xlu2 %4447 }
 0x3e2   : > { %v4438_v39 = vpop.permute.xlu0 %4437  ;;  %v4440_v13 = vpop.permute.xlu1 %4439 }
 0x3e3   : > { %v4497_v21 = vsel %vm1480_vm3, %v4438_v39, %v4440_v13  ;;  %v4498_v6 = vsel %vm1480_vm3, %v4440_v13, %v4442_v25 }
 0x3e4   : > { %v4555_v34 = vmax.f32 %v7143_v44, %v4497_v21  ;;  %v4556_v24 = vmax.f32 %v7146_v31, %v4498_v6 }
 0x3e6   : > { %4585 = vst [vmem:[%s7322_s23] sm:$0xff] %v4555_v34 }
 0x3e7   : > { %4586 = vst [vmem:[%s7322_s23 + $0x8] sm:$0xff] %v4556_v24 }
 0x3e8   : > { %v4472_v51 = vpop.permute.xlu2 %4471 }
 0x3f0   : > { %v4478_v10 = vpop.permute.xlu2 %4477 }
 0x3f2   : > { %v4468_v30 = vpop.permute.xlu0 %4467  ;;  %v4470_v1 = vpop.permute.xlu1 %4469 }
 0x3f3   : > { %v4511_v43 = vsel %vm1480_vm3, %v4468_v30, %v4470_v1  ;;  %v4512_v33 = vsel %vm1480_vm3, %v4470_v1, %v4472_v51 }
 0x3f4   : > { %v4570_v3 = vmax.f32 %v7159_v57, %v4511_v43  ;;  %v4571_v48 = vmax.f32 %v7162_v0, %v4512_v33 }
 0x3f6   : > { %4601 = vst [vmem:[%s7322_s23 + $0x78] sm:$0xff] %v4570_v3 }
 0x3f7   : > { %4602 = vst [vmem:[%s7322_s23 + $0x80] sm:$0xff] %v4571_v48 }
 0x3f8   : > { %v4454_v45 = vpop.permute.xlu2 %4453 }
 0x3fa   : > { %v4444_v44 = vpop.permute.xlu0 %4443  ;;  %v4446_v31 = vpop.permute.xlu1 %4445 }
 0x3fb   : > { %v4499_v63 = vsel %vm1480_vm3, %v4442_v25, %v4444_v44  ;;  %v4500_v36 = vsel %vm1480_vm3, %v4444_v44, %v4446_v31  ;;  %v4501_v29 = vsel %vm1480_vm3, %v4446_v31, %v4448_v42 }
 0x3fc   : > { %v4557_v38 = vmax.f32 %v7154_v52, %v4499_v63  ;;  %v4558_v57 = vmax.f32 %v7180_v49, %v4500_v36  ;;  %v4559_v0 = vmax.f32 %v7177_v27, %v4501_v29 }
 0x3fe   : > { %4587 = vst [vmem:[%s7322_s23 + $0x10] sm:$0xff] %v4557_v38 }
 0x3ff   : > { %4588 = vst [vmem:[%s7322_s23 + $0x18] sm:$0xff] %v4558_v57 }
 0x400   : > { %4589 = vst [vmem:[%s7322_s23 + $0x20] sm:$0xff] %v4559_v0 }
 0x402   : > { %v4474_v11 = vpop.permute.xlu0 %4473  ;;  %v4476_v60 = vpop.permute.xlu1 %4475 }
 0x403   : > { %v4513_v53 = vsel %vm1480_vm3, %v4472_v51, %v4474_v11  ;;  %v4514_v56 = vsel %vm1480_vm3, %v4474_v11, %v4476_v60  ;;  %v4515_v28 = vsel %vm1480_vm3, %v4476_v60, %v4478_v10 }
 0x404   : > { %v4572_v52 = vmax.f32 %v7192_v9, %v4513_v53  ;;  %v4573_v49 = vmax.f32 %v7198_v22, %v4514_v56  ;;  %v4574_v27 = vmax.f32 %v7195_v61, %v4515_v28 }
 0x406   : > { %4603 = vst [vmem:[%s7322_s23 + $0x88] sm:$0xff] %v4572_v52 }
 0x407   : > { %4604 = vst [vmem:[%s7322_s23 + $0x90] sm:$0xff] %v4573_v49 }
 0x408   : > { %4605 = vst [vmem:[%s7322_s23 + $0x98] sm:$0xff] %v4574_v27  ;;  %v4484_v2 = vpop.permute.xlu2 %4483 }
 0x40a   : > { %v4450_v41 = vpop.permute.xlu0 %4449  ;;  %v4452_v50 = vpop.permute.xlu1 %4451 }
 0x40b   : > { %v4502_v7 = vsel %vm1480_vm3, %v4448_v42, %v4450_v41  ;;  %v4503_v54 = vsel %vm1480_vm3, %v4450_v41, %v4452_v50  ;;  %v4504_v9 = vsel %vm1480_vm3, %v4452_v50, %v4454_v45 }
 0x40c   : > { %v4560_v8 = vmax.f32 %v7174_v58, %v4502_v7  ;;  %v4561_v22 = vmax.f32 %v7213_v19, %v4503_v54  ;;  %v4562_v61 = vmax.f32 %v7216_v32, %v4504_v9 }
 0x40e   : > { %4590 = vst [vmem:[%s7322_s23 + $0x28] sm:$0xff] %v4560_v8 }
 0x40f   : > { %4591 = vst [vmem:[%s7322_s23 + $0x30] sm:$0xff] %v4561_v22 }
 0x410   : > { %4592 = vst [vmem:[%s7322_s23 + $0x38] sm:$0xff] %v4562_v61  ;;  %v4460_v18 = vpop.permute.xlu2 %4459 }
 0x412   : > { %v4456_v37 = vpop.permute.xlu0 %4455  ;;  %v4482_v25 = vpop.permute.xlu1 %4481 }
 0x413   : > { %v4505_v42 = vsel %vm1480_vm3, %v4454_v45, %v4456_v37  ;;  %v4518_v39 = vsel %vm1480_vm3, %v4482_v25, %v4484_v2 }
 0x414   : > { %v4563_v13 = vmax.f32 %v7227_v26, %v4505_v42  ;;  %v4577_v21 = vmax.f32 %v7234_v12, %v4518_v39 }
 0x416   : > { %4593 = vst [vmem:[%s7322_s23 + $0x40] sm:$0xff] %v4563_v13 }
 0x417   : > { %4608 = vst [vmem:[%s7322_s23 + $0xb0] sm:$0xff] %v4577_v21 }
 0x418   : > { %v4466_v58 = vpop.permute.xlu2 %4465 }
 0x419   : > { %v4569_v19 = vmax.f32 %v7293_v14, %v4466_v58 }
 0x41a   : > { %v4480_v32 = vpop.permute.xlu0 %4479  ;;  %v4458_v6 = vpop.permute.xlu1 %4457 }
 0x41b   : > { %4600 = vst.msk [vmem:[%s7322_s23 + $0x70] sm:$0xff] %vm4599_vm9, %v4569_v19  ;;  %v4516_v34 = vsel %vm1480_vm3, %v4478_v10, %v4480_v32  ;;  %v4517_v26 = vsel %vm1480_vm3, %v4480_v32, %v4482_v25  ;;  %v4506_v12 = vsel %vm1480_vm3, %v4456_v37, %v4458_v6  ;;  %v4507_v24 = vsel %vm1480_vm3, %v4458_v6, %v4460_v18 }
 0x41c   : > { %v4575_v51 = vmax.f32 %v7210_v35, %v4516_v34  ;;  %v4576_v30 = vmax.f32 %v7248_v4, %v4517_v26  ;;  %v4564_v14 = vmax.f32 %v7231_v55, %v4506_v12  ;;  %v4565_v1 = vmax.f32 %v7245_v15, %v4507_v24 }
 0x41e   : > { %4606 = vst [vmem:[%s7322_s23 + $0xa0] sm:$0xff] %v4575_v51 }
 0x41f   : > { %4607 = vst [vmem:[%s7322_s23 + $0xa8] sm:$0xff] %v4576_v30 }
 0x420   : > { %4594 = vst [vmem:[%s7322_s23 + $0x48] sm:$0xff] %v4564_v14  ;;  %v4490_v43 = vpop.permute.xlu2 %4489 }
 0x421   : > { %4595 = vst [vmem:[%s7322_s23 + $0x50] sm:$0xff] %v4565_v1 }
 0x422   : > { %v4486_v33 = vpop.permute.xlu0 %4485  ;;  %v4464_v3 = vpop.permute.xlu1 %4463 }
 0x423   : > { %v4519_v48 = vsel %vm1480_vm3, %v4484_v2, %v4486_v33  ;;  %v4510_v10 = vsel %vm1480_vm3, %v4464_v3, %v4466_v58 }
 0x424   : > { %v4578_v35 = vmax.f32 %v7257_v5, %v4519_v48  ;;  %v4568_v4 = vmax.f32 %v7264_v20, %v4510_v10 }
 0x426   : > { %4609 = vst [vmem:[%s7322_s23 + $0xb8] sm:$0xff] %v4578_v35 }
 0x427   : > { %4598 = vst [vmem:[%s7322_s23 + $0x68] sm:$0xff] %v4568_v4 }
 0x428   : > { %v4496_v55 = vpop.permute.xlu2 %4495 }
 0x429   : > { %v4584_v15 = vmax.f32 %v7314_v46, %v4496_v55 }
 0x42a   : > { %v4462_v44 = vpop.permute.xlu0 %4461  ;;  %v4488_v31 = vpop.permute.xlu1 %4487 }
 0x42b   : > { %4615 = vst.msk [vmem:[%s7322_s23 + $0xe8] sm:$0xff] %vm4599_vm9, %v4584_v15  ;;  %v4508_v63 = vsel %vm1480_vm3, %v4460_v18, %v4462_v44  ;;  %v4509_v36 = vsel %vm1480_vm3, %v4462_v44, %v4464_v3  ;;  %v4520_v5 = vsel %vm1480_vm3, %v4486_v33, %v4488_v31  ;;  %v4521_v20 = vsel %vm1480_vm3, %v4488_v31, %v4490_v43 }
 0x42c   : > { %v4566_v29 = vmax.f32 %v7276_v40, %v4508_v63  ;;  %v4567_v38 = vmax.f32 %v7282_v59, %v4509_v36  ;;  %v4579_v46 = vmax.f32 %v7261_v23, %v4520_v5  ;;  %v4580_v57 = vmax.f32 %v7279_v17, %v4521_v20 }
 0x42e   : > { %4596 = vst [vmem:[%s7322_s23 + $0x58] sm:$0xff] %v4566_v29 }
 0x42f   : > { %4597 = vst [vmem:[%s7322_s23 + $0x60] sm:$0xff] %v4567_v38 }
 0x430   : > { %4610 = vst [vmem:[%s7322_s23 + $0xc0] sm:$0xff] %v4579_v46 }
 0x431   : > { %4611 = vst [vmem:[%s7322_s23 + $0xc8] sm:$0xff] %v4580_v57 }
 0x432   : > { %v4492_v0 = vpop.permute.xlu0 %4491  ;;  %v4494_v45 = vpop.permute.xlu1 %4493 }
 0x433   : > { %v4522_v11 = vsel %vm1480_vm3, %v4490_v43, %v4492_v0  ;;  %v4523_v60 = vsel %vm1480_vm3, %v4492_v0, %v4494_v45  ;;  %v4524_v40 = vsel %vm1480_vm3, %v4494_v45, %v4496_v55 }
 0x434   : > { %v4581_v59 = vmax.f32 %v7309_v16, %v4522_v11  ;;  %v4582_v53 = vmax.f32 %v7296_v62, %v4523_v60  ;;  %v4583_v23 = vmax.f32 %v7299_v47, %v4524_v40 }
 0x436   : > { %4612 = vst [vmem:[%s7322_s23 + $0xd0] sm:$0xff] %v4581_v59 }
 0x437   : > { %4613 = vst [vmem:[%s7322_s23 + $0xd8] sm:$0xff] %v4582_v53 }
 0x438   : > { %4614 = vst [vmem:[%s7322_s23 + $0xe0] sm:$0xff] %v4583_v23 }
 0x439 PF: > { %s13_s12 = sadd.s32 1, %s5191_s12  }
 0x43a   : > { %p10_p4 = scmp.ge.s32.totalorder %s13_s12, 4  }
 0x43c   :  { %12 = sbr.rel (!%p10_p4) target bundleno = 1 (0x1), region = 70 }

// kernel: fdfe_anomaly_net.7
= control target key start
LH: loop header
LB: loop body
LE: loop exit
PB: predicated region body
PF: predicated region fallthrough
CT: control target
= control target key end

     0   :  { %s2152_s24 = smov 0   ;;  %s2579_s0 = inlined_call_operand.vmem [shape: f32[2,16,1024], index: 0, kind: input, shape index: {}]   ;;  %s2580_s1 = inlined_call_operand.vmem [shape: f32[4,16,16], index: 1, kind: input, shape index: {}]   ;;  %s2581_s2 = inlined_call_operand.vmem [shape: f32[16,1], index: 2, kind: input, shape index: {}]   ;;  %s2582_s3 = inlined_call_operand.vmem [shape: f32[8,16], index: 3, kind: input, shape index: {}]   ;;  %s2583_s4 = inlined_call_operand.vmem [shape: f32[8,1], index: 4, kind: input, shape index: {}]   ;;  %s2584_s5 = inlined_call_operand.vmem [shape: f32[16,8], index: 5, kind: input, shape index: {}]   ;;  %s2585_s6 = inlined_call_operand.vmem [shape: f32[16,1], index: 6, kind: input, shape index: {}]   ;;  %s2586_s7 = inlined_call_operand.vmem [shape: f32[2,16,1019], index: 7, kind: output, shape index: {}]  }
   0x1 LB: > { %s1858_s25 = sadd.s32 4294967295, %s2106_s24   ;;  %p1862_p0 = scmp.ge.s32.totalorder %s2106_s24, 1  ;;  %s2106_s24 = sphi %s2152_s24, %s17_s24  }
   0x2   : > { %p237_p1 = scmp.lt.s32.totalorder %s2106_s24, 3 }
   0x4   : > { %p238_p2 = pnand %p1862_p0, %p237_p1 }
   0x5   : > { %p269_p3 = scmp.lt.s32.totalorder (!%p238_p2), %s1858_s25, 1  ;;  %s2108_s30 = smov (!%p238_p2), 127  }
   0x6   : > { %241 = sbr.rel (%p238_p2) target bundleno = 698 (0x2ba), region = 48  ;;  %s2109_s8 = smov (!%p238_p2), 124  }
   0x7   : > { %s2110_s9 = smov (!%p238_p2), 123  }
   0xb   : > { %s2588_s25 = smov (!%p269_p3, %s1858_s25), 1  ;;  %vm348_vm0 = vcmask 1039360   ;;  %v1867_v44 = vld [vmem:[%s2580_s1 + $0x10] sm:$0xff]  ;;  %vm379_vm1 = vcmask 130048   ;;  %v1868_v59 = vld [vmem:[%s2580_s1 + $0x18] sm:$0xff]  ;;  %vm795_vm2 = vcmask 1014784  }
   0xc   : > { %s1963_s26 = sshll.u32 %s2588_s25, 7  ;;  %vm1067_vm3 = vcmask 1006592   ;;  %vm1564_vm4 = vcmask 64512  }
   0xd   : > { %s273_s29 = scalar_lea.vmem %s2579_s0, %s1963_s26  ;;  %s2540_s27 = scalar_lea.vmem %s2586_s7, %s1963_s26 }
   0xe   : > { %v2168_v0 = vld [vmem:[%s273_s29 + $0x50] sm:$0xff]  ;;  %v2170_v1 = vld [vmem:[%s273_s29 + $0x58] sm:$0xff]  ;;  %v2176_v4 = vld [vmem:[%s273_s29 + $0x20] sm:$0xff] }
   0xf   : > { %v2172_v2 = vld [vmem:[%s273_s29 + $0x18] sm:$0xff]  ;;  %v1977_v3 = vpack.i.bf16 %v2170_v1, %v2168_v0  ;;  %v2180_v6 = vld [vmem:[%s273_s29 + $0x30] sm:$0xff]  ;;  %v2186_v9 = vld [vmem:[%s273_s29 + $0x60] sm:$0xff] }
  0x10   : > { %v1987_v5 = vpack.i.bf16 %v2176_v4, %v2172_v2  ;;  %v2182_v7 = vld [vmem:[%s273_s29 + $0x38] sm:$0xff]  ;;  %v2184_v8 = vld [vmem:[%s273_s29 + $0x10] sm:$0xff]  ;;  %v2196_v14 = vld [vmem:[%s273_s29 + $0x40] sm:$0xff] }
  0x11   : > { %1978 = vrot.lane.b32.xlu0 %v1977_v3, %s2108_s30  ;;  %v1997_v10 = vpack.i.bf16 %v2182_v7, %v2180_v6  ;;  %v2190_v11 = vld [vmem:[%s273_s29 + $0x70] sm:$0xff]  ;;  %v2192_v12 = vld [vmem:[%s273_s29 + $0x78] sm:$0xff]  ;;  %v1982_v13 = vpack.i.bf16 %v2184_v8, %v2186_v9  ;;  %v2198_v15 = vld [vmem:[%s273_s29 + $0x48] sm:$0xff] }
  0x12   : > { %1988 = vrot.lane.b32.xlu1 %v1987_v5, %s2108_s30  ;;  %v1992_v16 = vpack.i.bf16 %v2192_v12, %v2190_v11  ;;  %v2002_v17 = vpack.i.bf16 %v2198_v15, %v2196_v14  ;;  %v2204_v18 = vld [vmem:[%s273_s29] sm:$0xff]  ;;  %v2206_v19 = vld [vmem:[%s273_s29 + $0x8] sm:$0xff] }
  0x13   : > { %1998 = vrot.lane.b32.xlu2 %v1997_v10, %s2108_s30  ;;  %v2208_v20 = vld [vmem:[%s273_s29 + $0x28] sm:$0xff]  ;;  %v2007_v22 = vpack.i.bf16 %v2206_v19, %v2204_v18 }
  0x14   : > { %v2210_v21 = vld [vmem:[%s273_s29 + $0x68] sm:$0xff] }
  0x15   : > { %v2012_v23 = vpack.i.bf16 %v2208_v20, %v2210_v21 }
  0x19   : > { %1983 = vrot.lane.b32.xlu0 %v1982_v13, %s2108_s30 }
  0x1a   : > { %1993 = vrot.lane.b32.xlu1 %v1992_v16, %s2108_s30 }
  0x1b   : > { %2003 = vrot.lane.b32.xlu2 %v2002_v17, %s2108_s30 }
  0x21   : > { %2008 = vrot.lane.b32.xlu0 %v2007_v22, %s2108_s30 }
  0x22   : > { %2013 = vrot.lane.b32.xlu1 %v2012_v23, %s2108_s30 }
  0x23   : > { %2018 = vrot.lane.b32.xlu2 %v1977_v3, %s2109_s8 }
  0x29   : > { %2023 = vrot.lane.b32.xlu0 %v1982_v13, %s2109_s8 }
  0x2a   : > { %2028 = vrot.lane.b32.xlu1 %v1987_v5, %s2109_s8 }
  0x2b   : > { %2033 = vrot.lane.b32.xlu2 %v1992_v16, %s2109_s8 }
  0x31   : > { %2038 = vrot.lane.b32.xlu0 %v1997_v10, %s2109_s8 }
  0x32   : > { %2043 = vrot.lane.b32.xlu1 %v2002_v17, %s2109_s8 }
  0x33   : > { %2048 = vrot.lane.b32.xlu2 %v2007_v22, %s2109_s8 }
  0x39   : > { %2053 = vrot.lane.b32.xlu0 %v1977_v3, %s2110_s9 }
  0x3a   : > { %2058 = vrot.lane.b32.xlu1 %v1982_v13, %s2110_s9 }
  0x3b   : > { %2063 = vrot.lane.b32.xlu2 %v2012_v23, %s2109_s8 }
  0x41   : > { %2068 = vrot.lane.b32.xlu0 %v1987_v5, %s2110_s9 }
  0x42   : > { %2073 = vrot.lane.b32.xlu1 %v1992_v16, %s2110_s9 }
  0x43   : > { %2078 = vrot.lane.b32.xlu2 %v1997_v10, %s2110_s9 }
  0x49   : > { %2083 = vrot.lane.b32.xlu0 %v2002_v17, %s2110_s9 }
  0x4a   : > { %2088 = vrot.lane.b32.xlu1 %v2007_v22, %s2110_s9  ;;  %v296_v22 = vld [vmem:[%s2580_s1 + $0x8] sm:$0xff] }
  0x4b   : > { %2093 = vrot.lane.b32.xlu2 %v2012_v23, %s2110_s9 }
  0x6d   : > { %v2216_v24 = vpop.permute.xlu2 %1998 }
  0x6e   : > { %v2000_v38 = vunpack.i.l.bf16 %v2216_v24  ;;  %v2001_v42 = vunpack.i.h.bf16 %v2216_v24 }
  0x70   : > { %v355_v50 = vsel %vm348_vm0, %v2000_v38, %v2001_v42 }
  0x75   : > { %v2004_v25 = vpop.permute.xlu2 %2003 }
  0x76   : > { %v2006_v26 = vunpack.i.h.bf16 %v2004_v25  ;;  %v2005_v27 = vunpack.i.l.bf16 %v2004_v25 }
  0x78   : > { %v356_v28 = vsel %vm348_vm0, %v2005_v27, %v2006_v26 }
  0x79   : > { %400 = vmatpush.msra.mxu0 %v356_v28 }
  0x83   : > { %v1979_v29 = vpop.permute.xlu0 %1978 }
  0x84   : > { %v1981_v30 = vunpack.i.h.bf16 %v1979_v29  ;;  %v1980_v31 = vunpack.i.l.bf16 %v1979_v29  ;;  %v1989_v32 = vpop.permute.xlu1 %1988 }
  0x85   : > { %v1991_v35 = vunpack.i.h.bf16 %v1989_v32  ;;  %v1990_v36 = vunpack.i.l.bf16 %v1989_v32 }
  0x86   : > { %v357_v33 = vsel %vm348_vm0, %v2006_v26, %v1980_v31  ;;  %v358_v34 = vsel %vm348_vm0, %v1980_v31, %v1981_v30 }
  0x87   : > { %423 = vmatpush.msra.mxu1 %v357_v33  ;;  %446 = vmatpush.msra.mxu2 %v358_v34  ;;  %v352_v48 = vsel %vm348_vm0, %v1990_v36, %v1991_v35 }
  0x8b   : > { %v1984_v37 = vpop.permute.xlu0 %1983 }
  0x8c   : > { %v1994_v39 = vpop.permute.xlu1 %1993  ;;  %v1986_v40 = vunpack.i.h.bf16 %v1984_v37  ;;  %v1985_v41 = vunpack.i.l.bf16 %v1984_v37 }
  0x8d   : > { %v1995_v43 = vunpack.i.l.bf16 %v1994_v39  ;;  %v1996_v45 = vunpack.i.h.bf16 %v1994_v39 }
  0x8e   : > { %v351_v46 = vsel %vm348_vm0, %v1986_v40, %v1990_v36  ;;  %v359_v47 = vsel %vm348_vm0, %v1981_v30, %v1985_v41 }
  0x8f   : > { %447 = vmatpush.msra.mxu2 %v351_v46  ;;  %469 = vmatpush.msra.mxu3 %v359_v47  ;;  %v362_v49 = vsel %vm348_vm0, %v1995_v43, %v1996_v45 }
  0x90   : > { %1873 = vmatmul.msk.f32.vlgmr.msra.gmra.mxu2 %vm379_vm1, %v1867_v44 }
  0x91   : > { %470 = vmatpush.msra.mxu3 %v352_v48  ;;  %538 = vmatpush.msrb.mxu2 %v362_v49  ;;  %v1901_v49 = vld [vmem:[%s2580_s1 + $0x20] sm:$0xff] }
  0x92   : > { %1875 = vmatmul.msk.f32.vlgmr.msra.gmra.mxu3 %vm379_vm1, %v1867_v44 }
  0x93   : > { %v2009_v51 = vpop.permute.xlu0 %2008  ;;  %561 = vmatpush.msrb.mxu3 %v1996_v45  ;;  %539 = vmatpush.msrb.mxu2 %v355_v50 }
  0x94   : > { %v2014_v52 = vpop.permute.xlu1 %2013  ;;  %v2011_v53 = vunpack.i.h.bf16 %v2009_v51  ;;  %v2010_v54 = vunpack.i.l.bf16 %v2009_v51 }
  0x95   : > { %636 = vmatpush.msra.mxu2 %v2168_v0  ;;  %v2015_v55 = vunpack.i.l.bf16 %v2014_v52  ;;  %562 = vmatpush.msrb.mxu3 %v2001_v42  ;;  %v2016_v56 = vunpack.i.h.bf16 %v2014_v52  ;;  %v2019_v0 = vpop.permute.xlu2 %2018 }
  0x96   : > { %v349_v57 = vsel %vm348_vm0, %v2010_v54, %v2011_v53  ;;  %v350_v58 = vsel %vm348_vm0, %v2011_v53, %v1986_v40  ;;  %v2021_v5 = vunpack.i.h.bf16 %v2019_v0 }
  0x97   : > { %637 = vmatpush.msra.mxu2 %v2184_v8  ;;  %659 = vmatpush.msra.mxu3 %v2170_v1  ;;  %v360_v60 = vsel %vm348_vm0, %v1985_v41, %v2015_v55  ;;  %v361_v61 = vsel %vm348_vm0, %v2015_v55, %v1995_v43  ;;  %v354_v62 = vsel %vm348_vm0, %v2016_v56, %v2000_v38 }
  0x98   : > { %401 = vmatpush.msra.mxu0 %v349_v57  ;;  %424 = vmatpush.msra.mxu1 %v350_v58  ;;  %v353_v63 = vsel %vm348_vm0, %v1991_v35, %v2016_v56 }
  0x99   : > { %1869 = vmatmul.msk.f32.vlgmr.msra.gmra.mxu0 %vm379_vm1, %v1867_v44  ;;  %1871 = vmatmul.msk.f32.vlgmr.msra.gmra.mxu1 %vm379_vm1, %v1867_v44 }
  0x9a   : > { %1874 = vmatmul.msk.f32.gmra.mxu2 %vm379_vm1, %v1868_v59  ;;  %492 = vmatpush.msrb.mxu0 %v360_v60 }
  0x9b   : > { %515 = vmatpush.msrb.mxu1 %v361_v61  ;;  %1876 = vmatmul.msk.f32.gmra.mxu3 %vm379_vm1, %v1868_v59 }
  0x9c   : > { %493 = vmatpush.msrb.mxu0 %v353_v63  ;;  %660 = vmatpush.msra.mxu3 %v2172_v2  ;;  %v2261_v1 = vpop.permute.xlu1 %2028  ;;  %v2264_v2 = vpop.permute.xlu0 %2023 }
  0x9d   : > { %516 = vmatpush.msrb.mxu1 %v354_v62  ;;  %v2269_v3 = vpop.permute.xlu2 %2033  ;;  %v2030_v8 = vunpack.i.l.bf16 %v2261_v1  ;;  %v2026_v10 = vunpack.i.h.bf16 %v2264_v2  ;;  %v1902_v62 = vld [vmem:[%s2580_s1 + $0x28] sm:$0xff] }
  0x9e   : > { %590 = vmatpush.msra.mxu0 %v2196_v14  ;;  %v2036_v27 = vunpack.i.h.bf16 %v2269_v3  ;;  %v2035_v28 = vunpack.i.l.bf16 %v2269_v3 }
  0x9f   : > { %613 = vmatpush.msra.mxu1 %v2198_v15  ;;  %v798_v15 = vsel %vm795_vm2, %v2026_v10, %v2030_v8 }
  0xa0   : > { %591 = vmatpush.msra.mxu0 %v2204_v18  ;;  %v809_v34 = vsel %vm795_vm2, %v2035_v28, %v2036_v27 }
  0xa1   : > { %614 = vmatpush.msra.mxu1 %v2206_v19  ;;  %1870 = vmatmul.msk.f32.gmra.mxu0 %vm379_vm1, %v1868_v59 }
  0xa2   : > { %1872 = vmatmul.msk.f32.gmra.mxu1 %vm379_vm1, %v1868_v59  ;;  %1881 = vmatmul.msk.f32.vlgmr.msrb.gmra.mxu2 %vm379_vm1, %v1867_v44 }
  0xa3   : > { %1883 = vmatmul.msk.f32.vlgmr.msrb.gmra.mxu3 %vm379_vm1, %v1867_v44  ;;  %728 = vmatpush.msrb.mxu2 %v2190_v11  ;;  %v2031_v11 = vunpack.i.h.bf16 %v2261_v1 }
  0xa4   : > { %751 = vmatpush.msrb.mxu3 %v2192_v12  ;;  %v2044_v12 = vpop.permute.xlu1 %2043  ;;  %v2039_v14 = vpop.permute.xlu0 %2038 }
  0xa5   : > { %729 = vmatpush.msrb.mxu2 %v2180_v6  ;;  %v2020_v6 = vunpack.i.l.bf16 %v2019_v0  ;;  %v2046_v16 = vunpack.i.h.bf16 %v2044_v12  ;;  %v2045_v17 = vunpack.i.l.bf16 %v2044_v12  ;;  %v799_v18 = vsel %vm795_vm2, %v2030_v8, %v2031_v11  ;;  %v2049_v19 = vpop.permute.xlu2 %2048  ;;  %v1304_v12 = vld [vmem:[%s2581_s2] sm:$0xff] }
  0xa6   : > { %752 = vmatpush.msrb.mxu3 %v2182_v7  ;;  %v2025_v7 = vunpack.i.l.bf16 %v2264_v2  ;;  %v2041_v30 = vunpack.i.h.bf16 %v2039_v14  ;;  %v2040_v31 = vunpack.i.l.bf16 %v2039_v14 }
  0xa7   : > { %v805_v13 = vsel %vm795_vm2, %v2020_v6, %v2021_v5  ;;  %v803_v23 = vsel %vm795_vm2, %v2045_v17, %v2046_v16  ;;  %v804_v24 = vsel %vm795_vm2, %v2046_v16, %v2020_v6 }
  0xa8   : > { %v802_v35 = vsel %vm795_vm2, %v2040_v31, %v2041_v30 }
  0xa9   : > { %1877 = vmatmul.msk.f32.vlgmr.msrb.gmra.mxu0 %vm379_vm1, %v1867_v44 }
  0xaa   : > { %1879 = vmatmul.msk.f32.vlgmr.msrb.gmra.mxu1 %vm379_vm1, %v1867_v44  ;;  %1882 = vmatmul.msk.f32.gmra.mxu2 %vm379_vm1, %v1868_v59 }
  0xab   : > { %682 = vmatpush.msrb.mxu0 %v2186_v9  ;;  %1884 = vmatmul.msk.f32.gmra.mxu3 %vm379_vm1, %v1868_v59  ;;  %v295_v9 = vld [vmem:[%s2580_s1] sm:$0xff] }
  0xac   : > { %705 = vmatpush.msrb.mxu1 %v2210_v21  ;;  %v2050_v21 = vunpack.i.l.bf16 %v2049_v19  ;;  %v2054_v29 = vpop.permute.xlu0 %2053  ;;  %v2304_v32 = vpop.permute.xlu1 %2058 }
  0xad   : > { %683 = vmatpush.msrb.mxu0 %v2176_v4  ;;  %v806_v4 = vsel %vm795_vm2, %v2021_v5, %v2025_v7  ;;  %v2064_v33 = vpop.permute.xlu2 %2063  ;;  %v2056_v44 = vunpack.i.h.bf16 %v2054_v29  ;;  %v2055_v45 = vunpack.i.l.bf16 %v2054_v29  ;;  %v2060_v46 = vunpack.i.l.bf16 %v2304_v32 }
  0xae   : > { %706 = vmatpush.msrb.mxu1 %v2208_v20  ;;  %v2051_v20 = vunpack.i.h.bf16 %v2049_v19  ;;  %v2065_v36 = vunpack.i.l.bf16 %v2064_v33  ;;  %v2066_v37 = vunpack.i.h.bf16 %v2064_v33  ;;  %v2061_v47 = vunpack.i.h.bf16 %v2304_v32  ;;  %v1919_v19 = vld [vmem:[%s2580_s1 + $0x30] sm:$0xff] }
  0xaf   : > { %v1077_v52 = vsel %vm1067_vm3, %v2055_v45, %v2056_v44  ;;  %v1078_v53 = vsel %vm1067_vm3, %v2056_v44, %v2060_v46 }
  0xb0   : > { %v796_v25 = vsel %vm795_vm2, %v2050_v21, %v2051_v20  ;;  %v797_v26 = vsel %vm795_vm2, %v2051_v20, %v2026_v10  ;;  %v807_v39 = vsel %vm795_vm2, %v2025_v7, %v2065_v36  ;;  %v808_v40 = vsel %vm795_vm2, %v2065_v36, %v2035_v28  ;;  %v1552_v20 = vld [vmem:[%s2585_s6] sm:$0xff]  ;;  %v1920_v21 = vld [vmem:[%s2580_s1 + $0x38] sm:$0xff] }
  0xb1   : > { %1878 = vmatmul.msk.f32.gmra.mxu0 %vm379_vm1, %v1868_v59  ;;  %v800_v42 = vsel %vm795_vm2, %v2031_v11, %v2066_v37  ;;  %v801_v43 = vsel %vm795_vm2, %v2066_v37, %v2040_v31 }
  0xb2   : > { %1880 = vmatmul.msk.f32.gmra.mxu1 %vm379_vm1, %v1868_v59  ;;  %1889 = vmatmul.msk.f32.vlgmr.msra.gmra.mxu2 %vm379_vm1, %v295_v9 }
  0xb3   : > { %1891 = vmatmul.msk.f32.vlgmr.msra.gmra.mxu3 %vm379_vm1, %v295_v9  ;;  %892 = vmatpush.msra.mxu2 %v805_v13  ;;  %v2111_v13 = vmov 0  }
  0xb4   : > { %915 = vmatpush.msra.mxu3 %v806_v4  ;;  %v2312_v38 = vpop.permute.xlu0 %2068  ;;  %v2316_v41 = vpop.permute.xlu1 %2073  ;;  %2098 = vset.pattern.permute.xlu1 %v2111_v13 }
  0xb5   : > { %893 = vmatpush.msra.mxu2 %v798_v15  ;;  %v2070_v48 = vunpack.i.l.bf16 %v2312_v38  ;;  %v2071_v50 = vunpack.i.h.bf16 %v2312_v38  ;;  %v2079_v60 = vpop.permute.xlu2 %2078  ;;  %v2076_v3 = vunpack.i.h.bf16 %v2316_v41  ;;  %v2075_v5 = vunpack.i.l.bf16 %v2316_v41  ;;  %1308 = vperm.xlu1 %2098, %v1304_v12  }
  0xb6   : > { %916 = vmatpush.msra.mxu3 %v799_v18  ;;  %v2081_v6 = vunpack.i.h.bf16 %v2079_v60  ;;  %v2080_v7 = vunpack.i.l.bf16 %v2079_v60  ;;  %2097 = vset.pattern.permute.xlu0 %v2111_v13  ;;  %v1305_v18 = vld [vmem:[%s2581_s2 + $0x8] sm:$0xff] }
  0xb7   : > { %v1070_v55 = vsel %vm1067_vm3, %v2061_v47, %v2070_v48  ;;  %v1071_v57 = vsel %vm1067_vm3, %v2070_v48, %v2071_v50  ;;  %v1081_v10 = vsel %vm1067_vm3, %v2075_v5, %v2076_v3  ;;  %2099 = vset.pattern.permute.xlu2 %v2111_v13  ;;  %1313 = vperm.xlu0 %2097, %v1305_v18  }
  0xb9   : > { %1885 = vmatmul.msk.f32.vlgmr.msra.gmra.mxu0 %vm379_vm1, %v295_v9 }
  0xba   : > { %1887 = vmatmul.msk.f32.vlgmr.msra.gmra.mxu1 %vm379_vm1, %v295_v9  ;;  %1890 = vmatmul.msk.f32.gmra.mxu2 %vm379_vm1, %v296_v22 }
  0xbb   : > { %846 = vmatpush.msra.mxu0 %v803_v23  ;;  %1892 = vmatmul.msk.f32.gmra.mxu3 %vm379_vm1, %v296_v22 }
  0xbc   : > { %869 = vmatpush.msra.mxu1 %v804_v24  ;;  %v2084_v51 = vpop.permute.xlu0 %2083  ;;  %v2089_v54 = vpop.permute.xlu1 %2088 }
  0xbd   : > { %847 = vmatpush.msra.mxu0 %v796_v25  ;;  %v2086_v56 = vunpack.i.h.bf16 %v2084_v51  ;;  %v2085_v58 = vunpack.i.l.bf16 %v2084_v51  ;;  %v2091_v59 = vunpack.i.h.bf16 %v2089_v54  ;;  %v2090_v61 = vunpack.i.l.bf16 %v2089_v54  ;;  %v2094_v8 = vpop.permute.xlu2 %2093  ;;  %1556 = vperm.xlu1 %2098, %v1552_v20  }
  0xbe   : > { %870 = vmatpush.msra.mxu1 %v797_v26  ;;  %v2095_v11 = vunpack.i.l.bf16 %v2094_v8  ;;  %v2096_v4 = vunpack.i.h.bf16 %v2094_v8 }
  0xbf   : > { %v1076_v63 = vsel %vm1067_vm3, %v2086_v56, %v2055_v45  ;;  %v1075_v0 = vsel %vm1067_vm3, %v2085_v58, %v2086_v56  ;;  %v1069_v1 = vsel %vm1067_vm3, %v2091_v59, %v2061_v47  ;;  %v1068_v2 = vsel %vm1067_vm3, %v2090_v61, %v2091_v59 }
  0xc0   : > { %v1079_v14 = vsel %vm1067_vm3, %v2060_v46, %v2095_v11  ;;  %v1080_v15 = vsel %vm1067_vm3, %v2095_v11, %v2075_v5  ;;  %v1072_v16 = vsel %vm1067_vm3, %v2071_v50, %v2096_v4  ;;  %v1073_v17 = vsel %vm1067_vm3, %v2096_v4, %v2080_v7 }
  0xc1   : > { %1886 = vmatmul.msk.f32.gmra.mxu0 %vm379_vm1, %v296_v22 }
  0xc2   : > { %1888 = vmatmul.msk.f32.gmra.mxu1 %vm379_vm1, %v296_v22  ;;  %1897 = vmatmul.msk.f32.vlgmr.msrb.gmra.mxu2 %vm379_vm1, %v295_v9 }
  0xc3   : > { %1899 = vmatmul.msk.f32.vlgmr.msrb.gmra.mxu3 %vm379_vm1, %v295_v9  ;;  %984 = vmatpush.msrb.mxu2 %v809_v34 }
  0xc4   : > { %1007 = vmatpush.msrb.mxu3 %v2036_v27 }
  0xc5   : > { %985 = vmatpush.msrb.mxu2 %v802_v35 }
  0xc6   : > { %1008 = vmatpush.msrb.mxu3 %v2041_v30 }
  0xc9   : > { %1893 = vmatmul.msk.f32.vlgmr.msrb.gmra.mxu0 %vm379_vm1, %v295_v9 }
  0xca   : > { %1895 = vmatmul.msk.f32.vlgmr.msrb.gmra.mxu1 %vm379_vm1, %v295_v9  ;;  %1898 = vmatmul.msk.f32.gmra.mxu2 %vm379_vm1, %v296_v22  ;;  %v1074_v9 = vsel %vm1067_vm3, %v2080_v7, %v2081_v6 }
  0xcb   : > { %938 = vmatpush.msrb.mxu0 %v807_v39  ;;  %1900 = vmatmul.msk.f32.gmra.mxu3 %vm379_vm1, %v296_v22 }
  0xcc   : > { %961 = vmatpush.msrb.mxu1 %v808_v40 }
  0xcd   : > { %939 = vmatpush.msrb.mxu0 %v800_v42 }
  0xce   : > { %962 = vmatpush.msrb.mxu1 %v801_v43 }
  0xd1   : > { %1894 = vmatmul.msk.f32.gmra.mxu0 %vm379_vm1, %v296_v22 }
  0xd2   : > { %1896 = vmatmul.msk.f32.gmra.mxu1 %vm379_vm1, %v296_v22  ;;  %1907 = vmatmul.msk.f32.vlgmr.msra.gmra.mxu2 %vm379_vm1, %v1901_v49 }
  0xd3   : > { %1909 = vmatmul.msk.f32.vlgmr.msra.gmra.mxu3 %vm379_vm1, %v1901_v49  ;;  %1164 = vmatpush.msra.mxu2 %v1077_v52 }
  0xd4   : > { %1187 = vmatpush.msra.mxu3 %v1078_v53 }
  0xd5   : > { %1165 = vmatpush.msra.mxu2 %v1070_v55 }
  0xd6   : > { %1188 = vmatpush.msra.mxu3 %v1071_v57 }
  0xd9   : > { %1903 = vmatmul.msk.f32.vlgmr.msra.gmra.mxu0 %vm379_vm1, %v1901_v49 }
  0xda   : > { %1905 = vmatmul.msk.f32.vlgmr.msra.gmra.mxu1 %vm379_vm1, %v1901_v49  ;;  %1908 = vmatmul.msk.f32.gmra.mxu2 %vm379_vm1, %v1902_v62 }
  0xdb   : > { %1141 = vmatpush.msra.mxu1 %v1076_v63  ;;  %1910 = vmatmul.msk.f32.gmra.mxu3 %vm379_vm1, %v1902_v62 }
  0xdc   : > { %1118 = vmatpush.msra.mxu0 %v1075_v0 }
  0xdd   : > { %1142 = vmatpush.msra.mxu1 %v1069_v1 }
  0xde   : > { %1119 = vmatpush.msra.mxu0 %v1068_v2 }
  0xe1   : > { %1904 = vmatmul.msk.f32.gmra.mxu0 %vm379_vm1, %v1902_v62 }
  0xe2   : > { %1906 = vmatmul.msk.f32.gmra.mxu1 %vm379_vm1, %v1902_v62  ;;  %1915 = vmatmul.msk.f32.vlgmr.msrb.gmra.mxu2 %vm379_vm1, %v1901_v49 }
  0xe3   : > { %1917 = vmatmul.msk.f32.vlgmr.msrb.gmra.mxu3 %vm379_vm1, %v1901_v49  ;;  %1256 = vmatpush.msrb.mxu2 %v1081_v10 }
  0xe4   : > { %1279 = vmatpush.msrb.mxu3 %v2076_v3 }
  0xe5   : > { %1257 = vmatpush.msrb.mxu2 %v1074_v9 }
  0xe6   : > { %1280 = vmatpush.msrb.mxu3 %v2081_v6 }
  0xe9   : > { %1911 = vmatmul.msk.f32.vlgmr.msrb.gmra.mxu0 %vm379_vm1, %v1901_v49 }
  0xea   : > { %1913 = vmatmul.msk.f32.vlgmr.msrb.gmra.mxu1 %vm379_vm1, %v1901_v49  ;;  %1916 = vmatmul.msk.f32.gmra.mxu2 %vm379_vm1, %v1902_v62 }
  0xeb   : > { %1210 = vmatpush.msrb.mxu0 %v1079_v14  ;;  %1918 = vmatmul.msk.f32.gmra.mxu3 %vm379_vm1, %v1902_v62 }
  0xec   : > { %1233 = vmatpush.msrb.mxu1 %v1080_v15 }
  0xed   : > { %1211 = vmatpush.msrb.mxu0 %v1072_v16 }
  0xee   : > { %1234 = vmatpush.msrb.mxu1 %v1073_v17 }
  0xf1   : > { %1912 = vmatmul.msk.f32.gmra.mxu0 %vm379_vm1, %v1902_v62 }
  0xf2   : > { %1914 = vmatmul.msk.f32.gmra.mxu1 %vm379_vm1, %v1902_v62  ;;  %1925 = vmatmul.msk.f32.vlgmr.msra.gmra.mxu2 %vm379_vm1, %v1919_v19 }
  0xf3   : > { %1927 = vmatmul.msk.f32.vlgmr.msra.gmra.mxu3 %vm379_vm1, %v1919_v19 }
  0xf9   : > { %1921 = vmatmul.msk.f32.vlgmr.msra.gmra.mxu0 %vm379_vm1, %v1919_v19 }
  0xfa   : > { %1923 = vmatmul.msk.f32.vlgmr.msra.gmra.mxu1 %vm379_vm1, %v1919_v19  ;;  %1926 = vmatmul.msk.f32.gmra.mxu2 %vm379_vm1, %v1920_v21 }
  0xfb   : > { %1928 = vmatmul.msk.f32.gmra.mxu3 %vm379_vm1, %v1920_v21 }
 0x101   : > { %1922 = vmatmul.msk.f32.gmra.mxu0 %vm379_vm1, %v1920_v21 }
 0x102   : > { %1924 = vmatmul.msk.f32.gmra.mxu1 %vm379_vm1, %v1920_v21  ;;  %1933 = vmatmul.msk.f32.vlgmr.msrb.gmra.mxu2 %vm379_vm1, %v1919_v19 }
 0x103   : > { %1935 = vmatmul.msk.f32.vlgmr.msrb.gmra.mxu3 %vm379_vm1, %v1919_v19 }
 0x109   : > { %1929 = vmatmul.msk.f32.vlgmr.msrb.gmra.mxu0 %vm379_vm1, %v1919_v19 }
 0x10a   : > { %1931 = vmatmul.msk.f32.vlgmr.msrb.gmra.mxu1 %vm379_vm1, %v1919_v19  ;;  %1934 = vmatmul.msk.f32.gmra.mxu2 %vm379_vm1, %v1920_v21 }
 0x10b   : > { %1936 = vmatmul.msk.f32.gmra.mxu3 %vm379_vm1, %v1920_v21 }
 0x111   : > { %1930 = vmatmul.msk.f32.gmra.mxu0 %vm379_vm1, %v1920_v21 }
 0x112   : > { %1932 = vmatmul.msk.f32.gmra.mxu1 %vm379_vm1, %v1920_v21 }
 0x113   : > { %v449_v22 = vpop.f32.mrf.mxu2 }
 0x115   : > { %v472_v25 = vpop.f32.mrf.mxu3 }
 0x116   : > { %v403_v23 = vpop.f32.mrf.mxu0  ;;  %v426_v24 = vpop.f32.mrf.mxu1 }
 0x11d   : > { %v452_v26 = vpop.f32.mrf.mxu2 }
 0x11e   : > { %v406_v27 = vpop.f32.mrf.mxu0  ;;  %v2399_v29 = vpop.f32.mrf.mxu3 }
 0x11f   : > { %v429_v28 = vpop.f32.mrf.mxu1 }
 0x125   : > { %v541_v30 = vpop.f32.mrf.mxu2 }
 0x126   : > { %v495_v31 = vpop.f32.mrf.mxu0  ;;  %v564_v33 = vpop.f32.mrf.mxu3 }
 0x127   : > { %v518_v32 = vpop.f32.mrf.mxu1 }
 0x12d   : > { %v2401_v34 = vpop.f32.mrf.mxu2 }
 0x12e   : > { %v2403_v35 = vpop.f32.mrf.mxu0  ;;  %v2407_v37 = vpop.f32.mrf.mxu3 }
 0x12f   : > { %v2405_v36 = vpop.f32.mrf.mxu1 }
 0x135   : > { %v639_v38 = vpop.f32.mrf.mxu2 }
 0x136   : > { %v640_v39 = vadd.f32 %v639_v38, %v449_v22  ;;  %v593_v40 = vpop.f32.mrf.mxu0  ;;  %v662_v44 = vpop.f32.mrf.mxu3 }
 0x137   : > { %v616_v41 = vpop.f32.mrf.mxu1  ;;  %v594_v42 = vadd.f32 %v593_v40, %v403_v23  ;;  %v663_v45 = vadd.f32 %v662_v44, %v472_v25 }
 0x138   : > { %v617_v43 = vadd.f32 %v616_v41, %v426_v24  ;;  %v1365_v41 = vld [vmem:[%s2583_s4] sm:$0xff] }
 0x139   : > { %1368 = vperm.xlu2 %2099, %v1365_v41  }
 0x13d   : > { %v642_v46 = vpop.f32.mrf.mxu2 }
 0x13e   : > { %v596_v47 = vpop.f32.mrf.mxu0  ;;  %v665_v49 = vpop.f32.mrf.mxu3  ;;  %v643_v20 = vadd.f32 %v642_v46, %v452_v26 }
 0x13f   : > { %v619_v48 = vpop.f32.mrf.mxu1  ;;  %v597_v24 = vadd.f32 %v596_v47, %v406_v27 }
 0x140   : > { %v620_v25 = vadd.f32 %v619_v48, %v429_v28 }
 0x145   : > { %v731_v50 = vpop.f32.mrf.mxu2 }
 0x146   : > { %v2409_v51 = vadd.f32 %v731_v50, %v541_v30  ;;  %v685_v52 = vpop.f32.mrf.mxu0  ;;  %v754_v56 = vpop.f32.mrf.mxu3 }
 0x147   : > { %v708_v53 = vpop.f32.mrf.mxu1  ;;  %v2411_v54 = vadd.f32 %v685_v52, %v495_v31  ;;  %v2415_v57 = vadd.f32 %v754_v56, %v564_v33  ;;  %v2441_v30 = vpop.permute.xlu1 %1308 }
 0x148   : > { %v2413_v55 = vadd.f32 %v708_v53, %v518_v32  ;;  %v666_v32 = vadd.f32 %v665_v49, %v2399_v29 }
 0x14d   : > { %v2417_v58 = vpop.f32.mrf.mxu2 }
 0x14e   : > { %v2419_v59 = vpop.f32.mrf.mxu0  ;;  %v2423_v61 = vpop.f32.mrf.mxu3 }
 0x14f   : > { %v2421_v60 = vpop.f32.mrf.mxu1 }
 0x155   : > { %v895_v62 = vpop.f32.mrf.mxu2 }
 0x156   : > { %v849_v63 = vpop.f32.mrf.mxu0  ;;  %v918_v1 = vpop.f32.mrf.mxu3  ;;  %v1018_v18 = vadd.f32 %v895_v62, %v640_v39 }
 0x157   : > { %v872_v0 = vpop.f32.mrf.mxu1  ;;  %v1016_v19 = vadd.f32 %v849_v63, %v594_v42  ;;  %v1019_v22 = vadd.f32 %v918_v1, %v663_v45 }
 0x158   : > { %v1017_v21 = vadd.f32 %v872_v0, %v617_v43  ;;  %v2447_v43 = vpop.permute.xlu0 %1313 }
 0x15d   : > { %v898_v2 = vpop.f32.mrf.mxu2 }
 0x15e   : > { %v852_v3 = vpop.f32.mrf.mxu0  ;;  %v921_v6 = vpop.f32.mrf.mxu3  ;;  %v1026_v33 = vadd.f32 %v898_v2, %v643_v20 }
 0x15f   : > { %v875_v5 = vpop.f32.mrf.mxu1  ;;  %v1024_v39 = vadd.f32 %v852_v3, %v597_v24  ;;  %v1027_v27 = vadd.f32 %v921_v6, %v666_v32  ;;  %v1553_v3 = vld [vmem:[%s2585_s6 + $0x8] sm:$0xff] }
 0x160   : > { %v1025_v42 = vadd.f32 %v875_v5, %v620_v25  ;;  %1561 = vperm.xlu2 %2099, %v1553_v3  }
 0x165   : > { %v2425_v7 = vpop.f32.mrf.mxu2 }
 0x166   : > { %v2427_v8 = vpop.f32.mrf.mxu0  ;;  %v2431_v9 = vpop.f32.mrf.mxu3 }
 0x167   : > { %v2429_v10 = vpop.f32.mrf.mxu1 }
 0x16d   : > { %v2433_v11 = vpop.f32.mrf.mxu2 }
 0x16e   : > { %v2435_v12 = vpop.f32.mrf.mxu0  ;;  %v2439_v4 = vpop.f32.mrf.mxu3 }
 0x16f   : > { %v2437_v13 = vpop.f32.mrf.mxu1 }
 0x175   : > { %v1167_v14 = vpop.f32.mrf.mxu2 }
 0x176   : > { %v1121_v15 = vpop.f32.mrf.mxu0  ;;  %v1190_v17 = vpop.f32.mrf.mxu3  ;;  %v1290_v23 = vadd.f32 %v1167_v14, %v1018_v18 }
 0x177   : > { %v1144_v16 = vpop.f32.mrf.mxu1  ;;  %v1288_v31 = vadd.f32 %v1121_v15, %v1016_v19  ;;  %v1291_v40 = vadd.f32 %v1190_v17, %v1019_v22 }
 0x178   : > { %v1289_v38 = vadd.f32 %v1144_v16, %v1017_v21  ;;  %v1318_v46 = vadd.f32 %v2441_v30, %v1290_v23 }
 0x179   : > { %v1316_v29 = vadd.f32 %v2441_v30, %v1288_v31  ;;  %v1319_v52 = vadd.f32 %v2441_v30, %v1291_v40  ;;  %v2463_v31 = vld [vmem:[%s2582_s3] sm:$0xff] }
 0x17a   : > { %v1317_v50 = vadd.f32 %v2441_v30, %v1289_v38  ;;  %v1334_v2 = vmul.f32 0.005, %v1318_v46  ;;  %v1022_v38 = vadd.f32 %v2425_v7, %v2409_v51  ;;  %v1023_v51 = vadd.f32 %v2431_v9, %v2415_v57 }
 0x17b   : > { %v1332_v5 = vmul.f32 0.005, %v1316_v29  ;;  %v1335_v16 = vmul.f32 0.005, %v1319_v52 }
 0x17c   : > { %v1333_v15 = vmul.f32 0.005, %v1317_v50  ;;  %v1350_v25 = vmax.f32 %v1318_v46, %v1334_v2 }
 0x17d   : > { %v1170_v26 = vpop.f32.mrf.mxu2  ;;  %v1351_v41 = vmax.f32 %v1319_v52, %v1335_v16 }
 0x17e   : > { %v1298_v28 = vadd.f32 %v1170_v26, %v1026_v33  ;;  %v1124_v44 = vpop.f32.mrf.mxu0  ;;  %v1193_v49 = vpop.f32.mrf.mxu3  ;;  %v1348_v33 = vmax.f32 %v1316_v29, %v1332_v5  ;;  %v1349_v40 = vmax.f32 %v1317_v50, %v1333_v15  ;;  %v1021_v26 = vadd.f32 %v2429_v10, %v2413_v55 }
 0x17f   : > { %v1147_v45 = vpop.f32.mrf.mxu1  ;;  %v1296_v47 = vadd.f32 %v1124_v44, %v1024_v39  ;;  %v1299_v53 = vadd.f32 %v1193_v49, %v1027_v27  ;;  %v735_v39 = vadd.f32 %v2417_v58, %v2401_v34  ;;  %v689_v27 = vadd.f32 %v2419_v59, %v2403_v35 }
 0x180   : > { %v1297_v48 = vadd.f32 %v1147_v45, %v1025_v42  ;;  %v1326_v56 = vadd.f32 %v2447_v43, %v1298_v28  ;;  %v1020_v42 = vadd.f32 %v2427_v8, %v2411_v54  ;;  %v712_v34 = vadd.f32 %v2421_v60, %v2405_v36 }
 0x181   : > { %v1324_v62 = vadd.f32 %v2447_v43, %v1296_v47  ;;  %v1327_v0 = vadd.f32 %v2447_v43, %v1299_v53  ;;  %v758_v55 = vadd.f32 %v2423_v61, %v2407_v37  ;;  %v1030_v57 = vadd.f32 %v2433_v11, %v735_v39 }
 0x182   : > { %v1325_v63 = vadd.f32 %v2447_v43, %v1297_v48  ;;  %v1342_v1 = vmul.f32 0.005, %v1326_v56  ;;  %v1028_v35 = vadd.f32 %v2435_v12, %v689_v27  ;;  %v1029_v36 = vadd.f32 %v2437_v13, %v712_v34 }
 0x183   : > { %v1340_v6 = vmul.f32 0.005, %v1324_v62  ;;  %v1343_v17 = vmul.f32 0.005, %v1327_v0  ;;  %v1031_v60 = vadd.f32 %v2439_v4, %v758_v55 }
 0x184   : > { %v1341_v14 = vmul.f32 0.005, %v1325_v63  ;;  %v1358_v18 = vmax.f32 %v1326_v56, %v1342_v1 }
 0x185   : > { %v1356_v19 = vmax.f32 %v1324_v62, %v1340_v6  ;;  %v1259_v21 = vpop.f32.mrf.mxu2  ;;  %v1359_v22 = vmax.f32 %v1327_v0, %v1343_v17 }
 0x186   : > { %v1357_v20 = vmax.f32 %v1325_v63, %v1341_v14  ;;  %1428 = vmatpush.msra.mxu2 %v1358_v18  ;;  %v1213_v23 = vpop.f32.mrf.mxu0  ;;  %v1282_v32 = vpop.f32.mrf.mxu3  ;;  %v1294_v7 = vadd.f32 %v1259_v21, %v1022_v38 }
 0x187   : > { %v1236_v24 = vpop.f32.mrf.mxu1  ;;  %1388 = vmatpush.msra.mxu0 %v1356_v19  ;;  %1448 = vmatpush.msra.mxu3 %v1359_v22  ;;  %v1292_v54 = vadd.f32 %v1213_v23, %v1020_v42  ;;  %v1295_v8 = vadd.f32 %v1282_v32, %v1023_v51  ;;  %v1550_v32 = vld [vmem:[%s2584_s5] sm:$0xff]  ;;  %v1551_v42 = vld [vmem:[%s2584_s5 + $0x8] sm:$0xff] }
 0x188   : > { %1408 = vmatpush.msra.mxu1 %v1357_v20  ;;  %1429 = vmatpush.msra.mxu2 %v1350_v25  ;;  %v1293_v58 = vadd.f32 %v1236_v24, %v1021_v26  ;;  %v1322_v10 = vadd.f32 %v2441_v30, %v1294_v7 }
 0x189   : > { %1939 = vmatmul.msk.f32.vlgmr.msra.gmra.mxu2 %vm379_vm1, %v2463_v31  ;;  %1389 = vmatpush.msra.mxu0 %v1348_v33  ;;  %v1320_v37 = vadd.f32 %v2441_v30, %v1292_v54  ;;  %v1323_v29 = vadd.f32 %v2441_v30, %v1295_v8 }
 0x18a   : > { %1409 = vmatpush.msra.mxu1 %v1349_v40  ;;  %1449 = vmatpush.msra.mxu3 %v1351_v41  ;;  %v1321_v46 = vadd.f32 %v2441_v30, %v1293_v58  ;;  %v1338_v48 = vmul.f32 0.005, %v1322_v10 }
 0x18b   : > { %1937 = vmatmul.msk.f32.vlgmr.msra.gmra.mxu0 %vm379_vm1, %v2463_v31  ;;  %1938 = vmatmul.msk.f32.vlgmr.msra.gmra.mxu1 %vm379_vm1, %v2463_v31  ;;  %v1336_v52 = vmul.f32 0.005, %v1320_v37  ;;  %v1339_v63 = vmul.f32 0.005, %v1323_v29 }
 0x18c   : > { %1940 = vmatmul.msk.f32.vlgmr.msra.gmra.mxu3 %vm379_vm1, %v2463_v31  ;;  %v1337_v62 = vmul.f32 0.005, %v1321_v46  ;;  %v1354_v5 = vmax.f32 %v1322_v10, %v1338_v48 }
 0x18d   : > { %v1262_v59 = vpop.f32.mrf.mxu2  ;;  %v1352_v6 = vmax.f32 %v1320_v37, %v1336_v52  ;;  %v1355_v15 = vmax.f32 %v1323_v29, %v1339_v63 }
 0x18e   : > { %v1302_v9 = vadd.f32 %v1262_v59, %v1030_v57  ;;  %v1216_v28 = vpop.f32.mrf.mxu0  ;;  %v1285_v45 = vpop.f32.mrf.mxu3  ;;  %v1353_v14 = vmax.f32 %v1321_v46, %v1337_v62 }
 0x18f   : > { %v1239_v44 = vpop.f32.mrf.mxu1  ;;  %v1300_v61 = vadd.f32 %v1216_v28, %v1028_v35  ;;  %v1303_v13 = vadd.f32 %v1285_v45, %v1031_v60  ;;  %v2531_v28 = vpop.permute.xlu1 %1556 }
 0x190   : > { %v1301_v11 = vadd.f32 %v1239_v44, %v1029_v36  ;;  %v1330_v12 = vadd.f32 %v2447_v43, %v1302_v9 }
 0x191   : > { %v1328_v47 = vadd.f32 %v2447_v43, %v1300_v61  ;;  %v1331_v50 = vadd.f32 %v2447_v43, %v1303_v13 }
 0x192   : > { %v1329_v4 = vadd.f32 %v2447_v43, %v1301_v11  ;;  %v1346_v49 = vmul.f32 0.005, %v1330_v12 }
 0x193   : > { %v1344_v53 = vmul.f32 0.005, %v1328_v47  ;;  %v1347_v1 = vmul.f32 0.005, %v1331_v50  ;;  %v1369_v43 = vpop.permute.xlu2 %1368 }
 0x194   : > { %v1345_v56 = vmul.f32 0.005, %v1329_v4  ;;  %v1362_v0 = vmax.f32 %v1330_v12, %v1346_v49 }
 0x195   : > { %v1360_v2 = vmax.f32 %v1328_v47, %v1344_v53  ;;  %v1363_v3 = vmax.f32 %v1331_v50, %v1347_v1 }
 0x196   : > { %v1361_v30 = vmax.f32 %v1329_v4, %v1345_v56  ;;  %1508 = vmatpush.msrb.mxu2 %v1362_v0 }
 0x197   : > { %1468 = vmatpush.msrb.mxu0 %v1360_v2  ;;  %1528 = vmatpush.msrb.mxu3 %v1363_v3 }
 0x198   : > { %1488 = vmatpush.msrb.mxu1 %v1361_v30  ;;  %1509 = vmatpush.msrb.mxu2 %v1354_v5 }
 0x199   : > { %1943 = vmatmul.msk.f32.vlgmr.msrb.gmra.mxu2 %vm379_vm1, %v2463_v31  ;;  %1469 = vmatpush.msrb.mxu0 %v1352_v6 }
 0x19a   : > { %1489 = vmatpush.msrb.mxu1 %v1353_v14  ;;  %1529 = vmatpush.msrb.mxu3 %v1355_v15 }
 0x19b   : > { %1941 = vmatmul.msk.f32.vlgmr.msrb.gmra.mxu0 %vm379_vm1, %v2463_v31  ;;  %1942 = vmatmul.msk.f32.vlgmr.msrb.gmra.mxu1 %vm379_vm1, %v2463_v31 }
 0x19c   : > { %1944 = vmatmul.msk.f32.vlgmr.msrb.gmra.mxu3 %vm379_vm1, %v2463_v31 }
 0x1ba   : > { %v2542_v13 = vpop.permute.xlu2 %1561 }
 0x208   : > { %v1391_v16 = vpop.f32.mrf.mxu0  ;;  %v1411_v17 = vpop.f32.mrf.mxu1 }
 0x209   : > { %v1392_v18 = vadd.f32 %v1391_v16, %v1369_v43  ;;  %v1412_v19 = vadd.f32 %v1411_v17, %v1369_v43 }
 0x20b   : > { %v1534_v20 = vmul.f32 0.005, %v1392_v18  ;;  %v1535_v21 = vmul.f32 0.005, %v1412_v19 }
 0x20c   : > { %v1431_v22 = vpop.f32.mrf.mxu2 }
 0x20d   : > { %v1542_v23 = vmax.f32 %v1392_v18, %v1534_v20  ;;  %v1543_v24 = vmax.f32 %v1412_v19, %v1535_v21  ;;  %v1432_v25 = vadd.f32 %v1431_v22, %v1369_v43 }
 0x20f   : > { %v1536_v33 = vmul.f32 0.005, %v1432_v25  ;;  %v1451_v38 = vpop.f32.mrf.mxu3  ;;  %1586 = vmatpush.msra.mxu0 %v1542_v23  ;;  %1609 = vmatpush.msra.mxu1 %v1543_v24 }
 0x210   : > { %v1452_v31 = vadd.f32 %v1451_v38, %v1369_v43  ;;  %1945 = vmatmul.msk.f32.vlgmr.msra.gmra.mxu0 %vm1564_vm4, %v1550_v32  ;;  %1947 = vmatmul.msk.f32.vlgmr.msra.gmra.mxu1 %vm1564_vm4, %v1550_v32 }
 0x211   : > { %v1544_v40 = vmax.f32 %v1432_v25, %v1536_v33 }
 0x212   : > { %v1537_v41 = vmul.f32 0.005, %v1452_v31 }
 0x213   : > { %1632 = vmatpush.msra.mxu2 %v1544_v40 }
 0x214   : > { %v1545_v39 = vmax.f32 %v1452_v31, %v1537_v41  ;;  %1949 = vmatmul.msk.f32.vlgmr.msra.gmra.mxu2 %vm1564_vm4, %v1550_v32 }
 0x216   : > { %1655 = vmatpush.msra.mxu3 %v1545_v39 }
 0x217   : > { %1951 = vmatmul.msk.f32.vlgmr.msra.gmra.mxu3 %vm1564_vm4, %v1550_v32 }
 0x218   : > { %v1471_v26 = vpop.f32.mrf.mxu0  ;;  %v1491_v51 = vpop.f32.mrf.mxu1  ;;  %1946 = vmatmul.msk.f32.gmra.mxu0 %vm1564_vm4, %v1551_v42  ;;  %1948 = vmatmul.msk.f32.gmra.mxu1 %vm1564_vm4, %v1551_v42 }
 0x219   : > { %v1472_v7 = vadd.f32 %v1471_v26, %v1369_v43  ;;  %v1492_v27 = vadd.f32 %v1491_v51, %v1369_v43 }
 0x21b   : > { %v1538_v34 = vmul.f32 0.005, %v1472_v7  ;;  %v1539_v54 = vmul.f32 0.005, %v1492_v27 }
 0x21c   : > { %v1511_v55 = vpop.f32.mrf.mxu2  ;;  %1950 = vmatmul.msk.f32.gmra.mxu2 %vm1564_vm4, %v1551_v42 }
 0x21d   : > { %v1546_v57 = vmax.f32 %v1472_v7, %v1538_v34  ;;  %v1547_v58 = vmax.f32 %v1492_v27, %v1539_v54  ;;  %v1512_v8 = vadd.f32 %v1511_v55, %v1369_v43 }
 0x21f   : > { %v1540_v35 = vmul.f32 0.005, %v1512_v8  ;;  %v1531_v36 = vpop.f32.mrf.mxu3  ;;  %1952 = vmatmul.msk.f32.gmra.mxu3 %vm1564_vm4, %v1551_v42  ;;  %1678 = vmatpush.msrb.mxu0 %v1546_v57 }
 0x220   : > { %v1532_v59 = vadd.f32 %v1531_v36, %v1369_v43  ;;  %1701 = vmatpush.msrb.mxu1 %v1547_v58  ;;  %1953 = vmatmul.msk.f32.vlgmr.msrb.gmra.mxu0 %vm1564_vm4, %v1550_v32 }
 0x221   : > { %v1548_v60 = vmax.f32 %v1512_v8, %v1540_v35  ;;  %1955 = vmatmul.msk.f32.vlgmr.msrb.gmra.mxu1 %vm1564_vm4, %v1550_v32 }
 0x222   : > { %v1541_v10 = vmul.f32 0.005, %v1532_v59 }
 0x223   : > { %1724 = vmatpush.msrb.mxu2 %v1548_v60 }
 0x224   : > { %v1549_v9 = vmax.f32 %v1532_v59, %v1541_v10  ;;  %1957 = vmatmul.msk.f32.vlgmr.msrb.gmra.mxu2 %vm1564_vm4, %v1550_v32 }
 0x226   : > { %1747 = vmatpush.msrb.mxu3 %v1549_v9 }
 0x227   : > { %1959 = vmatmul.msk.f32.vlgmr.msrb.gmra.mxu3 %vm1564_vm4, %v1550_v32 }
 0x228   : > { %1954 = vmatmul.msk.f32.gmra.mxu0 %vm1564_vm4, %v1551_v42 }
 0x229   : > { %1956 = vmatmul.msk.f32.gmra.mxu1 %vm1564_vm4, %v1551_v42 }
 0x22c   : > { %1958 = vmatmul.msk.f32.gmra.mxu2 %vm1564_vm4, %v1551_v42 }
 0x22f   : > { %1960 = vmatmul.msk.f32.gmra.mxu3 %vm1564_vm4, %v1551_v42 }
 0x28d   : > { %v1588_v44 = vpop.f32.mrf.mxu0  ;;  %v1611_v37 = vpop.f32.mrf.mxu1 }
 0x28e   : > { %v1589_v61 = vadd.f32 %v1588_v44, %v2531_v28  ;;  %v1612_v11 = vadd.f32 %v1611_v37, %v2531_v28 }
 0x290   : > { %v1755_v45 = vmul.f32 0.005, %v1589_v61  ;;  %v1756_v46 = vmul.f32 0.005, %v1612_v11 }
 0x292   : > { %v1771_v29 = vmax.f32 %v1589_v61, %v1755_v45  ;;  %v1772_v12 = vmax.f32 %v1612_v11, %v1756_v46 }
 0x294   : > { %1787 = vst [vmem:[%s2540_s27] sm:$0xff] %v1771_v29 }
 0x295   : > { %1788 = vst [vmem:[%s2540_s27 + $0x8] sm:$0xff] %v1772_v12  ;;  %v1591_v47 = vpop.f32.mrf.mxu0  ;;  %v1614_v4 = vpop.f32.mrf.mxu1 }
 0x296   : > { %v1592_v48 = vadd.f32 %v1591_v47, %v2542_v13  ;;  %v1615_v49 = vadd.f32 %v1614_v4, %v2542_v13 }
 0x297   : > { %v1634_v50 = vpop.f32.mrf.mxu2 }
 0x298   : > { %v1763_v52 = vmul.f32 0.005, %v1592_v48  ;;  %v1764_v53 = vmul.f32 0.005, %v1615_v49  ;;  %v1635_v56 = vadd.f32 %v1634_v50, %v2531_v28 }
 0x29a   : > { %v1779_v62 = vmax.f32 %v1592_v48, %v1763_v52  ;;  %v1780_v63 = vmax.f32 %v1615_v49, %v1764_v53  ;;  %v1757_v0 = vmul.f32 0.005, %v1635_v56  ;;  %v1657_v1 = vpop.f32.mrf.mxu3 }
 0x29b   : > { %v1658_v2 = vadd.f32 %v1657_v1, %v2531_v28 }
 0x29c   : > { %1795 = vst [vmem:[%s2540_s27 + $0x40] sm:$0xff] %v1779_v62  ;;  %v1773_v30 = vmax.f32 %v1635_v56, %v1757_v0 }
 0x29d   : > { %1796 = vst [vmem:[%s2540_s27 + $0x48] sm:$0xff] %v1780_v63  ;;  %v1758_v3 = vmul.f32 0.005, %v1658_v2  ;;  %v1680_v5 = vpop.f32.mrf.mxu0 }
 0x29e   : > { %1789 = vst [vmem:[%s2540_s27 + $0x10] sm:$0xff] %v1773_v30  ;;  %v1681_v6 = vadd.f32 %v1680_v5, %v2531_v28  ;;  %v1703_v14 = vpop.f32.mrf.mxu1 }
 0x29f   : > { %v1774_v15 = vmax.f32 %v1658_v2, %v1758_v3  ;;  %v1704_v43 = vadd.f32 %v1703_v14, %v2531_v28  ;;  %v1637_v16 = vpop.f32.mrf.mxu2 }
 0x2a0   : > { %v1759_v17 = vmul.f32 0.005, %v1681_v6  ;;  %v1638_v18 = vadd.f32 %v1637_v16, %v2542_v13 }
 0x2a1   : > { %1790 = vst [vmem:[%s2540_s27 + $0x18] sm:$0xff] %v1774_v15  ;;  %v1760_v19 = vmul.f32 0.005, %v1704_v43 }
 0x2a2   : > { %v1775_v20 = vmax.f32 %v1681_v6, %v1759_v17  ;;  %v1765_v21 = vmul.f32 0.005, %v1638_v18  ;;  %v1660_v22 = vpop.f32.mrf.mxu3 }
 0x2a3   : > { %v1776_v23 = vmax.f32 %v1704_v43, %v1760_v19  ;;  %v1661_v24 = vadd.f32 %v1660_v22, %v2542_v13 }
 0x2a4   : > { %1791 = vst [vmem:[%s2540_s27 + $0x20] sm:$0xff] %v1775_v20  ;;  %v1781_v25 = vmax.f32 %v1638_v18, %v1765_v21 }
 0x2a5   : > { %1792 = vst [vmem:[%s2540_s27 + $0x28] sm:$0xff] %v1776_v23  ;;  %v1766_v32 = vmul.f32 0.005, %v1661_v24  ;;  %v1683_v33 = vpop.f32.mrf.mxu0 }
 0x2a6   : > { %1797 = vst [vmem:[%s2540_s27 + $0x50] sm:$0xff] %v1781_v25  ;;  %v1684_v38 = vadd.f32 %v1683_v33, %v2542_v13  ;;  %v1706_v31 = vpop.f32.mrf.mxu1 }
 0x2a7   : > { %v1782_v40 = vmax.f32 %v1661_v24, %v1766_v32  ;;  %v1707_v41 = vadd.f32 %v1706_v31, %v2542_v13  ;;  %v1726_v39 = vpop.f32.mrf.mxu2 }
 0x2a8   : > { %v1767_v42 = vmul.f32 0.005, %v1684_v38  ;;  %v1727_v26 = vadd.f32 %v1726_v39, %v2531_v28 }
 0x2a9   : > { %1798 = vst [vmem:[%s2540_s27 + $0x58] sm:$0xff] %v1782_v40  ;;  %v1768_v51 = vmul.f32 0.005, %v1707_v41 }
 0x2aa   : > { %v1783_v7 = vmax.f32 %v1684_v38, %v1767_v42  ;;  %v1761_v27 = vmul.f32 0.005, %v1727_v26  ;;  %v1749_v34 = vpop.f32.mrf.mxu3 }
 0x2ab   : > { %v1784_v54 = vmax.f32 %v1707_v41, %v1768_v51  ;;  %v1750_v55 = vadd.f32 %v1749_v34, %v2531_v28 }
 0x2ac   : > { %1799 = vst [vmem:[%s2540_s27 + $0x60] sm:$0xff] %v1783_v7  ;;  %v1777_v57 = vmax.f32 %v1727_v26, %v1761_v27 }
 0x2ad   : > { %1800 = vst [vmem:[%s2540_s27 + $0x68] sm:$0xff] %v1784_v54  ;;  %v1762_v58 = vmul.f32 0.005, %v1750_v55 }
 0x2ae   : > { %1793 = vst [vmem:[%s2540_s27 + $0x30] sm:$0xff] %v1777_v57 }
 0x2af   : > { %v1778_v8 = vmax.f32 %v1750_v55, %v1762_v58  ;;  %v1729_v35 = vpop.f32.mrf.mxu2 }
 0x2b0   : > { %v1730_v36 = vadd.f32 %v1729_v35, %v2542_v13 }
 0x2b1   : > { %1794 = vst.msk [vmem:[%s2540_s27 + $0x38] sm:$0xff] %vm1067_vm3, %v1778_v8 }
 0x2b2   : > { %v1769_v59 = vmul.f32 0.005, %v1730_v36  ;;  %v1752_v60 = vpop.f32.mrf.mxu3 }
 0x2b3   : > { %v1753_v10 = vadd.f32 %v1752_v60, %v2542_v13 }
 0x2b4   : > { %v1785_v9 = vmax.f32 %v1730_v36, %v1769_v59 }
 0x2b5   : > { %v1770_v44 = vmul.f32 0.005, %v1753_v10 }
 0x2b6   : > { %1801 = vst [vmem:[%s2540_s27 + $0x70] sm:$0xff] %v1785_v9 }
 0x2b7   : > { %v1786_v28 = vmax.f32 %v1753_v10, %v1770_v44 }
 0x2b9   : > { %1802 = vst.msk [vmem:[%s2540_s27 + $0x78] sm:$0xff] %vm1067_vm3, %v1786_v28 }
 0x2ba PF: > { %s17_s24 = sadd.s32 1, %s2106_s24  }
 0x2bb   : > { %p14_p4 = scmp.ge.s32.totalorder %s17_s24, 4  }
 0x2bd   :  { %16 = sbr.rel (!%p14_p4) target bundleno = 1 (0x1), region = 81 }

</bundles_post_ra>
